<compile_context>
chip_gen: v7x
topology: tpu7x:2x2x1
jax: 0.10.0
libtpu: 0.0.40
codegen_flags: <defaults>
</compile_context>

<pallas_src>
import math

import jax
import jax.numpy as jnp
from jax import lax
from jax.experimental import pallas as pl
from jax.experimental.pallas import tpu as pltpu

INPUT_SIZE = 6
HIDDEN_SIZE = 64
NUM_LAYERS = 2           # the two layers are explicitly skewed in the kernel
OUTPUT_SIZE = 6
TRAIN_WINDOW = 30
PREDICTION_WINDOW = 3


def lstm_kernel(x_ref, wih0_ref, whh0_ref, b0_ref,
                wih1_ref, whh1_ref, b1_ref,
                wout_ref, bout_ref,
                out_ref,
                pre0_ref, h1tail_ref):
    """Whole sequence processed in one kernel invocation (all VMEM resident).

    Gate column layout inside the kernel (after wrapper permutation):
        [ i | f | o | g ]   -> sigmoid on [:, :3H], tanh on [:, 3H:4H]
    """
    T = x_ref.shape[0]
    H = whh0_ref.shape[0]
    P = out_ref.shape[0]
    G3 = 3 * H

    # Hoist weight loads out of the unrolled recurrence; bf16 keeps the three
    # (64, 256) recurrent/layer-1 matrices at 24 vregs total if kept resident.
    whh0 = whh0_ref[...]
    wih1 = wih1_ref[...]
    whh1 = whh1_ref[...]
    b1 = b1_ref[...]

    def act(pre):
        sig = jax.nn.sigmoid(pre[:, :G3])        # one wide EUP call (i, f, o)
        g = jnp.tanh(pre[:, G3:])                # one tanh (cell candidate)
        i = sig[:, 0 * H:1 * H]
        f = sig[:, 1 * H:2 * H]
        o = sig[:, 2 * H:3 * H]
        return i, f, o, g

    def l0_step(t, h0, c0):
        pre = (pre0_ref[pl.ds(t, 1), :]
               + jnp.dot(h0.astype(jnp.bfloat16), whh0,
                         preferred_element_type=jnp.float32))
        i, f, o, g = act(pre)
        c0 = f * c0 + i * g
        h0 = o * jnp.tanh(c0)
        return h0, c0

    def l1_step(h0_in, h1, c1):
        pre = (jnp.dot(h0_in.astype(jnp.bfloat16), wih1,
                       preferred_element_type=jnp.float32)
               + jnp.dot(h1.astype(jnp.bfloat16), whh1,
                         preferred_element_type=jnp.float32)
               + b1)
        i, f, o, g = act(pre)
        c1 = f * c1 + i * g
        h1 = o * jnp.tanh(c1)
        return h1, c1

    zeros = jnp.zeros((1, H), jnp.float32)

    # ---- Pass A: batched layer-0 input projection (bias folded in, f32) ----
    pre0_ref[...] = (jnp.dot(x_ref[...], wih0_ref[...],
                             preferred_element_type=jnp.float32)
                     + b0_ref[...])

    # ---- Prologue: layer-0 step 0 ----
    h0, c0 = l0_step(0, zeros, zeros)
    h1, c1 = zeros, zeros

    # ---- Skewed main loop: iteration t = layer-0 step t + layer-1 step t-1 ----
    # Both sub-steps read only previous-iteration state, so they are independent
    # within an iteration and overlap under the full unroll.
    def body(t, carry):
        h0, c0, h1, c1 = carry
        nh1, nc1 = l1_step(h0, h1, c1)   # layer-1 step t-1 (uses old h0, h1)
        nh0, nc0 = l0_step(t, h0, c0)    # layer-0 step t
        return (nh0, nc0, nh1, nc1)

    h0, c0, h1, c1 = lax.fori_loop(1, T - P + 1, body,
                                   (h0, c0, h1, c1), unroll=True)

    # ---- Tail range: layer-1 outputs now belong to the last P timesteps ----
    # Static range split replaces the former per-step pl.when predicate.
    def tail_body(t, carry):
        h0, c0, h1, c1 = carry
        nh1, nc1 = l1_step(h0, h1, c1)                  # layer-1 step t-1
        h1tail_ref[pl.ds(t - 1 - (T - P), 1), :] = nh1  # rows 0 .. P-2
        nh0, nc0 = l0_step(t, h0, c0)                   # layer-0 step t
        return (nh0, nc0, nh1, nc1)

    h0, c0, h1, c1 = lax.fori_loop(T - P + 1, T, tail_body,
                                   (h0, c0, h1, c1), unroll=True)

    # ---- Epilogue: layer-1 step T-1 (no layer-0 work left) ----
    h1, c1 = l1_step(h0, h1, c1)
    h1tail_ref[pl.ds(P - 1, 1), :] = h1

    # ---- Linear head on the last P layer-1 hidden states ----
    out_ref[...] = (jnp.dot(h1tail_ref[pl.ds(0, P), :], wout_ref[...],
                            preferred_element_type=jnp.float32)
                    + bout_ref[...])


def _permute_gates(w):
    """Reorder 4H gate columns from PyTorch (i, f, g, o) to kernel (i, f, o, g)."""
    H = HIDDEN_SIZE
    return jnp.concatenate(
        [w[..., :2 * H], w[..., 3 * H:4 * H], w[..., 2 * H:3 * H]], axis=-1)


def lstm_forward(x, params):
    T = x.shape[0]
    assert T > PREDICTION_WINDOW and PREDICTION_WINDOW <= 8
    vmem = pl.BlockSpec(memory_space=pltpu.MemorySpace.VMEM)

    # Gate-column permutation (i,f,g,o) -> (i,f,o,g) done once in the wrapper.
    wih0 = _permute_gates(params["wih0"])                            # f32, one-shot
    b0 = _permute_gates(params["b0"])
    # Recurrent / layer-1 weights in bf16 (MXU native, f32 accumulate in-kernel).
    whh0 = _permute_gates(params["whh0"]).astype(jnp.bfloat16)
    wih1 = _permute_gates(params["wih1"]).astype(jnp.bfloat16)
    whh1 = _permute_gates(params["whh1"]).astype(jnp.bfloat16)
    b1 = _permute_gates(params["b1"])

    return pl.pallas_call(
        lstm_kernel,
        out_shape=jax.ShapeDtypeStruct((PREDICTION_WINDOW, OUTPUT_SIZE),
                                       jnp.float32),
        in_specs=[vmem] * 9,
        out_specs=vmem,
        scratch_shapes=[
            pltpu.VMEM((T, 4 * HIDDEN_SIZE), jnp.float32),   # pre0 (batched x-proj)
            pltpu.VMEM((8, HIDDEN_SIZE), jnp.float32),       # last P layer-1 h's
        ],
    )(x,
      wih0, whh0, b0,
      wih1, whh1, b1,
      params["wout"], params["bout"])


def init_params(key):
    """Deterministic init mirroring PyTorch default U(-1/sqrt(H), 1/sqrt(H)).

    Stored in PyTorch gate order (i, f, g, o); weights pre-transposed to
    (in_features, 4H) / (H, out) so the kernel hot path is row @ matrix.
    """
    H, IN, OUT = HIDDEN_SIZE, INPUT_SIZE, OUTPUT_SIZE
    k_lstm = 1.0 / math.sqrt(H)
    k_lin = 1.0 / math.sqrt(H)
    keys = jax.random.split(key, 10)

    def u(k, shape, bound):
        return jax.random.uniform(k, shape, jnp.float32, -bound, bound)

    wih0 = u(keys[0], (IN, 4 * H), k_lstm)
    whh0 = u(keys[1], (H, 4 * H), k_lstm)
    b0 = u(keys[2], (1, 4 * H), k_lstm) + u(keys[3], (1, 4 * H), k_lstm)  # b_ih + b_hh
    wih1 = u(keys[4], (H, 4 * H), k_lstm)
    whh1 = u(keys[5], (H, 4 * H), k_lstm)
    b1 = u(keys[6], (1, 4 * H), k_lstm) + u(keys[7], (1, 4 * H), k_lstm)
    wout = u(keys[8], (H, OUT), k_lin)
    bout = u(keys[9], (1, OUT), k_lin)
    return dict(wih0=wih0, whh0=whh0, b0=b0,
                wih1=wih1, whh1=whh1, b1=b1,
                wout=wout, bout=bout)


def lstm_reference(x, params):
    """Pure-JAX f32 reference (PyTorch gate order) for correctness check."""
    H = HIDDEN_SIZE
    h0 = c0 = h1 = c1 = jnp.zeros((1, H), jnp.float32)

    def gates(pre):
        i = jax.nn.sigmoid(pre[:, 0 * H:1 * H])
        f = jax.nn.sigmoid(pre[:, 1 * H:2 * H])
        g = jnp.tanh(pre[:, 2 * H:3 * H])
        o = jax.nn.sigmoid(pre[:, 3 * H:4 * H])
        return i, f, g, o

    hs = []
    for t in range(x.shape[0]):
        x_t = x[t:t + 1]
        i0, f0, g0, o0 = gates(x_t @ params["wih0"] + h0 @ params["whh0"] + params["b0"])
        c0 = f0 * c0 + i0 * g0
        h0 = o0 * jnp.tanh(c0)
        i1, f1, g1, o1 = gates(h0 @ params["wih1"] + h1 @ params["whh1"] + params["b1"])
        c1 = f1 * c1 + i1 * g1
        h1 = o1 * jnp.tanh(c1)
        hs.append(h1)
    hseq = jnp.concatenate(hs, axis=0)
    pred = hseq @ params["wout"] + params["bout"]
    return pred[-PREDICTION_WINDOW:]


if __name__ == "__main__":
    key = jax.random.PRNGKey(0)
    k_x, k_p = jax.random.split(key)
    x = jax.random.normal(k_x, (TRAIN_WINDOW, INPUT_SIZE), jnp.float32)  # (30, 6)
    params = init_params(k_p)

    out = jax.block_until_ready(lstm_forward(x, params))
    assert out.shape == (PREDICTION_WINDOW, OUTPUT_SIZE)

    ref = lstm_reference(x, params)
    # Tolerance accounts for bf16 recurrent weights / bf16 matmul operands with
    # f32 accumulation over 30 steps x 2 layers; structural bugs produce O(0.1+)
    # errors, so 1e-2 still catches them.
    assert jnp.allclose(out, ref, atol=1e-2, rtol=1e-2), \
        f"mismatch: max abs err {jnp.max(jnp.abs(out - ref))}"

    print("KERNEL_OK")
</pallas_src>

<mosaic_0001>
module attributes {stable_mosaic.version = 11 : i64} {
  func.func @lstm_kernel(%arg0: memref<30x6xf32, #tpu.memory_space<vmem>>, %arg1: memref<6x256xf32, #tpu.memory_space<vmem>>, %arg2: memref<64x256xbf16, #tpu.memory_space<vmem>>, %arg3: memref<1x256xf32, #tpu.memory_space<vmem>>, %arg4: memref<64x256xbf16, #tpu.memory_space<vmem>>, %arg5: memref<64x256xbf16, #tpu.memory_space<vmem>>, %arg6: memref<1x256xf32, #tpu.memory_space<vmem>>, %arg7: memref<64x6xf32, #tpu.memory_space<vmem>>, %arg8: memref<1x6xf32, #tpu.memory_space<vmem>>, %arg9: memref<3x6xf32, #tpu.memory_space<vmem>>, %arg10: memref<30x256xf32, #tpu.memory_space<vmem>>, %arg11: memref<8x64xf32, #tpu.memory_space<vmem>>) attributes {dimension_semantics = [], scalar_prefetch = 0 : i64, scratch_operands = 2 : i64, tpu.core_type = #tpu.core_type<tc>} {
    %c0 = arith.constant 0 : index
    %c0_0 = arith.constant 0 : index
    %0 = vector.load %arg2[%c0, %c0_0] : memref<64x256xbf16, #tpu.memory_space<vmem>>, vector<64x256xbf16>
    %c0_1 = arith.constant 0 : index
    %c0_2 = arith.constant 0 : index
    %1 = vector.load %arg4[%c0_1, %c0_2] : memref<64x256xbf16, #tpu.memory_space<vmem>>, vector<64x256xbf16>
    %c0_3 = arith.constant 0 : index
    %c0_4 = arith.constant 0 : index
    %2 = vector.load %arg5[%c0_3, %c0_4] : memref<64x256xbf16, #tpu.memory_space<vmem>>, vector<64x256xbf16>
    %c0_5 = arith.constant 0 : index
    %c0_6 = arith.constant 0 : index
    %3 = vector.load %arg6[%c0_5, %c0_6] : memref<1x256xf32, #tpu.memory_space<vmem>>, vector<1x256xf32>
    %cst = arith.constant 0.000000e+00 : f32
    %4 = vector.broadcast %cst : f32 to vector<1x64xf32>
    %c0_7 = arith.constant 0 : index
    %c0_8 = arith.constant 0 : index
    %5 = vector.load %arg0[%c0_7, %c0_8] : memref<30x6xf32, #tpu.memory_space<vmem>>, vector<30x6xf32>
    %c0_9 = arith.constant 0 : index
    %c0_10 = arith.constant 0 : index
    %6 = vector.load %arg1[%c0_9, %c0_10] : memref<6x256xf32, #tpu.memory_space<vmem>>, vector<6x256xf32>
    %cst_11 = arith.constant dense<0.000000e+00> : vector<30x256xf32>
    %7 = tpu.matmul %5, %6, %cst_11 {dimension_numbers = #tpu.dot_dimension_numbers<[1], [0], [0], [1], [0, 0, 1, 1], [], []>} : vector<30x6xf32>, vector<6x256xf32>, vector<30x256xf32> -> vector<30x256xf32>
    %c0_12 = arith.constant 0 : index
    %c0_13 = arith.constant 0 : index
    %8 = vector.load %arg3[%c0_12, %c0_13] : memref<1x256xf32, #tpu.memory_space<vmem>>, vector<1x256xf32>
    %9 = vector.broadcast %8 : vector<1x256xf32> to vector<30x256xf32>
    %10 = arith.addf %7, %9 : vector<30x256xf32>
    %c0_14 = arith.constant 0 : index
    %c0_15 = arith.constant 0 : index
    %11 = vector.load %arg10[%c0_14, %c0_15] : memref<30x256xf32, #tpu.memory_space<vmem>>, vector<30x256xf32>
    tpu.vector_store %arg10[%c0_14, %c0_15], %10 {strides = array<i32>} : memref<30x256xf32, #tpu.memory_space<vmem>>, vector<30x256xf32>,
    %c0_16 = arith.constant 0 : index
    %c0_17 = arith.constant 0 : index
    %12 = vector.load %arg10[%c0_16, %c0_17] : memref<30x256xf32, #tpu.memory_space<vmem>>, vector<1x256xf32>
    %13 = arith.truncf %4 : vector<1x64xf32> to vector<1x64xbf16>
    %cst_18 = arith.constant dense<0.000000e+00> : vector<1x256xf32>
    %14 = tpu.matmul %13, %0, %cst_18 {dimension_numbers = #tpu.dot_dimension_numbers<[1], [0], [0], [1], [0, 0, 1, 1], [], []>} : vector<1x64xbf16>, vector<64x256xbf16>, vector<1x256xf32> -> vector<1x256xf32>
    %15 = arith.addf %12, %14 : vector<1x256xf32>
    %16 = vector.extract_strided_slice %15 {offsets = [0, 0], sizes = [1, 192], strides = [1, 1]} : vector<1x256xf32> to vector<1x192xf32>
    %17 = arith.negf %16 : vector<1x192xf32>
    %18 = math.exp %17 : vector<1x192xf32>
    %cst_19 = arith.constant 1.000000e+00 : f32
    %19 = vector.broadcast %cst_19 : f32 to vector<1x192xf32>
    %20 = arith.addf %19, %18 : vector<1x192xf32>
    %21 = arith.divf %19, %20 : vector<1x192xf32>
    %22 = vector.extract_strided_slice %15 {offsets = [0, 192], sizes = [1, 64], strides = [1, 1]} : vector<1x256xf32> to vector<1x64xf32>
    %23 = math.tanh %22 : vector<1x64xf32>
    %24 = vector.extract_strided_slice %21 {offsets = [0, 0], sizes = [1, 64], strides = [1, 1]} : vector<1x192xf32> to vector<1x64xf32>
    %25 = vector.extract_strided_slice %21 {offsets = [0, 64], sizes = [1, 64], strides = [1, 1]} : vector<1x192xf32> to vector<1x64xf32>
    %26 = vector.extract_strided_slice %21 {offsets = [0, 128], sizes = [1, 64], strides = [1, 1]} : vector<1x192xf32> to vector<1x64xf32>
    %27 = arith.mulf %25, %4 : vector<1x64xf32>
    %28 = arith.mulf %24, %23 : vector<1x64xf32>
    %29 = arith.addf %27, %28 : vector<1x64xf32>
    %30 = math.tanh %29 : vector<1x64xf32>
    %31 = arith.mulf %26, %30 : vector<1x64xf32>
    %c1_i32 = arith.constant 1 : i32
    %32 = arith.truncf %31 : vector<1x64xf32> to vector<1x64xbf16>
    %cst_20 = arith.constant dense<0.000000e+00> : vector<1x256xf32>
    %33 = tpu.matmul %32, %1, %cst_20 {dimension_numbers = #tpu.dot_dimension_numbers<[1], [0], [0], [1], [0, 0, 1, 1], [], []>} : vector<1x64xbf16>, vector<64x256xbf16>, vector<1x256xf32> -> vector<1x256xf32>
    %34 = arith.truncf %4 : vector<1x64xf32> to vector<1x64xbf16>
    %cst_21 = arith.constant dense<0.000000e+00> : vector<1x256xf32>
    %35 = tpu.matmul %34, %2, %cst_21 {dimension_numbers = #tpu.dot_dimension_numbers<[1], [0], [0], [1], [0, 0, 1, 1], [], []>} : vector<1x64xbf16>, vector<64x256xbf16>, vector<1x256xf32> -> vector<1x256xf32>
    %36 = arith.addf %33, %35 : vector<1x256xf32>
    %37 = arith.addf %36, %3 : vector<1x256xf32>
    %38 = vector.extract_strided_slice %37 {offsets = [0, 0], sizes = [1, 192], strides = [1, 1]} : vector<1x256xf32> to vector<1x192xf32>
    %39 = arith.negf %38 : vector<1x192xf32>
    %40 = math.exp %39 : vector<1x192xf32>
    %cst_22 = arith.constant 1.000000e+00 : f32
    %41 = vector.broadcast %cst_22 : f32 to vector<1x192xf32>
    %42 = arith.addf %41, %40 : vector<1x192xf32>
    %43 = arith.divf %41, %42 : vector<1x192xf32>
    %44 = vector.extract_strided_slice %37 {offsets = [0, 192], sizes = [1, 64], strides = [1, 1]} : vector<1x256xf32> to vector<1x64xf32>
    %45 = math.tanh %44 : vector<1x64xf32>
    %46 = vector.extract_strided_slice %43 {offsets = [0, 0], sizes = [1, 64], strides = [1, 1]} : vector<1x192xf32> to vector<1x64xf32>
    %47 = vector.extract_strided_slice %43 {offsets = [0, 64], sizes = [1, 64], strides = [1, 1]} : vector<1x192xf32> to vector<1x64xf32>
    %48 = vector.extract_strided_slice %43 {offsets = [0, 128], sizes = [1, 64], strides = [1, 1]} : vector<1x192xf32> to vector<1x64xf32>
    %49 = arith.mulf %47, %4 : vector<1x64xf32>
    %50 = arith.mulf %46, %45 : vector<1x64xf32>
    %51 = arith.addf %49, %50 : vector<1x64xf32>
    %52 = math.tanh %51 : vector<1x64xf32>
    %53 = arith.mulf %48, %52 : vector<1x64xf32>
    %54 = arith.index_cast %c1_i32 : i32 to index
    %c0_23 = arith.constant 0 : index
    %55 = vector.load %arg10[%54, %c0_23] : memref<30x256xf32, #tpu.memory_space<vmem>>, vector<1x256xf32>
    %56 = arith.truncf %31 : vector<1x64xf32> to vector<1x64xbf16>
    %cst_24 = arith.constant dense<0.000000e+00> : vector<1x256xf32>
    %57 = tpu.matmul %56, %0, %cst_24 {dimension_numbers = #tpu.dot_dimension_numbers<[1], [0], [0], [1], [0, 0, 1, 1], [], []>} : vector<1x64xbf16>, vector<64x256xbf16>, vector<1x256xf32> -> vector<1x256xf32>
    %58 = arith.addf %55, %57 : vector<1x256xf32>
    %59 = vector.extract_strided_slice %58 {offsets = [0, 0], sizes = [1, 192], strides = [1, 1]} : vector<1x256xf32> to vector<1x192xf32>
    %60 = arith.negf %59 : vector<1x192xf32>
    %61 = math.exp %60 : vector<1x192xf32>
    %cst_25 = arith.constant 1.000000e+00 : f32
    %62 = vector.broadcast %cst_25 : f32 to vector<1x192xf32>
    %63 = arith.addf %62, %61 : vector<1x192xf32>
    %64 = arith.divf %62, %63 : vector<1x192xf32>
    %65 = vector.extract_strided_slice %58 {offsets = [0, 192], sizes = [1, 64], strides = [1, 1]} : vector<1x256xf32> to vector<1x64xf32>
    %66 = math.tanh %65 : vector<1x64xf32>
    %67 = vector.extract_strided_slice %64 {offsets = [0, 0], sizes = [1, 64], strides = [1, 1]} : vector<1x192xf32> to vector<1x64xf32>
    %68 = vector.extract_strided_slice %64 {offsets = [0, 64], sizes = [1, 64], strides = [1, 1]} : vector<1x192xf32> to vector<1x64xf32>
    %69 = vector.extract_strided_slice %64 {offsets = [0, 128], sizes = [1, 64], strides = [1, 1]} : vector<1x192xf32> to vector<1x64xf32>
    %70 = arith.mulf %68, %29 : vector<1x64xf32>
    %71 = arith.mulf %67, %66 : vector<1x64xf32>
    %72 = arith.addf %70, %71 : vector<1x64xf32>
    %73 = math.tanh %72 : vector<1x64xf32>
    %74 = arith.mulf %69, %73 : vector<1x64xf32>
    %c2_i32 = arith.constant 2 : i32
    %75 = arith.truncf %74 : vector<1x64xf32> to vector<1x64xbf16>
    %cst_26 = arith.constant dense<0.000000e+00> : vector<1x256xf32>
    %76 = tpu.matmul %75, %1, %cst_26 {dimension_numbers = #tpu.dot_dimension_numbers<[1], [0], [0], [1], [0, 0, 1, 1], [], []>} : vector<1x64xbf16>, vector<64x256xbf16>, vector<1x256xf32> -> vector<1x256xf32>
    %77 = arith.truncf %53 : vector<1x64xf32> to vector<1x64xbf16>
    %cst_27 = arith.constant dense<0.000000e+00> : vector<1x256xf32>
    %78 = tpu.matmul %77, %2, %cst_27 {dimension_numbers = #tpu.dot_dimension_numbers<[1], [0], [0], [1], [0, 0, 1, 1], [], []>} : vector<1x64xbf16>, vector<64x256xbf16>, vector<1x256xf32> -> vector<1x256xf32>
    %79 = arith.addf %76, %78 : vector<1x256xf32>
    %80 = arith.addf %79, %3 : vector<1x256xf32>
    %81 = vector.extract_strided_slice %80 {offsets = [0, 0], sizes = [1, 192], strides = [1, 1]} : vector<1x256xf32> to vector<1x192xf32>
    %82 = arith.negf %81 : vector<1x192xf32>
    %83 = math.exp %82 : vector<1x192xf32>
    %cst_28 = arith.constant 1.000000e+00 : f32
    %84 = vector.broadcast %cst_28 : f32 to vector<1x192xf32>
    %85 = arith.addf %84, %83 : vector<1x192xf32>
    %86 = arith.divf %84, %85 : vector<1x192xf32>
    %87 = vector.extract_strided_slice %80 {offsets = [0, 192], sizes = [1, 64], strides = [1, 1]} : vector<1x256xf32> to vector<1x64xf32>
    %88 = math.tanh %87 : vector<1x64xf32>
    %89 = vector.extract_strided_slice %86 {offsets = [0, 0], sizes = [1, 64], strides = [1, 1]} : vector<1x192xf32> to vector<1x64xf32>
    %90 = vector.extract_strided_slice %86 {offsets = [0, 64], sizes = [1, 64], strides = [1, 1]} : vector<1x192xf32> to vector<1x64xf32>
    %91 = vector.extract_strided_slice %86 {offsets = [0, 128], sizes = [1, 64], strides = [1, 1]} : vector<1x192xf32> to vector<1x64xf32>
    %92 = arith.mulf %90, %51 : vector<1x64xf32>
    %93 = arith.mulf %89, %88 : vector<1x64xf32>
    %94 = arith.addf %92, %93 : vector<1x64xf32>
    %95 = math.tanh %94 : vector<1x64xf32>
    %96 = arith.mulf %91, %95 : vector<1x64xf32>
    %97 = arith.index_cast %c2_i32 : i32 to index
    %c0_29 = arith.constant 0 : index
    %98 = vector.load %arg10[%97, %c0_29] : memref<30x256xf32, #tpu.memory_space<vmem>>, vector<1x256xf32>
    %99 = arith.truncf %74 : vector<1x64xf32> to vector<1x64xbf16>
    %cst_30 = arith.constant dense<0.000000e+00> : vector<1x256xf32>
    %100 = tpu.matmul %99, %0, %cst_30 {dimension_numbers = #tpu.dot_dimension_numbers<[1], [0], [0], [1], [0, 0, 1, 1], [], []>} : vector<1x64xbf16>, vector<64x256xbf16>, vector<1x256xf32> -> vector<1x256xf32>
    %101 = arith.addf %98, %100 : vector<1x256xf32>
    %102 = vector.extract_strided_slice %101 {offsets = [0, 0], sizes = [1, 192], strides = [1, 1]} : vector<1x256xf32> to vector<1x192xf32>
    %103 = arith.negf %102 : vector<1x192xf32>
    %104 = math.exp %103 : vector<1x192xf32>
    %cst_31 = arith.constant 1.000000e+00 : f32
    %105 = vector.broadcast %cst_31 : f32 to vector<1x192xf32>
    %106 = arith.addf %105, %104 : vector<1x192xf32>
    %107 = arith.divf %105, %106 : vector<1x192xf32>
    %108 = vector.extract_strided_slice %101 {offsets = [0, 192], sizes = [1, 64], strides = [1, 1]} : vector<1x256xf32> to vector<1x64xf32>
    %109 = math.tanh %108 : vector<1x64xf32>
    %110 = vector.extract_strided_slice %107 {offsets = [0, 0], sizes = [1, 64], strides = [1, 1]} : vector<1x192xf32> to vector<1x64xf32>
    %111 = vector.extract_strided_slice %107 {offsets = [0, 64], sizes = [1, 64], strides = [1, 1]} : vector<1x192xf32> to vector<1x64xf32>
    %112 = vector.extract_strided_slice %107 {offsets = [0, 128], sizes = [1, 64], strides = [1, 1]} : vector<1x192xf32> to vector<1x64xf32>
    %113 = arith.mulf %111, %72 : vector<1x64xf32>
    %114 = arith.mulf %110, %109 : vector<1x64xf32>
    %115 = arith.addf %113, %114 : vector<1x64xf32>
    %116 = math.tanh %115 : vector<1x64xf32>
    %117 = arith.mulf %112, %116 : vector<1x64xf32>
    %c3_i32 = arith.constant 3 : i32
    %118 = arith.truncf %117 : vector<1x64xf32> to vector<1x64xbf16>
    %cst_32 = arith.constant dense<0.000000e+00> : vector<1x256xf32>
    %119 = tpu.matmul %118, %1, %cst_32 {dimension_numbers = #tpu.dot_dimension_numbers<[1], [0], [0], [1], [0, 0, 1, 1], [], []>} : vector<1x64xbf16>, vector<64x256xbf16>, vector<1x256xf32> -> vector<1x256xf32>
    %120 = arith.truncf %96 : vector<1x64xf32> to vector<1x64xbf16>
    %cst_33 = arith.constant dense<0.000000e+00> : vector<1x256xf32>
    %121 = tpu.matmul %120, %2, %cst_33 {dimension_numbers = #tpu.dot_dimension_numbers<[1], [0], [0], [1], [0, 0, 1, 1], [], []>} : vector<1x64xbf16>, vector<64x256xbf16>, vector<1x256xf32> -> vector<1x256xf32>
    %122 = arith.addf %119, %121 : vector<1x256xf32>
    %123 = arith.addf %122, %3 : vector<1x256xf32>
    %124 = vector.extract_strided_slice %123 {offsets = [0, 0], sizes = [1, 192], strides = [1, 1]} : vector<1x256xf32> to vector<1x192xf32>
    %125 = arith.negf %124 : vector<1x192xf32>
    %126 = math.exp %125 : vector<1x192xf32>
    %cst_34 = arith.constant 1.000000e+00 : f32
    %127 = vector.broadcast %cst_34 : f32 to vector<1x192xf32>
    %128 = arith.addf %127, %126 : vector<1x192xf32>
    %129 = arith.divf %127, %128 : vector<1x192xf32>
    %130 = vector.extract_strided_slice %123 {offsets = [0, 192], sizes = [1, 64], strides = [1, 1]} : vector<1x256xf32> to vector<1x64xf32>
    %131 = math.tanh %130 : vector<1x64xf32>
    %132 = vector.extract_strided_slice %129 {offsets = [0, 0], sizes = [1, 64], strides = [1, 1]} : vector<1x192xf32> to vector<1x64xf32>
    %133 = vector.extract_strided_slice %129 {offsets = [0, 64], sizes = [1, 64], strides = [1, 1]} : vector<1x192xf32> to vector<1x64xf32>
    %134 = vector.extract_strided_slice %129 {offsets = [0, 128], sizes = [1, 64], strides = [1, 1]} : vector<1x192xf32> to vector<1x64xf32>
    %135 = arith.mulf %133, %94 : vector<1x64xf32>
    %136 = arith.mulf %132, %131 : vector<1x64xf32>
    %137 = arith.addf %135, %136 : vector<1x64xf32>
    %138 = math.tanh %137 : vector<1x64xf32>
    %139 = arith.mulf %134, %138 : vector<1x64xf32>
    %140 = arith.index_cast %c3_i32 : i32 to index
    %c0_35 = arith.constant 0 : index
    %141 = vector.load %arg10[%140, %c0_35] : memref<30x256xf32, #tpu.memory_space<vmem>>, vector<1x256xf32>
    %142 = arith.truncf %117 : vector<1x64xf32> to vector<1x64xbf16>
    %cst_36 = arith.constant dense<0.000000e+00> : vector<1x256xf32>
    %143 = tpu.matmul %142, %0, %cst_36 {dimension_numbers = #tpu.dot_dimension_numbers<[1], [0], [0], [1], [0, 0, 1, 1], [], []>} : vector<1x64xbf16>, vector<64x256xbf16>, vector<1x256xf32> -> vector<1x256xf32>
    %144 = arith.addf %141, %143 : vector<1x256xf32>
    %145 = vector.extract_strided_slice %144 {offsets = [0, 0], sizes = [1, 192], strides = [1, 1]} : vector<1x256xf32> to vector<1x192xf32>
    %146 = arith.negf %145 : vector<1x192xf32>
    %147 = math.exp %146 : vector<1x192xf32>
    %cst_37 = arith.constant 1.000000e+00 : f32
    %148 = vector.broadcast %cst_37 : f32 to vector<1x192xf32>
    %149 = arith.addf %148, %147 : vector<1x192xf32>
    %150 = arith.divf %148, %149 : vector<1x192xf32>
    %151 = vector.extract_strided_slice %144 {offsets = [0, 192], sizes = [1, 64], strides = [1, 1]} : vector<1x256xf32> to vector<1x64xf32>
    %152 = math.tanh %151 : vector<1x64xf32>
    %153 = vector.extract_strided_slice %150 {offsets = [0, 0], sizes = [1, 64], strides = [1, 1]} : vector<1x192xf32> to vector<1x64xf32>
    %154 = vector.extract_strided_slice %150 {offsets = [0, 64], sizes = [1, 64], strides = [1, 1]} : vector<1x192xf32> to vector<1x64xf32>
    %155 = vector.extract_strided_slice %150 {offsets = [0, 128], sizes = [1, 64], strides = [1, 1]} : vector<1x192xf32> to vector<1x64xf32>
    %156 = arith.mulf %154, %115 : vector<1x64xf32>
    %157 = arith.mulf %153, %152 : vector<1x64xf32>
    %158 = arith.addf %156, %157 : vector<1x64xf32>
    %159 = math.tanh %158 : vector<1x64xf32>
    %160 = arith.mulf %155, %159 : vector<1x64xf32>
    %c4_i32 = arith.constant 4 : i32
    %161 = arith.truncf %160 : vector<1x64xf32> to vector<1x64xbf16>
    %cst_38 = arith.constant dense<0.000000e+00> : vector<1x256xf32>
    %162 = tpu.matmul %161, %1, %cst_38 {dimension_numbers = #tpu.dot_dimension_numbers<[1], [0], [0], [1], [0, 0, 1, 1], [], []>} : vector<1x64xbf16>, vector<64x256xbf16>, vector<1x256xf32> -> vector<1x256xf32>
    %163 = arith.truncf %139 : vector<1x64xf32> to vector<1x64xbf16>
    %cst_39 = arith.constant dense<0.000000e+00> : vector<1x256xf32>
    %164 = tpu.matmul %163, %2, %cst_39 {dimension_numbers = #tpu.dot_dimension_numbers<[1], [0], [0], [1], [0, 0, 1, 1], [], []>} : vector<1x64xbf16>, vector<64x256xbf16>, vector<1x256xf32> -> vector<1x256xf32>
    %165 = arith.addf %162, %164 : vector<1x256xf32>
    %166 = arith.addf %165, %3 : vector<1x256xf32>
    %167 = vector.extract_strided_slice %166 {offsets = [0, 0], sizes = [1, 192], strides = [1, 1]} : vector<1x256xf32> to vector<1x192xf32>
    %168 = arith.negf %167 : vector<1x192xf32>
    %169 = math.exp %168 : vector<1x192xf32>
    %cst_40 = arith.constant 1.000000e+00 : f32
    %170 = vector.broadcast %cst_40 : f32 to vector<1x192xf32>
    %171 = arith.addf %170, %169 : vector<1x192xf32>
    %172 = arith.divf %170, %171 : vector<1x192xf32>
    %173 = vector.extract_strided_slice %166 {offsets = [0, 192], sizes = [1, 64], strides = [1, 1]} : vector<1x256xf32> to vector<1x64xf32>
    %174 = math.tanh %173 : vector<1x64xf32>
    %175 = vector.extract_strided_slice %172 {offsets = [0, 0], sizes = [1, 64], strides = [1, 1]} : vector<1x192xf32> to vector<1x64xf32>
    %176 = vector.extract_strided_slice %172 {offsets = [0, 64], sizes = [1, 64], strides = [1, 1]} : vector<1x192xf32> to vector<1x64xf32>
    %177 = vector.extract_strided_slice %172 {offsets = [0, 128], sizes = [1, 64], strides = [1, 1]} : vector<1x192xf32> to vector<1x64xf32>
    %178 = arith.mulf %176, %137 : vector<1x64xf32>
    %179 = arith.mulf %175, %174 : vector<1x64xf32>
    %180 = arith.addf %178, %179 : vector<1x64xf32>
    %181 = math.tanh %180 : vector<1x64xf32>
    %182 = arith.mulf %177, %181 : vector<1x64xf32>
    %183 = arith.index_cast %c4_i32 : i32 to index
    %c0_41 = arith.constant 0 : index
    %184 = vector.load %arg10[%183, %c0_41] : memref<30x256xf32, #tpu.memory_space<vmem>>, vector<1x256xf32>
    %185 = arith.truncf %160 : vector<1x64xf32> to vector<1x64xbf16>
    %cst_42 = arith.constant dense<0.000000e+00> : vector<1x256xf32>
    %186 = tpu.matmul %185, %0, %cst_42 {dimension_numbers = #tpu.dot_dimension_numbers<[1], [0], [0], [1], [0, 0, 1, 1], [], []>} : vector<1x64xbf16>, vector<64x256xbf16>, vector<1x256xf32> -> vector<1x256xf32>
    %187 = arith.addf %184, %186 : vector<1x256xf32>
    %188 = vector.extract_strided_slice %187 {offsets = [0, 0], sizes = [1, 192], strides = [1, 1]} : vector<1x256xf32> to vector<1x192xf32>
    %189 = arith.negf %188 : vector<1x192xf32>
    %190 = math.exp %189 : vector<1x192xf32>
    %cst_43 = arith.constant 1.000000e+00 : f32
    %191 = vector.broadcast %cst_43 : f32 to vector<1x192xf32>
    %192 = arith.addf %191, %190 : vector<1x192xf32>
    %193 = arith.divf %191, %192 : vector<1x192xf32>
    %194 = vector.extract_strided_slice %187 {offsets = [0, 192], sizes = [1, 64], strides = [1, 1]} : vector<1x256xf32> to vector<1x64xf32>
    %195 = math.tanh %194 : vector<1x64xf32>
    %196 = vector.extract_strided_slice %193 {offsets = [0, 0], sizes = [1, 64], strides = [1, 1]} : vector<1x192xf32> to vector<1x64xf32>
    %197 = vector.extract_strided_slice %193 {offsets = [0, 64], sizes = [1, 64], strides = [1, 1]} : vector<1x192xf32> to vector<1x64xf32>
    %198 = vector.extract_strided_slice %193 {offsets = [0, 128], sizes = [1, 64], strides = [1, 1]} : vector<1x192xf32> to vector<1x64xf32>
    %199 = arith.mulf %197, %158 : vector<1x64xf32>
    %200 = arith.mulf %196, %195 : vector<1x64xf32>
    %201 = arith.addf %199, %200 : vector<1x64xf32>
    %202 = math.tanh %201 : vector<1x64xf32>
    %203 = arith.mulf %198, %202 : vector<1x64xf32>
    %c5_i32 = arith.constant 5 : i32
    %204 = arith.truncf %203 : vector<1x64xf32> to vector<1x64xbf16>
    %cst_44 = arith.constant dense<0.000000e+00> : vector<1x256xf32>
    %205 = tpu.matmul %204, %1, %cst_44 {dimension_numbers = #tpu.dot_dimension_numbers<[1], [0], [0], [1], [0, 0, 1, 1], [], []>} : vector<1x64xbf16>, vector<64x256xbf16>, vector<1x256xf32> -> vector<1x256xf32>
    %206 = arith.truncf %182 : vector<1x64xf32> to vector<1x64xbf16>
    %cst_45 = arith.constant dense<0.000000e+00> : vector<1x256xf32>
    %207 = tpu.matmul %206, %2, %cst_45 {dimension_numbers = #tpu.dot_dimension_numbers<[1], [0], [0], [1], [0, 0, 1, 1], [], []>} : vector<1x64xbf16>, vector<64x256xbf16>, vector<1x256xf32> -> vector<1x256xf32>
    %208 = arith.addf %205, %207 : vector<1x256xf32>
    %209 = arith.addf %208, %3 : vector<1x256xf32>
    %210 = vector.extract_strided_slice %209 {offsets = [0, 0], sizes = [1, 192], strides = [1, 1]} : vector<1x256xf32> to vector<1x192xf32>
    %211 = arith.negf %210 : vector<1x192xf32>
    %212 = math.exp %211 : vector<1x192xf32>
    %cst_46 = arith.constant 1.000000e+00 : f32
    %213 = vector.broadcast %cst_46 : f32 to vector<1x192xf32>
    %214 = arith.addf %213, %212 : vector<1x192xf32>
    %215 = arith.divf %213, %214 : vector<1x192xf32>
    %216 = vector.extract_strided_slice %209 {offsets = [0, 192], sizes = [1, 64], strides = [1, 1]} : vector<1x256xf32> to vector<1x64xf32>
    %217 = math.tanh %216 : vector<1x64xf32>
    %218 = vector.extract_strided_slice %215 {offsets = [0, 0], sizes = [1, 64], strides = [1, 1]} : vector<1x192xf32> to vector<1x64xf32>
    %219 = vector.extract_strided_slice %215 {offsets = [0, 64], sizes = [1, 64], strides = [1, 1]} : vector<1x192xf32> to vector<1x64xf32>
    %220 = vector.extract_strided_slice %215 {offsets = [0, 128], sizes = [1, 64], strides = [1, 1]} : vector<1x192xf32> to vector<1x64xf32>
    %221 = arith.mulf %219, %180 : vector<1x64xf32>
    %222 = arith.mulf %218, %217 : vector<1x64xf32>
    %223 = arith.addf %221, %222 : vector<1x64xf32>
    %224 = math.tanh %223 : vector<1x64xf32>
    %225 = arith.mulf %220, %224 : vector<1x64xf32>
    %226 = arith.index_cast %c5_i32 : i32 to index
    %c0_47 = arith.constant 0 : index
    %227 = vector.load %arg10[%226, %c0_47] : memref<30x256xf32, #tpu.memory_space<vmem>>, vector<1x256xf32>
    %228 = arith.truncf %203 : vector<1x64xf32> to vector<1x64xbf16>
    %cst_48 = arith.constant dense<0.000000e+00> : vector<1x256xf32>
    %229 = tpu.matmul %228, %0, %cst_48 {dimension_numbers = #tpu.dot_dimension_numbers<[1], [0], [0], [1], [0, 0, 1, 1], [], []>} : vector<1x64xbf16>, vector<64x256xbf16>, vector<1x256xf32> -> vector<1x256xf32>
    %230 = arith.addf %227, %229 : vector<1x256xf32>
    %231 = vector.extract_strided_slice %230 {offsets = [0, 0], sizes = [1, 192], strides = [1, 1]} : vector<1x256xf32> to vector<1x192xf32>
    %232 = arith.negf %231 : vector<1x192xf32>
    %233 = math.exp %232 : vector<1x192xf32>
    %cst_49 = arith.constant 1.000000e+00 : f32
    %234 = vector.broadcast %cst_49 : f32 to vector<1x192xf32>
    %235 = arith.addf %234, %233 : vector<1x192xf32>
    %236 = arith.divf %234, %235 : vector<1x192xf32>
    %237 = vector.extract_strided_slice %230 {offsets = [0, 192], sizes = [1, 64], strides = [1, 1]} : vector<1x256xf32> to vector<1x64xf32>
    %238 = math.tanh %237 : vector<1x64xf32>
    %239 = vector.extract_strided_slice %236 {offsets = [0, 0], sizes = [1, 64], strides = [1, 1]} : vector<1x192xf32> to vector<1x64xf32>
    %240 = vector.extract_strided_slice %236 {offsets = [0, 64], sizes = [1, 64], strides = [1, 1]} : vector<1x192xf32> to vector<1x64xf32>
    %241 = vector.extract_strided_slice %236 {offsets = [0, 128], sizes = [1, 64], strides = [1, 1]} : vector<1x192xf32> to vector<1x64xf32>
    %242 = arith.mulf %240, %201 : vector<1x64xf32>
    %243 = arith.mulf %239, %238 : vector<1x64xf32>
    %244 = arith.addf %242, %243 : vector<1x64xf32>
    %245 = math.tanh %244 : vector<1x64xf32>
    %246 = arith.mulf %241, %245 : vector<1x64xf32>
    %c6_i32 = arith.constant 6 : i32
    %247 = arith.truncf %246 : vector<1x64xf32> to vector<1x64xbf16>
    %cst_50 = arith.constant dense<0.000000e+00> : vector<1x256xf32>
    %248 = tpu.matmul %247, %1, %cst_50 {dimension_numbers = #tpu.dot_dimension_numbers<[1], [0], [0], [1], [0, 0, 1, 1], [], []>} : vector<1x64xbf16>, vector<64x256xbf16>, vector<1x256xf32> -> vector<1x256xf32>
    %249 = arith.truncf %225 : vector<1x64xf32> to vector<1x64xbf16>
    %cst_51 = arith.constant dense<0.000000e+00> : vector<1x256xf32>
    %250 = tpu.matmul %249, %2, %cst_51 {dimension_numbers = #tpu.dot_dimension_numbers<[1], [0], [0], [1], [0, 0, 1, 1], [], []>} : vector<1x64xbf16>, vector<64x256xbf16>, vector<1x256xf32> -> vector<1x256xf32>
    %251 = arith.addf %248, %250 : vector<1x256xf32>
    %252 = arith.addf %251, %3 : vector<1x256xf32>
    %253 = vector.extract_strided_slice %252 {offsets = [0, 0], sizes = [1, 192], strides = [1, 1]} : vector<1x256xf32> to vector<1x192xf32>
    %254 = arith.negf %253 : vector<1x192xf32>
    %255 = math.exp %254 : vector<1x192xf32>
    %cst_52 = arith.constant 1.000000e+00 : f32
    %256 = vector.broadcast %cst_52 : f32 to vector<1x192xf32>
    %257 = arith.addf %256, %255 : vector<1x192xf32>
    %258 = arith.divf %256, %257 : vector<1x192xf32>
    %259 = vector.extract_strided_slice %252 {offsets = [0, 192], sizes = [1, 64], strides = [1, 1]} : vector<1x256xf32> to vector<1x64xf32>
    %260 = math.tanh %259 : vector<1x64xf32>
    %261 = vector.extract_strided_slice %258 {offsets = [0, 0], sizes = [1, 64], strides = [1, 1]} : vector<1x192xf32> to vector<1x64xf32>
    %262 = vector.extract_strided_slice %258 {offsets = [0, 64], sizes = [1, 64], strides = [1, 1]} : vector<1x192xf32> to vector<1x64xf32>
    %263 = vector.extract_strided_slice %258 {offsets = [0, 128], sizes = [1, 64], strides = [1, 1]} : vector<1x192xf32> to vector<1x64xf32>
    %264 = arith.mulf %262, %223 : vector<1x64xf32>
    %265 = arith.mulf %261, %260 : vector<1x64xf32>
    %266 = arith.addf %264, %265 : vector<1x64xf32>
    %267 = math.tanh %266 : vector<1x64xf32>
    %268 = arith.mulf %263, %267 : vector<1x64xf32>
    %269 = arith.index_cast %c6_i32 : i32 to index
    %c0_53 = arith.constant 0 : index
    %270 = vector.load %arg10[%269, %c0_53] : memref<30x256xf32, #tpu.memory_space<vmem>>, vector<1x256xf32>
    %271 = arith.truncf %246 : vector<1x64xf32> to vector<1x64xbf16>
    %cst_54 = arith.constant dense<0.000000e+00> : vector<1x256xf32>
    %272 = tpu.matmul %271, %0, %cst_54 {dimension_numbers = #tpu.dot_dimension_numbers<[1], [0], [0], [1], [0, 0, 1, 1], [], []>} : vector<1x64xbf16>, vector<64x256xbf16>, vector<1x256xf32> -> vector<1x256xf32>
    %273 = arith.addf %270, %272 : vector<1x256xf32>
    %274 = vector.extract_strided_slice %273 {offsets = [0, 0], sizes = [1, 192], strides = [1, 1]} : vector<1x256xf32> to vector<1x192xf32>
    %275 = arith.negf %274 : vector<1x192xf32>
    %276 = math.exp %275 : vector<1x192xf32>
    %cst_55 = arith.constant 1.000000e+00 : f32
    %277 = vector.broadcast %cst_55 : f32 to vector<1x192xf32>
    %278 = arith.addf %277, %276 : vector<1x192xf32>
    %279 = arith.divf %277, %278 : vector<1x192xf32>
    %280 = vector.extract_strided_slice %273 {offsets = [0, 192], sizes = [1, 64], strides = [1, 1]} : vector<1x256xf32> to vector<1x64xf32>
    %281 = math.tanh %280 : vector<1x64xf32>
    %282 = vector.extract_strided_slice %279 {offsets = [0, 0], sizes = [1, 64], strides = [1, 1]} : vector<1x192xf32> to vector<1x64xf32>
    %283 = vector.extract_strided_slice %279 {offsets = [0, 64], sizes = [1, 64], strides = [1, 1]} : vector<1x192xf32> to vector<1x64xf32>
    %284 = vector.extract_strided_slice %279 {offsets = [0, 128], sizes = [1, 64], strides = [1, 1]} : vector<1x192xf32> to vector<1x64xf32>
    %285 = arith.mulf %283, %244 : vector<1x64xf32>
    %286 = arith.mulf %282, %281 : vector<1x64xf32>
    %287 = arith.addf %285, %286 : vector<1x64xf32>
    %288 = math.tanh %287 : vector<1x64xf32>
    %289 = arith.mulf %284, %288 : vector<1x64xf32>
    %c7_i32 = arith.constant 7 : i32
    %290 = arith.truncf %289 : vector<1x64xf32> to vector<1x64xbf16>
    %cst_56 = arith.constant dense<0.000000e+00> : vector<1x256xf32>
    %291 = tpu.matmul %290, %1, %cst_56 {dimension_numbers = #tpu.dot_dimension_numbers<[1], [0], [0], [1], [0, 0, 1, 1], [], []>} : vector<1x64xbf16>, vector<64x256xbf16>, vector<1x256xf32> -> vector<1x256xf32>
    %292 = arith.truncf %268 : vector<1x64xf32> to vector<1x64xbf16>
    %cst_57 = arith.constant dense<0.000000e+00> : vector<1x256xf32>
    %293 = tpu.matmul %292, %2, %cst_57 {dimension_numbers = #tpu.dot_dimension_numbers<[1], [0], [0], [1], [0, 0, 1, 1], [], []>} : vector<1x64xbf16>, vector<64x256xbf16>, vector<1x256xf32> -> vector<1x256xf32>
    %294 = arith.addf %291, %293 : vector<1x256xf32>
    %295 = arith.addf %294, %3 : vector<1x256xf32>
    %296 = vector.extract_strided_slice %295 {offsets = [0, 0], sizes = [1, 192], strides = [1, 1]} : vector<1x256xf32> to vector<1x192xf32>
    %297 = arith.negf %296 : vector<1x192xf32>
    %298 = math.exp %297 : vector<1x192xf32>
    %cst_58 = arith.constant 1.000000e+00 : f32
    %299 = vector.broadcast %cst_58 : f32 to vector<1x192xf32>
    %300 = arith.addf %299, %298 : vector<1x192xf32>
    %301 = arith.divf %299, %300 : vector<1x192xf32>
    %302 = vector.extract_strided_slice %295 {offsets = [0, 192], sizes = [1, 64], strides = [1, 1]} : vector<1x256xf32> to vector<1x64xf32>
    %303 = math.tanh %302 : vector<1x64xf32>
    %304 = vector.extract_strided_slice %301 {offsets = [0, 0], sizes = [1, 64], strides = [1, 1]} : vector<1x192xf32> to vector<1x64xf32>
    %305 = vector.extract_strided_slice %301 {offsets = [0, 64], sizes = [1, 64], strides = [1, 1]} : vector<1x192xf32> to vector<1x64xf32>
    %306 = vector.extract_strided_slice %301 {offsets = [0, 128], sizes = [1, 64], strides = [1, 1]} : vector<1x192xf32> to vector<1x64xf32>
    %307 = arith.mulf %305, %266 : vector<1x64xf32>
    %308 = arith.mulf %304, %303 : vector<1x64xf32>
    %309 = arith.addf %307, %308 : vector<1x64xf32>
    %310 = math.tanh %309 : vector<1x64xf32>
    %311 = arith.mulf %306, %310 : vector<1x64xf32>
    %312 = arith.index_cast %c7_i32 : i32 to index
    %c0_59 = arith.constant 0 : index
    %313 = vector.load %arg10[%312, %c0_59] : memref<30x256xf32, #tpu.memory_space<vmem>>, vector<1x256xf32>
    %314 = arith.truncf %289 : vector<1x64xf32> to vector<1x64xbf16>
    %cst_60 = arith.constant dense<0.000000e+00> : vector<1x256xf32>
    %315 = tpu.matmul %314, %0, %cst_60 {dimension_numbers = #tpu.dot_dimension_numbers<[1], [0], [0], [1], [0, 0, 1, 1], [], []>} : vector<1x64xbf16>, vector<64x256xbf16>, vector<1x256xf32> -> vector<1x256xf32>
    %316 = arith.addf %313, %315 : vector<1x256xf32>
    %317 = vector.extract_strided_slice %316 {offsets = [0, 0], sizes = [1, 192], strides = [1, 1]} : vector<1x256xf32> to vector<1x192xf32>
    %318 = arith.negf %317 : vector<1x192xf32>
    %319 = math.exp %318 : vector<1x192xf32>
    %cst_61 = arith.constant 1.000000e+00 : f32
    %320 = vector.broadcast %cst_61 : f32 to vector<1x192xf32>
    %321 = arith.addf %320, %319 : vector<1x192xf32>
    %322 = arith.divf %320, %321 : vector<1x192xf32>
    %323 = vector.extract_strided_slice %316 {offsets = [0, 192], sizes = [1, 64], strides = [1, 1]} : vector<1x256xf32> to vector<1x64xf32>
    %324 = math.tanh %323 : vector<1x64xf32>
    %325 = vector.extract_strided_slice %322 {offsets = [0, 0], sizes = [1, 64], strides = [1, 1]} : vector<1x192xf32> to vector<1x64xf32>
    %326 = vector.extract_strided_slice %322 {offsets = [0, 64], sizes = [1, 64], strides = [1, 1]} : vector<1x192xf32> to vector<1x64xf32>
    %327 = vector.extract_strided_slice %322 {offsets = [0, 128], sizes = [1, 64], strides = [1, 1]} : vector<1x192xf32> to vector<1x64xf32>
    %328 = arith.mulf %326, %287 : vector<1x64xf32>
    %329 = arith.mulf %325, %324 : vector<1x64xf32>
    %330 = arith.addf %328, %329 : vector<1x64xf32>
    %331 = math.tanh %330 : vector<1x64xf32>
    %332 = arith.mulf %327, %331 : vector<1x64xf32>
    %c8_i32 = arith.constant 8 : i32
    %333 = arith.truncf %332 : vector<1x64xf32> to vector<1x64xbf16>
    %cst_62 = arith.constant dense<0.000000e+00> : vector<1x256xf32>
    %334 = tpu.matmul %333, %1, %cst_62 {dimension_numbers = #tpu.dot_dimension_numbers<[1], [0], [0], [1], [0, 0, 1, 1], [], []>} : vector<1x64xbf16>, vector<64x256xbf16>, vector<1x256xf32> -> vector<1x256xf32>
    %335 = arith.truncf %311 : vector<1x64xf32> to vector<1x64xbf16>
    %cst_63 = arith.constant dense<0.000000e+00> : vector<1x256xf32>
    %336 = tpu.matmul %335, %2, %cst_63 {dimension_numbers = #tpu.dot_dimension_numbers<[1], [0], [0], [1], [0, 0, 1, 1], [], []>} : vector<1x64xbf16>, vector<64x256xbf16>, vector<1x256xf32> -> vector<1x256xf32>
    %337 = arith.addf %334, %336 : vector<1x256xf32>
    %338 = arith.addf %337, %3 : vector<1x256xf32>
    %339 = vector.extract_strided_slice %338 {offsets = [0, 0], sizes = [1, 192], strides = [1, 1]} : vector<1x256xf32> to vector<1x192xf32>
    %340 = arith.negf %339 : vector<1x192xf32>
    %341 = math.exp %340 : vector<1x192xf32>
    %cst_64 = arith.constant 1.000000e+00 : f32
    %342 = vector.broadcast %cst_64 : f32 to vector<1x192xf32>
    %343 = arith.addf %342, %341 : vector<1x192xf32>
    %344 = arith.divf %342, %343 : vector<1x192xf32>
    %345 = vector.extract_strided_slice %338 {offsets = [0, 192], sizes = [1, 64], strides = [1, 1]} : vector<1x256xf32> to vector<1x64xf32>
    %346 = math.tanh %345 : vector<1x64xf32>
    %347 = vector.extract_strided_slice %344 {offsets = [0, 0], sizes = [1, 64], strides = [1, 1]} : vector<1x192xf32> to vector<1x64xf32>
    %348 = vector.extract_strided_slice %344 {offsets = [0, 64], sizes = [1, 64], strides = [1, 1]} : vector<1x192xf32> to vector<1x64xf32>
    %349 = vector.extract_strided_slice %344 {offsets = [0, 128], sizes = [1, 64], strides = [1, 1]} : vector<1x192xf32> to vector<1x64xf32>
    %350 = arith.mulf %348, %309 : vector<1x64xf32>
    %351 = arith.mulf %347, %346 : vector<1x64xf32>
    %352 = arith.addf %350, %351 : vector<1x64xf32>
    %353 = math.tanh %352 : vector<1x64xf32>
    %354 = arith.mulf %349, %353 : vector<1x64xf32>
    %355 = arith.index_cast %c8_i32 : i32 to index
    %c0_65 = arith.constant 0 : index
    %356 = vector.load %arg10[%355, %c0_65] : memref<30x256xf32, #tpu.memory_space<vmem>>, vector<1x256xf32>
    %357 = arith.truncf %332 : vector<1x64xf32> to vector<1x64xbf16>
    %cst_66 = arith.constant dense<0.000000e+00> : vector<1x256xf32>
    %358 = tpu.matmul %357, %0, %cst_66 {dimension_numbers = #tpu.dot_dimension_numbers<[1], [0], [0], [1], [0, 0, 1, 1], [], []>} : vector<1x64xbf16>, vector<64x256xbf16>, vector<1x256xf32> -> vector<1x256xf32>
    %359 = arith.addf %356, %358 : vector<1x256xf32>
    %360 = vector.extract_strided_slice %359 {offsets = [0, 0], sizes = [1, 192], strides = [1, 1]} : vector<1x256xf32> to vector<1x192xf32>
    %361 = arith.negf %360 : vector<1x192xf32>
    %362 = math.exp %361 : vector<1x192xf32>
    %cst_67 = arith.constant 1.000000e+00 : f32
    %363 = vector.broadcast %cst_67 : f32 to vector<1x192xf32>
    %364 = arith.addf %363, %362 : vector<1x192xf32>
    %365 = arith.divf %363, %364 : vector<1x192xf32>
    %366 = vector.extract_strided_slice %359 {offsets = [0, 192], sizes = [1, 64], strides = [1, 1]} : vector<1x256xf32> to vector<1x64xf32>
    %367 = math.tanh %366 : vector<1x64xf32>
    %368 = vector.extract_strided_slice %365 {offsets = [0, 0], sizes = [1, 64], strides = [1, 1]} : vector<1x192xf32> to vector<1x64xf32>
    %369 = vector.extract_strided_slice %365 {offsets = [0, 64], sizes = [1, 64], strides = [1, 1]} : vector<1x192xf32> to vector<1x64xf32>
    %370 = vector.extract_strided_slice %365 {offsets = [0, 128], sizes = [1, 64], strides = [1, 1]} : vector<1x192xf32> to vector<1x64xf32>
    %371 = arith.mulf %369, %330 : vector<1x64xf32>
    %372 = arith.mulf %368, %367 : vector<1x64xf32>
    %373 = arith.addf %371, %372 : vector<1x64xf32>
    %374 = math.tanh %373 : vector<1x64xf32>
    %375 = arith.mulf %370, %374 : vector<1x64xf32>
    %c9_i32 = arith.constant 9 : i32
    %376 = arith.truncf %375 : vector<1x64xf32> to vector<1x64xbf16>
    %cst_68 = arith.constant dense<0.000000e+00> : vector<1x256xf32>
    %377 = tpu.matmul %376, %1, %cst_68 {dimension_numbers = #tpu.dot_dimension_numbers<[1], [0], [0], [1], [0, 0, 1, 1], [], []>} : vector<1x64xbf16>, vector<64x256xbf16>, vector<1x256xf32> -> vector<1x256xf32>
    %378 = arith.truncf %354 : vector<1x64xf32> to vector<1x64xbf16>
    %cst_69 = arith.constant dense<0.000000e+00> : vector<1x256xf32>
    %379 = tpu.matmul %378, %2, %cst_69 {dimension_numbers = #tpu.dot_dimension_numbers<[1], [0], [0], [1], [0, 0, 1, 1], [], []>} : vector<1x64xbf16>, vector<64x256xbf16>, vector<1x256xf32> -> vector<1x256xf32>
    %380 = arith.addf %377, %379 : vector<1x256xf32>
    %381 = arith.addf %380, %3 : vector<1x256xf32>
    %382 = vector.extract_strided_slice %381 {offsets = [0, 0], sizes = [1, 192], strides = [1, 1]} : vector<1x256xf32> to vector<1x192xf32>
    %383 = arith.negf %382 : vector<1x192xf32>
    %384 = math.exp %383 : vector<1x192xf32>
    %cst_70 = arith.constant 1.000000e+00 : f32
    %385 = vector.broadcast %cst_70 : f32 to vector<1x192xf32>
    %386 = arith.addf %385, %384 : vector<1x192xf32>
    %387 = arith.divf %385, %386 : vector<1x192xf32>
    %388 = vector.extract_strided_slice %381 {offsets = [0, 192], sizes = [1, 64], strides = [1, 1]} : vector<1x256xf32> to vector<1x64xf32>
    %389 = math.tanh %388 : vector<1x64xf32>
    %390 = vector.extract_strided_slice %387 {offsets = [0, 0], sizes = [1, 64], strides = [1, 1]} : vector<1x192xf32> to vector<1x64xf32>
    %391 = vector.extract_strided_slice %387 {offsets = [0, 64], sizes = [1, 64], strides = [1, 1]} : vector<1x192xf32> to vector<1x64xf32>
    %392 = vector.extract_strided_slice %387 {offsets = [0, 128], sizes = [1, 64], strides = [1, 1]} : vector<1x192xf32> to vector<1x64xf32>
    %393 = arith.mulf %391, %352 : vector<1x64xf32>
    %394 = arith.mulf %390, %389 : vector<1x64xf32>
    %395 = arith.addf %393, %394 : vector<1x64xf32>
    %396 = math.tanh %395 : vector<1x64xf32>
    %397 = arith.mulf %392, %396 : vector<1x64xf32>
    %398 = arith.index_cast %c9_i32 : i32 to index
    %c0_71 = arith.constant 0 : index
    %399 = vector.load %arg10[%398, %c0_71] : memref<30x256xf32, #tpu.memory_space<vmem>>, vector<1x256xf32>
    %400 = arith.truncf %375 : vector<1x64xf32> to vector<1x64xbf16>
    %cst_72 = arith.constant dense<0.000000e+00> : vector<1x256xf32>
    %401 = tpu.matmul %400, %0, %cst_72 {dimension_numbers = #tpu.dot_dimension_numbers<[1], [0], [0], [1], [0, 0, 1, 1], [], []>} : vector<1x64xbf16>, vector<64x256xbf16>, vector<1x256xf32> -> vector<1x256xf32>
    %402 = arith.addf %399, %401 : vector<1x256xf32>
    %403 = vector.extract_strided_slice %402 {offsets = [0, 0], sizes = [1, 192], strides = [1, 1]} : vector<1x256xf32> to vector<1x192xf32>
    %404 = arith.negf %403 : vector<1x192xf32>
    %405 = math.exp %404 : vector<1x192xf32>
    %cst_73 = arith.constant 1.000000e+00 : f32
    %406 = vector.broadcast %cst_73 : f32 to vector<1x192xf32>
    %407 = arith.addf %406, %405 : vector<1x192xf32>
    %408 = arith.divf %406, %407 : vector<1x192xf32>
    %409 = vector.extract_strided_slice %402 {offsets = [0, 192], sizes = [1, 64], strides = [1, 1]} : vector<1x256xf32> to vector<1x64xf32>
    %410 = math.tanh %409 : vector<1x64xf32>
    %411 = vector.extract_strided_slice %408 {offsets = [0, 0], sizes = [1, 64], strides = [1, 1]} : vector<1x192xf32> to vector<1x64xf32>
    %412 = vector.extract_strided_slice %408 {offsets = [0, 64], sizes = [1, 64], strides = [1, 1]} : vector<1x192xf32> to vector<1x64xf32>
    %413 = vector.extract_strided_slice %408 {offsets = [0, 128], sizes = [1, 64], strides = [1, 1]} : vector<1x192xf32> to vector<1x64xf32>
    %414 = arith.mulf %412, %373 : vector<1x64xf32>
    %415 = arith.mulf %411, %410 : vector<1x64xf32>
    %416 = arith.addf %414, %415 : vector<1x64xf32>
    %417 = math.tanh %416 : vector<1x64xf32>
    %418 = arith.mulf %413, %417 : vector<1x64xf32>
    %c10_i32 = arith.constant 10 : i32
    %419 = arith.truncf %418 : vector<1x64xf32> to vector<1x64xbf16>
    %cst_74 = arith.constant dense<0.000000e+00> : vector<1x256xf32>
    %420 = tpu.matmul %419, %1, %cst_74 {dimension_numbers = #tpu.dot_dimension_numbers<[1], [0], [0], [1], [0, 0, 1, 1], [], []>} : vector<1x64xbf16>, vector<64x256xbf16>, vector<1x256xf32> -> vector<1x256xf32>
    %421 = arith.truncf %397 : vector<1x64xf32> to vector<1x64xbf16>
    %cst_75 = arith.constant dense<0.000000e+00> : vector<1x256xf32>
    %422 = tpu.matmul %421, %2, %cst_75 {dimension_numbers = #tpu.dot_dimension_numbers<[1], [0], [0], [1], [0, 0, 1, 1], [], []>} : vector<1x64xbf16>, vector<64x256xbf16>, vector<1x256xf32> -> vector<1x256xf32>
    %423 = arith.addf %420, %422 : vector<1x256xf32>
    %424 = arith.addf %423, %3 : vector<1x256xf32>
    %425 = vector.extract_strided_slice %424 {offsets = [0, 0], sizes = [1, 192], strides = [1, 1]} : vector<1x256xf32> to vector<1x192xf32>
    %426 = arith.negf %425 : vector<1x192xf32>
    %427 = math.exp %426 : vector<1x192xf32>
    %cst_76 = arith.constant 1.000000e+00 : f32
    %428 = vector.broadcast %cst_76 : f32 to vector<1x192xf32>
    %429 = arith.addf %428, %427 : vector<1x192xf32>
    %430 = arith.divf %428, %429 : vector<1x192xf32>
    %431 = vector.extract_strided_slice %424 {offsets = [0, 192], sizes = [1, 64], strides = [1, 1]} : vector<1x256xf32> to vector<1x64xf32>
    %432 = math.tanh %431 : vector<1x64xf32>
    %433 = vector.extract_strided_slice %430 {offsets = [0, 0], sizes = [1, 64], strides = [1, 1]} : vector<1x192xf32> to vector<1x64xf32>
    %434 = vector.extract_strided_slice %430 {offsets = [0, 64], sizes = [1, 64], strides = [1, 1]} : vector<1x192xf32> to vector<1x64xf32>
    %435 = vector.extract_strided_slice %430 {offsets = [0, 128], sizes = [1, 64], strides = [1, 1]} : vector<1x192xf32> to vector<1x64xf32>
    %436 = arith.mulf %434, %395 : vector<1x64xf32>
    %437 = arith.mulf %433, %432 : vector<1x64xf32>
    %438 = arith.addf %436, %437 : vector<1x64xf32>
    %439 = math.tanh %438 : vector<1x64xf32>
    %440 = arith.mulf %435, %439 : vector<1x64xf32>
    %441 = arith.index_cast %c10_i32 : i32 to index
    %c0_77 = arith.constant 0 : index
    %442 = vector.load %arg10[%441, %c0_77] : memref<30x256xf32, #tpu.memory_space<vmem>>, vector<1x256xf32>
    %443 = arith.truncf %418 : vector<1x64xf32> to vector<1x64xbf16>
    %cst_78 = arith.constant dense<0.000000e+00> : vector<1x256xf32>
    %444 = tpu.matmul %443, %0, %cst_78 {dimension_numbers = #tpu.dot_dimension_numbers<[1], [0], [0], [1], [0, 0, 1, 1], [], []>} : vector<1x64xbf16>, vector<64x256xbf16>, vector<1x256xf32> -> vector<1x256xf32>
    %445 = arith.addf %442, %444 : vector<1x256xf32>
    %446 = vector.extract_strided_slice %445 {offsets = [0, 0], sizes = [1, 192], strides = [1, 1]} : vector<1x256xf32> to vector<1x192xf32>
    %447 = arith.negf %446 : vector<1x192xf32>
    %448 = math.exp %447 : vector<1x192xf32>
    %cst_79 = arith.constant 1.000000e+00 : f32
    %449 = vector.broadcast %cst_79 : f32 to vector<1x192xf32>
    %450 = arith.addf %449, %448 : vector<1x192xf32>
    %451 = arith.divf %449, %450 : vector<1x192xf32>
    %452 = vector.extract_strided_slice %445 {offsets = [0, 192], sizes = [1, 64], strides = [1, 1]} : vector<1x256xf32> to vector<1x64xf32>
    %453 = math.tanh %452 : vector<1x64xf32>
    %454 = vector.extract_strided_slice %451 {offsets = [0, 0], sizes = [1, 64], strides = [1, 1]} : vector<1x192xf32> to vector<1x64xf32>
    %455 = vector.extract_strided_slice %451 {offsets = [0, 64], sizes = [1, 64], strides = [1, 1]} : vector<1x192xf32> to vector<1x64xf32>
    %456 = vector.extract_strided_slice %451 {offsets = [0, 128], sizes = [1, 64], strides = [1, 1]} : vector<1x192xf32> to vector<1x64xf32>
    %457 = arith.mulf %455, %416 : vector<1x64xf32>
    %458 = arith.mulf %454, %453 : vector<1x64xf32>
    %459 = arith.addf %457, %458 : vector<1x64xf32>
    %460 = math.tanh %459 : vector<1x64xf32>
    %461 = arith.mulf %456, %460 : vector<1x64xf32>
    %c11_i32 = arith.constant 11 : i32
    %462 = arith.truncf %461 : vector<1x64xf32> to vector<1x64xbf16>
    %cst_80 = arith.constant dense<0.000000e+00> : vector<1x256xf32>
    %463 = tpu.matmul %462, %1, %cst_80 {dimension_numbers = #tpu.dot_dimension_numbers<[1], [0], [0], [1], [0, 0, 1, 1], [], []>} : vector<1x64xbf16>, vector<64x256xbf16>, vector<1x256xf32> -> vector<1x256xf32>
    %464 = arith.truncf %440 : vector<1x64xf32> to vector<1x64xbf16>
    %cst_81 = arith.constant dense<0.000000e+00> : vector<1x256xf32>
    %465 = tpu.matmul %464, %2, %cst_81 {dimension_numbers = #tpu.dot_dimension_numbers<[1], [0], [0], [1], [0, 0, 1, 1], [], []>} : vector<1x64xbf16>, vector<64x256xbf16>, vector<1x256xf32> -> vector<1x256xf32>
    %466 = arith.addf %463, %465 : vector<1x256xf32>
    %467 = arith.addf %466, %3 : vector<1x256xf32>
    %468 = vector.extract_strided_slice %467 {offsets = [0, 0], sizes = [1, 192], strides = [1, 1]} : vector<1x256xf32> to vector<1x192xf32>
    %469 = arith.negf %468 : vector<1x192xf32>
    %470 = math.exp %469 : vector<1x192xf32>
    %cst_82 = arith.constant 1.000000e+00 : f32
    %471 = vector.broadcast %cst_82 : f32 to vector<1x192xf32>
    %472 = arith.addf %471, %470 : vector<1x192xf32>
    %473 = arith.divf %471, %472 : vector<1x192xf32>
    %474 = vector.extract_strided_slice %467 {offsets = [0, 192], sizes = [1, 64], strides = [1, 1]} : vector<1x256xf32> to vector<1x64xf32>
    %475 = math.tanh %474 : vector<1x64xf32>
    %476 = vector.extract_strided_slice %473 {offsets = [0, 0], sizes = [1, 64], strides = [1, 1]} : vector<1x192xf32> to vector<1x64xf32>
    %477 = vector.extract_strided_slice %473 {offsets = [0, 64], sizes = [1, 64], strides = [1, 1]} : vector<1x192xf32> to vector<1x64xf32>
    %478 = vector.extract_strided_slice %473 {offsets = [0, 128], sizes = [1, 64], strides = [1, 1]} : vector<1x192xf32> to vector<1x64xf32>
    %479 = arith.mulf %477, %438 : vector<1x64xf32>
    %480 = arith.mulf %476, %475 : vector<1x64xf32>
    %481 = arith.addf %479, %480 : vector<1x64xf32>
    %482 = math.tanh %481 : vector<1x64xf32>
    %483 = arith.mulf %478, %482 : vector<1x64xf32>
    %484 = arith.index_cast %c11_i32 : i32 to index
    %c0_83 = arith.constant 0 : index
    %485 = vector.load %arg10[%484, %c0_83] : memref<30x256xf32, #tpu.memory_space<vmem>>, vector<1x256xf32>
    %486 = arith.truncf %461 : vector<1x64xf32> to vector<1x64xbf16>
    %cst_84 = arith.constant dense<0.000000e+00> : vector<1x256xf32>
    %487 = tpu.matmul %486, %0, %cst_84 {dimension_numbers = #tpu.dot_dimension_numbers<[1], [0], [0], [1], [0, 0, 1, 1], [], []>} : vector<1x64xbf16>, vector<64x256xbf16>, vector<1x256xf32> -> vector<1x256xf32>
    %488 = arith.addf %485, %487 : vector<1x256xf32>
    %489 = vector.extract_strided_slice %488 {offsets = [0, 0], sizes = [1, 192], strides = [1, 1]} : vector<1x256xf32> to vector<1x192xf32>
    %490 = arith.negf %489 : vector<1x192xf32>
    %491 = math.exp %490 : vector<1x192xf32>
    %cst_85 = arith.constant 1.000000e+00 : f32
    %492 = vector.broadcast %cst_85 : f32 to vector<1x192xf32>
    %493 = arith.addf %492, %491 : vector<1x192xf32>
    %494 = arith.divf %492, %493 : vector<1x192xf32>
    %495 = vector.extract_strided_slice %488 {offsets = [0, 192], sizes = [1, 64], strides = [1, 1]} : vector<1x256xf32> to vector<1x64xf32>
    %496 = math.tanh %495 : vector<1x64xf32>
    %497 = vector.extract_strided_slice %494 {offsets = [0, 0], sizes = [1, 64], strides = [1, 1]} : vector<1x192xf32> to vector<1x64xf32>
    %498 = vector.extract_strided_slice %494 {offsets = [0, 64], sizes = [1, 64], strides = [1, 1]} : vector<1x192xf32> to vector<1x64xf32>
    %499 = vector.extract_strided_slice %494 {offsets = [0, 128], sizes = [1, 64], strides = [1, 1]} : vector<1x192xf32> to vector<1x64xf32>
    %500 = arith.mulf %498, %459 : vector<1x64xf32>
    %501 = arith.mulf %497, %496 : vector<1x64xf32>
    %502 = arith.addf %500, %501 : vector<1x64xf32>
    %503 = math.tanh %502 : vector<1x64xf32>
    %504 = arith.mulf %499, %503 : vector<1x64xf32>
    %c12_i32 = arith.constant 12 : i32
    %505 = arith.truncf %504 : vector<1x64xf32> to vector<1x64xbf16>
    %cst_86 = arith.constant dense<0.000000e+00> : vector<1x256xf32>
    %506 = tpu.matmul %505, %1, %cst_86 {dimension_numbers = #tpu.dot_dimension_numbers<[1], [0], [0], [1], [0, 0, 1, 1], [], []>} : vector<1x64xbf16>, vector<64x256xbf16>, vector<1x256xf32> -> vector<1x256xf32>
    %507 = arith.truncf %483 : vector<1x64xf32> to vector<1x64xbf16>
    %cst_87 = arith.constant dense<0.000000e+00> : vector<1x256xf32>
    %508 = tpu.matmul %507, %2, %cst_87 {dimension_numbers = #tpu.dot_dimension_numbers<[1], [0], [0], [1], [0, 0, 1, 1], [], []>} : vector<1x64xbf16>, vector<64x256xbf16>, vector<1x256xf32> -> vector<1x256xf32>
    %509 = arith.addf %506, %508 : vector<1x256xf32>
    %510 = arith.addf %509, %3 : vector<1x256xf32>
    %511 = vector.extract_strided_slice %510 {offsets = [0, 0], sizes = [1, 192], strides = [1, 1]} : vector<1x256xf32> to vector<1x192xf32>
    %512 = arith.negf %511 : vector<1x192xf32>
    %513 = math.exp %512 : vector<1x192xf32>
    %cst_88 = arith.constant 1.000000e+00 : f32
    %514 = vector.broadcast %cst_88 : f32 to vector<1x192xf32>
    %515 = arith.addf %514, %513 : vector<1x192xf32>
    %516 = arith.divf %514, %515 : vector<1x192xf32>
    %517 = vector.extract_strided_slice %510 {offsets = [0, 192], sizes = [1, 64], strides = [1, 1]} : vector<1x256xf32> to vector<1x64xf32>
    %518 = math.tanh %517 : vector<1x64xf32>
    %519 = vector.extract_strided_slice %516 {offsets = [0, 0], sizes = [1, 64], strides = [1, 1]} : vector<1x192xf32> to vector<1x64xf32>
    %520 = vector.extract_strided_slice %516 {offsets = [0, 64], sizes = [1, 64], strides = [1, 1]} : vector<1x192xf32> to vector<1x64xf32>
    %521 = vector.extract_strided_slice %516 {offsets = [0, 128], sizes = [1, 64], strides = [1, 1]} : vector<1x192xf32> to vector<1x64xf32>
    %522 = arith.mulf %520, %481 : vector<1x64xf32>
    %523 = arith.mulf %519, %518 : vector<1x64xf32>
    %524 = arith.addf %522, %523 : vector<1x64xf32>
    %525 = math.tanh %524 : vector<1x64xf32>
    %526 = arith.mulf %521, %525 : vector<1x64xf32>
    %527 = arith.index_cast %c12_i32 : i32 to index
    %c0_89 = arith.constant 0 : index
    %528 = vector.load %arg10[%527, %c0_89] : memref<30x256xf32, #tpu.memory_space<vmem>>, vector<1x256xf32>
    %529 = arith.truncf %504 : vector<1x64xf32> to vector<1x64xbf16>
    %cst_90 = arith.constant dense<0.000000e+00> : vector<1x256xf32>
    %530 = tpu.matmul %529, %0, %cst_90 {dimension_numbers = #tpu.dot_dimension_numbers<[1], [0], [0], [1], [0, 0, 1, 1], [], []>} : vector<1x64xbf16>, vector<64x256xbf16>, vector<1x256xf32> -> vector<1x256xf32>
    %531 = arith.addf %528, %530 : vector<1x256xf32>
    %532 = vector.extract_strided_slice %531 {offsets = [0, 0], sizes = [1, 192], strides = [1, 1]} : vector<1x256xf32> to vector<1x192xf32>
    %533 = arith.negf %532 : vector<1x192xf32>
    %534 = math.exp %533 : vector<1x192xf32>
    %cst_91 = arith.constant 1.000000e+00 : f32
    %535 = vector.broadcast %cst_91 : f32 to vector<1x192xf32>
    %536 = arith.addf %535, %534 : vector<1x192xf32>
    %537 = arith.divf %535, %536 : vector<1x192xf32>
    %538 = vector.extract_strided_slice %531 {offsets = [0, 192], sizes = [1, 64], strides = [1, 1]} : vector<1x256xf32> to vector<1x64xf32>
    %539 = math.tanh %538 : vector<1x64xf32>
    %540 = vector.extract_strided_slice %537 {offsets = [0, 0], sizes = [1, 64], strides = [1, 1]} : vector<1x192xf32> to vector<1x64xf32>
    %541 = vector.extract_strided_slice %537 {offsets = [0, 64], sizes = [1, 64], strides = [1, 1]} : vector<1x192xf32> to vector<1x64xf32>
    %542 = vector.extract_strided_slice %537 {offsets = [0, 128], sizes = [1, 64], strides = [1, 1]} : vector<1x192xf32> to vector<1x64xf32>
    %543 = arith.mulf %541, %502 : vector<1x64xf32>
    %544 = arith.mulf %540, %539 : vector<1x64xf32>
    %545 = arith.addf %543, %544 : vector<1x64xf32>
    %546 = math.tanh %545 : vector<1x64xf32>
    %547 = arith.mulf %542, %546 : vector<1x64xf32>
    %c13_i32 = arith.constant 13 : i32
    %548 = arith.truncf %547 : vector<1x64xf32> to vector<1x64xbf16>
    %cst_92 = arith.constant dense<0.000000e+00> : vector<1x256xf32>
    %549 = tpu.matmul %548, %1, %cst_92 {dimension_numbers = #tpu.dot_dimension_numbers<[1], [0], [0], [1], [0, 0, 1, 1], [], []>} : vector<1x64xbf16>, vector<64x256xbf16>, vector<1x256xf32> -> vector<1x256xf32>
    %550 = arith.truncf %526 : vector<1x64xf32> to vector<1x64xbf16>
    %cst_93 = arith.constant dense<0.000000e+00> : vector<1x256xf32>
    %551 = tpu.matmul %550, %2, %cst_93 {dimension_numbers = #tpu.dot_dimension_numbers<[1], [0], [0], [1], [0, 0, 1, 1], [], []>} : vector<1x64xbf16>, vector<64x256xbf16>, vector<1x256xf32> -> vector<1x256xf32>
    %552 = arith.addf %549, %551 : vector<1x256xf32>
    %553 = arith.addf %552, %3 : vector<1x256xf32>
    %554 = vector.extract_strided_slice %553 {offsets = [0, 0], sizes = [1, 192], strides = [1, 1]} : vector<1x256xf32> to vector<1x192xf32>
    %555 = arith.negf %554 : vector<1x192xf32>
    %556 = math.exp %555 : vector<1x192xf32>
    %cst_94 = arith.constant 1.000000e+00 : f32
    %557 = vector.broadcast %cst_94 : f32 to vector<1x192xf32>
    %558 = arith.addf %557, %556 : vector<1x192xf32>
    %559 = arith.divf %557, %558 : vector<1x192xf32>
    %560 = vector.extract_strided_slice %553 {offsets = [0, 192], sizes = [1, 64], strides = [1, 1]} : vector<1x256xf32> to vector<1x64xf32>
    %561 = math.tanh %560 : vector<1x64xf32>
    %562 = vector.extract_strided_slice %559 {offsets = [0, 0], sizes = [1, 64], strides = [1, 1]} : vector<1x192xf32> to vector<1x64xf32>
    %563 = vector.extract_strided_slice %559 {offsets = [0, 64], sizes = [1, 64], strides = [1, 1]} : vector<1x192xf32> to vector<1x64xf32>
    %564 = vector.extract_strided_slice %559 {offsets = [0, 128], sizes = [1, 64], strides = [1, 1]} : vector<1x192xf32> to vector<1x64xf32>
    %565 = arith.mulf %563, %524 : vector<1x64xf32>
    %566 = arith.mulf %562, %561 : vector<1x64xf32>
    %567 = arith.addf %565, %566 : vector<1x64xf32>
    %568 = math.tanh %567 : vector<1x64xf32>
    %569 = arith.mulf %564, %568 : vector<1x64xf32>
    %570 = arith.index_cast %c13_i32 : i32 to index
    %c0_95 = arith.constant 0 : index
    %571 = vector.load %arg10[%570, %c0_95] : memref<30x256xf32, #tpu.memory_space<vmem>>, vector<1x256xf32>
    %572 = arith.truncf %547 : vector<1x64xf32> to vector<1x64xbf16>
    %cst_96 = arith.constant dense<0.000000e+00> : vector<1x256xf32>
    %573 = tpu.matmul %572, %0, %cst_96 {dimension_numbers = #tpu.dot_dimension_numbers<[1], [0], [0], [1], [0, 0, 1, 1], [], []>} : vector<1x64xbf16>, vector<64x256xbf16>, vector<1x256xf32> -> vector<1x256xf32>
    %574 = arith.addf %571, %573 : vector<1x256xf32>
    %575 = vector.extract_strided_slice %574 {offsets = [0, 0], sizes = [1, 192], strides = [1, 1]} : vector<1x256xf32> to vector<1x192xf32>
    %576 = arith.negf %575 : vector<1x192xf32>
    %577 = math.exp %576 : vector<1x192xf32>
    %cst_97 = arith.constant 1.000000e+00 : f32
    %578 = vector.broadcast %cst_97 : f32 to vector<1x192xf32>
    %579 = arith.addf %578, %577 : vector<1x192xf32>
    %580 = arith.divf %578, %579 : vector<1x192xf32>
    %581 = vector.extract_strided_slice %574 {offsets = [0, 192], sizes = [1, 64], strides = [1, 1]} : vector<1x256xf32> to vector<1x64xf32>
    %582 = math.tanh %581 : vector<1x64xf32>
    %583 = vector.extract_strided_slice %580 {offsets = [0, 0], sizes = [1, 64], strides = [1, 1]} : vector<1x192xf32> to vector<1x64xf32>
    %584 = vector.extract_strided_slice %580 {offsets = [0, 64], sizes = [1, 64], strides = [1, 1]} : vector<1x192xf32> to vector<1x64xf32>
    %585 = vector.extract_strided_slice %580 {offsets = [0, 128], sizes = [1, 64], strides = [1, 1]} : vector<1x192xf32> to vector<1x64xf32>
    %586 = arith.mulf %584, %545 : vector<1x64xf32>
    %587 = arith.mulf %583, %582 : vector<1x64xf32>
    %588 = arith.addf %586, %587 : vector<1x64xf32>
    %589 = math.tanh %588 : vector<1x64xf32>
    %590 = arith.mulf %585, %589 : vector<1x64xf32>
    %c14_i32 = arith.constant 14 : i32
    %591 = arith.truncf %590 : vector<1x64xf32> to vector<1x64xbf16>
    %cst_98 = arith.constant dense<0.000000e+00> : vector<1x256xf32>
    %592 = tpu.matmul %591, %1, %cst_98 {dimension_numbers = #tpu.dot_dimension_numbers<[1], [0], [0], [1], [0, 0, 1, 1], [], []>} : vector<1x64xbf16>, vector<64x256xbf16>, vector<1x256xf32> -> vector<1x256xf32>
    %593 = arith.truncf %569 : vector<1x64xf32> to vector<1x64xbf16>
    %cst_99 = arith.constant dense<0.000000e+00> : vector<1x256xf32>
    %594 = tpu.matmul %593, %2, %cst_99 {dimension_numbers = #tpu.dot_dimension_numbers<[1], [0], [0], [1], [0, 0, 1, 1], [], []>} : vector<1x64xbf16>, vector<64x256xbf16>, vector<1x256xf32> -> vector<1x256xf32>
    %595 = arith.addf %592, %594 : vector<1x256xf32>
    %596 = arith.addf %595, %3 : vector<1x256xf32>
    %597 = vector.extract_strided_slice %596 {offsets = [0, 0], sizes = [1, 192], strides = [1, 1]} : vector<1x256xf32> to vector<1x192xf32>
    %598 = arith.negf %597 : vector<1x192xf32>
    %599 = math.exp %598 : vector<1x192xf32>
    %cst_100 = arith.constant 1.000000e+00 : f32
    %600 = vector.broadcast %cst_100 : f32 to vector<1x192xf32>
    %601 = arith.addf %600, %599 : vector<1x192xf32>
    %602 = arith.divf %600, %601 : vector<1x192xf32>
    %603 = vector.extract_strided_slice %596 {offsets = [0, 192], sizes = [1, 64], strides = [1, 1]} : vector<1x256xf32> to vector<1x64xf32>
    %604 = math.tanh %603 : vector<1x64xf32>
    %605 = vector.extract_strided_slice %602 {offsets = [0, 0], sizes = [1, 64], strides = [1, 1]} : vector<1x192xf32> to vector<1x64xf32>
    %606 = vector.extract_strided_slice %602 {offsets = [0, 64], sizes = [1, 64], strides = [1, 1]} : vector<1x192xf32> to vector<1x64xf32>
    %607 = vector.extract_strided_slice %602 {offsets = [0, 128], sizes = [1, 64], strides = [1, 1]} : vector<1x192xf32> to vector<1x64xf32>
    %608 = arith.mulf %606, %567 : vector<1x64xf32>
    %609 = arith.mulf %605, %604 : vector<1x64xf32>
    %610 = arith.addf %608, %609 : vector<1x64xf32>
    %611 = math.tanh %610 : vector<1x64xf32>
    %612 = arith.mulf %607, %611 : vector<1x64xf32>
    %613 = arith.index_cast %c14_i32 : i32 to index
    %c0_101 = arith.constant 0 : index
    %614 = vector.load %arg10[%613, %c0_101] : memref<30x256xf32, #tpu.memory_space<vmem>>, vector<1x256xf32>
    %615 = arith.truncf %590 : vector<1x64xf32> to vector<1x64xbf16>
    %cst_102 = arith.constant dense<0.000000e+00> : vector<1x256xf32>
    %616 = tpu.matmul %615, %0, %cst_102 {dimension_numbers = #tpu.dot_dimension_numbers<[1], [0], [0], [1], [0, 0, 1, 1], [], []>} : vector<1x64xbf16>, vector<64x256xbf16>, vector<1x256xf32> -> vector<1x256xf32>
    %617 = arith.addf %614, %616 : vector<1x256xf32>
    %618 = vector.extract_strided_slice %617 {offsets = [0, 0], sizes = [1, 192], strides = [1, 1]} : vector<1x256xf32> to vector<1x192xf32>
    %619 = arith.negf %618 : vector<1x192xf32>
    %620 = math.exp %619 : vector<1x192xf32>
    %cst_103 = arith.constant 1.000000e+00 : f32
    %621 = vector.broadcast %cst_103 : f32 to vector<1x192xf32>
    %622 = arith.addf %621, %620 : vector<1x192xf32>
    %623 = arith.divf %621, %622 : vector<1x192xf32>
    %624 = vector.extract_strided_slice %617 {offsets = [0, 192], sizes = [1, 64], strides = [1, 1]} : vector<1x256xf32> to vector<1x64xf32>
    %625 = math.tanh %624 : vector<1x64xf32>
    %626 = vector.extract_strided_slice %623 {offsets = [0, 0], sizes = [1, 64], strides = [1, 1]} : vector<1x192xf32> to vector<1x64xf32>
    %627 = vector.extract_strided_slice %623 {offsets = [0, 64], sizes = [1, 64], strides = [1, 1]} : vector<1x192xf32> to vector<1x64xf32>
    %628 = vector.extract_strided_slice %623 {offsets = [0, 128], sizes = [1, 64], strides = [1, 1]} : vector<1x192xf32> to vector<1x64xf32>
    %629 = arith.mulf %627, %588 : vector<1x64xf32>
    %630 = arith.mulf %626, %625 : vector<1x64xf32>
    %631 = arith.addf %629, %630 : vector<1x64xf32>
    %632 = math.tanh %631 : vector<1x64xf32>
    %633 = arith.mulf %628, %632 : vector<1x64xf32>
    %c15_i32 = arith.constant 15 : i32
    %634 = arith.truncf %633 : vector<1x64xf32> to vector<1x64xbf16>
    %cst_104 = arith.constant dense<0.000000e+00> : vector<1x256xf32>
    %635 = tpu.matmul %634, %1, %cst_104 {dimension_numbers = #tpu.dot_dimension_numbers<[1], [0], [0], [1], [0, 0, 1, 1], [], []>} : vector<1x64xbf16>, vector<64x256xbf16>, vector<1x256xf32> -> vector<1x256xf32>
    %636 = arith.truncf %612 : vector<1x64xf32> to vector<1x64xbf16>
    %cst_105 = arith.constant dense<0.000000e+00> : vector<1x256xf32>
    %637 = tpu.matmul %636, %2, %cst_105 {dimension_numbers = #tpu.dot_dimension_numbers<[1], [0], [0], [1], [0, 0, 1, 1], [], []>} : vector<1x64xbf16>, vector<64x256xbf16>, vector<1x256xf32> -> vector<1x256xf32>
    %638 = arith.addf %635, %637 : vector<1x256xf32>
    %639 = arith.addf %638, %3 : vector<1x256xf32>
    %640 = vector.extract_strided_slice %639 {offsets = [0, 0], sizes = [1, 192], strides = [1, 1]} : vector<1x256xf32> to vector<1x192xf32>
    %641 = arith.negf %640 : vector<1x192xf32>
    %642 = math.exp %641 : vector<1x192xf32>
    %cst_106 = arith.constant 1.000000e+00 : f32
    %643 = vector.broadcast %cst_106 : f32 to vector<1x192xf32>
    %644 = arith.addf %643, %642 : vector<1x192xf32>
    %645 = arith.divf %643, %644 : vector<1x192xf32>
    %646 = vector.extract_strided_slice %639 {offsets = [0, 192], sizes = [1, 64], strides = [1, 1]} : vector<1x256xf32> to vector<1x64xf32>
    %647 = math.tanh %646 : vector<1x64xf32>
    %648 = vector.extract_strided_slice %645 {offsets = [0, 0], sizes = [1, 64], strides = [1, 1]} : vector<1x192xf32> to vector<1x64xf32>
    %649 = vector.extract_strided_slice %645 {offsets = [0, 64], sizes = [1, 64], strides = [1, 1]} : vector<1x192xf32> to vector<1x64xf32>
    %650 = vector.extract_strided_slice %645 {offsets = [0, 128], sizes = [1, 64], strides = [1, 1]} : vector<1x192xf32> to vector<1x64xf32>
    %651 = arith.mulf %649, %610 : vector<1x64xf32>
    %652 = arith.mulf %648, %647 : vector<1x64xf32>
    %653 = arith.addf %651, %652 : vector<1x64xf32>
    %654 = math.tanh %653 : vector<1x64xf32>
    %655 = arith.mulf %650, %654 : vector<1x64xf32>
    %656 = arith.index_cast %c15_i32 : i32 to index
    %c0_107 = arith.constant 0 : index
    %657 = vector.load %arg10[%656, %c0_107] : memref<30x256xf32, #tpu.memory_space<vmem>>, vector<1x256xf32>
    %658 = arith.truncf %633 : vector<1x64xf32> to vector<1x64xbf16>
    %cst_108 = arith.constant dense<0.000000e+00> : vector<1x256xf32>
    %659 = tpu.matmul %658, %0, %cst_108 {dimension_numbers = #tpu.dot_dimension_numbers<[1], [0], [0], [1], [0, 0, 1, 1], [], []>} : vector<1x64xbf16>, vector<64x256xbf16>, vector<1x256xf32> -> vector<1x256xf32>
    %660 = arith.addf %657, %659 : vector<1x256xf32>
    %661 = vector.extract_strided_slice %660 {offsets = [0, 0], sizes = [1, 192], strides = [1, 1]} : vector<1x256xf32> to vector<1x192xf32>
    %662 = arith.negf %661 : vector<1x192xf32>
    %663 = math.exp %662 : vector<1x192xf32>
    %cst_109 = arith.constant 1.000000e+00 : f32
    %664 = vector.broadcast %cst_109 : f32 to vector<1x192xf32>
    %665 = arith.addf %664, %663 : vector<1x192xf32>
    %666 = arith.divf %664, %665 : vector<1x192xf32>
    %667 = vector.extract_strided_slice %660 {offsets = [0, 192], sizes = [1, 64], strides = [1, 1]} : vector<1x256xf32> to vector<1x64xf32>
    %668 = math.tanh %667 : vector<1x64xf32>
    %669 = vector.extract_strided_slice %666 {offsets = [0, 0], sizes = [1, 64], strides = [1, 1]} : vector<1x192xf32> to vector<1x64xf32>
    %670 = vector.extract_strided_slice %666 {offsets = [0, 64], sizes = [1, 64], strides = [1, 1]} : vector<1x192xf32> to vector<1x64xf32>
    %671 = vector.extract_strided_slice %666 {offsets = [0, 128], sizes = [1, 64], strides = [1, 1]} : vector<1x192xf32> to vector<1x64xf32>
    %672 = arith.mulf %670, %631 : vector<1x64xf32>
    %673 = arith.mulf %669, %668 : vector<1x64xf32>
    %674 = arith.addf %672, %673 : vector<1x64xf32>
    %675 = math.tanh %674 : vector<1x64xf32>
    %676 = arith.mulf %671, %675 : vector<1x64xf32>
    %c16_i32 = arith.constant 16 : i32
    %677 = arith.truncf %676 : vector<1x64xf32> to vector<1x64xbf16>
    %cst_110 = arith.constant dense<0.000000e+00> : vector<1x256xf32>
    %678 = tpu.matmul %677, %1, %cst_110 {dimension_numbers = #tpu.dot_dimension_numbers<[1], [0], [0], [1], [0, 0, 1, 1], [], []>} : vector<1x64xbf16>, vector<64x256xbf16>, vector<1x256xf32> -> vector<1x256xf32>
    %679 = arith.truncf %655 : vector<1x64xf32> to vector<1x64xbf16>
    %cst_111 = arith.constant dense<0.000000e+00> : vector<1x256xf32>
    %680 = tpu.matmul %679, %2, %cst_111 {dimension_numbers = #tpu.dot_dimension_numbers<[1], [0], [0], [1], [0, 0, 1, 1], [], []>} : vector<1x64xbf16>, vector<64x256xbf16>, vector<1x256xf32> -> vector<1x256xf32>
    %681 = arith.addf %678, %680 : vector<1x256xf32>
    %682 = arith.addf %681, %3 : vector<1x256xf32>
    %683 = vector.extract_strided_slice %682 {offsets = [0, 0], sizes = [1, 192], strides = [1, 1]} : vector<1x256xf32> to vector<1x192xf32>
    %684 = arith.negf %683 : vector<1x192xf32>
    %685 = math.exp %684 : vector<1x192xf32>
    %cst_112 = arith.constant 1.000000e+00 : f32
    %686 = vector.broadcast %cst_112 : f32 to vector<1x192xf32>
    %687 = arith.addf %686, %685 : vector<1x192xf32>
    %688 = arith.divf %686, %687 : vector<1x192xf32>
    %689 = vector.extract_strided_slice %682 {offsets = [0, 192], sizes = [1, 64], strides = [1, 1]} : vector<1x256xf32> to vector<1x64xf32>
    %690 = math.tanh %689 : vector<1x64xf32>
    %691 = vector.extract_strided_slice %688 {offsets = [0, 0], sizes = [1, 64], strides = [1, 1]} : vector<1x192xf32> to vector<1x64xf32>
    %692 = vector.extract_strided_slice %688 {offsets = [0, 64], sizes = [1, 64], strides = [1, 1]} : vector<1x192xf32> to vector<1x64xf32>
    %693 = vector.extract_strided_slice %688 {offsets = [0, 128], sizes = [1, 64], strides = [1, 1]} : vector<1x192xf32> to vector<1x64xf32>
    %694 = arith.mulf %692, %653 : vector<1x64xf32>
    %695 = arith.mulf %691, %690 : vector<1x64xf32>
    %696 = arith.addf %694, %695 : vector<1x64xf32>
    %697 = math.tanh %696 : vector<1x64xf32>
    %698 = arith.mulf %693, %697 : vector<1x64xf32>
    %699 = arith.index_cast %c16_i32 : i32 to index
    %c0_113 = arith.constant 0 : index
    %700 = vector.load %arg10[%699, %c0_113] : memref<30x256xf32, #tpu.memory_space<vmem>>, vector<1x256xf32>
    %701 = arith.truncf %676 : vector<1x64xf32> to vector<1x64xbf16>
    %cst_114 = arith.constant dense<0.000000e+00> : vector<1x256xf32>
    %702 = tpu.matmul %701, %0, %cst_114 {dimension_numbers = #tpu.dot_dimension_numbers<[1], [0], [0], [1], [0, 0, 1, 1], [], []>} : vector<1x64xbf16>, vector<64x256xbf16>, vector<1x256xf32> -> vector<1x256xf32>
    %703 = arith.addf %700, %702 : vector<1x256xf32>
    %704 = vector.extract_strided_slice %703 {offsets = [0, 0], sizes = [1, 192], strides = [1, 1]} : vector<1x256xf32> to vector<1x192xf32>
    %705 = arith.negf %704 : vector<1x192xf32>
    %706 = math.exp %705 : vector<1x192xf32>
    %cst_115 = arith.constant 1.000000e+00 : f32
    %707 = vector.broadcast %cst_115 : f32 to vector<1x192xf32>
    %708 = arith.addf %707, %706 : vector<1x192xf32>
    %709 = arith.divf %707, %708 : vector<1x192xf32>
    %710 = vector.extract_strided_slice %703 {offsets = [0, 192], sizes = [1, 64], strides = [1, 1]} : vector<1x256xf32> to vector<1x64xf32>
    %711 = math.tanh %710 : vector<1x64xf32>
    %712 = vector.extract_strided_slice %709 {offsets = [0, 0], sizes = [1, 64], strides = [1, 1]} : vector<1x192xf32> to vector<1x64xf32>
    %713 = vector.extract_strided_slice %709 {offsets = [0, 64], sizes = [1, 64], strides = [1, 1]} : vector<1x192xf32> to vector<1x64xf32>
    %714 = vector.extract_strided_slice %709 {offsets = [0, 128], sizes = [1, 64], strides = [1, 1]} : vector<1x192xf32> to vector<1x64xf32>
    %715 = arith.mulf %713, %674 : vector<1x64xf32>
    %716 = arith.mulf %712, %711 : vector<1x64xf32>
    %717 = arith.addf %715, %716 : vector<1x64xf32>
    %718 = math.tanh %717 : vector<1x64xf32>
    %719 = arith.mulf %714, %718 : vector<1x64xf32>
    %c17_i32 = arith.constant 17 : i32
    %720 = arith.truncf %719 : vector<1x64xf32> to vector<1x64xbf16>
    %cst_116 = arith.constant dense<0.000000e+00> : vector<1x256xf32>
    %721 = tpu.matmul %720, %1, %cst_116 {dimension_numbers = #tpu.dot_dimension_numbers<[1], [0], [0], [1], [0, 0, 1, 1], [], []>} : vector<1x64xbf16>, vector<64x256xbf16>, vector<1x256xf32> -> vector<1x256xf32>
    %722 = arith.truncf %698 : vector<1x64xf32> to vector<1x64xbf16>
    %cst_117 = arith.constant dense<0.000000e+00> : vector<1x256xf32>
    %723 = tpu.matmul %722, %2, %cst_117 {dimension_numbers = #tpu.dot_dimension_numbers<[1], [0], [0], [1], [0, 0, 1, 1], [], []>} : vector<1x64xbf16>, vector<64x256xbf16>, vector<1x256xf32> -> vector<1x256xf32>
    %724 = arith.addf %721, %723 : vector<1x256xf32>
    %725 = arith.addf %724, %3 : vector<1x256xf32>
    %726 = vector.extract_strided_slice %725 {offsets = [0, 0], sizes = [1, 192], strides = [1, 1]} : vector<1x256xf32> to vector<1x192xf32>
    %727 = arith.negf %726 : vector<1x192xf32>
    %728 = math.exp %727 : vector<1x192xf32>
    %cst_118 = arith.constant 1.000000e+00 : f32
    %729 = vector.broadcast %cst_118 : f32 to vector<1x192xf32>
    %730 = arith.addf %729, %728 : vector<1x192xf32>
    %731 = arith.divf %729, %730 : vector<1x192xf32>
    %732 = vector.extract_strided_slice %725 {offsets = [0, 192], sizes = [1, 64], strides = [1, 1]} : vector<1x256xf32> to vector<1x64xf32>
    %733 = math.tanh %732 : vector<1x64xf32>
    %734 = vector.extract_strided_slice %731 {offsets = [0, 0], sizes = [1, 64], strides = [1, 1]} : vector<1x192xf32> to vector<1x64xf32>
    %735 = vector.extract_strided_slice %731 {offsets = [0, 64], sizes = [1, 64], strides = [1, 1]} : vector<1x192xf32> to vector<1x64xf32>
    %736 = vector.extract_strided_slice %731 {offsets = [0, 128], sizes = [1, 64], strides = [1, 1]} : vector<1x192xf32> to vector<1x64xf32>
    %737 = arith.mulf %735, %696 : vector<1x64xf32>
    %738 = arith.mulf %734, %733 : vector<1x64xf32>
    %739 = arith.addf %737, %738 : vector<1x64xf32>
    %740 = math.tanh %739 : vector<1x64xf32>
    %741 = arith.mulf %736, %740 : vector<1x64xf32>
    %742 = arith.index_cast %c17_i32 : i32 to index
    %c0_119 = arith.constant 0 : index
    %743 = vector.load %arg10[%742, %c0_119] : memref<30x256xf32, #tpu.memory_space<vmem>>, vector<1x256xf32>
    %744 = arith.truncf %719 : vector<1x64xf32> to vector<1x64xbf16>
    %cst_120 = arith.constant dense<0.000000e+00> : vector<1x256xf32>
    %745 = tpu.matmul %744, %0, %cst_120 {dimension_numbers = #tpu.dot_dimension_numbers<[1], [0], [0], [1], [0, 0, 1, 1], [], []>} : vector<1x64xbf16>, vector<64x256xbf16>, vector<1x256xf32> -> vector<1x256xf32>
    %746 = arith.addf %743, %745 : vector<1x256xf32>
    %747 = vector.extract_strided_slice %746 {offsets = [0, 0], sizes = [1, 192], strides = [1, 1]} : vector<1x256xf32> to vector<1x192xf32>
    %748 = arith.negf %747 : vector<1x192xf32>
    %749 = math.exp %748 : vector<1x192xf32>
    %cst_121 = arith.constant 1.000000e+00 : f32
    %750 = vector.broadcast %cst_121 : f32 to vector<1x192xf32>
    %751 = arith.addf %750, %749 : vector<1x192xf32>
    %752 = arith.divf %750, %751 : vector<1x192xf32>
    %753 = vector.extract_strided_slice %746 {offsets = [0, 192], sizes = [1, 64], strides = [1, 1]} : vector<1x256xf32> to vector<1x64xf32>
    %754 = math.tanh %753 : vector<1x64xf32>
    %755 = vector.extract_strided_slice %752 {offsets = [0, 0], sizes = [1, 64], strides = [1, 1]} : vector<1x192xf32> to vector<1x64xf32>
    %756 = vector.extract_strided_slice %752 {offsets = [0, 64], sizes = [1, 64], strides = [1, 1]} : vector<1x192xf32> to vector<1x64xf32>
    %757 = vector.extract_strided_slice %752 {offsets = [0, 128], sizes = [1, 64], strides = [1, 1]} : vector<1x192xf32> to vector<1x64xf32>
    %758 = arith.mulf %756, %717 : vector<1x64xf32>
    %759 = arith.mulf %755, %754 : vector<1x64xf32>
    %760 = arith.addf %758, %759 : vector<1x64xf32>
    %761 = math.tanh %760 : vector<1x64xf32>
    %762 = arith.mulf %757, %761 : vector<1x64xf32>
    %c18_i32 = arith.constant 18 : i32
    %763 = arith.truncf %762 : vector<1x64xf32> to vector<1x64xbf16>
    %cst_122 = arith.constant dense<0.000000e+00> : vector<1x256xf32>
    %764 = tpu.matmul %763, %1, %cst_122 {dimension_numbers = #tpu.dot_dimension_numbers<[1], [0], [0], [1], [0, 0, 1, 1], [], []>} : vector<1x64xbf16>, vector<64x256xbf16>, vector<1x256xf32> -> vector<1x256xf32>
    %765 = arith.truncf %741 : vector<1x64xf32> to vector<1x64xbf16>
    %cst_123 = arith.constant dense<0.000000e+00> : vector<1x256xf32>
    %766 = tpu.matmul %765, %2, %cst_123 {dimension_numbers = #tpu.dot_dimension_numbers<[1], [0], [0], [1], [0, 0, 1, 1], [], []>} : vector<1x64xbf16>, vector<64x256xbf16>, vector<1x256xf32> -> vector<1x256xf32>
    %767 = arith.addf %764, %766 : vector<1x256xf32>
    %768 = arith.addf %767, %3 : vector<1x256xf32>
    %769 = vector.extract_strided_slice %768 {offsets = [0, 0], sizes = [1, 192], strides = [1, 1]} : vector<1x256xf32> to vector<1x192xf32>
    %770 = arith.negf %769 : vector<1x192xf32>
    %771 = math.exp %770 : vector<1x192xf32>
    %cst_124 = arith.constant 1.000000e+00 : f32
    %772 = vector.broadcast %cst_124 : f32 to vector<1x192xf32>
    %773 = arith.addf %772, %771 : vector<1x192xf32>
    %774 = arith.divf %772, %773 : vector<1x192xf32>
    %775 = vector.extract_strided_slice %768 {offsets = [0, 192], sizes = [1, 64], strides = [1, 1]} : vector<1x256xf32> to vector<1x64xf32>
    %776 = math.tanh %775 : vector<1x64xf32>
    %777 = vector.extract_strided_slice %774 {offsets = [0, 0], sizes = [1, 64], strides = [1, 1]} : vector<1x192xf32> to vector<1x64xf32>
    %778 = vector.extract_strided_slice %774 {offsets = [0, 64], sizes = [1, 64], strides = [1, 1]} : vector<1x192xf32> to vector<1x64xf32>
    %779 = vector.extract_strided_slice %774 {offsets = [0, 128], sizes = [1, 64], strides = [1, 1]} : vector<1x192xf32> to vector<1x64xf32>
    %780 = arith.mulf %778, %739 : vector<1x64xf32>
    %781 = arith.mulf %777, %776 : vector<1x64xf32>
    %782 = arith.addf %780, %781 : vector<1x64xf32>
    %783 = math.tanh %782 : vector<1x64xf32>
    %784 = arith.mulf %779, %783 : vector<1x64xf32>
    %785 = arith.index_cast %c18_i32 : i32 to index
    %c0_125 = arith.constant 0 : index
    %786 = vector.load %arg10[%785, %c0_125] : memref<30x256xf32, #tpu.memory_space<vmem>>, vector<1x256xf32>
    %787 = arith.truncf %762 : vector<1x64xf32> to vector<1x64xbf16>
    %cst_126 = arith.constant dense<0.000000e+00> : vector<1x256xf32>
    %788 = tpu.matmul %787, %0, %cst_126 {dimension_numbers = #tpu.dot_dimension_numbers<[1], [0], [0], [1], [0, 0, 1, 1], [], []>} : vector<1x64xbf16>, vector<64x256xbf16>, vector<1x256xf32> -> vector<1x256xf32>
    %789 = arith.addf %786, %788 : vector<1x256xf32>
    %790 = vector.extract_strided_slice %789 {offsets = [0, 0], sizes = [1, 192], strides = [1, 1]} : vector<1x256xf32> to vector<1x192xf32>
    %791 = arith.negf %790 : vector<1x192xf32>
    %792 = math.exp %791 : vector<1x192xf32>
    %cst_127 = arith.constant 1.000000e+00 : f32
    %793 = vector.broadcast %cst_127 : f32 to vector<1x192xf32>
    %794 = arith.addf %793, %792 : vector<1x192xf32>
    %795 = arith.divf %793, %794 : vector<1x192xf32>
    %796 = vector.extract_strided_slice %789 {offsets = [0, 192], sizes = [1, 64], strides = [1, 1]} : vector<1x256xf32> to vector<1x64xf32>
    %797 = math.tanh %796 : vector<1x64xf32>
    %798 = vector.extract_strided_slice %795 {offsets = [0, 0], sizes = [1, 64], strides = [1, 1]} : vector<1x192xf32> to vector<1x64xf32>
    %799 = vector.extract_strided_slice %795 {offsets = [0, 64], sizes = [1, 64], strides = [1, 1]} : vector<1x192xf32> to vector<1x64xf32>
    %800 = vector.extract_strided_slice %795 {offsets = [0, 128], sizes = [1, 64], strides = [1, 1]} : vector<1x192xf32> to vector<1x64xf32>
    %801 = arith.mulf %799, %760 : vector<1x64xf32>
    %802 = arith.mulf %798, %797 : vector<1x64xf32>
    %803 = arith.addf %801, %802 : vector<1x64xf32>
    %804 = math.tanh %803 : vector<1x64xf32>
    %805 = arith.mulf %800, %804 : vector<1x64xf32>
    %c19_i32 = arith.constant 19 : i32
    %806 = arith.truncf %805 : vector<1x64xf32> to vector<1x64xbf16>
    %cst_128 = arith.constant dense<0.000000e+00> : vector<1x256xf32>
    %807 = tpu.matmul %806, %1, %cst_128 {dimension_numbers = #tpu.dot_dimension_numbers<[1], [0], [0], [1], [0, 0, 1, 1], [], []>} : vector<1x64xbf16>, vector<64x256xbf16>, vector<1x256xf32> -> vector<1x256xf32>
    %808 = arith.truncf %784 : vector<1x64xf32> to vector<1x64xbf16>
    %cst_129 = arith.constant dense<0.000000e+00> : vector<1x256xf32>
    %809 = tpu.matmul %808, %2, %cst_129 {dimension_numbers = #tpu.dot_dimension_numbers<[1], [0], [0], [1], [0, 0, 1, 1], [], []>} : vector<1x64xbf16>, vector<64x256xbf16>, vector<1x256xf32> -> vector<1x256xf32>
    %810 = arith.addf %807, %809 : vector<1x256xf32>
    %811 = arith.addf %810, %3 : vector<1x256xf32>
    %812 = vector.extract_strided_slice %811 {offsets = [0, 0], sizes = [1, 192], strides = [1, 1]} : vector<1x256xf32> to vector<1x192xf32>
    %813 = arith.negf %812 : vector<1x192xf32>
    %814 = math.exp %813 : vector<1x192xf32>
    %cst_130 = arith.constant 1.000000e+00 : f32
    %815 = vector.broadcast %cst_130 : f32 to vector<1x192xf32>
    %816 = arith.addf %815, %814 : vector<1x192xf32>
    %817 = arith.divf %815, %816 : vector<1x192xf32>
    %818 = vector.extract_strided_slice %811 {offsets = [0, 192], sizes = [1, 64], strides = [1, 1]} : vector<1x256xf32> to vector<1x64xf32>
    %819 = math.tanh %818 : vector<1x64xf32>
    %820 = vector.extract_strided_slice %817 {offsets = [0, 0], sizes = [1, 64], strides = [1, 1]} : vector<1x192xf32> to vector<1x64xf32>
    %821 = vector.extract_strided_slice %817 {offsets = [0, 64], sizes = [1, 64], strides = [1, 1]} : vector<1x192xf32> to vector<1x64xf32>
    %822 = vector.extract_strided_slice %817 {offsets = [0, 128], sizes = [1, 64], strides = [1, 1]} : vector<1x192xf32> to vector<1x64xf32>
    %823 = arith.mulf %821, %782 : vector<1x64xf32>
    %824 = arith.mulf %820, %819 : vector<1x64xf32>
    %825 = arith.addf %823, %824 : vector<1x64xf32>
    %826 = math.tanh %825 : vector<1x64xf32>
    %827 = arith.mulf %822, %826 : vector<1x64xf32>
    %828 = arith.index_cast %c19_i32 : i32 to index
    %c0_131 = arith.constant 0 : index
    %829 = vector.load %arg10[%828, %c0_131] : memref<30x256xf32, #tpu.memory_space<vmem>>, vector<1x256xf32>
    %830 = arith.truncf %805 : vector<1x64xf32> to vector<1x64xbf16>
    %cst_132 = arith.constant dense<0.000000e+00> : vector<1x256xf32>
    %831 = tpu.matmul %830, %0, %cst_132 {dimension_numbers = #tpu.dot_dimension_numbers<[1], [0], [0], [1], [0, 0, 1, 1], [], []>} : vector<1x64xbf16>, vector<64x256xbf16>, vector<1x256xf32> -> vector<1x256xf32>
    %832 = arith.addf %829, %831 : vector<1x256xf32>
    %833 = vector.extract_strided_slice %832 {offsets = [0, 0], sizes = [1, 192], strides = [1, 1]} : vector<1x256xf32> to vector<1x192xf32>
    %834 = arith.negf %833 : vector<1x192xf32>
    %835 = math.exp %834 : vector<1x192xf32>
    %cst_133 = arith.constant 1.000000e+00 : f32
    %836 = vector.broadcast %cst_133 : f32 to vector<1x192xf32>
    %837 = arith.addf %836, %835 : vector<1x192xf32>
    %838 = arith.divf %836, %837 : vector<1x192xf32>
    %839 = vector.extract_strided_slice %832 {offsets = [0, 192], sizes = [1, 64], strides = [1, 1]} : vector<1x256xf32> to vector<1x64xf32>
    %840 = math.tanh %839 : vector<1x64xf32>
    %841 = vector.extract_strided_slice %838 {offsets = [0, 0], sizes = [1, 64], strides = [1, 1]} : vector<1x192xf32> to vector<1x64xf32>
    %842 = vector.extract_strided_slice %838 {offsets = [0, 64], sizes = [1, 64], strides = [1, 1]} : vector<1x192xf32> to vector<1x64xf32>
    %843 = vector.extract_strided_slice %838 {offsets = [0, 128], sizes = [1, 64], strides = [1, 1]} : vector<1x192xf32> to vector<1x64xf32>
    %844 = arith.mulf %842, %803 : vector<1x64xf32>
    %845 = arith.mulf %841, %840 : vector<1x64xf32>
    %846 = arith.addf %844, %845 : vector<1x64xf32>
    %847 = math.tanh %846 : vector<1x64xf32>
    %848 = arith.mulf %843, %847 : vector<1x64xf32>
    %c20_i32 = arith.constant 20 : i32
    %849 = arith.truncf %848 : vector<1x64xf32> to vector<1x64xbf16>
    %cst_134 = arith.constant dense<0.000000e+00> : vector<1x256xf32>
    %850 = tpu.matmul %849, %1, %cst_134 {dimension_numbers = #tpu.dot_dimension_numbers<[1], [0], [0], [1], [0, 0, 1, 1], [], []>} : vector<1x64xbf16>, vector<64x256xbf16>, vector<1x256xf32> -> vector<1x256xf32>
    %851 = arith.truncf %827 : vector<1x64xf32> to vector<1x64xbf16>
    %cst_135 = arith.constant dense<0.000000e+00> : vector<1x256xf32>
    %852 = tpu.matmul %851, %2, %cst_135 {dimension_numbers = #tpu.dot_dimension_numbers<[1], [0], [0], [1], [0, 0, 1, 1], [], []>} : vector<1x64xbf16>, vector<64x256xbf16>, vector<1x256xf32> -> vector<1x256xf32>
    %853 = arith.addf %850, %852 : vector<1x256xf32>
    %854 = arith.addf %853, %3 : vector<1x256xf32>
    %855 = vector.extract_strided_slice %854 {offsets = [0, 0], sizes = [1, 192], strides = [1, 1]} : vector<1x256xf32> to vector<1x192xf32>
    %856 = arith.negf %855 : vector<1x192xf32>
    %857 = math.exp %856 : vector<1x192xf32>
    %cst_136 = arith.constant 1.000000e+00 : f32
    %858 = vector.broadcast %cst_136 : f32 to vector<1x192xf32>
    %859 = arith.addf %858, %857 : vector<1x192xf32>
    %860 = arith.divf %858, %859 : vector<1x192xf32>
    %861 = vector.extract_strided_slice %854 {offsets = [0, 192], sizes = [1, 64], strides = [1, 1]} : vector<1x256xf32> to vector<1x64xf32>
    %862 = math.tanh %861 : vector<1x64xf32>
    %863 = vector.extract_strided_slice %860 {offsets = [0, 0], sizes = [1, 64], strides = [1, 1]} : vector<1x192xf32> to vector<1x64xf32>
    %864 = vector.extract_strided_slice %860 {offsets = [0, 64], sizes = [1, 64], strides = [1, 1]} : vector<1x192xf32> to vector<1x64xf32>
    %865 = vector.extract_strided_slice %860 {offsets = [0, 128], sizes = [1, 64], strides = [1, 1]} : vector<1x192xf32> to vector<1x64xf32>
    %866 = arith.mulf %864, %825 : vector<1x64xf32>
    %867 = arith.mulf %863, %862 : vector<1x64xf32>
    %868 = arith.addf %866, %867 : vector<1x64xf32>
    %869 = math.tanh %868 : vector<1x64xf32>
    %870 = arith.mulf %865, %869 : vector<1x64xf32>
    %871 = arith.index_cast %c20_i32 : i32 to index
    %c0_137 = arith.constant 0 : index
    %872 = vector.load %arg10[%871, %c0_137] : memref<30x256xf32, #tpu.memory_space<vmem>>, vector<1x256xf32>
    %873 = arith.truncf %848 : vector<1x64xf32> to vector<1x64xbf16>
    %cst_138 = arith.constant dense<0.000000e+00> : vector<1x256xf32>
    %874 = tpu.matmul %873, %0, %cst_138 {dimension_numbers = #tpu.dot_dimension_numbers<[1], [0], [0], [1], [0, 0, 1, 1], [], []>} : vector<1x64xbf16>, vector<64x256xbf16>, vector<1x256xf32> -> vector<1x256xf32>
    %875 = arith.addf %872, %874 : vector<1x256xf32>
    %876 = vector.extract_strided_slice %875 {offsets = [0, 0], sizes = [1, 192], strides = [1, 1]} : vector<1x256xf32> to vector<1x192xf32>
    %877 = arith.negf %876 : vector<1x192xf32>
    %878 = math.exp %877 : vector<1x192xf32>
    %cst_139 = arith.constant 1.000000e+00 : f32
    %879 = vector.broadcast %cst_139 : f32 to vector<1x192xf32>
    %880 = arith.addf %879, %878 : vector<1x192xf32>
    %881 = arith.divf %879, %880 : vector<1x192xf32>
    %882 = vector.extract_strided_slice %875 {offsets = [0, 192], sizes = [1, 64], strides = [1, 1]} : vector<1x256xf32> to vector<1x64xf32>
    %883 = math.tanh %882 : vector<1x64xf32>
    %884 = vector.extract_strided_slice %881 {offsets = [0, 0], sizes = [1, 64], strides = [1, 1]} : vector<1x192xf32> to vector<1x64xf32>
    %885 = vector.extract_strided_slice %881 {offsets = [0, 64], sizes = [1, 64], strides = [1, 1]} : vector<1x192xf32> to vector<1x64xf32>
    %886 = vector.extract_strided_slice %881 {offsets = [0, 128], sizes = [1, 64], strides = [1, 1]} : vector<1x192xf32> to vector<1x64xf32>
    %887 = arith.mulf %885, %846 : vector<1x64xf32>
    %888 = arith.mulf %884, %883 : vector<1x64xf32>
    %889 = arith.addf %887, %888 : vector<1x64xf32>
    %890 = math.tanh %889 : vector<1x64xf32>
    %891 = arith.mulf %886, %890 : vector<1x64xf32>
    %c21_i32 = arith.constant 21 : i32
    %892 = arith.truncf %891 : vector<1x64xf32> to vector<1x64xbf16>
    %cst_140 = arith.constant dense<0.000000e+00> : vector<1x256xf32>
    %893 = tpu.matmul %892, %1, %cst_140 {dimension_numbers = #tpu.dot_dimension_numbers<[1], [0], [0], [1], [0, 0, 1, 1], [], []>} : vector<1x64xbf16>, vector<64x256xbf16>, vector<1x256xf32> -> vector<1x256xf32>
    %894 = arith.truncf %870 : vector<1x64xf32> to vector<1x64xbf16>
    %cst_141 = arith.constant dense<0.000000e+00> : vector<1x256xf32>
    %895 = tpu.matmul %894, %2, %cst_141 {dimension_numbers = #tpu.dot_dimension_numbers<[1], [0], [0], [1], [0, 0, 1, 1], [], []>} : vector<1x64xbf16>, vector<64x256xbf16>, vector<1x256xf32> -> vector<1x256xf32>
    %896 = arith.addf %893, %895 : vector<1x256xf32>
    %897 = arith.addf %896, %3 : vector<1x256xf32>
    %898 = vector.extract_strided_slice %897 {offsets = [0, 0], sizes = [1, 192], strides = [1, 1]} : vector<1x256xf32> to vector<1x192xf32>
    %899 = arith.negf %898 : vector<1x192xf32>
    %900 = math.exp %899 : vector<1x192xf32>
    %cst_142 = arith.constant 1.000000e+00 : f32
    %901 = vector.broadcast %cst_142 : f32 to vector<1x192xf32>
    %902 = arith.addf %901, %900 : vector<1x192xf32>
    %903 = arith.divf %901, %902 : vector<1x192xf32>
    %904 = vector.extract_strided_slice %897 {offsets = [0, 192], sizes = [1, 64], strides = [1, 1]} : vector<1x256xf32> to vector<1x64xf32>
    %905 = math.tanh %904 : vector<1x64xf32>
    %906 = vector.extract_strided_slice %903 {offsets = [0, 0], sizes = [1, 64], strides = [1, 1]} : vector<1x192xf32> to vector<1x64xf32>
    %907 = vector.extract_strided_slice %903 {offsets = [0, 64], sizes = [1, 64], strides = [1, 1]} : vector<1x192xf32> to vector<1x64xf32>
    %908 = vector.extract_strided_slice %903 {offsets = [0, 128], sizes = [1, 64], strides = [1, 1]} : vector<1x192xf32> to vector<1x64xf32>
    %909 = arith.mulf %907, %868 : vector<1x64xf32>
    %910 = arith.mulf %906, %905 : vector<1x64xf32>
    %911 = arith.addf %909, %910 : vector<1x64xf32>
    %912 = math.tanh %911 : vector<1x64xf32>
    %913 = arith.mulf %908, %912 : vector<1x64xf32>
    %914 = arith.index_cast %c21_i32 : i32 to index
    %c0_143 = arith.constant 0 : index
    %915 = vector.load %arg10[%914, %c0_143] : memref<30x256xf32, #tpu.memory_space<vmem>>, vector<1x256xf32>
    %916 = arith.truncf %891 : vector<1x64xf32> to vector<1x64xbf16>
    %cst_144 = arith.constant dense<0.000000e+00> : vector<1x256xf32>
    %917 = tpu.matmul %916, %0, %cst_144 {dimension_numbers = #tpu.dot_dimension_numbers<[1], [0], [0], [1], [0, 0, 1, 1], [], []>} : vector<1x64xbf16>, vector<64x256xbf16>, vector<1x256xf32> -> vector<1x256xf32>
    %918 = arith.addf %915, %917 : vector<1x256xf32>
    %919 = vector.extract_strided_slice %918 {offsets = [0, 0], sizes = [1, 192], strides = [1, 1]} : vector<1x256xf32> to vector<1x192xf32>
    %920 = arith.negf %919 : vector<1x192xf32>
    %921 = math.exp %920 : vector<1x192xf32>
    %cst_145 = arith.constant 1.000000e+00 : f32
    %922 = vector.broadcast %cst_145 : f32 to vector<1x192xf32>
    %923 = arith.addf %922, %921 : vector<1x192xf32>
    %924 = arith.divf %922, %923 : vector<1x192xf32>
    %925 = vector.extract_strided_slice %918 {offsets = [0, 192], sizes = [1, 64], strides = [1, 1]} : vector<1x256xf32> to vector<1x64xf32>
    %926 = math.tanh %925 : vector<1x64xf32>
    %927 = vector.extract_strided_slice %924 {offsets = [0, 0], sizes = [1, 64], strides = [1, 1]} : vector<1x192xf32> to vector<1x64xf32>
    %928 = vector.extract_strided_slice %924 {offsets = [0, 64], sizes = [1, 64], strides = [1, 1]} : vector<1x192xf32> to vector<1x64xf32>
    %929 = vector.extract_strided_slice %924 {offsets = [0, 128], sizes = [1, 64], strides = [1, 1]} : vector<1x192xf32> to vector<1x64xf32>
    %930 = arith.mulf %928, %889 : vector<1x64xf32>
    %931 = arith.mulf %927, %926 : vector<1x64xf32>
    %932 = arith.addf %930, %931 : vector<1x64xf32>
    %933 = math.tanh %932 : vector<1x64xf32>
    %934 = arith.mulf %929, %933 : vector<1x64xf32>
    %c22_i32 = arith.constant 22 : i32
    %935 = arith.truncf %934 : vector<1x64xf32> to vector<1x64xbf16>
    %cst_146 = arith.constant dense<0.000000e+00> : vector<1x256xf32>
    %936 = tpu.matmul %935, %1, %cst_146 {dimension_numbers = #tpu.dot_dimension_numbers<[1], [0], [0], [1], [0, 0, 1, 1], [], []>} : vector<1x64xbf16>, vector<64x256xbf16>, vector<1x256xf32> -> vector<1x256xf32>
    %937 = arith.truncf %913 : vector<1x64xf32> to vector<1x64xbf16>
    %cst_147 = arith.constant dense<0.000000e+00> : vector<1x256xf32>
    %938 = tpu.matmul %937, %2, %cst_147 {dimension_numbers = #tpu.dot_dimension_numbers<[1], [0], [0], [1], [0, 0, 1, 1], [], []>} : vector<1x64xbf16>, vector<64x256xbf16>, vector<1x256xf32> -> vector<1x256xf32>
    %939 = arith.addf %936, %938 : vector<1x256xf32>
    %940 = arith.addf %939, %3 : vector<1x256xf32>
    %941 = vector.extract_strided_slice %940 {offsets = [0, 0], sizes = [1, 192], strides = [1, 1]} : vector<1x256xf32> to vector<1x192xf32>
    %942 = arith.negf %941 : vector<1x192xf32>
    %943 = math.exp %942 : vector<1x192xf32>
    %cst_148 = arith.constant 1.000000e+00 : f32
    %944 = vector.broadcast %cst_148 : f32 to vector<1x192xf32>
    %945 = arith.addf %944, %943 : vector<1x192xf32>
    %946 = arith.divf %944, %945 : vector<1x192xf32>
    %947 = vector.extract_strided_slice %940 {offsets = [0, 192], sizes = [1, 64], strides = [1, 1]} : vector<1x256xf32> to vector<1x64xf32>
    %948 = math.tanh %947 : vector<1x64xf32>
    %949 = vector.extract_strided_slice %946 {offsets = [0, 0], sizes = [1, 64], strides = [1, 1]} : vector<1x192xf32> to vector<1x64xf32>
    %950 = vector.extract_strided_slice %946 {offsets = [0, 64], sizes = [1, 64], strides = [1, 1]} : vector<1x192xf32> to vector<1x64xf32>
    %951 = vector.extract_strided_slice %946 {offsets = [0, 128], sizes = [1, 64], strides = [1, 1]} : vector<1x192xf32> to vector<1x64xf32>
    %952 = arith.mulf %950, %911 : vector<1x64xf32>
    %953 = arith.mulf %949, %948 : vector<1x64xf32>
    %954 = arith.addf %952, %953 : vector<1x64xf32>
    %955 = math.tanh %954 : vector<1x64xf32>
    %956 = arith.mulf %951, %955 : vector<1x64xf32>
    %957 = arith.index_cast %c22_i32 : i32 to index
    %c0_149 = arith.constant 0 : index
    %958 = vector.load %arg10[%957, %c0_149] : memref<30x256xf32, #tpu.memory_space<vmem>>, vector<1x256xf32>
    %959 = arith.truncf %934 : vector<1x64xf32> to vector<1x64xbf16>
    %cst_150 = arith.constant dense<0.000000e+00> : vector<1x256xf32>
    %960 = tpu.matmul %959, %0, %cst_150 {dimension_numbers = #tpu.dot_dimension_numbers<[1], [0], [0], [1], [0, 0, 1, 1], [], []>} : vector<1x64xbf16>, vector<64x256xbf16>, vector<1x256xf32> -> vector<1x256xf32>
    %961 = arith.addf %958, %960 : vector<1x256xf32>
    %962 = vector.extract_strided_slice %961 {offsets = [0, 0], sizes = [1, 192], strides = [1, 1]} : vector<1x256xf32> to vector<1x192xf32>
    %963 = arith.negf %962 : vector<1x192xf32>
    %964 = math.exp %963 : vector<1x192xf32>
    %cst_151 = arith.constant 1.000000e+00 : f32
    %965 = vector.broadcast %cst_151 : f32 to vector<1x192xf32>
    %966 = arith.addf %965, %964 : vector<1x192xf32>
    %967 = arith.divf %965, %966 : vector<1x192xf32>
    %968 = vector.extract_strided_slice %961 {offsets = [0, 192], sizes = [1, 64], strides = [1, 1]} : vector<1x256xf32> to vector<1x64xf32>
    %969 = math.tanh %968 : vector<1x64xf32>
    %970 = vector.extract_strided_slice %967 {offsets = [0, 0], sizes = [1, 64], strides = [1, 1]} : vector<1x192xf32> to vector<1x64xf32>
    %971 = vector.extract_strided_slice %967 {offsets = [0, 64], sizes = [1, 64], strides = [1, 1]} : vector<1x192xf32> to vector<1x64xf32>
    %972 = vector.extract_strided_slice %967 {offsets = [0, 128], sizes = [1, 64], strides = [1, 1]} : vector<1x192xf32> to vector<1x64xf32>
    %973 = arith.mulf %971, %932 : vector<1x64xf32>
    %974 = arith.mulf %970, %969 : vector<1x64xf32>
    %975 = arith.addf %973, %974 : vector<1x64xf32>
    %976 = math.tanh %975 : vector<1x64xf32>
    %977 = arith.mulf %972, %976 : vector<1x64xf32>
    %c23_i32 = arith.constant 23 : i32
    %978 = arith.truncf %977 : vector<1x64xf32> to vector<1x64xbf16>
    %cst_152 = arith.constant dense<0.000000e+00> : vector<1x256xf32>
    %979 = tpu.matmul %978, %1, %cst_152 {dimension_numbers = #tpu.dot_dimension_numbers<[1], [0], [0], [1], [0, 0, 1, 1], [], []>} : vector<1x64xbf16>, vector<64x256xbf16>, vector<1x256xf32> -> vector<1x256xf32>
    %980 = arith.truncf %956 : vector<1x64xf32> to vector<1x64xbf16>
    %cst_153 = arith.constant dense<0.000000e+00> : vector<1x256xf32>
    %981 = tpu.matmul %980, %2, %cst_153 {dimension_numbers = #tpu.dot_dimension_numbers<[1], [0], [0], [1], [0, 0, 1, 1], [], []>} : vector<1x64xbf16>, vector<64x256xbf16>, vector<1x256xf32> -> vector<1x256xf32>
    %982 = arith.addf %979, %981 : vector<1x256xf32>
    %983 = arith.addf %982, %3 : vector<1x256xf32>
    %984 = vector.extract_strided_slice %983 {offsets = [0, 0], sizes = [1, 192], strides = [1, 1]} : vector<1x256xf32> to vector<1x192xf32>
    %985 = arith.negf %984 : vector<1x192xf32>
    %986 = math.exp %985 : vector<1x192xf32>
    %cst_154 = arith.constant 1.000000e+00 : f32
    %987 = vector.broadcast %cst_154 : f32 to vector<1x192xf32>
    %988 = arith.addf %987, %986 : vector<1x192xf32>
    %989 = arith.divf %987, %988 : vector<1x192xf32>
    %990 = vector.extract_strided_slice %983 {offsets = [0, 192], sizes = [1, 64], strides = [1, 1]} : vector<1x256xf32> to vector<1x64xf32>
    %991 = math.tanh %990 : vector<1x64xf32>
    %992 = vector.extract_strided_slice %989 {offsets = [0, 0], sizes = [1, 64], strides = [1, 1]} : vector<1x192xf32> to vector<1x64xf32>
    %993 = vector.extract_strided_slice %989 {offsets = [0, 64], sizes = [1, 64], strides = [1, 1]} : vector<1x192xf32> to vector<1x64xf32>
    %994 = vector.extract_strided_slice %989 {offsets = [0, 128], sizes = [1, 64], strides = [1, 1]} : vector<1x192xf32> to vector<1x64xf32>
    %995 = arith.mulf %993, %954 : vector<1x64xf32>
    %996 = arith.mulf %992, %991 : vector<1x64xf32>
    %997 = arith.addf %995, %996 : vector<1x64xf32>
    %998 = math.tanh %997 : vector<1x64xf32>
    %999 = arith.mulf %994, %998 : vector<1x64xf32>
    %1000 = arith.index_cast %c23_i32 : i32 to index
    %c0_155 = arith.constant 0 : index
    %1001 = vector.load %arg10[%1000, %c0_155] : memref<30x256xf32, #tpu.memory_space<vmem>>, vector<1x256xf32>
    %1002 = arith.truncf %977 : vector<1x64xf32> to vector<1x64xbf16>
    %cst_156 = arith.constant dense<0.000000e+00> : vector<1x256xf32>
    %1003 = tpu.matmul %1002, %0, %cst_156 {dimension_numbers = #tpu.dot_dimension_numbers<[1], [0], [0], [1], [0, 0, 1, 1], [], []>} : vector<1x64xbf16>, vector<64x256xbf16>, vector<1x256xf32> -> vector<1x256xf32>
    %1004 = arith.addf %1001, %1003 : vector<1x256xf32>
    %1005 = vector.extract_strided_slice %1004 {offsets = [0, 0], sizes = [1, 192], strides = [1, 1]} : vector<1x256xf32> to vector<1x192xf32>
    %1006 = arith.negf %1005 : vector<1x192xf32>
    %1007 = math.exp %1006 : vector<1x192xf32>
    %cst_157 = arith.constant 1.000000e+00 : f32
    %1008 = vector.broadcast %cst_157 : f32 to vector<1x192xf32>
    %1009 = arith.addf %1008, %1007 : vector<1x192xf32>
    %1010 = arith.divf %1008, %1009 : vector<1x192xf32>
    %1011 = vector.extract_strided_slice %1004 {offsets = [0, 192], sizes = [1, 64], strides = [1, 1]} : vector<1x256xf32> to vector<1x64xf32>
    %1012 = math.tanh %1011 : vector<1x64xf32>
    %1013 = vector.extract_strided_slice %1010 {offsets = [0, 0], sizes = [1, 64], strides = [1, 1]} : vector<1x192xf32> to vector<1x64xf32>
    %1014 = vector.extract_strided_slice %1010 {offsets = [0, 64], sizes = [1, 64], strides = [1, 1]} : vector<1x192xf32> to vector<1x64xf32>
    %1015 = vector.extract_strided_slice %1010 {offsets = [0, 128], sizes = [1, 64], strides = [1, 1]} : vector<1x192xf32> to vector<1x64xf32>
    %1016 = arith.mulf %1014, %975 : vector<1x64xf32>
    %1017 = arith.mulf %1013, %1012 : vector<1x64xf32>
    %1018 = arith.addf %1016, %1017 : vector<1x64xf32>
    %1019 = math.tanh %1018 : vector<1x64xf32>
    %1020 = arith.mulf %1015, %1019 : vector<1x64xf32>
    %c24_i32 = arith.constant 24 : i32
    %1021 = arith.truncf %1020 : vector<1x64xf32> to vector<1x64xbf16>
    %cst_158 = arith.constant dense<0.000000e+00> : vector<1x256xf32>
    %1022 = tpu.matmul %1021, %1, %cst_158 {dimension_numbers = #tpu.dot_dimension_numbers<[1], [0], [0], [1], [0, 0, 1, 1], [], []>} : vector<1x64xbf16>, vector<64x256xbf16>, vector<1x256xf32> -> vector<1x256xf32>
    %1023 = arith.truncf %999 : vector<1x64xf32> to vector<1x64xbf16>
    %cst_159 = arith.constant dense<0.000000e+00> : vector<1x256xf32>
    %1024 = tpu.matmul %1023, %2, %cst_159 {dimension_numbers = #tpu.dot_dimension_numbers<[1], [0], [0], [1], [0, 0, 1, 1], [], []>} : vector<1x64xbf16>, vector<64x256xbf16>, vector<1x256xf32> -> vector<1x256xf32>
    %1025 = arith.addf %1022, %1024 : vector<1x256xf32>
    %1026 = arith.addf %1025, %3 : vector<1x256xf32>
    %1027 = vector.extract_strided_slice %1026 {offsets = [0, 0], sizes = [1, 192], strides = [1, 1]} : vector<1x256xf32> to vector<1x192xf32>
    %1028 = arith.negf %1027 : vector<1x192xf32>
    %1029 = math.exp %1028 : vector<1x192xf32>
    %cst_160 = arith.constant 1.000000e+00 : f32
    %1030 = vector.broadcast %cst_160 : f32 to vector<1x192xf32>
    %1031 = arith.addf %1030, %1029 : vector<1x192xf32>
    %1032 = arith.divf %1030, %1031 : vector<1x192xf32>
    %1033 = vector.extract_strided_slice %1026 {offsets = [0, 192], sizes = [1, 64], strides = [1, 1]} : vector<1x256xf32> to vector<1x64xf32>
    %1034 = math.tanh %1033 : vector<1x64xf32>
    %1035 = vector.extract_strided_slice %1032 {offsets = [0, 0], sizes = [1, 64], strides = [1, 1]} : vector<1x192xf32> to vector<1x64xf32>
    %1036 = vector.extract_strided_slice %1032 {offsets = [0, 64], sizes = [1, 64], strides = [1, 1]} : vector<1x192xf32> to vector<1x64xf32>
    %1037 = vector.extract_strided_slice %1032 {offsets = [0, 128], sizes = [1, 64], strides = [1, 1]} : vector<1x192xf32> to vector<1x64xf32>
    %1038 = arith.mulf %1036, %997 : vector<1x64xf32>
    %1039 = arith.mulf %1035, %1034 : vector<1x64xf32>
    %1040 = arith.addf %1038, %1039 : vector<1x64xf32>
    %1041 = math.tanh %1040 : vector<1x64xf32>
    %1042 = arith.mulf %1037, %1041 : vector<1x64xf32>
    %1043 = arith.index_cast %c24_i32 : i32 to index
    %c0_161 = arith.constant 0 : index
    %1044 = vector.load %arg10[%1043, %c0_161] : memref<30x256xf32, #tpu.memory_space<vmem>>, vector<1x256xf32>
    %1045 = arith.truncf %1020 : vector<1x64xf32> to vector<1x64xbf16>
    %cst_162 = arith.constant dense<0.000000e+00> : vector<1x256xf32>
    %1046 = tpu.matmul %1045, %0, %cst_162 {dimension_numbers = #tpu.dot_dimension_numbers<[1], [0], [0], [1], [0, 0, 1, 1], [], []>} : vector<1x64xbf16>, vector<64x256xbf16>, vector<1x256xf32> -> vector<1x256xf32>
    %1047 = arith.addf %1044, %1046 : vector<1x256xf32>
    %1048 = vector.extract_strided_slice %1047 {offsets = [0, 0], sizes = [1, 192], strides = [1, 1]} : vector<1x256xf32> to vector<1x192xf32>
    %1049 = arith.negf %1048 : vector<1x192xf32>
    %1050 = math.exp %1049 : vector<1x192xf32>
    %cst_163 = arith.constant 1.000000e+00 : f32
    %1051 = vector.broadcast %cst_163 : f32 to vector<1x192xf32>
    %1052 = arith.addf %1051, %1050 : vector<1x192xf32>
    %1053 = arith.divf %1051, %1052 : vector<1x192xf32>
    %1054 = vector.extract_strided_slice %1047 {offsets = [0, 192], sizes = [1, 64], strides = [1, 1]} : vector<1x256xf32> to vector<1x64xf32>
    %1055 = math.tanh %1054 : vector<1x64xf32>
    %1056 = vector.extract_strided_slice %1053 {offsets = [0, 0], sizes = [1, 64], strides = [1, 1]} : vector<1x192xf32> to vector<1x64xf32>
    %1057 = vector.extract_strided_slice %1053 {offsets = [0, 64], sizes = [1, 64], strides = [1, 1]} : vector<1x192xf32> to vector<1x64xf32>
    %1058 = vector.extract_strided_slice %1053 {offsets = [0, 128], sizes = [1, 64], strides = [1, 1]} : vector<1x192xf32> to vector<1x64xf32>
    %1059 = arith.mulf %1057, %1018 : vector<1x64xf32>
    %1060 = arith.mulf %1056, %1055 : vector<1x64xf32>
    %1061 = arith.addf %1059, %1060 : vector<1x64xf32>
    %1062 = math.tanh %1061 : vector<1x64xf32>
    %1063 = arith.mulf %1058, %1062 : vector<1x64xf32>
    %c25_i32 = arith.constant 25 : i32
    %1064 = arith.truncf %1063 : vector<1x64xf32> to vector<1x64xbf16>
    %cst_164 = arith.constant dense<0.000000e+00> : vector<1x256xf32>
    %1065 = tpu.matmul %1064, %1, %cst_164 {dimension_numbers = #tpu.dot_dimension_numbers<[1], [0], [0], [1], [0, 0, 1, 1], [], []>} : vector<1x64xbf16>, vector<64x256xbf16>, vector<1x256xf32> -> vector<1x256xf32>
    %1066 = arith.truncf %1042 : vector<1x64xf32> to vector<1x64xbf16>
    %cst_165 = arith.constant dense<0.000000e+00> : vector<1x256xf32>
    %1067 = tpu.matmul %1066, %2, %cst_165 {dimension_numbers = #tpu.dot_dimension_numbers<[1], [0], [0], [1], [0, 0, 1, 1], [], []>} : vector<1x64xbf16>, vector<64x256xbf16>, vector<1x256xf32> -> vector<1x256xf32>
    %1068 = arith.addf %1065, %1067 : vector<1x256xf32>
    %1069 = arith.addf %1068, %3 : vector<1x256xf32>
    %1070 = vector.extract_strided_slice %1069 {offsets = [0, 0], sizes = [1, 192], strides = [1, 1]} : vector<1x256xf32> to vector<1x192xf32>
    %1071 = arith.negf %1070 : vector<1x192xf32>
    %1072 = math.exp %1071 : vector<1x192xf32>
    %cst_166 = arith.constant 1.000000e+00 : f32
    %1073 = vector.broadcast %cst_166 : f32 to vector<1x192xf32>
    %1074 = arith.addf %1073, %1072 : vector<1x192xf32>
    %1075 = arith.divf %1073, %1074 : vector<1x192xf32>
    %1076 = vector.extract_strided_slice %1069 {offsets = [0, 192], sizes = [1, 64], strides = [1, 1]} : vector<1x256xf32> to vector<1x64xf32>
    %1077 = math.tanh %1076 : vector<1x64xf32>
    %1078 = vector.extract_strided_slice %1075 {offsets = [0, 0], sizes = [1, 64], strides = [1, 1]} : vector<1x192xf32> to vector<1x64xf32>
    %1079 = vector.extract_strided_slice %1075 {offsets = [0, 64], sizes = [1, 64], strides = [1, 1]} : vector<1x192xf32> to vector<1x64xf32>
    %1080 = vector.extract_strided_slice %1075 {offsets = [0, 128], sizes = [1, 64], strides = [1, 1]} : vector<1x192xf32> to vector<1x64xf32>
    %1081 = arith.mulf %1079, %1040 : vector<1x64xf32>
    %1082 = arith.mulf %1078, %1077 : vector<1x64xf32>
    %1083 = arith.addf %1081, %1082 : vector<1x64xf32>
    %1084 = math.tanh %1083 : vector<1x64xf32>
    %1085 = arith.mulf %1080, %1084 : vector<1x64xf32>
    %1086 = arith.index_cast %c25_i32 : i32 to index
    %c0_167 = arith.constant 0 : index
    %1087 = vector.load %arg10[%1086, %c0_167] : memref<30x256xf32, #tpu.memory_space<vmem>>, vector<1x256xf32>
    %1088 = arith.truncf %1063 : vector<1x64xf32> to vector<1x64xbf16>
    %cst_168 = arith.constant dense<0.000000e+00> : vector<1x256xf32>
    %1089 = tpu.matmul %1088, %0, %cst_168 {dimension_numbers = #tpu.dot_dimension_numbers<[1], [0], [0], [1], [0, 0, 1, 1], [], []>} : vector<1x64xbf16>, vector<64x256xbf16>, vector<1x256xf32> -> vector<1x256xf32>
    %1090 = arith.addf %1087, %1089 : vector<1x256xf32>
    %1091 = vector.extract_strided_slice %1090 {offsets = [0, 0], sizes = [1, 192], strides = [1, 1]} : vector<1x256xf32> to vector<1x192xf32>
    %1092 = arith.negf %1091 : vector<1x192xf32>
    %1093 = math.exp %1092 : vector<1x192xf32>
    %cst_169 = arith.constant 1.000000e+00 : f32
    %1094 = vector.broadcast %cst_169 : f32 to vector<1x192xf32>
    %1095 = arith.addf %1094, %1093 : vector<1x192xf32>
    %1096 = arith.divf %1094, %1095 : vector<1x192xf32>
    %1097 = vector.extract_strided_slice %1090 {offsets = [0, 192], sizes = [1, 64], strides = [1, 1]} : vector<1x256xf32> to vector<1x64xf32>
    %1098 = math.tanh %1097 : vector<1x64xf32>
    %1099 = vector.extract_strided_slice %1096 {offsets = [0, 0], sizes = [1, 64], strides = [1, 1]} : vector<1x192xf32> to vector<1x64xf32>
    %1100 = vector.extract_strided_slice %1096 {offsets = [0, 64], sizes = [1, 64], strides = [1, 1]} : vector<1x192xf32> to vector<1x64xf32>
    %1101 = vector.extract_strided_slice %1096 {offsets = [0, 128], sizes = [1, 64], strides = [1, 1]} : vector<1x192xf32> to vector<1x64xf32>
    %1102 = arith.mulf %1100, %1061 : vector<1x64xf32>
    %1103 = arith.mulf %1099, %1098 : vector<1x64xf32>
    %1104 = arith.addf %1102, %1103 : vector<1x64xf32>
    %1105 = math.tanh %1104 : vector<1x64xf32>
    %1106 = arith.mulf %1101, %1105 : vector<1x64xf32>
    %c26_i32 = arith.constant 26 : i32
    %1107 = arith.truncf %1106 : vector<1x64xf32> to vector<1x64xbf16>
    %cst_170 = arith.constant dense<0.000000e+00> : vector<1x256xf32>
    %1108 = tpu.matmul %1107, %1, %cst_170 {dimension_numbers = #tpu.dot_dimension_numbers<[1], [0], [0], [1], [0, 0, 1, 1], [], []>} : vector<1x64xbf16>, vector<64x256xbf16>, vector<1x256xf32> -> vector<1x256xf32>
    %1109 = arith.truncf %1085 : vector<1x64xf32> to vector<1x64xbf16>
    %cst_171 = arith.constant dense<0.000000e+00> : vector<1x256xf32>
    %1110 = tpu.matmul %1109, %2, %cst_171 {dimension_numbers = #tpu.dot_dimension_numbers<[1], [0], [0], [1], [0, 0, 1, 1], [], []>} : vector<1x64xbf16>, vector<64x256xbf16>, vector<1x256xf32> -> vector<1x256xf32>
    %1111 = arith.addf %1108, %1110 : vector<1x256xf32>
    %1112 = arith.addf %1111, %3 : vector<1x256xf32>
    %1113 = vector.extract_strided_slice %1112 {offsets = [0, 0], sizes = [1, 192], strides = [1, 1]} : vector<1x256xf32> to vector<1x192xf32>
    %1114 = arith.negf %1113 : vector<1x192xf32>
    %1115 = math.exp %1114 : vector<1x192xf32>
    %cst_172 = arith.constant 1.000000e+00 : f32
    %1116 = vector.broadcast %cst_172 : f32 to vector<1x192xf32>
    %1117 = arith.addf %1116, %1115 : vector<1x192xf32>
    %1118 = arith.divf %1116, %1117 : vector<1x192xf32>
    %1119 = vector.extract_strided_slice %1112 {offsets = [0, 192], sizes = [1, 64], strides = [1, 1]} : vector<1x256xf32> to vector<1x64xf32>
    %1120 = math.tanh %1119 : vector<1x64xf32>
    %1121 = vector.extract_strided_slice %1118 {offsets = [0, 0], sizes = [1, 64], strides = [1, 1]} : vector<1x192xf32> to vector<1x64xf32>
    %1122 = vector.extract_strided_slice %1118 {offsets = [0, 64], sizes = [1, 64], strides = [1, 1]} : vector<1x192xf32> to vector<1x64xf32>
    %1123 = vector.extract_strided_slice %1118 {offsets = [0, 128], sizes = [1, 64], strides = [1, 1]} : vector<1x192xf32> to vector<1x64xf32>
    %1124 = arith.mulf %1122, %1083 : vector<1x64xf32>
    %1125 = arith.mulf %1121, %1120 : vector<1x64xf32>
    %1126 = arith.addf %1124, %1125 : vector<1x64xf32>
    %1127 = math.tanh %1126 : vector<1x64xf32>
    %1128 = arith.mulf %1123, %1127 : vector<1x64xf32>
    %1129 = arith.index_cast %c26_i32 : i32 to index
    %c0_173 = arith.constant 0 : index
    %1130 = vector.load %arg10[%1129, %c0_173] : memref<30x256xf32, #tpu.memory_space<vmem>>, vector<1x256xf32>
    %1131 = arith.truncf %1106 : vector<1x64xf32> to vector<1x64xbf16>
    %cst_174 = arith.constant dense<0.000000e+00> : vector<1x256xf32>
    %1132 = tpu.matmul %1131, %0, %cst_174 {dimension_numbers = #tpu.dot_dimension_numbers<[1], [0], [0], [1], [0, 0, 1, 1], [], []>} : vector<1x64xbf16>, vector<64x256xbf16>, vector<1x256xf32> -> vector<1x256xf32>
    %1133 = arith.addf %1130, %1132 : vector<1x256xf32>
    %1134 = vector.extract_strided_slice %1133 {offsets = [0, 0], sizes = [1, 192], strides = [1, 1]} : vector<1x256xf32> to vector<1x192xf32>
    %1135 = arith.negf %1134 : vector<1x192xf32>
    %1136 = math.exp %1135 : vector<1x192xf32>
    %cst_175 = arith.constant 1.000000e+00 : f32
    %1137 = vector.broadcast %cst_175 : f32 to vector<1x192xf32>
    %1138 = arith.addf %1137, %1136 : vector<1x192xf32>
    %1139 = arith.divf %1137, %1138 : vector<1x192xf32>
    %1140 = vector.extract_strided_slice %1133 {offsets = [0, 192], sizes = [1, 64], strides = [1, 1]} : vector<1x256xf32> to vector<1x64xf32>
    %1141 = math.tanh %1140 : vector<1x64xf32>
    %1142 = vector.extract_strided_slice %1139 {offsets = [0, 0], sizes = [1, 64], strides = [1, 1]} : vector<1x192xf32> to vector<1x64xf32>
    %1143 = vector.extract_strided_slice %1139 {offsets = [0, 64], sizes = [1, 64], strides = [1, 1]} : vector<1x192xf32> to vector<1x64xf32>
    %1144 = vector.extract_strided_slice %1139 {offsets = [0, 128], sizes = [1, 64], strides = [1, 1]} : vector<1x192xf32> to vector<1x64xf32>
    %1145 = arith.mulf %1143, %1104 : vector<1x64xf32>
    %1146 = arith.mulf %1142, %1141 : vector<1x64xf32>
    %1147 = arith.addf %1145, %1146 : vector<1x64xf32>
    %1148 = math.tanh %1147 : vector<1x64xf32>
    %1149 = arith.mulf %1144, %1148 : vector<1x64xf32>
    %c27_i32 = arith.constant 27 : i32
    %1150 = arith.truncf %1149 : vector<1x64xf32> to vector<1x64xbf16>
    %cst_176 = arith.constant dense<0.000000e+00> : vector<1x256xf32>
    %1151 = tpu.matmul %1150, %1, %cst_176 {dimension_numbers = #tpu.dot_dimension_numbers<[1], [0], [0], [1], [0, 0, 1, 1], [], []>} : vector<1x64xbf16>, vector<64x256xbf16>, vector<1x256xf32> -> vector<1x256xf32>
    %1152 = arith.truncf %1128 : vector<1x64xf32> to vector<1x64xbf16>
    %cst_177 = arith.constant dense<0.000000e+00> : vector<1x256xf32>
    %1153 = tpu.matmul %1152, %2, %cst_177 {dimension_numbers = #tpu.dot_dimension_numbers<[1], [0], [0], [1], [0, 0, 1, 1], [], []>} : vector<1x64xbf16>, vector<64x256xbf16>, vector<1x256xf32> -> vector<1x256xf32>
    %1154 = arith.addf %1151, %1153 : vector<1x256xf32>
    %1155 = arith.addf %1154, %3 : vector<1x256xf32>
    %1156 = vector.extract_strided_slice %1155 {offsets = [0, 0], sizes = [1, 192], strides = [1, 1]} : vector<1x256xf32> to vector<1x192xf32>
    %1157 = arith.negf %1156 : vector<1x192xf32>
    %1158 = math.exp %1157 : vector<1x192xf32>
    %cst_178 = arith.constant 1.000000e+00 : f32
    %1159 = vector.broadcast %cst_178 : f32 to vector<1x192xf32>
    %1160 = arith.addf %1159, %1158 : vector<1x192xf32>
    %1161 = arith.divf %1159, %1160 : vector<1x192xf32>
    %1162 = vector.extract_strided_slice %1155 {offsets = [0, 192], sizes = [1, 64], strides = [1, 1]} : vector<1x256xf32> to vector<1x64xf32>
    %1163 = math.tanh %1162 : vector<1x64xf32>
    %1164 = vector.extract_strided_slice %1161 {offsets = [0, 0], sizes = [1, 64], strides = [1, 1]} : vector<1x192xf32> to vector<1x64xf32>
    %1165 = vector.extract_strided_slice %1161 {offsets = [0, 64], sizes = [1, 64], strides = [1, 1]} : vector<1x192xf32> to vector<1x64xf32>
    %1166 = vector.extract_strided_slice %1161 {offsets = [0, 128], sizes = [1, 64], strides = [1, 1]} : vector<1x192xf32> to vector<1x64xf32>
    %1167 = arith.mulf %1165, %1126 : vector<1x64xf32>
    %1168 = arith.mulf %1164, %1163 : vector<1x64xf32>
    %1169 = arith.addf %1167, %1168 : vector<1x64xf32>
    %1170 = math.tanh %1169 : vector<1x64xf32>
    %1171 = arith.mulf %1166, %1170 : vector<1x64xf32>
    %1172 = arith.index_cast %c27_i32 : i32 to index
    %c0_179 = arith.constant 0 : index
    %1173 = vector.load %arg10[%1172, %c0_179] : memref<30x256xf32, #tpu.memory_space<vmem>>, vector<1x256xf32>
    %1174 = arith.truncf %1149 : vector<1x64xf32> to vector<1x64xbf16>
    %cst_180 = arith.constant dense<0.000000e+00> : vector<1x256xf32>
    %1175 = tpu.matmul %1174, %0, %cst_180 {dimension_numbers = #tpu.dot_dimension_numbers<[1], [0], [0], [1], [0, 0, 1, 1], [], []>} : vector<1x64xbf16>, vector<64x256xbf16>, vector<1x256xf32> -> vector<1x256xf32>
    %1176 = arith.addf %1173, %1175 : vector<1x256xf32>
    %1177 = vector.extract_strided_slice %1176 {offsets = [0, 0], sizes = [1, 192], strides = [1, 1]} : vector<1x256xf32> to vector<1x192xf32>
    %1178 = arith.negf %1177 : vector<1x192xf32>
    %1179 = math.exp %1178 : vector<1x192xf32>
    %cst_181 = arith.constant 1.000000e+00 : f32
    %1180 = vector.broadcast %cst_181 : f32 to vector<1x192xf32>
    %1181 = arith.addf %1180, %1179 : vector<1x192xf32>
    %1182 = arith.divf %1180, %1181 : vector<1x192xf32>
    %1183 = vector.extract_strided_slice %1176 {offsets = [0, 192], sizes = [1, 64], strides = [1, 1]} : vector<1x256xf32> to vector<1x64xf32>
    %1184 = math.tanh %1183 : vector<1x64xf32>
    %1185 = vector.extract_strided_slice %1182 {offsets = [0, 0], sizes = [1, 64], strides = [1, 1]} : vector<1x192xf32> to vector<1x64xf32>
    %1186 = vector.extract_strided_slice %1182 {offsets = [0, 64], sizes = [1, 64], strides = [1, 1]} : vector<1x192xf32> to vector<1x64xf32>
    %1187 = vector.extract_strided_slice %1182 {offsets = [0, 128], sizes = [1, 64], strides = [1, 1]} : vector<1x192xf32> to vector<1x64xf32>
    %1188 = arith.mulf %1186, %1147 : vector<1x64xf32>
    %1189 = arith.mulf %1185, %1184 : vector<1x64xf32>
    %1190 = arith.addf %1188, %1189 : vector<1x64xf32>
    %1191 = math.tanh %1190 : vector<1x64xf32>
    %1192 = arith.mulf %1187, %1191 : vector<1x64xf32>
    %c27_i32_182 = arith.constant 27 : i32
    %c28_i32 = arith.constant 28 : i32
    %1193 = arith.truncf %1192 : vector<1x64xf32> to vector<1x64xbf16>
    %cst_183 = arith.constant dense<0.000000e+00> : vector<1x256xf32>
    %1194 = tpu.matmul %1193, %1, %cst_183 {dimension_numbers = #tpu.dot_dimension_numbers<[1], [0], [0], [1], [0, 0, 1, 1], [], []>} : vector<1x64xbf16>, vector<64x256xbf16>, vector<1x256xf32> -> vector<1x256xf32>
    %1195 = arith.truncf %1171 : vector<1x64xf32> to vector<1x64xbf16>
    %cst_184 = arith.constant dense<0.000000e+00> : vector<1x256xf32>
    %1196 = tpu.matmul %1195, %2, %cst_184 {dimension_numbers = #tpu.dot_dimension_numbers<[1], [0], [0], [1], [0, 0, 1, 1], [], []>} : vector<1x64xbf16>, vector<64x256xbf16>, vector<1x256xf32> -> vector<1x256xf32>
    %1197 = arith.addf %1194, %1196 : vector<1x256xf32>
    %1198 = arith.addf %1197, %3 : vector<1x256xf32>
    %1199 = vector.extract_strided_slice %1198 {offsets = [0, 0], sizes = [1, 192], strides = [1, 1]} : vector<1x256xf32> to vector<1x192xf32>
    %1200 = arith.negf %1199 : vector<1x192xf32>
    %1201 = math.exp %1200 : vector<1x192xf32>
    %cst_185 = arith.constant 1.000000e+00 : f32
    %1202 = vector.broadcast %cst_185 : f32 to vector<1x192xf32>
    %1203 = arith.addf %1202, %1201 : vector<1x192xf32>
    %1204 = arith.divf %1202, %1203 : vector<1x192xf32>
    %1205 = vector.extract_strided_slice %1198 {offsets = [0, 192], sizes = [1, 64], strides = [1, 1]} : vector<1x256xf32> to vector<1x64xf32>
    %1206 = math.tanh %1205 : vector<1x64xf32>
    %1207 = vector.extract_strided_slice %1204 {offsets = [0, 0], sizes = [1, 64], strides = [1, 1]} : vector<1x192xf32> to vector<1x64xf32>
    %1208 = vector.extract_strided_slice %1204 {offsets = [0, 64], sizes = [1, 64], strides = [1, 1]} : vector<1x192xf32> to vector<1x64xf32>
    %1209 = vector.extract_strided_slice %1204 {offsets = [0, 128], sizes = [1, 64], strides = [1, 1]} : vector<1x192xf32> to vector<1x64xf32>
    %1210 = arith.mulf %1208, %1169 : vector<1x64xf32>
    %1211 = arith.mulf %1207, %1206 : vector<1x64xf32>
    %1212 = arith.addf %1210, %1211 : vector<1x64xf32>
    %1213 = math.tanh %1212 : vector<1x64xf32>
    %1214 = arith.mulf %1209, %1213 : vector<1x64xf32>
    %c1_i32_186 = arith.constant 1 : i32
    %1215 = arith.subi %c28_i32, %c1_i32_186 : i32
    %c27_i32_187 = arith.constant 27 : i32
    %1216 = arith.subi %1215, %c27_i32_187 : i32
    %1217 = arith.index_cast %1216 : i32 to index
    %c0_188 = arith.constant 0 : index
    %1218 = vector.load %arg11[%1217, %c0_188] : memref<8x64xf32, #tpu.memory_space<vmem>>, vector<1x64xf32>
    tpu.vector_store %arg11[%1217, %c0_188], %1214 {strides = array<i32>} : memref<8x64xf32, #tpu.memory_space<vmem>>, vector<1x64xf32>,
    %1219 = arith.index_cast %c28_i32 : i32 to index
    %c0_189 = arith.constant 0 : index
    %1220 = vector.load %arg10[%1219, %c0_189] : memref<30x256xf32, #tpu.memory_space<vmem>>, vector<1x256xf32>
    %1221 = arith.truncf %1192 : vector<1x64xf32> to vector<1x64xbf16>
    %cst_190 = arith.constant dense<0.000000e+00> : vector<1x256xf32>
    %1222 = tpu.matmul %1221, %0, %cst_190 {dimension_numbers = #tpu.dot_dimension_numbers<[1], [0], [0], [1], [0, 0, 1, 1], [], []>} : vector<1x64xbf16>, vector<64x256xbf16>, vector<1x256xf32> -> vector<1x256xf32>
    %1223 = arith.addf %1220, %1222 : vector<1x256xf32>
    %1224 = vector.extract_strided_slice %1223 {offsets = [0, 0], sizes = [1, 192], strides = [1, 1]} : vector<1x256xf32> to vector<1x192xf32>
    %1225 = arith.negf %1224 : vector<1x192xf32>
    %1226 = math.exp %1225 : vector<1x192xf32>
    %cst_191 = arith.constant 1.000000e+00 : f32
    %1227 = vector.broadcast %cst_191 : f32 to vector<1x192xf32>
    %1228 = arith.addf %1227, %1226 : vector<1x192xf32>
    %1229 = arith.divf %1227, %1228 : vector<1x192xf32>
    %1230 = vector.extract_strided_slice %1223 {offsets = [0, 192], sizes = [1, 64], strides = [1, 1]} : vector<1x256xf32> to vector<1x64xf32>
    %1231 = math.tanh %1230 : vector<1x64xf32>
    %1232 = vector.extract_strided_slice %1229 {offsets = [0, 0], sizes = [1, 64], strides = [1, 1]} : vector<1x192xf32> to vector<1x64xf32>
    %1233 = vector.extract_strided_slice %1229 {offsets = [0, 64], sizes = [1, 64], strides = [1, 1]} : vector<1x192xf32> to vector<1x64xf32>
    %1234 = vector.extract_strided_slice %1229 {offsets = [0, 128], sizes = [1, 64], strides = [1, 1]} : vector<1x192xf32> to vector<1x64xf32>
    %1235 = arith.mulf %1233, %1190 : vector<1x64xf32>
    %1236 = arith.mulf %1232, %1231 : vector<1x64xf32>
    %1237 = arith.addf %1235, %1236 : vector<1x64xf32>
    %1238 = math.tanh %1237 : vector<1x64xf32>
    %1239 = arith.mulf %1234, %1238 : vector<1x64xf32>
    %c29_i32 = arith.constant 29 : i32
    %1240 = arith.truncf %1239 : vector<1x64xf32> to vector<1x64xbf16>
    %cst_192 = arith.constant dense<0.000000e+00> : vector<1x256xf32>
    %1241 = tpu.matmul %1240, %1, %cst_192 {dimension_numbers = #tpu.dot_dimension_numbers<[1], [0], [0], [1], [0, 0, 1, 1], [], []>} : vector<1x64xbf16>, vector<64x256xbf16>, vector<1x256xf32> -> vector<1x256xf32>
    %1242 = arith.truncf %1214 : vector<1x64xf32> to vector<1x64xbf16>
    %cst_193 = arith.constant dense<0.000000e+00> : vector<1x256xf32>
    %1243 = tpu.matmul %1242, %2, %cst_193 {dimension_numbers = #tpu.dot_dimension_numbers<[1], [0], [0], [1], [0, 0, 1, 1], [], []>} : vector<1x64xbf16>, vector<64x256xbf16>, vector<1x256xf32> -> vector<1x256xf32>
    %1244 = arith.addf %1241, %1243 : vector<1x256xf32>
    %1245 = arith.addf %1244, %3 : vector<1x256xf32>
    %1246 = vector.extract_strided_slice %1245 {offsets = [0, 0], sizes = [1, 192], strides = [1, 1]} : vector<1x256xf32> to vector<1x192xf32>
    %1247 = arith.negf %1246 : vector<1x192xf32>
    %1248 = math.exp %1247 : vector<1x192xf32>
    %cst_194 = arith.constant 1.000000e+00 : f32
    %1249 = vector.broadcast %cst_194 : f32 to vector<1x192xf32>
    %1250 = arith.addf %1249, %1248 : vector<1x192xf32>
    %1251 = arith.divf %1249, %1250 : vector<1x192xf32>
    %1252 = vector.extract_strided_slice %1245 {offsets = [0, 192], sizes = [1, 64], strides = [1, 1]} : vector<1x256xf32> to vector<1x64xf32>
    %1253 = math.tanh %1252 : vector<1x64xf32>
    %1254 = vector.extract_strided_slice %1251 {offsets = [0, 0], sizes = [1, 64], strides = [1, 1]} : vector<1x192xf32> to vector<1x64xf32>
    %1255 = vector.extract_strided_slice %1251 {offsets = [0, 64], sizes = [1, 64], strides = [1, 1]} : vector<1x192xf32> to vector<1x64xf32>
    %1256 = vector.extract_strided_slice %1251 {offsets = [0, 128], sizes = [1, 64], strides = [1, 1]} : vector<1x192xf32> to vector<1x64xf32>
    %1257 = arith.mulf %1255, %1212 : vector<1x64xf32>
    %1258 = arith.mulf %1254, %1253 : vector<1x64xf32>
    %1259 = arith.addf %1257, %1258 : vector<1x64xf32>
    %1260 = math.tanh %1259 : vector<1x64xf32>
    %1261 = arith.mulf %1256, %1260 : vector<1x64xf32>
    %c1_i32_195 = arith.constant 1 : i32
    %1262 = arith.subi %c29_i32, %c1_i32_195 : i32
    %c27_i32_196 = arith.constant 27 : i32
    %1263 = arith.subi %1262, %c27_i32_196 : i32
    %1264 = arith.index_cast %1263 : i32 to index
    %c0_197 = arith.constant 0 : index
    %1265 = vector.load %arg11[%1264, %c0_197] : memref<8x64xf32, #tpu.memory_space<vmem>>, vector<1x64xf32>
    tpu.vector_store %arg11[%1264, %c0_197], %1261 {strides = array<i32>} : memref<8x64xf32, #tpu.memory_space<vmem>>, vector<1x64xf32>,
    %1266 = arith.index_cast %c29_i32 : i32 to index
    %c0_198 = arith.constant 0 : index
    %1267 = vector.load %arg10[%1266, %c0_198] : memref<30x256xf32, #tpu.memory_space<vmem>>, vector<1x256xf32>
    %1268 = arith.truncf %1239 : vector<1x64xf32> to vector<1x64xbf16>
    %cst_199 = arith.constant dense<0.000000e+00> : vector<1x256xf32>
    %1269 = tpu.matmul %1268, %0, %cst_199 {dimension_numbers = #tpu.dot_dimension_numbers<[1], [0], [0], [1], [0, 0, 1, 1], [], []>} : vector<1x64xbf16>, vector<64x256xbf16>, vector<1x256xf32> -> vector<1x256xf32>
    %1270 = arith.addf %1267, %1269 : vector<1x256xf32>
    %1271 = vector.extract_strided_slice %1270 {offsets = [0, 0], sizes = [1, 192], strides = [1, 1]} : vector<1x256xf32> to vector<1x192xf32>
    %1272 = arith.negf %1271 : vector<1x192xf32>
    %1273 = math.exp %1272 : vector<1x192xf32>
    %cst_200 = arith.constant 1.000000e+00 : f32
    %1274 = vector.broadcast %cst_200 : f32 to vector<1x192xf32>
    %1275 = arith.addf %1274, %1273 : vector<1x192xf32>
    %1276 = arith.divf %1274, %1275 : vector<1x192xf32>
    %1277 = vector.extract_strided_slice %1270 {offsets = [0, 192], sizes = [1, 64], strides = [1, 1]} : vector<1x256xf32> to vector<1x64xf32>
    %1278 = math.tanh %1277 : vector<1x64xf32>
    %1279 = vector.extract_strided_slice %1276 {offsets = [0, 0], sizes = [1, 64], strides = [1, 1]} : vector<1x192xf32> to vector<1x64xf32>
    %1280 = vector.extract_strided_slice %1276 {offsets = [0, 64], sizes = [1, 64], strides = [1, 1]} : vector<1x192xf32> to vector<1x64xf32>
    %1281 = vector.extract_strided_slice %1276 {offsets = [0, 128], sizes = [1, 64], strides = [1, 1]} : vector<1x192xf32> to vector<1x64xf32>
    %1282 = arith.mulf %1280, %1237 : vector<1x64xf32>
    %1283 = arith.mulf %1279, %1278 : vector<1x64xf32>
    %1284 = arith.addf %1282, %1283 : vector<1x64xf32>
    %1285 = math.tanh %1284 : vector<1x64xf32>
    %1286 = arith.mulf %1281, %1285 : vector<1x64xf32>
    %c2_i32_201 = arith.constant 2 : i32
    %1287 = arith.truncf %1286 : vector<1x64xf32> to vector<1x64xbf16>
    %cst_202 = arith.constant dense<0.000000e+00> : vector<1x256xf32>
    %1288 = tpu.matmul %1287, %1, %cst_202 {dimension_numbers = #tpu.dot_dimension_numbers<[1], [0], [0], [1], [0, 0, 1, 1], [], []>} : vector<1x64xbf16>, vector<64x256xbf16>, vector<1x256xf32> -> vector<1x256xf32>
    %1289 = arith.truncf %1261 : vector<1x64xf32> to vector<1x64xbf16>
    %cst_203 = arith.constant dense<0.000000e+00> : vector<1x256xf32>
    %1290 = tpu.matmul %1289, %2, %cst_203 {dimension_numbers = #tpu.dot_dimension_numbers<[1], [0], [0], [1], [0, 0, 1, 1], [], []>} : vector<1x64xbf16>, vector<64x256xbf16>, vector<1x256xf32> -> vector<1x256xf32>
    %1291 = arith.addf %1288, %1290 : vector<1x256xf32>
    %1292 = arith.addf %1291, %3 : vector<1x256xf32>
    %1293 = vector.extract_strided_slice %1292 {offsets = [0, 0], sizes = [1, 192], strides = [1, 1]} : vector<1x256xf32> to vector<1x192xf32>
    %1294 = arith.negf %1293 : vector<1x192xf32>
    %1295 = math.exp %1294 : vector<1x192xf32>
    %cst_204 = arith.constant 1.000000e+00 : f32
    %1296 = vector.broadcast %cst_204 : f32 to vector<1x192xf32>
    %1297 = arith.addf %1296, %1295 : vector<1x192xf32>
    %1298 = arith.divf %1296, %1297 : vector<1x192xf32>
    %1299 = vector.extract_strided_slice %1292 {offsets = [0, 192], sizes = [1, 64], strides = [1, 1]} : vector<1x256xf32> to vector<1x64xf32>
    %1300 = math.tanh %1299 : vector<1x64xf32>
    %1301 = vector.extract_strided_slice %1298 {offsets = [0, 0], sizes = [1, 64], strides = [1, 1]} : vector<1x192xf32> to vector<1x64xf32>
    %1302 = vector.extract_strided_slice %1298 {offsets = [0, 64], sizes = [1, 64], strides = [1, 1]} : vector<1x192xf32> to vector<1x64xf32>
    %1303 = vector.extract_strided_slice %1298 {offsets = [0, 128], sizes = [1, 64], strides = [1, 1]} : vector<1x192xf32> to vector<1x64xf32>
    %1304 = arith.mulf %1302, %1259 : vector<1x64xf32>
    %1305 = arith.mulf %1301, %1300 : vector<1x64xf32>
    %1306 = arith.addf %1304, %1305 : vector<1x64xf32>
    %1307 = math.tanh %1306 : vector<1x64xf32>
    %1308 = arith.mulf %1303, %1307 : vector<1x64xf32>
    %c2 = arith.constant 2 : index
    %c0_205 = arith.constant 0 : index
    %1309 = vector.load %arg11[%c2, %c0_205] : memref<8x64xf32, #tpu.memory_space<vmem>>, vector<1x64xf32>
    tpu.vector_store %arg11[%c2, %c0_205], %1308 {strides = array<i32>} : memref<8x64xf32, #tpu.memory_space<vmem>>, vector<1x64xf32>,
    %c0_206 = arith.constant 0 : index
    %c0_207 = arith.constant 0 : index
    %1310 = vector.load %arg11[%c0_206, %c0_207] : memref<8x64xf32, #tpu.memory_space<vmem>>, vector<3x64xf32>
    %c0_208 = arith.constant 0 : index
    %c0_209 = arith.constant 0 : index
    %1311 = vector.load %arg7[%c0_208, %c0_209] : memref<64x6xf32, #tpu.memory_space<vmem>>, vector<64x6xf32>
    %cst_210 = arith.constant dense<0.000000e+00> : vector<3x6xf32>
    %1312 = tpu.matmul %1310, %1311, %cst_210 {dimension_numbers = #tpu.dot_dimension_numbers<[1], [0], [0], [1], [0, 0, 1, 1], [], []>} : vector<3x64xf32>, vector<64x6xf32>, vector<3x6xf32> -> vector<3x6xf32>
    %c0_211 = arith.constant 0 : index
    %c0_212 = arith.constant 0 : index
    %1313 = vector.load %arg8[%c0_211, %c0_212] : memref<1x6xf32, #tpu.memory_space<vmem>>, vector<1x6xf32>
    %1314 = vector.broadcast %1313 : vector<1x6xf32> to vector<3x6xf32>
    %1315 = arith.addf %1312, %1314 : vector<3x6xf32>
    %c0_213 = arith.constant 0 : index
    %c0_214 = arith.constant 0 : index
    %1316 = vector.load %arg9[%c0_213, %c0_214] : memref<3x6xf32, #tpu.memory_space<vmem>>, vector<3x6xf32>
    tpu.vector_store %arg9[%c0_213, %c0_214], %1315 {strides = array<i32>} : memref<3x6xf32, #tpu.memory_space<vmem>>, vector<3x6xf32>,
    return
  }
}

</mosaic_0001>

<bundles_post_ra>
// kernel: tpu_custom_call.1
= control target key start
LH: loop header
LB: loop body
LE: loop exit
PB: predicated region body
PF: predicated region fallthrough
CT: control target
= control target key end

     0   :  { %14 = vsyncpa [#allocation5], 0  ;;  %s10077_s0 = inlined_call_operand.vmem [shape: f32[30,6], index: 0, kind: input, shape index: {}]   ;;  %s10078_s1 = inlined_call_operand.hbm [shape: f32[6,256], index: 1, kind: input, shape index: {}]   ;;  %s10079_s2 = inlined_call_operand.vmem [shape: bf16[64,256], index: 2, kind: input, shape index: {}]   ;;  %s10080_s3 = inlined_call_operand.vmem [shape: f32[1,256], index: 3, kind: input, shape index: {}]   ;;  %s10081_s4 = inlined_call_operand.hbm [shape: bf16[64,256], index: 4, kind: input, shape index: {}]   ;;  %s10082_s5 = inlined_call_operand.vmem [shape: bf16[64,256], index: 5, kind: input, shape index: {}]   ;;  %s10083_s6 = inlined_call_operand.hbm [shape: f32[1,256], index: 6, kind: input, shape index: {}]   ;;  %s10084_s7 = inlined_call_operand.vmem [shape: f32[64,6], index: 7, kind: input, shape index: {}]   ;;  %s10085_s8 = inlined_call_operand.vmem [shape: f32[1,6], index: 8, kind: input, shape index: {}]   ;;  %s10086_s9 = inlined_call_operand.hbm [shape: f32[3,6], index: 9, kind: output, shape index: {}]  }
   0x1   :  { %15 = vsyncpa [#allocation8], 0 }
   0x2   :  { %16 = vsyncpa [#allocation6], 0  ;;  %s7933_s30 = smov [#allocation7]   ;;  %s7839_s13 = scalar_lea.hbm %s10081_s4, 1024 }
   0x3   :  { %s38_s10 = sshll.u32 %s7933_s30, 4  ;;  %p7840_p0 = scmp.ne.s32.totalorder %s10081_s4, %s7839_s13  ;;  %s39_s10 = int_to_ptr.vmem [resolvable:$true] %s38_s10 }
   0x4   :  { %p7843_p1 = scmp.lt.u32.totalorder %s7839_s13, %s10081_s4 }
   0x6   :  { %p7845_p2 = pnand %p7843_p1, %p7840_p0 }
   0x8   :  { %7848 = shalt.err (!%p7845_p2)
}
   0x9   :  { %s7849_s18 = scalar_lea.vmem %s39_s10, 1024  ;;  %p7854_p4 = scmp.lt.s32.totalorder %s39_s10, %s39_s10 }
   0xa   :  { %p7850_p3 = scmp.ne.s32.totalorder %s39_s10, %s7849_s18  ;;  %p7855_p5 = scmp.lt.s32.totalorder %s7849_s18, %s7849_s18 }
   0xc   :  { %p7856_p6 = por %p7855_p5, %p7854_p4 }
   0xe   :  { %p7857_p7 = pnand %p7856_p6, %p7850_p3 }
  0x10   :  { %7860 = shalt.err (!%p7857_p7)
}
  0x11   :  { %s7934_s19 = smov 128   ;;  %s7935_s20 = smov 8  }
  0x12   :  { %44 = dma.hbm_to_vmem [thread:$0]  %s10081_s4, 1024, %s39_s10, [#allocation8], %s7934_s19, %s7934_s19, %s7935_s20  }
  0x13   :  { %s7936_s23 = smov [#allocation4]   ;;  %s7937_s25 = smov [#allocation9]  }
  0x14   :  { %s25_s24 = sshll.u32 %s7936_s23, 4  ;;  %s53_s26 = sshll.u32 %s7937_s25, 4  ;;  %s26_s24 = int_to_ptr.vmem [resolvable:$true] %s25_s24  ;;  %s54_s26 = int_to_ptr.vmem [resolvable:$true] %s53_s26 }
  0x15   :  { %s7861_s29 = scalar_lea.hbm %s10078_s1, 256 }
  0x16   :  { %p7862_p8 = scmp.ne.s32.totalorder %s10078_s1, %s7861_s29  ;;  %p7865_p9 = scmp.lt.u32.totalorder %s7861_s29, %s10078_s1 }
  0x18   :  { %p7867_p10 = pnand %p7865_p9, %p7862_p8 }
  0x1a   :  { %7870 = shalt.err (!%p7867_p10)
}
  0x1b   :  { %s7871_s4 = scalar_lea.vmem %s26_s24, 256  ;;  %p7876_p12 = scmp.lt.s32.totalorder %s26_s24, %s26_s24 }
  0x1c   :  { %p7872_p11 = scmp.ne.s32.totalorder %s26_s24, %s7871_s4  ;;  %p7877_p13 = scmp.lt.s32.totalorder %s7871_s4, %s7871_s4 }
  0x1e   :  { %p7878_p0 = por %p7877_p13, %p7876_p12 }
  0x20   :  { %p7879_p1 = pnand %p7878_p0, %p7872_p11 }
  0x22   :  { %7882 = shalt.err (!%p7879_p1)
}
  0x23   :  { %28 = dma.hbm_to_vmem [thread:$0]  %s10078_s1, 256, %s26_s24, [#allocation5]  }
  0x24   :  { %s7883_s17 = scalar_lea.hbm %s10083_s6, 32 }
  0x25   :  { %p7884_p2 = scmp.ne.s32.totalorder %s10083_s6, %s7883_s17  ;;  %p7887_p3 = scmp.lt.u32.totalorder %s7883_s17, %s10083_s6 }
  0x27   :  { %p7889_p4 = pnand %p7887_p3, %p7884_p2 }
  0x29   :  { %7892 = shalt.err (!%p7889_p4)
}
  0x2a   :  { %s7893_s22 = scalar_lea.vmem %s54_s26, 32  ;;  %p7898_p6 = scmp.lt.s32.totalorder %s54_s26, %s54_s26 }
  0x2b   :  { %p7894_p5 = scmp.ne.s32.totalorder %s54_s26, %s7893_s22  ;;  %p7899_p7 = scmp.lt.s32.totalorder %s7893_s22, %s7893_s22 }
  0x2d   :  { %p7900_p8 = por %p7899_p7, %p7898_p6 }
  0x2f   :  { %p7901_p9 = pnand %p7900_p8, %p7894_p5 }
  0x31   :  { %7904 = shalt.err (!%p7901_p9)
}
  0x32   :  { %56 = dma.hbm_to_vmem [thread:$0]  %s10083_s6, 32, %s54_s26, [#allocation8]  }
  0x33   :  { %7927 = dma.done.wait [#allocation5], 256  }
  0x34   :  { %7928 = vsyncadd [#allocation5], 4294967040 }
  0x35   :  { %7929 = dma.done.wait [#allocation8], 1056  }
  0x36   :  { %7930 = vsyncadd [#allocation8], 4294966240  ;;  %v7938_v0 = vmov 0.0   ;;  %v7939_v1 = vmov 0   ;;  %v8036_v2 = vld [vmem:[%s10079_s2 + $0x4] ss:$8 sps:$4 sm:$0xff]   ;;  %v104_v13 = vlaneseq }
  0x37   :  { %198 = vmatprep.mubr.f32.mxu0 %v7938_v0  ;;  %308 = vmatprep.mubr.bf16.mxu1 %v7939_v1  ;;  %v8041_v3 = vld [vmem:[%s10079_s2] ss:$8 sps:$4 sm:$0xff]   ;;  %vm127_vm0 = vcmask 1045504   ;;  %v8047_v4 = vld [vmem:[%s10079_s2 + $0x14] ss:$8 sps:$4 sm:$0xff]   ;;  %vm114_vm1 = vcmask 48128  }
  0x38   :  { %276 = vmatprep.subr.bf16.mxu1 %v8036_v2  ;;  %v8053_v5 = vld [vmem:[%s10079_s2 + $0x10] ss:$8 sps:$4 sm:$0xff]   ;;  %v8059_v7 = vld [vmem:[%s10079_s2 + $0x24] ss:$8 sps:$4 sm:$0xff]   ;;  %v8067_v10 = vld [vmem:[%s10079_s2 + $0x20] ss:$8 sps:$4 sm:$0xff]  }
  0x39   :  { %277 = vmatpush1.bf16.msra.mxu1 %v8041_v3  ;;  %v101_v6 = vld [vmem:[#allocation4 + $0x8] sm:$0x3f]  ;;  %v100_v8 = vld [vmem:[#allocation4] sm:$0x3f]  ;;  %v96_v9 = vld [vmem:[%s10077_s0] sm:$0xff]  ;;  %v8088_v14 = vshrl.u32 %v104_v13, 7 }
  0x3a   :  { %278 = vmatprep.subr.bf16.mxu1 %v8047_v4  ;;  %6832 = vmatprep.subr.msk.mxu0 %vm127_vm0, %v101_v6  ;;  %v8073_v11 = vld [vmem:[%s10079_s2 + $0x34] ss:$8 sps:$4 sm:$0xff]   ;;  %v8081_v12 = vld [vmem:[%s10079_s2 + $0x30] ss:$8 sps:$4 sm:$0xff]   ;;  %v102_v16 = vld [vmem:[%s10080_s3] sm:$0x3] }
  0x3b   :  { %6833 = vmatpush1.msk.msra.mxu0 %vm127_vm0, %v100_v8  ;;  %v106_v15 = vsub.s32 0, %v8088_v14  ;;  %v110_v17 = vsub.s32 1, %v8088_v14  ;;  %v7940_v24 = vmov 1966171168   ;;  %s7941_s3 = smov 64   ;;  %v97_v47 = vld [vmem:[%s10077_s0 + $0x8] sm:$0xff] }
  0x3c   :  { %6834 = vmatmul.mubr.msk.f32.vlgmr.msra.gmra.mrb[0].mxu0 %vm114_vm1, %v96_v9  ;;  %v321_v25 = vunpack.c.l.s4 %v7940_v24  ;;  %v8118_v45 = vld [vmem:[%s10082_s5 + $0x4] ss:$8 sps:$4 sm:$0xff]   ;;  %v8123_v46 = vld [vmem:[%s10082_s5] ss:$8 sps:$4 sm:$0xff]   ;;  %v8132_v48 = vld [vmem:[%s10082_s5 + $0x14] ss:$8 sps:$4 sm:$0xff]  }
  0x3d   :  { %279 = vmatpush1.bf16.msra.mxu1 %v8053_v5  ;;  %204 = vmatprep.mubr.f32.mxu0 %v7938_v0  ;;  %v8097_v18 = vrot.slane %v102_v16, %v106_v15  ;;  %v8101_v19 = vrot.slane %v102_v16, %v110_v17  ;;  %v98_v49 = vld [vmem:[%s10077_s0 + $0x10] sm:$0xff]  ;;  %v8145_v51 = vld [vmem:[#allocation7 + $0x4] ss:$8 sps:$4 sm:$0xff]   ;;  %v8153_v53 = vld [vmem:[#allocation7] ss:$8 sps:$4 sm:$0xff]   ;;  %vm272_vm2 = vcmask 523264  }
  0x3e   :  { %280 = vmatprep.subr.bf16.mxu1 %v8059_v7  ;;  %v322_v26 = vunpack.c.0.s8 %v321_v25  ;;  %405 = vmatprep.subr.bf16.mxu0 %v8118_v45  ;;  %v8143_v50 = vld [vmem:[%s10082_s5 + $0x10] ss:$8 sps:$4 sm:$0xff]   ;;  %v8151_v52 = vld [vmem:[%s10082_s5 + $0x24] ss:$8 sps:$4 sm:$0xff]   ;;  %v8170_v57 = vld [vmem:[%s10082_s5 + $0x20] ss:$8 sps:$4 sm:$0xff]  }
  0x3f   :  { %406 = vmatpush1.bf16.msra.mxu0 %v8123_v46  ;;  %v8155_v54 = vld [vmem:[#allocation7 + $0x14] ss:$8 sps:$4 sm:$0xff]   ;;  %v99_v55 = vld [vmem:[%s10077_s0 + $0x18] sm:$0x3f]  ;;  %v8164_v56 = vld [vmem:[#allocation7 + $0x10] ss:$8 sps:$4 sm:$0xff]  }
  0x40   :  { %v8106_v27 = vsub.s32 %v322_v26, %v8088_v14  ;;  %6835 = vmatmul.mubr.msk.f32.gmra.mrb[2].mxu0 %vm114_vm1, %v97_v47  ;;  %407 = vmatprep.subr.bf16.mxu0 %v8132_v48  ;;  %v8173_v58 = vld [vmem:[#allocation7 + $0x24] ss:$8 sps:$4 sm:$0xff]   ;;  %v8184_v60 = vld [vmem:[#allocation7 + $0x20] ss:$8 sps:$4 sm:$0xff]   ;;  %v8208_v63 = vld [vmem:[#allocation7 + $0x34] ss:$8 sps:$4 sm:$0xff]  }
  0x41   :  { %281 = vmatpush1.bf16.msra.mxu1 %v8067_v10  ;;  %210 = vmatprep.mubr.f32.mxu0 %v7938_v0  ;;  %v8179_v59 = vld [vmem:[%s10082_s5 + $0x34] ss:$8 sps:$4 sm:$0xff]   ;;  %v8190_v61 = vld [vmem:[%s10082_s5 + $0x30] ss:$8 sps:$4 sm:$0xff]   ;;  %vm6297_vm3 = vcmask 516096   ;;  %vm7943_vm4 = vmmov 0  }
  0x42   :  { %282 = vmatprep.subr.bf16.mxu1 %v8073_v11  ;;  %v8210_v8 = vld [vmem:[#allocation7 + $0x30] ss:$8 sps:$4 sm:$0xff]   ;;  %vm6814_vm5 = vcmask 43008  }
  0x43   :  { %408 = vmatpush1.bf16.msra.mxu0 %v8143_v50 }
  0x44   :  { %6836 = vmatmul.mubr.msk.f32.gmra.mrb[4].mxu0 %vm114_vm1, %v98_v49  ;;  %409 = vmatprep.subr.bf16.mxu0 %v8151_v52 }
  0x45   :  { %283 = vmatpush1.bf16.msra.mxu1 %v8081_v12  ;;  %216 = vmatprep.mubr.f32.mxu0 %v7938_v0 }
  0x46   :  { %489 = vmatprep.subr.bf16.mxu1 %v8145_v51 }
  0x47   :  { %410 = vmatpush1.bf16.msra.mxu0 %v8170_v57 }
  0x48   :  { %309 = vmatmul.mubr.bf16.vlgmr.msra.gmra.mrb[0].mxu1 %v7939_v1  ;;  %6837 = vmatmul.mubr.msk.f32.gmra.mrb[6].mxu0 %vm114_vm1, %v99_v55 }
  0x49   :  { %521 = vmatprep.mubr.bf16.mxu1 %v7939_v1  ;;  %490 = vmatpush1.bf16.msra.mxu1 %v8153_v53 }
  0x4a   :  { %491 = vmatprep.subr.bf16.mxu1 %v8155_v54  ;;  %437 = vmatprep.mubr.bf16.mxu0 %v7939_v1 }
  0x4b   :  { %411 = vmatprep.subr.bf16.mxu0 %v8179_v59 }
  0x4c   :  { %412 = vmatpush1.bf16.msra.mxu0 %v8190_v61 }
  0x4d   :  { %492 = vmatpush1.bf16.msra.mxu1 %v8164_v56  ;;  %575 = vmatprep.subr.bf16.mxu0 %v8036_v2 }
  0x4e   :  { %493 = vmatprep.subr.bf16.mxu1 %v8173_v58 }
  0x4f   :  { %438 = vmatmul.mubr.bf16.vlgmr.msra.gmra.mrb[8].mxu0 %v7939_v1 }
  0x50   :  { %576 = vmatpush1.bf16.msra.mxu0 %v8041_v3  ;;  %607 = vmatprep.mubr.bf16.mxu0 %v7939_v1 }
  0x51   :  { %494 = vmatpush1.bf16.msra.mxu1 %v8184_v60  ;;  %577 = vmatprep.subr.bf16.mxu0 %v8047_v4 }
  0x52   :  { %495 = vmatprep.subr.bf16.mxu1 %v8208_v63 }
  0x54   :  { %578 = vmatpush1.bf16.msra.mxu0 %v8053_v5 }
  0x55   :  { %579 = vmatprep.subr.bf16.mxu0 %v8059_v7  ;;  %496 = vmatpush1.bf16.msra.mxu1 %v8210_v8 }
  0x56   :  { %668 = vmatprep.subr.bf16.mxu1 %v8118_v45 }
  0x58   :  { %580 = vmatpush1.bf16.msra.mxu0 %v8067_v10 }
  0x59   :  { %581 = vmatprep.subr.bf16.mxu0 %v8073_v11 }
  0x5c   :  { %582 = vmatpush1.bf16.msra.mxu0 %v8081_v12 }
  0x5d   :  { %712 = vmatprep.subr.bf16.mxu0 %v8145_v51 }
 0x10f   :  { %v200_v20 = vpop.f32.mrb[0].mxu0 }
 0x110   :  { %v201_v21 = vadd.f32 %v200_v20, %v8097_v18  ;;  %v202_v22 = vpop.f32.mrb[1].mxu0 }
 0x111   :  { %v203_v23 = vadd.f32 %v202_v22, %v8101_v19 }
 0x112   :  { %223 = vst [vmem:[#allocation2] sm:$0xff] %v201_v21 }
 0x113   :  { %224 = vst [vmem:[#allocation2 + $0x8] sm:$0xff] %v203_v23  ;;  %v206_v16 = vpop.f32.mrb[2].mxu0 }
 0x114   :  { %v207_v20 = vadd.f32 %v206_v16, %v8097_v18  ;;  %v208_v21 = vpop.f32.mrb[3].mxu0 }
 0x115   :  { %v209_v22 = vadd.f32 %v208_v21, %v8101_v19 }
 0x116   :  { %225 = vst [vmem:[#allocation2 + $0x10] sm:$0xff] %v207_v20 }
 0x117   :  { %226 = vst [vmem:[#allocation2 + $0x18] sm:$0xff] %v209_v22  ;;  %v212_v23 = vpop.f32.mrb[4].mxu0 }
 0x118   :  { %v213_v24 = vadd.f32 %v212_v23, %v8097_v18  ;;  %v214_v25 = vpop.f32.mrb[5].mxu0 }
 0x119   :  { %v215_v26 = vadd.f32 %v214_v25, %v8101_v19 }
 0x11a   :  { %v231_v34 = vld [vmem:[#allocation2] ss:$8 sm:$0x3]  ;;  %227 = vst [vmem:[#allocation2 + $0x20] sm:$0xff] %v213_v24 }
 0x11b   :  { %v310_v28 = vpop.f32.mrb[0].mxu1  ;;  %228 = vst [vmem:[#allocation2 + $0x28] sm:$0xff] %v215_v26 }
 0x11c   :  { %v312_v29 = vpop.f32.mrb[1].mxu1 }
 0x11d   :  { %v319_v30 = vcombine.low %v310_v28, %v312_v29  ;;  %v314_v31 = vpop.f32.mrb[2].mxu1  ;;  %v218_v28 = vpop.f32.mrb[6].mxu0 }
 0x11e   :  { %v315_v32 = vpop.f32.mrb[3].mxu1  ;;  %v219_v29 = vadd.f32 %v218_v28, %v8097_v18  ;;  %v95_v18 = vld [vmem:[#allocation9] sm:$0x3] }
 0x11f   :  { %v326_v33 = vrot.slane %v319_v30, %v8106_v27  ;;  %v220_v30 = vpop.f32.mrb[7].mxu0  ;;  %v8257_v24 = vrot.slane %v95_v18, %v106_v15 }
 0x120   :  { %v221_v31 = vadd.f32 %v220_v30, %v8101_v19  ;;  %229 = vst [vmem:[#allocation2 + $0x30] sm:$0x3f] %v219_v29  ;;  %v8248_v19 = vrot.slane %v95_v18, %v110_v17  ;;  %v574_v17 = vld [vmem:[#allocation2 + $0x1] ss:$8 sm:$0x3] }
 0x121   :  { %v333_v35 = vrot.slane %v326_v33, %v8106_v27 }
 0x122   :  { %230 = vst [vmem:[#allocation2 + $0x38] sm:$0x3f] %v221_v31  ;;  %v439_v32 = vpop.f32.mrb[8].mxu0 }
 0x123   :  { %v335_v36 = vadd.f32 %v333_v35, %v231_v34  ;;  %v441_v33 = vpop.f32.mrb[9].mxu0 }
 0x124   :  { %v443_v34 = vpop.f32.mrb[10].mxu0 }
 0x125   :  { %343 = vrot.lane.b32.xlu0 %v335_v36, %s7941_s3  ;;  %v6846_v37 = vmul.f32 -1.442695, %v335_v36  ;;  %v444_v35 = vpop.f32.mrb[11].mxu0 }
 0x127   :  { %7130 = vpow2.f32 %v6846_v37 }
 0x131   :  { %v7131_v38 = vpop.eup %7130 }
 0x132   :  { %v339_v39 = vadd.f32 1.0, %v7131_v38 }
 0x134   :  { %7132 = vrcp.f32 %v339_v39 }
 0x13e   :  { %v8111_v42 = vpop.eup %7132 }
 0x13f   :  { %v348_v62 = vmul.f32 0.0, %v8111_v42  ;;  %v357_v36 = vrot.slane %v8111_v42, 1 }
 0x197   :  { %v344_v40 = vpop.permute.xlu0 %343 }
 0x198   :  { %v345_v41 = vrot.slane %v344_v40, 1 }
 0x19a   :  { %7134 = vtanh.f32 %v345_v41 }
 0x1a4   :  { %v7135_v43 = vpop.eup %7134 }
 0x1a5   :  { %v349_v44 = vmul.f32 %v7135_v43, %v8111_v42 }
 0x1a7   :  { %351 = vrot.lane.b32.xlu0 %v349_v44, %s7941_s3 }
 0x219   :  { %v352_v6 = vpop.permute.xlu0 %351 }
 0x21a   :  { %v8212_v9 = vadd.f32 %v352_v6, %v348_v62 }
 0x21c   :  { %7136 = vtanh.f32 %v8212_v9 }
 0x226   :  { %v7137_v13 = vpop.eup %7136 }
 0x227   :  { %360 = vrot.lane.b32.xlu1 %v7137_v13, %s7941_s3 }
 0x299   :  { %v361_v37 = vpop.permute.xlu1 %360 }
 0x29a   :  { %v363_v38 = vmul.f32 %v361_v37, %v357_v36 }
 0x29c   :  { %v364_v39 = vpack.c.bf16 %v363_v38, %v363_v38 }
 0x29e   :  { %6863 = vmatmul.mubr.msk.bf16.vlgmr.msra.gmra.mrb[4].mxu1 %vm272_vm2, %v364_v39  ;;  %6866 = vmatmul.mubr.msk.bf16.vlgmr.msra.gmra.mrb[12].mxu0 %vm272_vm2, %v364_v39 }
 0x29f   :  { %669 = vmatpush1.bf16.msra.mxu1 %v8123_v46  ;;  %713 = vmatpush1.bf16.msra.mxu0 %v8153_v53 }
 0x2a0   :  { %670 = vmatprep.subr.bf16.mxu1 %v8132_v48  ;;  %714 = vmatprep.subr.bf16.mxu0 %v8155_v54 }
 0x2a1   :  { %700 = vmatprep.mubr.bf16.mxu1 %v7939_v1  ;;  %744 = vmatprep.mubr.bf16.mxu0 %v7939_v1 }
 0x2a3   :  { %671 = vmatpush1.bf16.msra.mxu1 %v8143_v50  ;;  %715 = vmatpush1.bf16.msra.mxu0 %v8164_v56 }
 0x2a4   :  { %672 = vmatprep.subr.bf16.mxu1 %v8151_v52  ;;  %716 = vmatprep.subr.bf16.mxu0 %v8173_v58 }
 0x2a7   :  { %673 = vmatpush1.bf16.msra.mxu1 %v8170_v57  ;;  %717 = vmatpush1.bf16.msra.mxu0 %v8184_v60 }
 0x2a8   :  { %674 = vmatprep.subr.bf16.mxu1 %v8179_v59  ;;  %718 = vmatprep.subr.bf16.mxu0 %v8208_v63 }
 0x2ab   :  { %675 = vmatpush1.bf16.msra.mxu1 %v8190_v61  ;;  %719 = vmatpush1.bf16.msra.mxu0 %v8210_v8 }
 0x2ac   :  { %787 = vmatprep.subr.bf16.mxu1 %v8036_v2  ;;  %880 = vmatprep.subr.bf16.mxu0 %v8118_v45 }
 0x371   :  { %v523_v40 = vpop.f32.mrb[4].mxu1  ;;  %v609_v41 = vpop.f32.mrb[12].mxu0 }
 0x372   :  { %v524_v42 = vadd.f32 %v523_v40, %v439_v32  ;;  %v525_v43 = vpop.f32.mrb[5].mxu1  ;;  %v611_v44 = vpop.f32.mrb[13].mxu0 }
 0x373   :  { %v526_v47 = vadd.f32 %v525_v43, %v441_v33  ;;  %v618_v49 = vcombine.low %v609_v41, %v611_v44  ;;  %v527_v55 = vpop.f32.mrb[6].mxu1  ;;  %v613_v62 = vpop.f32.mrb[14].mxu0 }
 0x374   :  { %v528_v6 = vpop.f32.mrb[7].mxu1  ;;  %v614_v13 = vpop.f32.mrb[15].mxu0  ;;  %v541_v25 = vadd.f32 %v8257_v24, %v524_v42 }
 0x375   :  { %v542_v16 = vadd.f32 %v8248_v19, %v526_v47  ;;  %v625_v20 = vrot.slane %v618_v49, %v8106_v27 }
 0x376   :  { %v6864_v26 = vmul.f32 -1.442695, %v541_v25 }
 0x377   :  { %7138 = vtanh.f32 %v542_v16  ;;  %v632_v21 = vrot.slane %v625_v20, %v8106_v27  ;;  %v6865_v49 = vmul.f32 -1.442695, %v542_v16 }
 0x378   :  { %7140 = vpow2.f32 %v6864_v26 }
 0x379   :  { %v634_v22 = vadd.f32 %v632_v21, %v574_v17 }
 0x37b   :  { %642 = vrot.lane.b32.xlu1 %v634_v22, %s7941_s3  ;;  %v6867_v28 = vmul.f32 -1.442695, %v634_v22 }
 0x37d   :  { %7142 = vpow2.f32 %v6867_v28 }
 0x381   :  { %v7139_v23 = vpop.eup %7138 }
 0x382   :  { %558 = vrot.lane.b32.xlu0 %v7139_v23, %s7941_s3  ;;  %v7141_v29 = vpop.eup %7140 }
 0x383   :  { %v549_v30 = vadd.f32 1.0, %v7141_v29 }
 0x385   :  { %7144 = vrcp.f32 %v549_v30 }
 0x387   :  { %v7143_v31 = vpop.eup %7142 }
 0x388   :  { %v638_v32 = vadd.f32 1.0, %v7143_v31 }
 0x38a   :  { %7146 = vrcp.f32 %v638_v32 }
 0x38f   :  { %v7145_v35 = vpop.eup %7144 }
 0x390   :  { %v556_v39 = vmul.f32 0.0, %v7145_v35 }
 0x394   :  { %v7147_v15 = vpop.eup %7146 }
 0x395   :  { %v647_v41 = vmul.f32 %v7147_v15, %v8212_v9  ;;  %v656_v21 = vrot.slane %v7147_v15, 1 }
 0x3ed   :  { %v643_v33 = vpop.permute.xlu1 %642 }
 0x3ee   :  { %v644_v34 = vrot.slane %v643_v33, 1 }
 0x3f0   :  { %7148 = vtanh.f32 %v644_v34 }
 0x3f4   :  { %v559_v36 = vpop.permute.xlu0 %558 }
 0x3f5   :  { %v561_v14 = vmul.f32 %v7145_v35, %v559_v36 }
 0x3f7   :  { %563 = vrot.lane.b32.xlu1 %v561_v14, %s7941_s3 }
 0x3fa   :  { %v7149_v37 = vpop.eup %7148 }
 0x3fb   :  { %v648_v38 = vmul.f32 %v7149_v37, %v7147_v15 }
 0x3fd   :  { %650 = vrot.lane.b32.xlu0 %v648_v38, %s7941_s3 }
 0x469   :  { %v564_v18 = vpop.permute.xlu1 %563 }
 0x46a   :  { %v8262_v40 = vadd.f32 %v564_v18, %v556_v39 }
 0x46c   :  { %7150 = vtanh.f32 %v8262_v40 }
 0x46f   :  { %v651_v42 = vpop.permute.xlu0 %650 }
 0x470   :  { %v8266_v43 = vadd.f32 %v651_v42, %v647_v41  ;;  %v786_v42 = vld [vmem:[#allocation2 + $0x2] ss:$8 sm:$0x3] }
 0x472   :  { %7152 = vtanh.f32 %v8266_v43 }
 0x473   :  { %7154 = vpow2.f32 %v6865_v49 }
 0x476   :  { %v7151_v44 = vpop.eup %7150 }
 0x477   :  { %569 = vrot.lane.b32.xlu1 %v7151_v44, %s7941_s3 }
 0x47c   :  { %v7153_v47 = vpop.eup %7152 }
 0x47d   :  { %659 = vrot.lane.b32.xlu0 %v7153_v47, %s7941_s3  ;;  %v7155_v55 = vpop.eup %7154 }
 0x47e   :  { %v550_v62 = vadd.f32 1.0, %v7155_v55 }
 0x480   :  { %7156 = vrcp.f32 %v550_v62 }
 0x48a   :  { %v7157_v6 = vpop.eup %7156 }
 0x4e9   :  { %v570_v13 = vpop.permute.xlu1 %569 }
 0x4ea   :  { %v572_v20 = vmul.f32 %v7157_v6, %v570_v13 }
 0x4ec   :  { %v664_v9 = vpack.c.bf16 %v572_v20, %v572_v20 }
 0x4ee   :  { %6868 = vmatmul.mubr.msk.bf16.vlgmr.msra.gmra.mrb[8].mxu1 %vm272_vm2, %v664_v9 }
 0x4ef   :  { %788 = vmatpush1.bf16.msra.mxu1 %v8041_v3  ;;  %v660_v17 = vpop.permute.xlu0 %659  ;;  %819 = vmatprep.mubr.bf16.mxu1 %v7939_v1 }
 0x4f0   :  { %v662_v22 = vmul.f32 %v660_v17, %v656_v21  ;;  %789 = vmatprep.subr.bf16.mxu1 %v8047_v4 }
 0x4f2   :  { %v663_v16 = vpack.c.bf16 %v662_v22, %v662_v22 }
 0x4f3   :  { %790 = vmatpush1.bf16.msra.mxu1 %v8053_v5 }
 0x4f4   :  { %6869 = vmatmul.mubr.msk.bf16.vlgmr.msra.gmra.mrb[16].mxu0 %vm272_vm2, %v663_v16  ;;  %791 = vmatprep.subr.bf16.mxu1 %v8059_v7 }
 0x4f5   :  { %881 = vmatpush1.bf16.msra.mxu0 %v8123_v46  ;;  %912 = vmatprep.mubr.bf16.mxu0 %v7939_v1 }
 0x4f6   :  { %882 = vmatprep.subr.bf16.mxu0 %v8132_v48 }
 0x4f7   :  { %792 = vmatpush1.bf16.msra.mxu1 %v8067_v10 }
 0x4f8   :  { %793 = vmatprep.subr.bf16.mxu1 %v8073_v11 }
 0x4f9   :  { %883 = vmatpush1.bf16.msra.mxu0 %v8143_v50 }
 0x4fa   :  { %884 = vmatprep.subr.bf16.mxu0 %v8151_v52 }
 0x4fb   :  { %794 = vmatpush1.bf16.msra.mxu1 %v8081_v12 }
 0x4fc   :  { %924 = vmatprep.subr.bf16.mxu1 %v8145_v51 }
 0x4fd   :  { %885 = vmatpush1.bf16.msra.mxu0 %v8170_v57 }
 0x4fe   :  { %6872 = vmatmul.mubr.msk.bf16.vlgmr.msra.gmra.mrb[12].mxu1 %vm272_vm2, %v663_v16  ;;  %886 = vmatprep.subr.bf16.mxu0 %v8179_v59 }
 0x4ff   :  { %925 = vmatpush1.bf16.msra.mxu1 %v8153_v53  ;;  %956 = vmatprep.mubr.bf16.mxu1 %v7939_v1 }
 0x500   :  { %926 = vmatprep.subr.bf16.mxu1 %v8155_v54 }
 0x501   :  { %887 = vmatpush1.bf16.msra.mxu0 %v8190_v61 }
 0x502   :  { %999 = vmatprep.subr.bf16.mxu0 %v8036_v2 }
 0x503   :  { %927 = vmatpush1.bf16.msra.mxu1 %v8164_v56 }
 0x504   :  { %928 = vmatprep.subr.bf16.mxu1 %v8173_v58 }
 0x507   :  { %929 = vmatpush1.bf16.msra.mxu1 %v8184_v60 }
 0x508   :  { %930 = vmatprep.subr.bf16.mxu1 %v8208_v63 }
 0x50b   :  { %931 = vmatpush1.bf16.msra.mxu1 %v8210_v8 }
 0x50c   :  { %1092 = vmatprep.subr.bf16.mxu1 %v8118_v45 }
 0x5c1   :  { %v702_v23 = vpop.f32.mrb[8].mxu1 }
 0x5c2   :  { %v704_v25 = vpop.f32.mrb[9].mxu1 }
 0x5c3   :  { %v706_v26 = vpop.f32.mrb[10].mxu1 }
 0x5c4   :  { %v707_v28 = vpop.f32.mrb[11].mxu1 }
 0x5c7   :  { %v746_v29 = vpop.f32.mrb[16].mxu0 }
 0x5c8   :  { %v747_v30 = vadd.f32 %v746_v29, %v702_v23  ;;  %v748_v31 = vpop.f32.mrb[17].mxu0 }
 0x5c9   :  { %v749_v32 = vadd.f32 %v748_v31, %v704_v25  ;;  %v750_v33 = vpop.f32.mrb[18].mxu0 }
 0x5ca   :  { %v751_v34 = vpop.f32.mrb[19].mxu0  ;;  %v753_v47 = vadd.f32 %v747_v30, %v8257_v24 }
 0x5cb   :  { %v754_v35 = vadd.f32 %v749_v32, %v8248_v19 }
 0x5cc   :  { %v6870_v49 = vmul.f32 -1.442695, %v753_v47 }
 0x5cd   :  { %7158 = vtanh.f32 %v754_v35 }
 0x5ce   :  { %7160 = vpow2.f32 %v6870_v49 }
 0x5d1   :  { %v821_v36 = vpop.f32.mrb[12].mxu1 }
 0x5d2   :  { %v823_v14 = vpop.f32.mrb[13].mxu1 }
 0x5d3   :  { %v830_v15 = vcombine.low %v821_v36, %v823_v14  ;;  %v825_v37 = vpop.f32.mrb[14].mxu1  ;;  %v6871_v14 = vmul.f32 -1.442695, %v754_v35 }
 0x5d4   :  { %v826_v38 = vpop.f32.mrb[15].mxu1 }
 0x5d5   :  { %v837_v39 = vrot.slane %v830_v15, %v8106_v27 }
 0x5d7   :  { %v7159_v18 = vpop.eup %7158  ;;  %v844_v41 = vrot.slane %v837_v39, %v8106_v27 }
 0x5d8   :  { %770 = vrot.lane.b32.xlu1 %v7159_v18, %s7941_s3  ;;  %v7161_v55 = vpop.eup %7160 }
 0x5d9   :  { %v846_v44 = vadd.f32 %v844_v41, %v786_v42  ;;  %v761_v6 = vadd.f32 1.0, %v7161_v55 }
 0x5db   :  { %854 = vrot.lane.b32.xlu0 %v846_v44, %s7941_s3  ;;  %v6873_v62 = vmul.f32 -1.442695, %v846_v44 }
 0x5dd   :  { %7162 = vpow2.f32 %v6873_v62 }
 0x5de   :  { %7164 = vrcp.f32 %v761_v6 }
 0x5e7   :  { %v7163_v13 = vpop.eup %7162 }
 0x5e8   :  { %v7165_v20 = vpop.eup %7164  ;;  %v850_v21 = vadd.f32 1.0, %v7163_v13 }
 0x5e9   :  { %v768_v28 = vmul.f32 %v7165_v20, %v8262_v40 }
 0x5ea   :  { %7166 = vrcp.f32 %v850_v21 }
 0x5f4   :  { %v7167_v23 = vpop.eup %7166 }
 0x5f5   :  { %v859_v32 = vmul.f32 %v7167_v23, %v8266_v43  ;;  %v868_v43 = vrot.slane %v7167_v23, 1 }
 0x64a   :  { %v771_v9 = vpop.permute.xlu1 %770 }
 0x64b   :  { %v773_v17 = vmul.f32 %v7165_v20, %v771_v9 }
 0x64d   :  { %v855_v22 = vpop.permute.xlu0 %854  ;;  %775 = vrot.lane.b32.xlu1 %v773_v17, %s7941_s3 }
 0x64e   :  { %v856_v16 = vrot.slane %v855_v22, 1 }
 0x650   :  { %7168 = vtanh.f32 %v856_v16 }
 0x65a   :  { %v7169_v25 = vpop.eup %7168 }
 0x65b   :  { %v860_v26 = vmul.f32 %v7169_v25, %v7167_v23 }
 0x65d   :  { %862 = vrot.lane.b32.xlu0 %v860_v26, %s7941_s3 }
 0x6bf   :  { %v776_v29 = vpop.permute.xlu1 %775 }
 0x6c0   :  { %v8310_v30 = vadd.f32 %v776_v29, %v768_v28 }
 0x6c2   :  { %7170 = vtanh.f32 %v8310_v30 }
 0x6cc   :  { %v7171_v31 = vpop.eup %7170 }
 0x6cd   :  { %781 = vrot.lane.b32.xlu1 %v7171_v31, %s7941_s3  ;;  %v998_v31 = vld [vmem:[#allocation2 + $0x3] ss:$8 sm:$0x3] }
 0x6cf   :  { %v863_v33 = vpop.permute.xlu0 %862 }
 0x6d0   :  { %v8315_v34 = vadd.f32 %v863_v33, %v859_v32 }
 0x6d2   :  { %7172 = vtanh.f32 %v8315_v34 }
 0x6d3   :  { %7174 = vpow2.f32 %v6871_v14 }
 0x6dc   :  { %v7173_v36 = vpop.eup %7172 }
 0x6dd   :  { %871 = vrot.lane.b32.xlu0 %v7173_v36, %s7941_s3  ;;  %v7175_v40 = vpop.eup %7174 }
 0x6de   :  { %v762_v15 = vadd.f32 1.0, %v7175_v40 }
 0x6e0   :  { %7176 = vrcp.f32 %v762_v15 }
 0x6ea   :  { %v7177_v37 = vpop.eup %7176 }
 0x73f   :  { %v782_v38 = vpop.permute.xlu1 %781 }
 0x740   :  { %v784_v39 = vmul.f32 %v7177_v37, %v782_v38 }
 0x742   :  { %v876_v18 = vpack.c.bf16 %v784_v39, %v784_v39 }
 0x744   :  { %6874 = vmatmul.mubr.msk.bf16.vlgmr.msra.gmra.mrb[20].mxu0 %vm272_vm2, %v876_v18 }
 0x745   :  { %1000 = vmatpush1.bf16.msra.mxu0 %v8041_v3  ;;  %1031 = vmatprep.mubr.bf16.mxu0 %v7939_v1 }
 0x746   :  { %1001 = vmatprep.subr.bf16.mxu0 %v8047_v4 }
 0x749   :  { %1002 = vmatpush1.bf16.msra.mxu0 %v8053_v5 }
 0x74a   :  { %1003 = vmatprep.subr.bf16.mxu0 %v8059_v7 }
 0x74d   :  { %1004 = vmatpush1.bf16.msra.mxu0 %v8067_v10 }
 0x74e   :  { %1005 = vmatprep.subr.bf16.mxu0 %v8073_v11 }
 0x74f   :  { %v872_v35 = vpop.permute.xlu0 %871 }
 0x750   :  { %v874_v41 = vmul.f32 %v872_v35, %v868_v43 }
 0x751   :  { %1006 = vmatpush1.bf16.msra.mxu0 %v8081_v12 }
 0x752   :  { %v875_v42 = vpack.c.bf16 %v874_v41, %v874_v41  ;;  %1136 = vmatprep.subr.bf16.mxu0 %v8145_v51 }
 0x754   :  { %6875 = vmatmul.mubr.msk.bf16.vlgmr.msra.gmra.mrb[16].mxu1 %vm272_vm2, %v875_v42  ;;  %6878 = vmatmul.mubr.msk.bf16.vlgmr.msra.gmra.mrb[24].mxu0 %vm272_vm2, %v875_v42 }
 0x755   :  { %1093 = vmatpush1.bf16.msra.mxu1 %v8123_v46  ;;  %1137 = vmatpush1.bf16.msra.mxu0 %v8153_v53 }
 0x756   :  { %1094 = vmatprep.subr.bf16.mxu1 %v8132_v48  ;;  %1138 = vmatprep.subr.bf16.mxu0 %v8155_v54 }
 0x757   :  { %1124 = vmatprep.mubr.bf16.mxu1 %v7939_v1  ;;  %1168 = vmatprep.mubr.bf16.mxu0 %v7939_v1 }
 0x759   :  { %1095 = vmatpush1.bf16.msra.mxu1 %v8143_v50  ;;  %1139 = vmatpush1.bf16.msra.mxu0 %v8164_v56 }
 0x75a   :  { %1096 = vmatprep.subr.bf16.mxu1 %v8151_v52  ;;  %1140 = vmatprep.subr.bf16.mxu0 %v8173_v58 }
 0x75d   :  { %1097 = vmatpush1.bf16.msra.mxu1 %v8170_v57  ;;  %1141 = vmatpush1.bf16.msra.mxu0 %v8184_v60 }
 0x75e   :  { %1098 = vmatprep.subr.bf16.mxu1 %v8179_v59  ;;  %1142 = vmatprep.subr.bf16.mxu0 %v8208_v63 }
 0x761   :  { %1099 = vmatpush1.bf16.msra.mxu1 %v8190_v61  ;;  %1143 = vmatpush1.bf16.msra.mxu0 %v8210_v8 }
 0x762   :  { %1211 = vmatprep.subr.bf16.mxu1 %v8036_v2  ;;  %1304 = vmatprep.subr.bf16.mxu0 %v8118_v45 }
 0x817   :  { %v914_v44 = vpop.f32.mrb[20].mxu0 }
 0x818   :  { %v916_v47 = vpop.f32.mrb[21].mxu0 }
 0x819   :  { %v918_v49 = vpop.f32.mrb[22].mxu0 }
 0x81a   :  { %v919_v55 = vpop.f32.mrb[23].mxu0 }
 0x827   :  { %v958_v62 = vpop.f32.mrb[16].mxu1  ;;  %v1033_v6 = vpop.f32.mrb[24].mxu0 }
 0x828   :  { %v959_v13 = vadd.f32 %v958_v62, %v914_v44  ;;  %v960_v20 = vpop.f32.mrb[17].mxu1  ;;  %v1035_v9 = vpop.f32.mrb[25].mxu0 }
 0x829   :  { %v961_v21 = vadd.f32 %v960_v20, %v916_v47  ;;  %v1042_v17 = vcombine.low %v1033_v6, %v1035_v9  ;;  %v962_v22 = vpop.f32.mrb[18].mxu1  ;;  %v1037_v16 = vpop.f32.mrb[26].mxu0 }
 0x82a   :  { %v963_v23 = vpop.f32.mrb[19].mxu1  ;;  %v1038_v25 = vpop.f32.mrb[27].mxu0  ;;  %v965_v36 = vadd.f32 %v959_v13, %v8257_v24 }
 0x82b   :  { %v966_v26 = vadd.f32 %v961_v21, %v8248_v19  ;;  %v1049_v28 = vrot.slane %v1042_v17, %v8106_v27 }
 0x82c   :  { %v6876_v14 = vmul.f32 -1.442695, %v965_v36 }
 0x82d   :  { %7178 = vtanh.f32 %v966_v26  ;;  %v1056_v29 = vrot.slane %v1049_v28, %v8106_v27  ;;  %v6877_v22 = vmul.f32 -1.442695, %v966_v26 }
 0x82e   :  { %7180 = vpow2.f32 %v6876_v14 }
 0x82f   :  { %v1058_v32 = vadd.f32 %v1056_v29, %v998_v31 }
 0x831   :  { %1066 = vrot.lane.b32.xlu1 %v1058_v32, %s7941_s3  ;;  %v6879_v40 = vmul.f32 -1.442695, %v1058_v32 }
 0x833   :  { %7182 = vpow2.f32 %v6879_v40 }
 0x837   :  { %v7179_v33 = vpop.eup %7178 }
 0x838   :  { %982 = vrot.lane.b32.xlu0 %v7179_v33, %s7941_s3  ;;  %v7181_v15 = vpop.eup %7180 }
 0x839   :  { %v973_v37 = vadd.f32 1.0, %v7181_v15 }
 0x83b   :  { %7184 = vrcp.f32 %v973_v37 }
 0x83d   :  { %v7183_v38 = vpop.eup %7182 }
 0x83e   :  { %v1062_v39 = vadd.f32 1.0, %v7183_v38 }
 0x840   :  { %7186 = vrcp.f32 %v1062_v39 }
 0x845   :  { %v7185_v35 = vpop.eup %7184 }
 0x846   :  { %v980_v55 = vmul.f32 %v7185_v35, %v8310_v30 }
 0x84a   :  { %v7187_v44 = vpop.eup %7186 }
 0x84b   :  { %v1071_v13 = vmul.f32 %v7187_v44, %v8315_v34  ;;  %v1080_v29 = vrot.slane %v7187_v44, 1 }
 0x8a3   :  { %v1067_v18 = vpop.permute.xlu1 %1066 }
 0x8a4   :  { %v1068_v43 = vrot.slane %v1067_v18, 1 }
 0x8a6   :  { %7188 = vtanh.f32 %v1068_v43 }
 0x8aa   :  { %v983_v41 = vpop.permute.xlu0 %982 }
 0x8ab   :  { %v985_v42 = vmul.f32 %v7185_v35, %v983_v41  ;;  %v1210_v41 = vld [vmem:[#allocation2 + $0x4] ss:$8 sm:$0x3] }
 0x8ad   :  { %987 = vrot.lane.b32.xlu1 %v985_v42, %s7941_s3 }
 0x8b0   :  { %v7189_v47 = vpop.eup %7188 }
 0x8b1   :  { %v1072_v49 = vmul.f32 %v7189_v47, %v7187_v44 }
 0x8b3   :  { %1074 = vrot.lane.b32.xlu0 %v1072_v49, %s7941_s3 }
 0x91f   :  { %v988_v62 = vpop.permute.xlu1 %987 }
 0x920   :  { %v8358_v6 = vadd.f32 %v988_v62, %v980_v55 }
 0x922   :  { %7190 = vtanh.f32 %v8358_v6 }
 0x925   :  { %v1075_v20 = vpop.permute.xlu0 %1074 }
 0x926   :  { %v8362_v9 = vadd.f32 %v1075_v20, %v1071_v13 }
 0x928   :  { %7192 = vtanh.f32 %v8362_v9 }
 0x929   :  { %7194 = vpow2.f32 %v6877_v22 }
 0x92c   :  { %v7191_v21 = vpop.eup %7190 }
 0x92d   :  { %993 = vrot.lane.b32.xlu1 %v7191_v21, %s7941_s3 }
 0x932   :  { %v7193_v17 = vpop.eup %7192 }
 0x933   :  { %1083 = vrot.lane.b32.xlu0 %v7193_v17, %s7941_s3  ;;  %v7195_v30 = vpop.eup %7194 }
 0x934   :  { %v974_v16 = vadd.f32 1.0, %v7195_v30 }
 0x936   :  { %7196 = vrcp.f32 %v974_v16 }
 0x940   :  { %v7197_v23 = vpop.eup %7196 }
 0x99f   :  { %v994_v25 = vpop.permute.xlu1 %993 }
 0x9a0   :  { %v996_v28 = vmul.f32 %v7197_v23, %v994_v25 }
 0x9a2   :  { %v1088_v34 = vpack.c.bf16 %v996_v28, %v996_v28 }
 0x9a4   :  { %6880 = vmatmul.mubr.msk.bf16.vlgmr.msra.gmra.mrb[20].mxu1 %vm272_vm2, %v1088_v34 }
 0x9a5   :  { %1212 = vmatpush1.bf16.msra.mxu1 %v8041_v3  ;;  %v1084_v31 = vpop.permute.xlu0 %1083  ;;  %1243 = vmatprep.mubr.bf16.mxu1 %v7939_v1 }
 0x9a6   :  { %v1086_v32 = vmul.f32 %v1084_v31, %v1080_v29  ;;  %1213 = vmatprep.subr.bf16.mxu1 %v8047_v4 }
 0x9a8   :  { %v1087_v26 = vpack.c.bf16 %v1086_v32, %v1086_v32 }
 0x9a9   :  { %1214 = vmatpush1.bf16.msra.mxu1 %v8053_v5 }
 0x9aa   :  { %6881 = vmatmul.mubr.msk.bf16.vlgmr.msra.gmra.mrb[28].mxu0 %vm272_vm2, %v1087_v26  ;;  %1215 = vmatprep.subr.bf16.mxu1 %v8059_v7 }
 0x9ab   :  { %1305 = vmatpush1.bf16.msra.mxu0 %v8123_v46  ;;  %1336 = vmatprep.mubr.bf16.mxu0 %v7939_v1 }
 0x9ac   :  { %1306 = vmatprep.subr.bf16.mxu0 %v8132_v48 }
 0x9ad   :  { %1216 = vmatpush1.bf16.msra.mxu1 %v8067_v10 }
 0x9ae   :  { %1217 = vmatprep.subr.bf16.mxu1 %v8073_v11 }
 0x9af   :  { %1307 = vmatpush1.bf16.msra.mxu0 %v8143_v50 }
 0x9b0   :  { %1308 = vmatprep.subr.bf16.mxu0 %v8151_v52 }
 0x9b1   :  { %1218 = vmatpush1.bf16.msra.mxu1 %v8081_v12 }
 0x9b2   :  { %1348 = vmatprep.subr.bf16.mxu1 %v8145_v51 }
 0x9b3   :  { %1309 = vmatpush1.bf16.msra.mxu0 %v8170_v57 }
 0x9b4   :  { %6884 = vmatmul.mubr.msk.bf16.vlgmr.msra.gmra.mrb[24].mxu1 %vm272_vm2, %v1087_v26  ;;  %1310 = vmatprep.subr.bf16.mxu0 %v8179_v59 }
 0x9b5   :  { %1349 = vmatpush1.bf16.msra.mxu1 %v8153_v53  ;;  %1380 = vmatprep.mubr.bf16.mxu1 %v7939_v1 }
 0x9b6   :  { %1350 = vmatprep.subr.bf16.mxu1 %v8155_v54 }
 0x9b7   :  { %1311 = vmatpush1.bf16.msra.mxu0 %v8190_v61 }
 0x9b8   :  { %1423 = vmatprep.subr.bf16.mxu0 %v8036_v2 }
 0x9b9   :  { %1351 = vmatpush1.bf16.msra.mxu1 %v8164_v56 }
 0x9ba   :  { %1352 = vmatprep.subr.bf16.mxu1 %v8173_v58 }
 0x9bd   :  { %1353 = vmatpush1.bf16.msra.mxu1 %v8184_v60 }
 0x9be   :  { %1354 = vmatprep.subr.bf16.mxu1 %v8208_v63 }
 0x9c1   :  { %1355 = vmatpush1.bf16.msra.mxu1 %v8210_v8 }
 0x9c2   :  { %1516 = vmatprep.subr.bf16.mxu1 %v8118_v45 }
 0xa77   :  { %v1126_v3 = vpop.f32.mrb[20].mxu1 }
 0xa78   :  { %v1128_v4 = vpop.f32.mrb[21].mxu1 }
 0xa79   :  { %v1130_v5 = vpop.f32.mrb[22].mxu1 }
 0xa7a   :  { %v1131_v7 = vpop.f32.mrb[23].mxu1 }
 0xa7d   :  { %v1170_v10 = vpop.f32.mrb[28].mxu0 }
 0xa7e   :  { %v1171_v11 = vadd.f32 %v1170_v10, %v1126_v3  ;;  %v1172_v12 = vpop.f32.mrb[29].mxu0 }
 0xa7f   :  { %v1173_v2 = vadd.f32 %v1172_v12, %v1128_v4  ;;  %v1174_v33 = vpop.f32.mrb[30].mxu0 }
 0xa80   :  { %v1175_v36 = vpop.f32.mrb[31].mxu0  ;;  %v1177_v44 = vadd.f32 %v1171_v11, %v8257_v24 }
 0xa81   :  { %v1178_v14 = vadd.f32 %v1173_v2, %v8248_v19  ;;  %v8426_v36 = vld [vmem:[%s10079_s2 + $0x14] ss:$8 sps:$4 sm:$0xff]  }
 0xa82   :  { %v6882_v47 = vmul.f32 -1.442695, %v1177_v44 }
 0xa83   :  { %7198 = vtanh.f32 %v1178_v14  ;;  %v6883_v7 = vmul.f32 -1.442695, %v1178_v14  ;;  %v8432_v14 = vld [vmem:[%s10079_s2 + $0x10] ss:$8 sps:$4 sm:$0xff]  }
 0xa84   :  { %7200 = vpow2.f32 %v6882_v47  ;;  %v1422_v47 = vld [vmem:[#allocation2 + $0x5] ss:$8 sm:$0x3] }
 0xa87   :  { %v1245_v40 = vpop.f32.mrb[24].mxu1 }
 0xa88   :  { %v1247_v15 = vpop.f32.mrb[25].mxu1 }
 0xa89   :  { %v1254_v37 = vcombine.low %v1245_v40, %v1247_v15  ;;  %v1249_v38 = vpop.f32.mrb[26].mxu1  ;;  %v8438_v40 = vld [vmem:[%s10079_s2 + $0x24] ss:$8 sps:$4 sm:$0xff]   ;;  %v8444_v15 = vld [vmem:[%s10079_s2 + $0x20] ss:$8 sps:$4 sm:$0xff]  }
 0xa8a   :  { %v1250_v39 = vpop.f32.mrb[27].mxu1  ;;  %v8450_v38 = vld [vmem:[%s10079_s2 + $0x34] ss:$8 sps:$4 sm:$0xff]  }
 0xa8b   :  { %v1261_v18 = vrot.slane %v1254_v37, %v8106_v27 }
 0xa8d   :  { %v7199_v43 = vpop.eup %7198  ;;  %v1268_v35 = vrot.slane %v1261_v18, %v8106_v27 }
 0xa8e   :  { %1194 = vrot.lane.b32.xlu1 %v7199_v43, %s7941_s3  ;;  %v7201_v49 = vpop.eup %7200  ;;  %v8456_v43 = vld [vmem:[%s10079_s2 + $0x30] ss:$8 sps:$4 sm:$0xff]  }
 0xa8f   :  { %v1270_v42 = vadd.f32 %v1268_v35, %v1210_v41  ;;  %v1185_v62 = vadd.f32 1.0, %v7201_v49 }
 0xa91   :  { %1278 = vrot.lane.b32.xlu0 %v1270_v42, %s7941_s3  ;;  %v6885_v55 = vmul.f32 -1.442695, %v1270_v42 }
 0xa93   :  { %7202 = vpow2.f32 %v6885_v55 }
 0xa94   :  { %7204 = vrcp.f32 %v1185_v62 }
 0xa9d   :  { %v7203_v13 = vpop.eup %7202 }
 0xa9e   :  { %v7205_v20 = vpop.eup %7204  ;;  %v1274_v17 = vadd.f32 1.0, %v7203_v13 }
 0xa9f   :  { %v1192_v34 = vmul.f32 %v7205_v20, %v8358_v6 }
 0xaa0   :  { %7206 = vrcp.f32 %v1274_v17 }
 0xaaa   :  { %v7207_v23 = vpop.eup %7206 }
 0xaab   :  { %v1283_v26 = vmul.f32 %v7207_v23, %v8362_v9  ;;  %v8419_v9 = vld [vmem:[%s10079_s2] ss:$8 sps:$4 sm:$0xff]   ;;  %v1292_v37 = vrot.slane %v7207_v23, 1 }
 0xb00   :  { %v1195_v21 = vpop.permute.xlu1 %1194 }
 0xb01   :  { %v1197_v22 = vmul.f32 %v7205_v20, %v1195_v21 }
 0xb03   :  { %v1279_v30 = vpop.permute.xlu0 %1278  ;;  %1199 = vrot.lane.b32.xlu1 %v1197_v22, %s7941_s3 }
 0xb04   :  { %v1280_v16 = vrot.slane %v1279_v30, 1 }
 0xb06   :  { %7208 = vtanh.f32 %v1280_v16 }
 0xb10   :  { %v7209_v25 = vpop.eup %7208 }
 0xb11   :  { %v1284_v28 = vmul.f32 %v7209_v25, %v7207_v23 }
 0xb13   :  { %1286 = vrot.lane.b32.xlu0 %v1284_v28, %s7941_s3 }
 0xb75   :  { %v1200_v29 = vpop.permute.xlu1 %1199 }
 0xb76   :  { %v8406_v31 = vadd.f32 %v1200_v29, %v1192_v34 }
 0xb78   :  { %7210 = vtanh.f32 %v8406_v31 }
 0xb82   :  { %v7211_v32 = vpop.eup %7210 }
 0xb83   :  { %1205 = vrot.lane.b32.xlu1 %v7211_v32, %s7941_s3 }
 0xb85   :  { %v1287_v3 = vpop.permute.xlu0 %1286 }
 0xb86   :  { %v8411_v4 = vadd.f32 %v1287_v3, %v1283_v26 }
 0xb88   :  { %7212 = vtanh.f32 %v8411_v4 }
 0xb89   :  { %7214 = vpow2.f32 %v6883_v7 }
 0xb92   :  { %v7213_v5 = vpop.eup %7212 }
 0xb93   :  { %1295 = vrot.lane.b32.xlu0 %v7213_v5, %s7941_s3  ;;  %v7215_v6 = vpop.eup %7214 }
 0xb94   :  { %v1186_v10 = vadd.f32 1.0, %v7215_v6 }
 0xb96   :  { %7216 = vrcp.f32 %v1186_v10 }
 0xba0   :  { %v7217_v11 = vpop.eup %7216 }
 0xbf5   :  { %v1206_v12 = vpop.permute.xlu1 %1205 }
 0xbf6   :  { %v1208_v2 = vmul.f32 %v7217_v11, %v1206_v12 }
 0xbf8   :  { %v1300_v33 = vpack.c.bf16 %v1208_v2, %v1208_v2 }
 0xbfa   :  { %6886 = vmatmul.mubr.msk.bf16.vlgmr.msra.gmra.mrb[32].mxu0 %vm272_vm2, %v1300_v33 }
 0xbfb   :  { %1424 = vmatpush1.bf16.msra.mxu0 %v8419_v9  ;;  %1455 = vmatprep.mubr.bf16.mxu0 %v7939_v1 }
 0xbfc   :  { %1425 = vmatprep.subr.bf16.mxu0 %v8426_v36 }
 0xbff   :  { %1426 = vmatpush1.bf16.msra.mxu0 %v8432_v14 }
 0xc00   :  { %1427 = vmatprep.subr.bf16.mxu0 %v8438_v40 }
 0xc03   :  { %1428 = vmatpush1.bf16.msra.mxu0 %v8444_v15 }
 0xc04   :  { %1429 = vmatprep.subr.bf16.mxu0 %v8450_v38 }
 0xc05   :  { %v1296_v39 = vpop.permute.xlu0 %1295 }
 0xc06   :  { %v1298_v18 = vmul.f32 %v1296_v39, %v1292_v37 }
 0xc07   :  { %1430 = vmatpush1.bf16.msra.mxu0 %v8456_v43 }
 0xc08   :  { %v1299_v35 = vpack.c.bf16 %v1298_v18, %v1298_v18  ;;  %1560 = vmatprep.subr.bf16.mxu0 %v8145_v51 }
 0xc0a   :  { %6887 = vmatmul.mubr.msk.bf16.vlgmr.msra.gmra.mrb[28].mxu1 %vm272_vm2, %v1299_v35  ;;  %6890 = vmatmul.mubr.msk.bf16.vlgmr.msra.gmra.mrb[36].mxu0 %vm272_vm2, %v1299_v35 }
 0xc0b   :  { %1517 = vmatpush1.bf16.msra.mxu1 %v8123_v46  ;;  %1561 = vmatpush1.bf16.msra.mxu0 %v8153_v53  ;;  %v8481_v46 = vld [vmem:[%s10079_s2 + $0x4] ss:$8 sps:$4 sm:$0xff]  }
 0xc0c   :  { %1518 = vmatprep.subr.bf16.mxu1 %v8132_v48  ;;  %1562 = vmatprep.subr.bf16.mxu0 %v8155_v54 }
 0xc0d   :  { %1548 = vmatprep.mubr.bf16.mxu1 %v7939_v1  ;;  %1592 = vmatprep.mubr.bf16.mxu0 %v7939_v1 }
 0xc0f   :  { %1519 = vmatpush1.bf16.msra.mxu1 %v8143_v50  ;;  %1563 = vmatpush1.bf16.msra.mxu0 %v8164_v56 }
 0xc10   :  { %1520 = vmatprep.subr.bf16.mxu1 %v8151_v52  ;;  %1564 = vmatprep.subr.bf16.mxu0 %v8173_v58 }
 0xc13   :  { %1521 = vmatpush1.bf16.msra.mxu1 %v8170_v57  ;;  %1565 = vmatpush1.bf16.msra.mxu0 %v8184_v60 }
 0xc14   :  { %1522 = vmatprep.subr.bf16.mxu1 %v8179_v59  ;;  %1566 = vmatprep.subr.bf16.mxu0 %v8208_v63 }
 0xc17   :  { %1523 = vmatpush1.bf16.msra.mxu1 %v8190_v61  ;;  %1567 = vmatpush1.bf16.msra.mxu0 %v8210_v8 }
 0xc18   :  { %1635 = vmatprep.subr.bf16.mxu1 %v8481_v46  ;;  %1728 = vmatprep.subr.bf16.mxu0 %v8118_v45 }
 0xccd   :  { %v1338_v48 = vpop.f32.mrb[32].mxu0 }
 0xcce   :  { %v1340_v50 = vpop.f32.mrb[33].mxu0 }
 0xccf   :  { %v1342_v51 = vpop.f32.mrb[34].mxu0 }
 0xcd0   :  { %v1343_v52 = vpop.f32.mrb[35].mxu0 }
 0xcdd   :  { %v1382_v53 = vpop.f32.mrb[28].mxu1  ;;  %v1457_v54 = vpop.f32.mrb[36].mxu0 }
 0xcde   :  { %v1383_v56 = vadd.f32 %v1382_v53, %v1338_v48  ;;  %v1384_v57 = vpop.f32.mrb[29].mxu1  ;;  %v1459_v58 = vpop.f32.mrb[37].mxu0  ;;  %v8513_v53 = vld [vmem:[%s10082_s5] ss:$8 sps:$4 sm:$0xff]  }
 0xcdf   :  { %v1385_v59 = vadd.f32 %v1384_v57, %v1340_v50  ;;  %v1466_v60 = vcombine.low %v1457_v54, %v1459_v58  ;;  %v1386_v61 = vpop.f32.mrb[30].mxu1  ;;  %v1461_v63 = vpop.f32.mrb[38].mxu0  ;;  %v8520_v54 = vld [vmem:[%s10082_s5 + $0x14] ss:$8 sps:$4 sm:$0xff]   ;;  %v8534_v57 = vld [vmem:[%s10082_s5 + $0x24] ss:$8 sps:$4 sm:$0xff]  }
 0xce0   :  { %v1387_v8 = vpop.f32.mrb[31].mxu1  ;;  %v1462_v41 = vpop.f32.mrb[39].mxu0  ;;  %v1389_v62 = vadd.f32 %v1383_v56, %v8257_v24  ;;  %v8528_v56 = vld [vmem:[%s10082_s5 + $0x10] ss:$8 sps:$4 sm:$0xff]   ;;  %v8538_v58 = vld [vmem:[#allocation7 + $0x4] ss:$8 sps:$4 sm:$0xff]  }
 0xce1   :  { %v1390_v42 = vadd.f32 %v1385_v59, %v8248_v19  ;;  %v1473_v44 = vrot.slane %v1466_v60, %v8106_v27  ;;  %v8544_v59 = vld [vmem:[%s10082_s5 + $0x20] ss:$8 sps:$4 sm:$0xff]   ;;  %v8551_v60 = vld [vmem:[%s10082_s5 + $0x34] ss:$8 sps:$4 sm:$0xff]   ;;  %v8564_v8 = vld [vmem:[%s10082_s5 + $0x30] ss:$8 sps:$4 sm:$0xff]  }
 0xce2   :  { %v6888_v13 = vmul.f32 -1.442695, %v1389_v62  ;;  %v8554_v61 = vld [vmem:[#allocation7] ss:$8 sps:$4 sm:$0xff]   ;;  %v8558_v63 = vld [vmem:[#allocation7 + $0x14] ss:$8 sps:$4 sm:$0xff]  }
 0xce3   :  { %7218 = vtanh.f32 %v1390_v42  ;;  %v1480_v45 = vrot.slane %v1473_v44, %v8106_v27  ;;  %v6889_v33 = vmul.f32 -1.442695, %v1390_v42  ;;  %v8568_v41 = vld [vmem:[#allocation7 + $0x10] ss:$8 sps:$4 sm:$0xff]   ;;  %v8571_v42 = vld [vmem:[#allocation7 + $0x24] ss:$8 sps:$4 sm:$0xff]  }
 0xce4   :  { %7220 = vpow2.f32 %v6888_v13  ;;  %v8574_v44 = vld [vmem:[#allocation7 + $0x20] ss:$8 sps:$4 sm:$0xff]  }
 0xce5   :  { %v1482_v49 = vadd.f32 %v1480_v45, %v1422_v47  ;;  %v8577_v45 = vld [vmem:[#allocation7 + $0x34] ss:$8 sps:$4 sm:$0xff]   ;;  %v8580_v47 = vld [vmem:[#allocation7 + $0x30] ss:$8 sps:$4 sm:$0xff]  }
 0xce7   :  { %1490 = vrot.lane.b32.xlu1 %v1482_v49, %s7941_s3  ;;  %v6891_v20 = vmul.f32 -1.442695, %v1482_v49  ;;  %v8586_v49 = vld [vmem:[%s10082_s5 + $0x4] ss:$8 sps:$4 sm:$0xff]  }
 0xce9   :  { %7222 = vpow2.f32 %v6891_v20 }
 0xced   :  { %v7219_v55 = vpop.eup %7218 }
 0xcee   :  { %1406 = vrot.lane.b32.xlu0 %v7219_v55, %s7941_s3  ;;  %v7221_v21 = vpop.eup %7220 }
 0xcef   :  { %v1397_v17 = vadd.f32 1.0, %v7221_v21 }
 0xcf1   :  { %7224 = vrcp.f32 %v1397_v17 }
 0xcf3   :  { %v7223_v22 = vpop.eup %7222 }
 0xcf4   :  { %v1486_v30 = vadd.f32 1.0, %v7223_v22 }
 0xcf6   :  { %7226 = vrcp.f32 %v1486_v30 }
 0xcfb   :  { %v7225_v25 = vpop.eup %7224 }
 0xcfc   :  { %v1404_v3 = vmul.f32 %v7225_v25, %v8406_v31 }
 0xd00   :  { %v7227_v29 = vpop.eup %7226 }
 0xd01   :  { %v1495_v6 = vmul.f32 %v7227_v29, %v8411_v4  ;;  %v1504_v48 = vrot.slane %v7227_v29, 1 }
 0xd59   :  { %v1491_v16 = vpop.permute.xlu1 %1490 }
 0xd5a   :  { %v1492_v23 = vrot.slane %v1491_v16, 1 }
 0xd5c   :  { %7228 = vtanh.f32 %v1492_v23 }
 0xd60   :  { %v1407_v28 = vpop.permute.xlu0 %1406 }
 0xd61   :  { %v1409_v34 = vmul.f32 %v7225_v25, %v1407_v28 }
 0xd63   :  { %1411 = vrot.lane.b32.xlu1 %v1409_v34, %s7941_s3 }
 0xd66   :  { %v7229_v32 = vpop.eup %7228 }
 0xd67   :  { %v1496_v26 = vmul.f32 %v7229_v32, %v7227_v29 }
 0xd69   :  { %1498 = vrot.lane.b32.xlu0 %v1496_v26, %s7941_s3 }
 0xdd5   :  { %v1412_v5 = vpop.permute.xlu1 %1411 }
 0xdd6   :  { %v8494_v7 = vadd.f32 %v1412_v5, %v1404_v3 }
 0xdd8   :  { %7230 = vtanh.f32 %v8494_v7 }
 0xddb   :  { %v1499_v10 = vpop.permute.xlu0 %1498 }
 0xddc   :  { %v8498_v11 = vadd.f32 %v1499_v10, %v1495_v6  ;;  %v1634_v10 = vld [vmem:[#allocation2 + $0x6] ss:$8 sm:$0x3] }
 0xdde   :  { %7232 = vtanh.f32 %v8498_v11 }
 0xddf   :  { %7234 = vpow2.f32 %v6889_v33 }
 0xde2   :  { %v7231_v12 = vpop.eup %7230 }
 0xde3   :  { %1417 = vrot.lane.b32.xlu1 %v7231_v12, %s7941_s3 }
 0xde8   :  { %v7233_v2 = vpop.eup %7232 }
 0xde9   :  { %1507 = vrot.lane.b32.xlu0 %v7233_v2, %s7941_s3  ;;  %v7235_v31 = vpop.eup %7234 }
 0xdea   :  { %v1398_v37 = vadd.f32 1.0, %v7235_v31 }
 0xdec   :  { %7236 = vrcp.f32 %v1398_v37 }
 0xdf6   :  { %v7237_v39 = vpop.eup %7236 }
 0xe55   :  { %v1418_v18 = vpop.permute.xlu1 %1417 }
 0xe56   :  { %v1420_v35 = vmul.f32 %v7237_v39, %v1418_v18 }
 0xe58   :  { %v1512_v4 = vpack.c.bf16 %v1420_v35, %v1420_v35 }
 0xe5a   :  { %6892 = vmatmul.mubr.msk.bf16.vlgmr.msra.gmra.mrb[32].mxu1 %vm272_vm2, %v1512_v4 }
 0xe5b   :  { %1636 = vmatpush1.bf16.msra.mxu1 %v8419_v9  ;;  %v1508_v50 = vpop.permute.xlu0 %1507  ;;  %1667 = vmatprep.mubr.bf16.mxu1 %v7939_v1 }
 0xe5c   :  { %v1510_v51 = vmul.f32 %v1508_v50, %v1504_v48  ;;  %1637 = vmatprep.subr.bf16.mxu1 %v8426_v36 }
 0xe5e   :  { %v1511_v52 = vpack.c.bf16 %v1510_v51, %v1510_v51 }
 0xe5f   :  { %1638 = vmatpush1.bf16.msra.mxu1 %v8432_v14 }
 0xe60   :  { %6893 = vmatmul.mubr.msk.bf16.vlgmr.msra.gmra.mrb[40].mxu0 %vm272_vm2, %v1511_v52  ;;  %1639 = vmatprep.subr.bf16.mxu1 %v8438_v40 }
 0xe61   :  { %1729 = vmatpush1.bf16.msra.mxu0 %v8513_v53  ;;  %1760 = vmatprep.mubr.bf16.mxu0 %v7939_v1 }
 0xe62   :  { %1730 = vmatprep.subr.bf16.mxu0 %v8520_v54 }
 0xe63   :  { %1640 = vmatpush1.bf16.msra.mxu1 %v8444_v15 }
 0xe64   :  { %1641 = vmatprep.subr.bf16.mxu1 %v8450_v38 }
 0xe65   :  { %1731 = vmatpush1.bf16.msra.mxu0 %v8528_v56 }
 0xe66   :  { %1732 = vmatprep.subr.bf16.mxu0 %v8534_v57 }
 0xe67   :  { %1642 = vmatpush1.bf16.msra.mxu1 %v8456_v43 }
 0xe68   :  { %1772 = vmatprep.subr.bf16.mxu1 %v8538_v58 }
 0xe69   :  { %1733 = vmatpush1.bf16.msra.mxu0 %v8544_v59 }
 0xe6a   :  { %6896 = vmatmul.mubr.msk.bf16.vlgmr.msra.gmra.mrb[36].mxu1 %vm272_vm2, %v1511_v52  ;;  %1734 = vmatprep.subr.bf16.mxu0 %v8551_v60 }
 0xe6b   :  { %1773 = vmatpush1.bf16.msra.mxu1 %v8554_v61  ;;  %1804 = vmatprep.mubr.bf16.mxu1 %v7939_v1 }
 0xe6c   :  { %1774 = vmatprep.subr.bf16.mxu1 %v8558_v63 }
 0xe6d   :  { %1735 = vmatpush1.bf16.msra.mxu0 %v8564_v8 }
 0xe6e   :  { %1847 = vmatprep.subr.bf16.mxu0 %v8481_v46 }
 0xe6f   :  { %1775 = vmatpush1.bf16.msra.mxu1 %v8568_v41 }
 0xe70   :  { %1776 = vmatprep.subr.bf16.mxu1 %v8571_v42 }
 0xe73   :  { %1777 = vmatpush1.bf16.msra.mxu1 %v8574_v44 }
 0xe74   :  { %1778 = vmatprep.subr.bf16.mxu1 %v8577_v45 }
 0xe77   :  { %1779 = vmatpush1.bf16.msra.mxu1 %v8580_v47 }
 0xe78   :  { %1940 = vmatprep.subr.bf16.mxu1 %v8586_v49 }
 0xf2d   :  { %v1550_v55 = vpop.f32.mrb[32].mxu1 }
 0xf2e   :  { %v1552_v62 = vpop.f32.mrb[33].mxu1 }
 0xf2f   :  { %v1554_v13 = vpop.f32.mrb[34].mxu1 }
 0xf30   :  { %v1555_v20 = vpop.f32.mrb[35].mxu1 }
 0xf33   :  { %v1594_v21 = vpop.f32.mrb[40].mxu0 }
 0xf34   :  { %v1595_v17 = vadd.f32 %v1594_v21, %v1550_v55  ;;  %v1596_v22 = vpop.f32.mrb[41].mxu0 }
 0xf35   :  { %v1597_v30 = vadd.f32 %v1596_v22, %v1552_v62  ;;  %v1598_v16 = vpop.f32.mrb[42].mxu0 }
 0xf36   :  { %v1599_v23 = vpop.f32.mrb[43].mxu0  ;;  %v1601_v2 = vadd.f32 %v1595_v17, %v8257_v24 }
 0xf37   :  { %v1602_v25 = vadd.f32 %v1597_v30, %v8248_v19 }
 0xf38   :  { %v6894_v33 = vmul.f32 -1.442695, %v1601_v2 }
 0xf39   :  { %7238 = vtanh.f32 %v1602_v25 }
 0xf3a   :  { %7240 = vpow2.f32 %v6894_v33 }
 0xf3d   :  { %v1669_v28 = vpop.f32.mrb[36].mxu1 }
 0xf3e   :  { %v1671_v34 = vpop.f32.mrb[37].mxu1 }
 0xf3f   :  { %v1678_v29 = vcombine.low %v1669_v28, %v1671_v34  ;;  %v1673_v32 = vpop.f32.mrb[38].mxu1  ;;  %v6895_v34 = vmul.f32 -1.442695, %v1602_v25 }
 0xf40   :  { %v1674_v26 = vpop.f32.mrb[39].mxu1 }
 0xf41   :  { %v1685_v3 = vrot.slane %v1678_v29, %v8106_v27 }
 0xf43   :  { %v7239_v5 = vpop.eup %7238  ;;  %v1692_v6 = vrot.slane %v1685_v3, %v8106_v27 }
 0xf44   :  { %1618 = vrot.lane.b32.xlu1 %v7239_v5, %s7941_s3  ;;  %v7241_v31 = vpop.eup %7240 }
 0xf45   :  { %v1694_v12 = vadd.f32 %v1692_v6, %v1634_v10  ;;  %v1609_v39 = vadd.f32 1.0, %v7241_v31 }
 0xf47   :  { %1702 = vrot.lane.b32.xlu0 %v1694_v12, %s7941_s3  ;;  %v6897_v37 = vmul.f32 -1.442695, %v1694_v12 }
 0xf49   :  { %7242 = vpow2.f32 %v6897_v37 }
 0xf4a   :  { %7244 = vrcp.f32 %v1609_v39 }
 0xf53   :  { %v7243_v18 = vpop.eup %7242 }
 0xf54   :  { %v7245_v35 = vpop.eup %7244  ;;  %v1698_v48 = vadd.f32 1.0, %v7243_v18 }
 0xf55   :  { %v1616_v20 = vmul.f32 %v7245_v35, %v8494_v7 }
 0xf56   :  { %7246 = vrcp.f32 %v1698_v48 }
 0xf60   :  { %v7247_v55 = vpop.eup %7246 }
 0xf61   :  { %v1707_v30 = vmul.f32 %v7247_v55, %v8498_v11  ;;  %v1716_v11 = vrot.slane %v7247_v55, 1 }
 0xfb6   :  { %v1619_v4 = vpop.permute.xlu1 %1618 }
 0xfb7   :  { %v1621_v50 = vmul.f32 %v7245_v35, %v1619_v4 }
 0xfb9   :  { %v1703_v51 = vpop.permute.xlu0 %1702  ;;  %1623 = vrot.lane.b32.xlu1 %v1621_v50, %s7941_s3 }
 0xfba   :  { %v1704_v52 = vrot.slane %v1703_v51, 1 }
 0xfbc   :  { %7248 = vtanh.f32 %v1704_v52 }
 0xfc6   :  { %v7249_v62 = vpop.eup %7248 }
 0xfc7   :  { %v1708_v13 = vmul.f32 %v7249_v62, %v7247_v55 }
 0xfc9   :  { %1710 = vrot.lane.b32.xlu0 %v1708_v13, %s7941_s3 }
0x102b   :  { %v1624_v21 = vpop.permute.xlu1 %1623 }
0x102c   :  { %v8598_v17 = vadd.f32 %v1624_v21, %v1616_v20 }
0x102e   :  { %7250 = vtanh.f32 %v8598_v17 }
0x1038   :  { %v7251_v22 = vpop.eup %7250 }
0x1039   :  { %1629 = vrot.lane.b32.xlu1 %v7251_v22, %s7941_s3  ;;  %v1846_v22 = vld [vmem:[#allocation2 + $0x7] ss:$8 sm:$0x3] }
0x103b   :  { %v1711_v16 = vpop.permute.xlu0 %1710 }
0x103c   :  { %v8603_v23 = vadd.f32 %v1711_v16, %v1707_v30 }
0x103e   :  { %7252 = vtanh.f32 %v8603_v23 }
0x103f   :  { %7254 = vpow2.f32 %v6895_v34 }
0x1048   :  { %v7253_v28 = vpop.eup %7252 }
0x1049   :  { %1719 = vrot.lane.b32.xlu0 %v7253_v28, %s7941_s3  ;;  %v7255_v7 = vpop.eup %7254 }
0x104a   :  { %v1610_v29 = vadd.f32 1.0, %v7255_v7 }
0x104c   :  { %7256 = vrcp.f32 %v1610_v29 }
0x1056   :  { %v7257_v32 = vpop.eup %7256 }
0x10ab   :  { %v1630_v26 = vpop.permute.xlu1 %1629 }
0x10ac   :  { %v1632_v3 = vmul.f32 %v7257_v32, %v1630_v26 }
0x10ae   :  { %v1724_v5 = vpack.c.bf16 %v1632_v3, %v1632_v3 }
0x10b0   :  { %6898 = vmatmul.mubr.msk.bf16.vlgmr.msra.gmra.mrb[44].mxu0 %vm272_vm2, %v1724_v5 }
0x10b1   :  { %1848 = vmatpush1.bf16.msra.mxu0 %v8419_v9  ;;  %1879 = vmatprep.mubr.bf16.mxu0 %v7939_v1 }
0x10b2   :  { %1849 = vmatprep.subr.bf16.mxu0 %v8426_v36 }
0x10b5   :  { %1850 = vmatpush1.bf16.msra.mxu0 %v8432_v14 }
0x10b6   :  { %1851 = vmatprep.subr.bf16.mxu0 %v8438_v40 }
0x10b9   :  { %1852 = vmatpush1.bf16.msra.mxu0 %v8444_v15 }
0x10ba   :  { %1853 = vmatprep.subr.bf16.mxu0 %v8450_v38 }
0x10bb   :  { %v1720_v25 = vpop.permute.xlu0 %1719 }
0x10bc   :  { %v1722_v6 = vmul.f32 %v1720_v25, %v1716_v11 }
0x10bd   :  { %1854 = vmatpush1.bf16.msra.mxu0 %v8456_v43 }
0x10be   :  { %v1723_v10 = vpack.c.bf16 %v1722_v6, %v1722_v6  ;;  %1984 = vmatprep.subr.bf16.mxu0 %v8538_v58 }
0x10c0   :  { %6899 = vmatmul.mubr.msk.bf16.vlgmr.msra.gmra.mrb[40].mxu1 %vm272_vm2, %v1723_v10  ;;  %6902 = vmatmul.mubr.msk.bf16.vlgmr.msra.gmra.mrb[48].mxu0 %vm272_vm2, %v1723_v10 }
0x10c1   :  { %1941 = vmatpush1.bf16.msra.mxu1 %v8513_v53  ;;  %1985 = vmatpush1.bf16.msra.mxu0 %v8554_v61 }
0x10c2   :  { %1942 = vmatprep.subr.bf16.mxu1 %v8520_v54  ;;  %1986 = vmatprep.subr.bf16.mxu0 %v8558_v63 }
0x10c3   :  { %1972 = vmatprep.mubr.bf16.mxu1 %v7939_v1  ;;  %2016 = vmatprep.mubr.bf16.mxu0 %v7939_v1 }
0x10c5   :  { %1943 = vmatpush1.bf16.msra.mxu1 %v8528_v56  ;;  %1987 = vmatpush1.bf16.msra.mxu0 %v8568_v41 }
0x10c6   :  { %1944 = vmatprep.subr.bf16.mxu1 %v8534_v57  ;;  %1988 = vmatprep.subr.bf16.mxu0 %v8571_v42 }
0x10c9   :  { %1945 = vmatpush1.bf16.msra.mxu1 %v8544_v59  ;;  %1989 = vmatpush1.bf16.msra.mxu0 %v8574_v44 }
0x10ca   :  { %1946 = vmatprep.subr.bf16.mxu1 %v8551_v60  ;;  %1990 = vmatprep.subr.bf16.mxu0 %v8577_v45 }
0x10cd   :  { %1947 = vmatpush1.bf16.msra.mxu1 %v8564_v8  ;;  %1991 = vmatpush1.bf16.msra.mxu0 %v8580_v47 }
0x10ce   :  { %2059 = vmatprep.subr.bf16.mxu1 %v8481_v46  ;;  %2152 = vmatprep.subr.bf16.mxu0 %v8586_v49 }
0x1183   :  { %v1762_v12 = vpop.f32.mrb[44].mxu0 }
0x1184   :  { %v1764_v2 = vpop.f32.mrb[45].mxu0 }
0x1185   :  { %v1766_v33 = vpop.f32.mrb[46].mxu0 }
0x1186   :  { %v1767_v31 = vpop.f32.mrb[47].mxu0 }
0x1193   :  { %v1806_v37 = vpop.f32.mrb[40].mxu1  ;;  %v1881_v39 = vpop.f32.mrb[48].mxu0 }
0x1194   :  { %v1807_v18 = vadd.f32 %v1806_v37, %v1762_v12  ;;  %v1808_v35 = vpop.f32.mrb[41].mxu1  ;;  %v1883_v4 = vpop.f32.mrb[49].mxu0 }
0x1195   :  { %v1809_v48 = vadd.f32 %v1808_v35, %v1764_v2  ;;  %v1890_v50 = vcombine.low %v1881_v39, %v1883_v4  ;;  %v1810_v51 = vpop.f32.mrb[42].mxu1  ;;  %v1885_v52 = vpop.f32.mrb[50].mxu0 }
0x1196   :  { %v1811_v55 = vpop.f32.mrb[43].mxu1  ;;  %v1886_v62 = vpop.f32.mrb[51].mxu0  ;;  %v1813_v28 = vadd.f32 %v1807_v18, %v8257_v24 }
0x1197   :  { %v1814_v13 = vadd.f32 %v1809_v48, %v8248_v19  ;;  %v1897_v20 = vrot.slane %v1890_v50, %v8106_v27 }
0x1198   :  { %v6900_v34 = vmul.f32 -1.442695, %v1813_v28 }
0x1199   :  { %7258 = vtanh.f32 %v1814_v13  ;;  %v1904_v21 = vrot.slane %v1897_v20, %v8106_v27  ;;  %v6901_v51 = vmul.f32 -1.442695, %v1814_v13 }
0x119a   :  { %7260 = vpow2.f32 %v6900_v34 }
0x119b   :  { %v1906_v30 = vadd.f32 %v1904_v21, %v1846_v22 }
0x119d   :  { %1914 = vrot.lane.b32.xlu1 %v1906_v30, %s7941_s3  ;;  %v6903_v7 = vmul.f32 -1.442695, %v1906_v30 }
0x119f   :  { %7262 = vpow2.f32 %v6903_v7 }
0x11a3   :  { %v7259_v16 = vpop.eup %7258 }
0x11a4   :  { %1830 = vrot.lane.b32.xlu0 %v7259_v16, %s7941_s3  ;;  %v7261_v29 = vpop.eup %7260 }
0x11a5   :  { %v1821_v32 = vadd.f32 1.0, %v7261_v29 }
0x11a7   :  { %7264 = vrcp.f32 %v1821_v32 }
0x11a9   :  { %v7263_v26 = vpop.eup %7262 }
0x11aa   :  { %v1910_v3 = vadd.f32 1.0, %v7263_v26 }
0x11ac   :  { %7266 = vrcp.f32 %v1910_v3 }
0x11b1   :  { %v7265_v25 = vpop.eup %7264 }
0x11b2   :  { %v1828_v31 = vmul.f32 %v7265_v25, %v8598_v17 }
0x11b6   :  { %v7267_v12 = vpop.eup %7266 }
0x11b7   :  { %v1919_v18 = vmul.f32 %v7267_v12, %v8603_v23  ;;  %v1928_v21 = vrot.slane %v7267_v12, 1 }
0x120f   :  { %v1915_v5 = vpop.permute.xlu1 %1914 }
0x1210   :  { %v1916_v11 = vrot.slane %v1915_v5, 1 }
0x1212   :  { %7268 = vtanh.f32 %v1916_v11 }
0x1216   :  { %v1831_v6 = vpop.permute.xlu0 %1830 }
0x1217   :  { %v1833_v10 = vmul.f32 %v7265_v25, %v1831_v6 }
0x1219   :  { %1835 = vrot.lane.b32.xlu1 %v1833_v10, %s7941_s3 }
0x121c   :  { %v7269_v2 = vpop.eup %7268 }
0x121d   :  { %v1920_v33 = vmul.f32 %v7269_v2, %v7267_v12 }
0x121f   :  { %1922 = vrot.lane.b32.xlu0 %v1920_v33, %s7941_s3 }
0x128b   :  { %v1836_v37 = vpop.permute.xlu1 %1835 }
0x128c   :  { %v8646_v39 = vadd.f32 %v1836_v37, %v1828_v31 }
0x128e   :  { %7270 = vtanh.f32 %v8646_v39 }
0x1291   :  { %v1923_v35 = vpop.permute.xlu0 %1922 }
0x1292   :  { %v8650_v4 = vadd.f32 %v1923_v35, %v1919_v18  ;;  %v2058_v35 = vld [vmem:[#allocation2 + $0x10] ss:$8 sm:$0x3] }
0x1294   :  { %7272 = vtanh.f32 %v8650_v4 }
0x1295   :  { %7274 = vpow2.f32 %v6901_v51 }
0x1298   :  { %v7271_v48 = vpop.eup %7270 }
0x1299   :  { %1841 = vrot.lane.b32.xlu1 %v7271_v48, %s7941_s3 }
0x129e   :  { %v7273_v50 = vpop.eup %7272 }
0x129f   :  { %1931 = vrot.lane.b32.xlu0 %v7273_v50, %s7941_s3  ;;  %v7275_v17 = vpop.eup %7274 }
0x12a0   :  { %v1822_v52 = vadd.f32 1.0, %v7275_v17 }
0x12a2   :  { %7276 = vrcp.f32 %v1822_v52 }
0x12ac   :  { %v7277_v55 = vpop.eup %7276 }
0x130b   :  { %v1842_v62 = vpop.permute.xlu1 %1841 }
0x130c   :  { %v1844_v20 = vmul.f32 %v7277_v55, %v1842_v62 }
0x130e   :  { %v1936_v23 = vpack.c.bf16 %v1844_v20, %v1844_v20 }
0x1310   :  { %6904 = vmatmul.mubr.msk.bf16.vlgmr.msra.gmra.mrb[44].mxu1 %vm272_vm2, %v1936_v23 }
0x1311   :  { %2060 = vmatpush1.bf16.msra.mxu1 %v8419_v9  ;;  %v1932_v22 = vpop.permute.xlu0 %1931  ;;  %2091 = vmatprep.mubr.bf16.mxu1 %v7939_v1 }
0x1312   :  { %v1934_v30 = vmul.f32 %v1932_v22, %v1928_v21  ;;  %2061 = vmatprep.subr.bf16.mxu1 %v8426_v36 }
0x1314   :  { %v1935_v13 = vpack.c.bf16 %v1934_v30, %v1934_v30 }
0x1315   :  { %2062 = vmatpush1.bf16.msra.mxu1 %v8432_v14 }
0x1316   :  { %6905 = vmatmul.mubr.msk.bf16.vlgmr.msra.gmra.mrb[52].mxu0 %vm272_vm2, %v1935_v13  ;;  %2063 = vmatprep.subr.bf16.mxu1 %v8438_v40 }
0x1317   :  { %2153 = vmatpush1.bf16.msra.mxu0 %v8513_v53  ;;  %2184 = vmatprep.mubr.bf16.mxu0 %v7939_v1 }
0x1318   :  { %2154 = vmatprep.subr.bf16.mxu0 %v8520_v54 }
0x1319   :  { %2064 = vmatpush1.bf16.msra.mxu1 %v8444_v15 }
0x131a   :  { %2065 = vmatprep.subr.bf16.mxu1 %v8450_v38 }
0x131b   :  { %2155 = vmatpush1.bf16.msra.mxu0 %v8528_v56 }
0x131c   :  { %2156 = vmatprep.subr.bf16.mxu0 %v8534_v57 }
0x131d   :  { %2066 = vmatpush1.bf16.msra.mxu1 %v8456_v43 }
0x131e   :  { %2196 = vmatprep.subr.bf16.mxu1 %v8538_v58 }
0x131f   :  { %2157 = vmatpush1.bf16.msra.mxu0 %v8544_v59 }
0x1320   :  { %6908 = vmatmul.mubr.msk.bf16.vlgmr.msra.gmra.mrb[48].mxu1 %vm272_vm2, %v1935_v13  ;;  %2158 = vmatprep.subr.bf16.mxu0 %v8551_v60 }
0x1321   :  { %2197 = vmatpush1.bf16.msra.mxu1 %v8554_v61  ;;  %2228 = vmatprep.mubr.bf16.mxu1 %v7939_v1 }
0x1322   :  { %2198 = vmatprep.subr.bf16.mxu1 %v8558_v63 }
0x1323   :  { %2159 = vmatpush1.bf16.msra.mxu0 %v8564_v8 }
0x1324   :  { %2271 = vmatprep.subr.bf16.mxu0 %v8481_v46 }
0x1325   :  { %2199 = vmatpush1.bf16.msra.mxu1 %v8568_v41 }
0x1326   :  { %2200 = vmatprep.subr.bf16.mxu1 %v8571_v42 }
0x1329   :  { %2201 = vmatpush1.bf16.msra.mxu1 %v8574_v44 }
0x132a   :  { %2202 = vmatprep.subr.bf16.mxu1 %v8577_v45 }
0x132d   :  { %2203 = vmatpush1.bf16.msra.mxu1 %v8580_v47 }
0x132e   :  { %2364 = vmatprep.subr.bf16.mxu1 %v8586_v49 }
0x13e3   :  { %v1974_v16 = vpop.f32.mrb[44].mxu1 }
0x13e4   :  { %v1976_v28 = vpop.f32.mrb[45].mxu1 }
0x13e5   :  { %v1978_v34 = vpop.f32.mrb[46].mxu1 }
0x13e6   :  { %v1979_v7 = vpop.f32.mrb[47].mxu1 }
0x13e9   :  { %v2018_v29 = vpop.f32.mrb[52].mxu0 }
0x13ea   :  { %v2019_v32 = vadd.f32 %v2018_v29, %v1974_v16  ;;  %v2020_v26 = vpop.f32.mrb[53].mxu0 }
0x13eb   :  { %v2021_v3 = vadd.f32 %v2020_v26, %v1976_v28  ;;  %v2022_v5 = vpop.f32.mrb[54].mxu0 }
0x13ec   :  { %v2023_v11 = vpop.f32.mrb[55].mxu0  ;;  %v2025_v50 = vadd.f32 %v2019_v32, %v8257_v24 }
0x13ed   :  { %v2026_v25 = vadd.f32 %v2021_v3, %v8248_v19 }
0x13ee   :  { %v6906_v51 = vmul.f32 -1.442695, %v2025_v50 }
0x13ef   :  { %7278 = vtanh.f32 %v2026_v25 }
0x13f0   :  { %7280 = vpow2.f32 %v6906_v51 }
0x13f3   :  { %v2093_v6 = vpop.f32.mrb[48].mxu1 }
0x13f4   :  { %v2095_v10 = vpop.f32.mrb[49].mxu1 }
0x13f5   :  { %v2102_v12 = vcombine.low %v2093_v6, %v2095_v10  ;;  %v2097_v2 = vpop.f32.mrb[50].mxu1  ;;  %v6907_v10 = vmul.f32 -1.442695, %v2026_v25 }
0x13f6   :  { %v2098_v33 = vpop.f32.mrb[51].mxu1 }
0x13f7   :  { %v2109_v31 = vrot.slane %v2102_v12, %v8106_v27 }
0x13f9   :  { %v7279_v37 = vpop.eup %7278  ;;  %v2116_v18 = vrot.slane %v2109_v31, %v8106_v27 }
0x13fa   :  { %2042 = vrot.lane.b32.xlu1 %v7279_v37, %s7941_s3  ;;  %v7281_v17 = vpop.eup %7280 }
0x13fb   :  { %v2118_v48 = vadd.f32 %v2116_v18, %v2058_v35  ;;  %v2033_v55 = vadd.f32 1.0, %v7281_v17 }
0x13fd   :  { %2126 = vrot.lane.b32.xlu0 %v2118_v48, %s7941_s3  ;;  %v6909_v52 = vmul.f32 -1.442695, %v2118_v48 }
0x13ff   :  { %7282 = vpow2.f32 %v6909_v52 }
0x1400   :  { %7284 = vrcp.f32 %v2033_v55 }
0x1409   :  { %v7283_v62 = vpop.eup %7282 }
0x140a   :  { %v7285_v20 = vpop.eup %7284  ;;  %v2122_v21 = vadd.f32 1.0, %v7283_v62 }
0x140b   :  { %v2040_v7 = vmul.f32 %v7285_v20, %v8646_v39 }
0x140c   :  { %7286 = vrcp.f32 %v2122_v21 }
0x1416   :  { %v7287_v16 = vpop.eup %7286 }
0x1417   :  { %v2131_v3 = vmul.f32 %v7287_v16, %v8650_v4  ;;  %v2140_v4 = vrot.slane %v7287_v16, 1 }
0x146c   :  { %v2043_v23 = vpop.permute.xlu1 %2042 }
0x146d   :  { %v2045_v22 = vmul.f32 %v7285_v20, %v2043_v23 }
0x146f   :  { %v2127_v30 = vpop.permute.xlu0 %2126  ;;  %2047 = vrot.lane.b32.xlu1 %v2045_v22, %s7941_s3 }
0x1470   :  { %v2128_v13 = vrot.slane %v2127_v30, 1 }
0x1472   :  { %7288 = vtanh.f32 %v2128_v13 }
0x147c   :  { %v7289_v28 = vpop.eup %7288 }
0x147d   :  { %v2132_v34 = vmul.f32 %v7289_v28, %v7287_v16 }
0x147f   :  { %2134 = vrot.lane.b32.xlu0 %v2132_v34, %s7941_s3  ;;  %v2270_v34 = vld [vmem:[#allocation2 + $0x11] ss:$8 sm:$0x3] }
0x14e1   :  { %v2048_v29 = vpop.permute.xlu1 %2047 }
0x14e2   :  { %v8694_v32 = vadd.f32 %v2048_v29, %v2040_v7 }
0x14e4   :  { %7290 = vtanh.f32 %v8694_v32 }
0x14ee   :  { %v7291_v26 = vpop.eup %7290 }
0x14ef   :  { %2053 = vrot.lane.b32.xlu1 %v7291_v26, %s7941_s3 }
0x14f1   :  { %v2135_v5 = vpop.permute.xlu0 %2134 }
0x14f2   :  { %v8699_v11 = vadd.f32 %v2135_v5, %v2131_v3 }
0x14f4   :  { %7292 = vtanh.f32 %v8699_v11 }
0x14f5   :  { %7294 = vpow2.f32 %v6907_v10 }
0x14fe   :  { %v7293_v6 = vpop.eup %7292 }
0x14ff   :  { %2143 = vrot.lane.b32.xlu0 %v7293_v6, %s7941_s3  ;;  %v7295_v39 = vpop.eup %7294 }
0x1500   :  { %v2034_v12 = vadd.f32 1.0, %v7295_v39 }
0x1502   :  { %7296 = vrcp.f32 %v2034_v12 }
0x150c   :  { %v7297_v2 = vpop.eup %7296 }
0x1561   :  { %v2054_v33 = vpop.permute.xlu1 %2053 }
0x1562   :  { %v2056_v31 = vmul.f32 %v7297_v2, %v2054_v33 }
0x1564   :  { %v2148_v37 = vpack.c.bf16 %v2056_v31, %v2056_v31 }
0x1566   :  { %6910 = vmatmul.mubr.msk.bf16.vlgmr.msra.gmra.mrb[56].mxu0 %vm272_vm2, %v2148_v37 }
0x1567   :  { %2272 = vmatpush1.bf16.msra.mxu0 %v8419_v9  ;;  %2303 = vmatprep.mubr.bf16.mxu0 %v7939_v1 }
0x1568   :  { %2273 = vmatprep.subr.bf16.mxu0 %v8426_v36 }
0x156b   :  { %2274 = vmatpush1.bf16.msra.mxu0 %v8432_v14 }
0x156c   :  { %2275 = vmatprep.subr.bf16.mxu0 %v8438_v40 }
0x156f   :  { %2276 = vmatpush1.bf16.msra.mxu0 %v8444_v15 }
0x1570   :  { %2277 = vmatprep.subr.bf16.mxu0 %v8450_v38 }
0x1571   :  { %v2144_v25 = vpop.permute.xlu0 %2143 }
0x1572   :  { %v2146_v18 = vmul.f32 %v2144_v25, %v2140_v4 }
0x1573   :  { %2278 = vmatpush1.bf16.msra.mxu0 %v8456_v43 }
0x1574   :  { %v2147_v35 = vpack.c.bf16 %v2146_v18, %v2146_v18  ;;  %2408 = vmatprep.subr.bf16.mxu0 %v8538_v58 }
0x1576   :  { %6911 = vmatmul.mubr.msk.bf16.vlgmr.msra.gmra.mrb[52].mxu1 %vm272_vm2, %v2147_v35  ;;  %6914 = vmatmul.mubr.msk.bf16.vlgmr.msra.gmra.mrb[60].mxu0 %vm272_vm2, %v2147_v35 }
0x1577   :  { %2365 = vmatpush1.bf16.msra.mxu1 %v8513_v53  ;;  %2409 = vmatpush1.bf16.msra.mxu0 %v8554_v61 }
0x1578   :  { %2366 = vmatprep.subr.bf16.mxu1 %v8520_v54  ;;  %2410 = vmatprep.subr.bf16.mxu0 %v8558_v63 }
0x1579   :  { %2396 = vmatprep.mubr.bf16.mxu1 %v7939_v1  ;;  %2440 = vmatprep.mubr.bf16.mxu0 %v7939_v1 }
0x157b   :  { %2367 = vmatpush1.bf16.msra.mxu1 %v8528_v56  ;;  %2411 = vmatpush1.bf16.msra.mxu0 %v8568_v41 }
0x157c   :  { %2368 = vmatprep.subr.bf16.mxu1 %v8534_v57  ;;  %2412 = vmatprep.subr.bf16.mxu0 %v8571_v42 }
0x157f   :  { %2369 = vmatpush1.bf16.msra.mxu1 %v8544_v59  ;;  %2413 = vmatpush1.bf16.msra.mxu0 %v8574_v44 }
0x1580   :  { %2370 = vmatprep.subr.bf16.mxu1 %v8551_v60  ;;  %2414 = vmatprep.subr.bf16.mxu0 %v8577_v45 }
0x1583   :  { %2371 = vmatpush1.bf16.msra.mxu1 %v8564_v8  ;;  %2415 = vmatpush1.bf16.msra.mxu0 %v8580_v47 }
0x1584   :  { %2483 = vmatprep.subr.bf16.mxu1 %v8481_v46  ;;  %2576 = vmatprep.subr.bf16.mxu0 %v8586_v49 }
0x1639   :  { %v2186_v15 = vpop.f32.mrb[56].mxu0 }
0x163a   :  { %v2188_v38 = vpop.f32.mrb[57].mxu0 }
0x163b   :  { %v2190_v43 = vpop.f32.mrb[58].mxu0 }
0x163c   :  { %v2191_v48 = vpop.f32.mrb[59].mxu0 }
0x1649   :  { %v2230_v50 = vpop.f32.mrb[52].mxu1  ;;  %v2305_v51 = vpop.f32.mrb[60].mxu0 }
0x164a   :  { %v2231_v17 = vadd.f32 %v2230_v50, %v2186_v15  ;;  %v2232_v52 = vpop.f32.mrb[53].mxu1  ;;  %v2307_v55 = vpop.f32.mrb[61].mxu0 }
0x164b   :  { %v2233_v62 = vadd.f32 %v2232_v52, %v2188_v38  ;;  %v2314_v20 = vcombine.low %v2305_v51, %v2307_v55  ;;  %v2234_v23 = vpop.f32.mrb[54].mxu1  ;;  %v2309_v21 = vpop.f32.mrb[62].mxu0 }
0x164c   :  { %v2235_v22 = vpop.f32.mrb[55].mxu1  ;;  %v2310_v30 = vpop.f32.mrb[63].mxu0  ;;  %v2237_v26 = vadd.f32 %v2231_v17, %v8257_v24 }
0x164d   :  { %v2238_v13 = vadd.f32 %v2233_v62, %v8248_v19  ;;  %v2321_v16 = vrot.slane %v2314_v20, %v8106_v27 }
0x164e   :  { %v6912_v3 = vmul.f32 -1.442695, %v2237_v26 }
0x164f   :  { %7298 = vtanh.f32 %v2238_v13  ;;  %v2328_v28 = vrot.slane %v2321_v16, %v8106_v27  ;;  %v6913_v55 = vmul.f32 -1.442695, %v2238_v13 }
0x1650   :  { %7300 = vpow2.f32 %v6912_v3 }
0x1651   :  { %v2330_v7 = vadd.f32 %v2328_v28, %v2270_v34 }
0x1653   :  { %2338 = vrot.lane.b32.xlu1 %v2330_v7, %s7941_s3  ;;  %v6915_v5 = vmul.f32 -1.442695, %v2330_v7 }
0x1655   :  { %7302 = vpow2.f32 %v6915_v5 }
0x1659   :  { %v7299_v29 = vpop.eup %7298 }
0x165a   :  { %2254 = vrot.lane.b32.xlu0 %v7299_v29, %s7941_s3  ;;  %v7301_v6 = vpop.eup %7300 }
0x165b   :  { %v2245_v10 = vadd.f32 1.0, %v7301_v6 }
0x165d   :  { %7304 = vrcp.f32 %v2245_v10 }
0x165f   :  { %v7303_v39 = vpop.eup %7302 }
0x1660   :  { %v2334_v12 = vadd.f32 1.0, %v7303_v39 }
0x1662   :  { %7306 = vrcp.f32 %v2334_v12 }
0x1667   :  { %v7305_v31 = vpop.eup %7304 }
0x1668   :  { %v2252_v15 = vmul.f32 %v7305_v31, %v8694_v32 }
0x166c   :  { %v7307_v25 = vpop.eup %7306 }
0x166d   :  { %v2343_v48 = vmul.f32 %v7307_v25, %v8699_v11  ;;  %v2352_v22 = vrot.slane %v7307_v25, 1 }
0x16c5   :  { %v2339_v2 = vpop.permute.xlu1 %2338 }
0x16c6   :  { %v2340_v33 = vrot.slane %v2339_v2, 1 }
0x16c8   :  { %7308 = vtanh.f32 %v2340_v33 }
0x16cc   :  { %v2255_v37 = vpop.permute.xlu0 %2254 }
0x16cd   :  { %v2257_v4 = vmul.f32 %v7305_v31, %v2255_v37 }
0x16cf   :  { %2259 = vrot.lane.b32.xlu1 %v2257_v4, %s7941_s3 }
0x16d2   :  { %v7309_v18 = vpop.eup %7308 }
0x16d3   :  { %v2344_v35 = vmul.f32 %v7309_v18, %v7307_v25  ;;  %v2482_v25 = vld [vmem:[#allocation2 + $0x12] ss:$8 sm:$0x3] }
0x16d5   :  { %2346 = vrot.lane.b32.xlu0 %v2344_v35, %s7941_s3 }
0x1741   :  { %v2260_v38 = vpop.permute.xlu1 %2259 }
0x1742   :  { %v8742_v43 = vadd.f32 %v2260_v38, %v2252_v15 }
0x1744   :  { %7310 = vtanh.f32 %v8742_v43 }
0x1747   :  { %v2347_v50 = vpop.permute.xlu0 %2346 }
0x1748   :  { %v8746_v51 = vadd.f32 %v2347_v50, %v2343_v48 }
0x174a   :  { %7312 = vtanh.f32 %v8746_v51 }
0x174b   :  { %7314 = vpow2.f32 %v6913_v55 }
0x174e   :  { %v7311_v17 = vpop.eup %7310 }
0x174f   :  { %2265 = vrot.lane.b32.xlu1 %v7311_v17, %s7941_s3 }
0x1754   :  { %v7313_v52 = vpop.eup %7312 }
0x1755   :  { %2355 = vrot.lane.b32.xlu0 %v7313_v52, %s7941_s3  ;;  %v7315_v32 = vpop.eup %7314 }
0x1756   :  { %v2246_v62 = vadd.f32 1.0, %v7315_v32 }
0x1758   :  { %7316 = vrcp.f32 %v2246_v62 }
0x1762   :  { %v7317_v20 = vpop.eup %7316 }
0x17c1   :  { %v2266_v23 = vpop.permute.xlu1 %2265 }
0x17c2   :  { %v2268_v21 = vmul.f32 %v7317_v20, %v2266_v23 }
0x17c4   :  { %v2360_v11 = vpack.c.bf16 %v2268_v21, %v2268_v21 }
0x17c6   :  { %6916 = vmatmul.mubr.msk.bf16.vlgmr.msra.gmra.mrb[56].mxu1 %vm272_vm2, %v2360_v11 }
0x17c7   :  { %2484 = vmatpush1.bf16.msra.mxu1 %v8419_v9  ;;  %v2356_v30 = vpop.permute.xlu0 %2355  ;;  %2515 = vmatprep.mubr.bf16.mxu1 %v7939_v1  ;;  %v8764_v9 = vld [vmem:[%s10079_s2 + $0x20] ss:$8 sps:$4 sm:$0xff]  }
0x17c8   :  { %v2358_v16 = vmul.f32 %v2356_v30, %v2352_v22  ;;  %2485 = vmatprep.subr.bf16.mxu1 %v8426_v36  ;;  %v8770_v36 = vld [vmem:[%s10079_s2 + $0x34] ss:$8 sps:$4 sm:$0xff]  }
0x17ca   :  { %v2359_v13 = vpack.c.bf16 %v2358_v16, %v2358_v16 }
0x17cb   :  { %2486 = vmatpush1.bf16.msra.mxu1 %v8432_v14  ;;  %v8778_v14 = vld [vmem:[%s10079_s2 + $0x30] ss:$8 sps:$4 sm:$0xff]  }
0x17cc   :  { %6917 = vmatmul.mubr.msk.bf16.vlgmr.msra.gmra.mrb[64].mxu0 %vm272_vm2, %v2359_v13  ;;  %2487 = vmatprep.subr.bf16.mxu1 %v8438_v40 }
0x17cd   :  { %2577 = vmatpush1.bf16.msra.mxu0 %v8513_v53  ;;  %2608 = vmatprep.mubr.bf16.mxu0 %v7939_v1 }
0x17ce   :  { %2578 = vmatprep.subr.bf16.mxu0 %v8520_v54 }
0x17cf   :  { %2488 = vmatpush1.bf16.msra.mxu1 %v8764_v9 }
0x17d0   :  { %2489 = vmatprep.subr.bf16.mxu1 %v8770_v36 }
0x17d1   :  { %2579 = vmatpush1.bf16.msra.mxu0 %v8528_v56 }
0x17d2   :  { %2580 = vmatprep.subr.bf16.mxu0 %v8534_v57 }
0x17d3   :  { %2490 = vmatpush1.bf16.msra.mxu1 %v8778_v14 }
0x17d4   :  { %2620 = vmatprep.subr.bf16.mxu1 %v8538_v58 }
0x17d5   :  { %2581 = vmatpush1.bf16.msra.mxu0 %v8544_v59 }
0x17d6   :  { %6920 = vmatmul.mubr.msk.bf16.vlgmr.msra.gmra.mrb[60].mxu1 %vm272_vm2, %v2359_v13  ;;  %2582 = vmatprep.subr.bf16.mxu0 %v8551_v60 }
0x17d7   :  { %2621 = vmatpush1.bf16.msra.mxu1 %v8554_v61  ;;  %2652 = vmatprep.mubr.bf16.mxu1 %v7939_v1 }
0x17d8   :  { %2622 = vmatprep.subr.bf16.mxu1 %v8558_v63 }
0x17d9   :  { %2583 = vmatpush1.bf16.msra.mxu0 %v8564_v8 }
0x17da   :  { %2695 = vmatprep.subr.bf16.mxu0 %v8481_v46 }
0x17db   :  { %2623 = vmatpush1.bf16.msra.mxu1 %v8568_v41 }
0x17dc   :  { %2624 = vmatprep.subr.bf16.mxu1 %v8571_v42 }
0x17df   :  { %2625 = vmatpush1.bf16.msra.mxu1 %v8574_v44 }
0x17e0   :  { %2626 = vmatprep.subr.bf16.mxu1 %v8577_v45 }
0x17e3   :  { %2627 = vmatpush1.bf16.msra.mxu1 %v8580_v47 }
0x17e4   :  { %2788 = vmatprep.subr.bf16.mxu1 %v8586_v49 }
0x1899   :  { %v2398_v40 = vpop.f32.mrb[56].mxu1 }
0x189a   :  { %v2400_v57 = vpop.f32.mrb[57].mxu1 }
0x189b   :  { %v2402_v28 = vpop.f32.mrb[58].mxu1 }
0x189c   :  { %v2403_v34 = vpop.f32.mrb[59].mxu1 }
0x189f   :  { %v2442_v7 = vpop.f32.mrb[64].mxu0 }
0x18a0   :  { %v2443_v29 = vadd.f32 %v2442_v7, %v2398_v40  ;;  %v2444_v26 = vpop.f32.mrb[65].mxu0 }
0x18a1   :  { %v2445_v46 = vadd.f32 %v2444_v26, %v2400_v57  ;;  %v2446_v3 = vpop.f32.mrb[66].mxu0 }
0x18a2   :  { %v2447_v5 = vpop.f32.mrb[67].mxu0  ;;  %v2449_v35 = vadd.f32 %v2443_v29, %v8257_v24 }
0x18a3   :  { %v2450_v6 = vadd.f32 %v2445_v46, %v8248_v19 }
0x18a4   :  { %v6918_v15 = vmul.f32 -1.442695, %v2449_v35 }
0x18a5   :  { %7318 = vtanh.f32 %v2450_v6  ;;  %v6919_v29 = vmul.f32 -1.442695, %v2450_v6  ;;  %v8825_v6 = vld [vmem:[%s10079_s2 + $0x14] ss:$8 sps:$4 sm:$0xff]  }
0x18a6   :  { %7320 = vpow2.f32 %v6918_v15 }
0x18a9   :  { %v2517_v10 = vpop.f32.mrb[60].mxu1 }
0x18aa   :  { %v2519_v39 = vpop.f32.mrb[61].mxu1 }
0x18ab   :  { %v2526_v12 = vcombine.low %v2517_v10, %v2519_v39  ;;  %v2521_v2 = vpop.f32.mrb[62].mxu1  ;;  %v8831_v39 = vld [vmem:[%s10079_s2 + $0x10] ss:$8 sps:$4 sm:$0xff]  }
0x18ac   :  { %v2522_v33 = vpop.f32.mrb[63].mxu1 }
0x18ad   :  { %v2533_v31 = vrot.slane %v2526_v12, %v8106_v27  ;;  %v8837_v12 = vld [vmem:[%s10079_s2 + $0x24] ss:$8 sps:$4 sm:$0xff]  }
0x18af   :  { %v7319_v37 = vpop.eup %7318  ;;  %v2540_v4 = vrot.slane %v2533_v31, %v8106_v27 }
0x18b0   :  { %2466 = vrot.lane.b32.xlu1 %v7319_v37, %s7941_s3  ;;  %v7321_v38 = vpop.eup %7320 }
0x18b1   :  { %v2542_v18 = vadd.f32 %v2540_v4, %v2482_v25  ;;  %v2457_v50 = vadd.f32 1.0, %v7321_v38  ;;  %v2694_v38 = vld [vmem:[#allocation2 + $0x13] ss:$8 sm:$0x3] }
0x18b3   :  { %2550 = vrot.lane.b32.xlu0 %v2542_v18, %s7941_s3  ;;  %v6921_v48 = vmul.f32 -1.442695, %v2542_v18 }
0x18b5   :  { %7322 = vpow2.f32 %v6921_v48 }
0x18b6   :  { %7324 = vrcp.f32 %v2457_v50 }
0x18bf   :  { %v7323_v17 = vpop.eup %7322 }
0x18c0   :  { %v7325_v52 = vpop.eup %7324  ;;  %v2546_v32 = vadd.f32 1.0, %v7323_v17 }
0x18c1   :  { %v2464_v30 = vmul.f32 %v7325_v52, %v8742_v43 }
0x18c2   :  { %7326 = vrcp.f32 %v2546_v32 }
0x18cc   :  { %v7327_v21 = vpop.eup %7326 }
0x18cd   :  { %v2555_v57 = vmul.f32 %v7327_v21, %v8746_v51  ;;  %v8818_v51 = vld [vmem:[%s10079_s2] ss:$8 sps:$4 sm:$0xff]   ;;  %v2564_v2 = vrot.slane %v7327_v21, 1 }
0x1922   :  { %v2467_v55 = vpop.permute.xlu1 %2466 }
0x1923   :  { %v2469_v62 = vmul.f32 %v7325_v52, %v2467_v55 }
0x1925   :  { %v2551_v20 = vpop.permute.xlu0 %2550  ;;  %2471 = vrot.lane.b32.xlu1 %v2469_v62, %s7941_s3 }
0x1926   :  { %v2552_v23 = vrot.slane %v2551_v20, 1 }
0x1928   :  { %7328 = vtanh.f32 %v2552_v23 }
0x1932   :  { %v7329_v11 = vpop.eup %7328 }
0x1933   :  { %v2556_v22 = vmul.f32 %v7329_v11, %v7327_v21 }
0x1935   :  { %2558 = vrot.lane.b32.xlu0 %v2556_v22, %s7941_s3 }
0x1997   :  { %v2472_v16 = vpop.permute.xlu1 %2471 }
0x1998   :  { %v8805_v13 = vadd.f32 %v2472_v16, %v2464_v30 }
0x199a   :  { %7330 = vtanh.f32 %v8805_v13 }
0x19a4   :  { %v7331_v40 = vpop.eup %7330 }
0x19a5   :  { %2477 = vrot.lane.b32.xlu1 %v7331_v40, %s7941_s3 }
0x19a7   :  { %v2559_v28 = vpop.permute.xlu0 %2558 }
0x19a8   :  { %v8810_v34 = vadd.f32 %v2559_v28, %v2555_v57 }
0x19aa   :  { %7332 = vtanh.f32 %v8810_v34 }
0x19ab   :  { %7334 = vpow2.f32 %v6919_v29 }
0x19b4   :  { %v7333_v7 = vpop.eup %7332 }
0x19b5   :  { %2567 = vrot.lane.b32.xlu0 %v7333_v7, %s7941_s3  ;;  %v7335_v43 = vpop.eup %7334 }
0x19b6   :  { %v2458_v26 = vadd.f32 1.0, %v7335_v43 }
0x19b8   :  { %7336 = vrcp.f32 %v2458_v26 }
0x19c2   :  { %v7337_v46 = vpop.eup %7336 }
0x1a17   :  { %v2478_v3 = vpop.permute.xlu1 %2477 }
0x1a18   :  { %v2480_v5 = vmul.f32 %v7337_v46, %v2478_v3 }
0x1a1a   :  { %v2572_v10 = vpack.c.bf16 %v2480_v5, %v2480_v5 }
0x1a1c   :  { %6922 = vmatmul.mubr.msk.bf16.vlgmr.msra.gmra.mrb[68].mxu0 %vm272_vm2, %v2572_v10 }
0x1a1d   :  { %2696 = vmatpush1.bf16.msra.mxu0 %v8818_v51  ;;  %2727 = vmatprep.mubr.bf16.mxu0 %v7939_v1 }
0x1a1e   :  { %2697 = vmatprep.subr.bf16.mxu0 %v8825_v6 }
0x1a21   :  { %2698 = vmatpush1.bf16.msra.mxu0 %v8831_v39 }
0x1a22   :  { %2699 = vmatprep.subr.bf16.mxu0 %v8837_v12 }
0x1a25   :  { %2700 = vmatpush1.bf16.msra.mxu0 %v8764_v9 }
0x1a26   :  { %2701 = vmatprep.subr.bf16.mxu0 %v8770_v36 }
0x1a27   :  { %v2568_v33 = vpop.permute.xlu0 %2567 }
0x1a28   :  { %v2570_v31 = vmul.f32 %v2568_v33, %v2564_v2 }
0x1a29   :  { %2702 = vmatpush1.bf16.msra.mxu0 %v8778_v14 }
0x1a2a   :  { %v2571_v37 = vpack.c.bf16 %v2570_v31, %v2570_v31  ;;  %2832 = vmatprep.subr.bf16.mxu0 %v8538_v58  ;;  %v8857_v58 = vld [vmem:[%s10082_s5 + $0x24] ss:$8 sps:$4 sm:$0xff]  }
0x1a2c   :  { %6923 = vmatmul.mubr.msk.bf16.vlgmr.msra.gmra.mrb[64].mxu1 %vm272_vm2, %v2571_v37  ;;  %6926 = vmatmul.mubr.msk.bf16.vlgmr.msra.gmra.mrb[72].mxu0 %vm272_vm2, %v2571_v37 }
0x1a2d   :  { %2789 = vmatpush1.bf16.msra.mxu1 %v8513_v53  ;;  %2833 = vmatpush1.bf16.msra.mxu0 %v8554_v61  ;;  %v8870_v53 = vld [vmem:[%s10079_s2 + $0x4] ss:$8 sps:$4 sm:$0xff]  }
0x1a2e   :  { %2790 = vmatprep.subr.bf16.mxu1 %v8520_v54  ;;  %2834 = vmatprep.subr.bf16.mxu0 %v8558_v63 }
0x1a2f   :  { %2820 = vmatprep.mubr.bf16.mxu1 %v7939_v1  ;;  %2864 = vmatprep.mubr.bf16.mxu0 %v7939_v1 }
0x1a31   :  { %2791 = vmatpush1.bf16.msra.mxu1 %v8528_v56  ;;  %2835 = vmatpush1.bf16.msra.mxu0 %v8568_v41 }
0x1a32   :  { %2792 = vmatprep.subr.bf16.mxu1 %v8857_v58  ;;  %2836 = vmatprep.subr.bf16.mxu0 %v8571_v42 }
0x1a35   :  { %2793 = vmatpush1.bf16.msra.mxu1 %v8544_v59  ;;  %2837 = vmatpush1.bf16.msra.mxu0 %v8574_v44 }
0x1a36   :  { %2794 = vmatprep.subr.bf16.mxu1 %v8551_v60  ;;  %2838 = vmatprep.subr.bf16.mxu0 %v8577_v45 }
0x1a39   :  { %2795 = vmatpush1.bf16.msra.mxu1 %v8564_v8  ;;  %2839 = vmatpush1.bf16.msra.mxu0 %v8580_v47 }
0x1a3a   :  { %2907 = vmatprep.subr.bf16.mxu1 %v8870_v53  ;;  %3000 = vmatprep.subr.bf16.mxu0 %v8586_v49 }
0x1aef   :  { %v2610_v54 = vpop.f32.mrb[68].mxu0 }
0x1af0   :  { %v2612_v56 = vpop.f32.mrb[69].mxu0 }
0x1af1   :  { %v2614_v59 = vpop.f32.mrb[70].mxu0 }
0x1af2   :  { %v2615_v61 = vpop.f32.mrb[71].mxu0 }
0x1aff   :  { %v2654_v60 = vpop.f32.mrb[64].mxu1  ;;  %v2729_v63 = vpop.f32.mrb[72].mxu0 }
0x1b00   :  { %v2655_v41 = vadd.f32 %v2654_v60, %v2610_v54  ;;  %v2656_v42 = vpop.f32.mrb[65].mxu1  ;;  %v2731_v8 = vpop.f32.mrb[73].mxu0 }
0x1b01   :  { %v2657_v44 = vadd.f32 %v2656_v42, %v2612_v56  ;;  %v2738_v45 = vcombine.low %v2729_v63, %v2731_v8  ;;  %v2658_v47 = vpop.f32.mrb[66].mxu1  ;;  %v2733_v4 = vpop.f32.mrb[74].mxu0  ;;  %v8902_v63 = vld [vmem:[%s10082_s5] ss:$8 sps:$4 sm:$0xff]   ;;  %v8917_v42 = vld [vmem:[%s10082_s5 + $0x10] ss:$8 sps:$4 sm:$0xff]  }
0x1b02   :  { %v2659_v25 = vpop.f32.mrb[67].mxu1  ;;  %v2734_v18 = vpop.f32.mrb[75].mxu0  ;;  %v2661_v17 = vadd.f32 %v2655_v41, %v8257_v24  ;;  %v8909_v41 = vld [vmem:[%s10082_s5 + $0x14] ss:$8 sps:$4 sm:$0xff]   ;;  %v8938_v47 = vld [vmem:[#allocation7] ss:$8 sps:$4 sm:$0xff]  }
0x1b03   :  { %v2662_v35 = vadd.f32 %v2657_v44, %v8248_v19  ;;  %v2745_v15 = vrot.slane %v2738_v45, %v8106_v27  ;;  %v8922_v8 = vld [vmem:[#allocation7 + $0x4] ss:$8 sps:$4 sm:$0xff]   ;;  %v8928_v44 = vld [vmem:[%s10082_s5 + $0x20] ss:$8 sps:$4 sm:$0xff]   ;;  %v8942_v4 = vld [vmem:[#allocation7 + $0x14] ss:$8 sps:$4 sm:$0xff]  }
0x1b04   :  { %v6924_v52 = vmul.f32 -1.442695, %v2661_v17  ;;  %v8935_v45 = vld [vmem:[%s10082_s5 + $0x34] ss:$8 sps:$4 sm:$0xff]   ;;  %v8948_v25 = vld [vmem:[%s10082_s5 + $0x30] ss:$8 sps:$4 sm:$0xff]  }
0x1b05   :  { %7338 = vtanh.f32 %v2662_v35  ;;  %v2752_v49 = vrot.slane %v2745_v15, %v8106_v27  ;;  %v6925_v2 = vmul.f32 -1.442695, %v2662_v35  ;;  %v8952_v18 = vld [vmem:[#allocation7 + $0x10] ss:$8 sps:$4 sm:$0xff]   ;;  %v8955_v35 = vld [vmem:[#allocation7 + $0x24] ss:$8 sps:$4 sm:$0xff]  }
0x1b06   :  { %7340 = vpow2.f32 %v6924_v52  ;;  %v8958_v15 = vld [vmem:[#allocation7 + $0x20] ss:$8 sps:$4 sm:$0xff]  }
0x1b07   :  { %v2754_v48 = vadd.f32 %v2752_v49, %v2694_v38  ;;  %v8961_v49 = vld [vmem:[#allocation7 + $0x34] ss:$8 sps:$4 sm:$0xff]   ;;  %v8964_v38 = vld [vmem:[#allocation7 + $0x30] ss:$8 sps:$4 sm:$0xff]  }
0x1b09   :  { %2762 = vrot.lane.b32.xlu1 %v2754_v48, %s7941_s3  ;;  %v6927_v55 = vmul.f32 -1.442695, %v2754_v48  ;;  %v8970_v48 = vld [vmem:[%s10082_s5 + $0x4] ss:$8 sps:$4 sm:$0xff]  }
0x1b0b   :  { %7342 = vpow2.f32 %v6927_v55 }
0x1b0f   :  { %v7339_v50 = vpop.eup %7338 }
0x1b10   :  { %2678 = vrot.lane.b32.xlu0 %v7339_v50, %s7941_s3  ;;  %v7341_v32 = vpop.eup %7340 }
0x1b11   :  { %v2669_v62 = vadd.f32 1.0, %v7341_v32 }
0x1b13   :  { %7344 = vrcp.f32 %v2669_v62 }
0x1b15   :  { %v7343_v20 = vpop.eup %7342 }
0x1b16   :  { %v2758_v23 = vadd.f32 1.0, %v7343_v20 }
0x1b18   :  { %7346 = vrcp.f32 %v2758_v23 }
0x1b1d   :  { %v7345_v22 = vpop.eup %7344 }
0x1b1e   :  { %v2676_v7 = vmul.f32 %v7345_v22, %v8805_v13 }
0x1b22   :  { %v7347_v40 = vpop.eup %7346 }
0x1b23   :  { %v2767_v26 = vmul.f32 %v7347_v40, %v8810_v34  ;;  %v2776_v56 = vrot.slane %v7347_v40, 1 }
0x1b7b   :  { %v2763_v21 = vpop.permute.xlu1 %2762 }
0x1b7c   :  { %v2764_v11 = vrot.slane %v2763_v21, 1 }
0x1b7e   :  { %7348 = vtanh.f32 %v2764_v11 }
0x1b82   :  { %v2679_v30 = vpop.permute.xlu0 %2678 }
0x1b83   :  { %v2681_v16 = vmul.f32 %v7345_v22, %v2679_v30 }
0x1b85   :  { %2683 = vrot.lane.b32.xlu1 %v2681_v16, %s7941_s3 }
0x1b88   :  { %v7349_v57 = vpop.eup %7348 }
0x1b89   :  { %v2768_v28 = vmul.f32 %v7349_v57, %v7347_v40 }
0x1b8b   :  { %2770 = vrot.lane.b32.xlu0 %v2768_v28, %s7941_s3 }
0x1bf7   :  { %v2684_v29 = vpop.permute.xlu1 %2683 }
0x1bf8   :  { %v8883_v43 = vadd.f32 %v2684_v29, %v2676_v7 }
0x1bfa   :  { %7350 = vtanh.f32 %v8883_v43 }
0x1bfd   :  { %v2771_v46 = vpop.permute.xlu0 %2770 }
0x1bfe   :  { %v8887_v3 = vadd.f32 %v2771_v46, %v2767_v26  ;;  %v2906_v46 = vld [vmem:[#allocation2 + $0x14] ss:$8 sm:$0x3] }
0x1c00   :  { %7352 = vtanh.f32 %v8887_v3 }
0x1c01   :  { %7354 = vpow2.f32 %v6925_v2 }
0x1c04   :  { %v7351_v5 = vpop.eup %7350 }
0x1c05   :  { %2689 = vrot.lane.b32.xlu1 %v7351_v5, %s7941_s3 }
0x1c0a   :  { %v7353_v10 = vpop.eup %7352 }
0x1c0b   :  { %2779 = vrot.lane.b32.xlu0 %v7353_v10, %s7941_s3  ;;  %v7355_v13 = vpop.eup %7354 }
0x1c0c   :  { %v2670_v33 = vadd.f32 1.0, %v7355_v13 }
0x1c0e   :  { %7356 = vrcp.f32 %v2670_v33 }
0x1c18   :  { %v7357_v31 = vpop.eup %7356 }
0x1c77   :  { %v2690_v37 = vpop.permute.xlu1 %2689 }
0x1c78   :  { %v2692_v54 = vmul.f32 %v7357_v31, %v2690_v37 }
0x1c7a   :  { %v2784_v34 = vpack.c.bf16 %v2692_v54, %v2692_v54 }
0x1c7c   :  { %6928 = vmatmul.mubr.msk.bf16.vlgmr.msra.gmra.mrb[68].mxu1 %vm272_vm2, %v2784_v34 }
0x1c7d   :  { %2908 = vmatpush1.bf16.msra.mxu1 %v8818_v51  ;;  %v2780_v59 = vpop.permute.xlu0 %2779  ;;  %2939 = vmatprep.mubr.bf16.mxu1 %v7939_v1 }
0x1c7e   :  { %v2782_v61 = vmul.f32 %v2780_v59, %v2776_v56  ;;  %2909 = vmatprep.subr.bf16.mxu1 %v8825_v6 }
0x1c80   :  { %v2783_v60 = vpack.c.bf16 %v2782_v61, %v2782_v61 }
0x1c81   :  { %2910 = vmatpush1.bf16.msra.mxu1 %v8831_v39 }
0x1c82   :  { %6929 = vmatmul.mubr.msk.bf16.vlgmr.msra.gmra.mrb[76].mxu0 %vm272_vm2, %v2783_v60  ;;  %2911 = vmatprep.subr.bf16.mxu1 %v8837_v12 }
0x1c83   :  { %3001 = vmatpush1.bf16.msra.mxu0 %v8902_v63  ;;  %3032 = vmatprep.mubr.bf16.mxu0 %v7939_v1 }
0x1c84   :  { %3002 = vmatprep.subr.bf16.mxu0 %v8909_v41 }
0x1c85   :  { %2912 = vmatpush1.bf16.msra.mxu1 %v8764_v9 }
0x1c86   :  { %2913 = vmatprep.subr.bf16.mxu1 %v8770_v36 }
0x1c87   :  { %3003 = vmatpush1.bf16.msra.mxu0 %v8917_v42 }
0x1c88   :  { %3004 = vmatprep.subr.bf16.mxu0 %v8857_v58 }
0x1c89   :  { %2914 = vmatpush1.bf16.msra.mxu1 %v8778_v14 }
0x1c8a   :  { %3044 = vmatprep.subr.bf16.mxu1 %v8922_v8 }
0x1c8b   :  { %3005 = vmatpush1.bf16.msra.mxu0 %v8928_v44 }
0x1c8c   :  { %6932 = vmatmul.mubr.msk.bf16.vlgmr.msra.gmra.mrb[72].mxu1 %vm272_vm2, %v2783_v60  ;;  %3006 = vmatprep.subr.bf16.mxu0 %v8935_v45 }
0x1c8d   :  { %3045 = vmatpush1.bf16.msra.mxu1 %v8938_v47  ;;  %3076 = vmatprep.mubr.bf16.mxu1 %v7939_v1 }
0x1c8e   :  { %3046 = vmatprep.subr.bf16.mxu1 %v8942_v4 }
0x1c8f   :  { %3007 = vmatpush1.bf16.msra.mxu0 %v8948_v25 }
0x1c90   :  { %3119 = vmatprep.subr.bf16.mxu0 %v8870_v53 }
0x1c91   :  { %3047 = vmatpush1.bf16.msra.mxu1 %v8952_v18 }
0x1c92   :  { %3048 = vmatprep.subr.bf16.mxu1 %v8955_v35 }
0x1c95   :  { %3049 = vmatpush1.bf16.msra.mxu1 %v8958_v15 }
0x1c96   :  { %3050 = vmatprep.subr.bf16.mxu1 %v8961_v49 }
0x1c99   :  { %3051 = vmatpush1.bf16.msra.mxu1 %v8964_v38 }
0x1c9a   :  { %3212 = vmatprep.subr.bf16.mxu1 %v8970_v48 }
0x1d4f   :  { %v2822_v50 = vpop.f32.mrb[68].mxu1 }
0x1d50   :  { %v2824_v17 = vpop.f32.mrb[69].mxu1 }
0x1d51   :  { %v2826_v52 = vpop.f32.mrb[70].mxu1 }
0x1d52   :  { %v2827_v55 = vpop.f32.mrb[71].mxu1 }
0x1d55   :  { %v2866_v32 = vpop.f32.mrb[76].mxu0 }
0x1d56   :  { %v2867_v62 = vadd.f32 %v2866_v32, %v2822_v50  ;;  %v2868_v20 = vpop.f32.mrb[77].mxu0 }
0x1d57   :  { %v2869_v23 = vadd.f32 %v2868_v20, %v2824_v17  ;;  %v2870_v21 = vpop.f32.mrb[78].mxu0 }
0x1d58   :  { %v2871_v11 = vpop.f32.mrb[79].mxu0  ;;  %v2873_v10 = vadd.f32 %v2867_v62, %v8257_v24 }
0x1d59   :  { %v2874_v22 = vadd.f32 %v2869_v23, %v8248_v19 }
0x1d5a   :  { %v6930_v2 = vmul.f32 -1.442695, %v2873_v10 }
0x1d5b   :  { %7358 = vtanh.f32 %v2874_v22 }
0x1d5c   :  { %7360 = vpow2.f32 %v6930_v2 }
0x1d5f   :  { %v2941_v30 = vpop.f32.mrb[72].mxu1 }
0x1d60   :  { %v2943_v16 = vpop.f32.mrb[73].mxu1 }
0x1d61   :  { %v2950_v40 = vcombine.low %v2941_v30, %v2943_v16  ;;  %v2945_v57 = vpop.f32.mrb[74].mxu1  ;;  %v6931_v16 = vmul.f32 -1.442695, %v2874_v22 }
0x1d62   :  { %v2946_v28 = vpop.f32.mrb[75].mxu1 }
0x1d63   :  { %v2957_v7 = vrot.slane %v2950_v40, %v8106_v27 }
0x1d65   :  { %v7359_v29 = vpop.eup %7358  ;;  %v2964_v26 = vrot.slane %v2957_v7, %v8106_v27 }
0x1d66   :  { %2890 = vrot.lane.b32.xlu1 %v7359_v29, %s7941_s3  ;;  %v7361_v13 = vpop.eup %7360 }
0x1d67   :  { %v2966_v5 = vadd.f32 %v2964_v26, %v2906_v46  ;;  %v2881_v31 = vadd.f32 1.0, %v7361_v13 }
0x1d69   :  { %2974 = vrot.lane.b32.xlu0 %v2966_v5, %s7941_s3  ;;  %v6933_v33 = vmul.f32 -1.442695, %v2966_v5 }
0x1d6b   :  { %7362 = vpow2.f32 %v6933_v33 }
0x1d6c   :  { %7364 = vrcp.f32 %v2881_v31 }
0x1d75   :  { %v7363_v37 = vpop.eup %7362 }
0x1d76   :  { %v7365_v54 = vpop.eup %7364  ;;  %v2970_v56 = vadd.f32 1.0, %v7363_v37 }
0x1d77   :  { %v2888_v55 = vmul.f32 %v7365_v54, %v8883_v43 }
0x1d78   :  { %7366 = vrcp.f32 %v2970_v56 }
0x1d82   :  { %v7367_v50 = vpop.eup %7366 }
0x1d83   :  { %v2979_v23 = vmul.f32 %v7367_v50, %v8887_v3  ;;  %v2988_v3 = vrot.slane %v7367_v50, 1 }
0x1dd8   :  { %v2891_v34 = vpop.permute.xlu1 %2890 }
0x1dd9   :  { %v2893_v59 = vmul.f32 %v7365_v54, %v2891_v34 }
0x1ddb   :  { %v2975_v61 = vpop.permute.xlu0 %2974  ;;  %2895 = vrot.lane.b32.xlu1 %v2893_v59, %s7941_s3 }
0x1ddc   :  { %v2976_v60 = vrot.slane %v2975_v61, 1 }
0x1dde   :  { %7368 = vtanh.f32 %v2976_v60 }
0x1de8   :  { %v7369_v17 = vpop.eup %7368 }
0x1de9   :  { %v2980_v52 = vmul.f32 %v7369_v17, %v7367_v50 }
0x1deb   :  { %2982 = vrot.lane.b32.xlu0 %v2980_v52, %s7941_s3 }
0x1e4d   :  { %v2896_v32 = vpop.permute.xlu1 %2895 }
0x1e4e   :  { %v8982_v62 = vadd.f32 %v2896_v32, %v2888_v55 }
0x1e50   :  { %7370 = vtanh.f32 %v8982_v62 }
0x1e5a   :  { %v7371_v20 = vpop.eup %7370 }
0x1e5b   :  { %2901 = vrot.lane.b32.xlu1 %v7371_v20, %s7941_s3  ;;  %v3118_v20 = vld [vmem:[#allocation2 + $0x15] ss:$8 sm:$0x3] }
0x1e5d   :  { %v2983_v21 = vpop.permute.xlu0 %2982 }
0x1e5e   :  { %v8987_v11 = vadd.f32 %v2983_v21, %v2979_v23 }
0x1e60   :  { %7372 = vtanh.f32 %v8987_v11 }
0x1e61   :  { %7374 = vpow2.f32 %v6931_v16 }
0x1e6a   :  { %v7373_v30 = vpop.eup %7372 }
0x1e6b   :  { %2991 = vrot.lane.b32.xlu0 %v7373_v30, %s7941_s3  ;;  %v7375_v43 = vpop.eup %7374 }
0x1e6c   :  { %v2882_v40 = vadd.f32 1.0, %v7375_v43 }
0x1e6e   :  { %7376 = vrcp.f32 %v2882_v40 }
0x1e78   :  { %v7377_v57 = vpop.eup %7376 }
0x1ecd   :  { %v2902_v28 = vpop.permute.xlu1 %2901 }
0x1ece   :  { %v2904_v7 = vmul.f32 %v7377_v57, %v2902_v28 }
0x1ed0   :  { %v2996_v29 = vpack.c.bf16 %v2904_v7, %v2904_v7 }
0x1ed2   :  { %6934 = vmatmul.mubr.msk.bf16.vlgmr.msra.gmra.mrb[80].mxu0 %vm272_vm2, %v2996_v29 }
0x1ed3   :  { %3120 = vmatpush1.bf16.msra.mxu0 %v8818_v51  ;;  %3151 = vmatprep.mubr.bf16.mxu0 %v7939_v1 }
0x1ed4   :  { %3121 = vmatprep.subr.bf16.mxu0 %v8825_v6 }
0x1ed7   :  { %3122 = vmatpush1.bf16.msra.mxu0 %v8831_v39 }
0x1ed8   :  { %3123 = vmatprep.subr.bf16.mxu0 %v8837_v12 }
0x1edb   :  { %3124 = vmatpush1.bf16.msra.mxu0 %v8764_v9 }
0x1edc   :  { %3125 = vmatprep.subr.bf16.mxu0 %v8770_v36 }
0x1edd   :  { %v2992_v22 = vpop.permute.xlu0 %2991 }
0x1ede   :  { %v2994_v26 = vmul.f32 %v2992_v22, %v2988_v3 }
0x1edf   :  { %3126 = vmatpush1.bf16.msra.mxu0 %v8778_v14 }
0x1ee0   :  { %v2995_v46 = vpack.c.bf16 %v2994_v26, %v2994_v26  ;;  %3256 = vmatprep.subr.bf16.mxu0 %v8922_v8 }
0x1ee2   :  { %6935 = vmatmul.mubr.msk.bf16.vlgmr.msra.gmra.mrb[76].mxu1 %vm272_vm2, %v2995_v46  ;;  %6938 = vmatmul.mubr.msk.bf16.vlgmr.msra.gmra.mrb[84].mxu0 %vm272_vm2, %v2995_v46 }
0x1ee3   :  { %3213 = vmatpush1.bf16.msra.mxu1 %v8902_v63  ;;  %3257 = vmatpush1.bf16.msra.mxu0 %v8938_v47 }
0x1ee4   :  { %3214 = vmatprep.subr.bf16.mxu1 %v8909_v41  ;;  %3258 = vmatprep.subr.bf16.mxu0 %v8942_v4 }
0x1ee5   :  { %3244 = vmatprep.mubr.bf16.mxu1 %v7939_v1  ;;  %3288 = vmatprep.mubr.bf16.mxu0 %v7939_v1 }
0x1ee7   :  { %3215 = vmatpush1.bf16.msra.mxu1 %v8917_v42  ;;  %3259 = vmatpush1.bf16.msra.mxu0 %v8952_v18 }
0x1ee8   :  { %3216 = vmatprep.subr.bf16.mxu1 %v8857_v58  ;;  %3260 = vmatprep.subr.bf16.mxu0 %v8955_v35 }
0x1eeb   :  { %3217 = vmatpush1.bf16.msra.mxu1 %v8928_v44  ;;  %3261 = vmatpush1.bf16.msra.mxu0 %v8958_v15 }
0x1eec   :  { %3218 = vmatprep.subr.bf16.mxu1 %v8935_v45  ;;  %3262 = vmatprep.subr.bf16.mxu0 %v8961_v49 }
0x1eef   :  { %3219 = vmatpush1.bf16.msra.mxu1 %v8948_v25  ;;  %3263 = vmatpush1.bf16.msra.mxu0 %v8964_v38 }
0x1ef0   :  { %3331 = vmatprep.subr.bf16.mxu1 %v8870_v53  ;;  %3424 = vmatprep.subr.bf16.mxu0 %v8970_v48 }
0x1fa5   :  { %v3034_v5 = vpop.f32.mrb[80].mxu0 }
0x1fa6   :  { %v3036_v10 = vpop.f32.mrb[81].mxu0 }
0x1fa7   :  { %v3038_v2 = vpop.f32.mrb[82].mxu0 }
0x1fa8   :  { %v3039_v13 = vpop.f32.mrb[83].mxu0 }
0x1fb5   :  { %v3078_v33 = vpop.f32.mrb[76].mxu1  ;;  %v3153_v31 = vpop.f32.mrb[84].mxu0 }
0x1fb6   :  { %v3079_v37 = vadd.f32 %v3078_v33, %v3034_v5  ;;  %v3080_v54 = vpop.f32.mrb[77].mxu1  ;;  %v3155_v34 = vpop.f32.mrb[85].mxu0 }
0x1fb7   :  { %v3081_v56 = vadd.f32 %v3080_v54, %v3036_v10  ;;  %v3162_v59 = vcombine.low %v3153_v31, %v3155_v34  ;;  %v3082_v61 = vpop.f32.mrb[78].mxu1  ;;  %v3157_v60 = vpop.f32.mrb[86].mxu0 }
0x1fb8   :  { %v3083_v50 = vpop.f32.mrb[79].mxu1  ;;  %v3158_v17 = vpop.f32.mrb[87].mxu0  ;;  %v3085_v30 = vadd.f32 %v3079_v37, %v8257_v24 }
0x1fb9   :  { %v3086_v52 = vadd.f32 %v3081_v56, %v8248_v19  ;;  %v3169_v55 = vrot.slane %v3162_v59, %v8106_v27 }
0x1fba   :  { %v6936_v16 = vmul.f32 -1.442695, %v3085_v30 }
0x1fbb   :  { %7378 = vtanh.f32 %v3086_v52  ;;  %v3176_v32 = vrot.slane %v3169_v55, %v8106_v27  ;;  %v6937_v61 = vmul.f32 -1.442695, %v3086_v52 }
0x1fbc   :  { %7380 = vpow2.f32 %v6936_v16 }
0x1fbd   :  { %v3178_v23 = vadd.f32 %v3176_v32, %v3118_v20 }
0x1fbf   :  { %3186 = vrot.lane.b32.xlu1 %v3178_v23, %s7941_s3  ;;  %v6939_v43 = vmul.f32 -1.442695, %v3178_v23 }
0x1fc1   :  { %7382 = vpow2.f32 %v6939_v43 }
0x1fc5   :  { %v7379_v21 = vpop.eup %7378 }
0x1fc6   :  { %3102 = vrot.lane.b32.xlu0 %v7379_v21, %s7941_s3  ;;  %v7381_v40 = vpop.eup %7380 }
0x1fc7   :  { %v3093_v57 = vadd.f32 1.0, %v7381_v40 }
0x1fc9   :  { %7384 = vrcp.f32 %v3093_v57 }
0x1fcb   :  { %v7383_v28 = vpop.eup %7382 }
0x1fcc   :  { %v3182_v7 = vadd.f32 1.0, %v7383_v28 }
0x1fce   :  { %7386 = vrcp.f32 %v3182_v7 }
0x1fd3   :  { %v7385_v22 = vpop.eup %7384 }
0x1fd4   :  { %v3100_v13 = vmul.f32 %v7385_v22, %v8982_v62 }
0x1fd8   :  { %v7387_v5 = vpop.eup %7386 }
0x1fd9   :  { %v3191_v37 = vmul.f32 %v7387_v5, %v8987_v11  ;;  %v3200_v32 = vrot.slane %v7387_v5, 1 }
0x2031   :  { %v3187_v29 = vpop.permute.xlu1 %3186 }
0x2032   :  { %v3188_v3 = vrot.slane %v3187_v29, 1 }
0x2034   :  { %7388 = vtanh.f32 %v3188_v3 }
0x2038   :  { %v3103_v26 = vpop.permute.xlu0 %3102 }
0x2039   :  { %v3105_v46 = vmul.f32 %v7385_v22, %v3103_v26 }
0x203b   :  { %3107 = vrot.lane.b32.xlu1 %v3105_v46, %s7941_s3 }
0x203e   :  { %v7389_v10 = vpop.eup %7388 }
0x203f   :  { %v3192_v2 = vmul.f32 %v7389_v10, %v7387_v5 }
0x2041   :  { %3194 = vrot.lane.b32.xlu0 %v3192_v2, %s7941_s3 }
0x20ad   :  { %v3108_v33 = vpop.permute.xlu1 %3107 }
0x20ae   :  { %v9030_v31 = vadd.f32 %v3108_v33, %v3100_v13 }
0x20b0   :  { %7390 = vtanh.f32 %v9030_v31 }
0x20b3   :  { %v3195_v54 = vpop.permute.xlu0 %3194 }
0x20b4   :  { %v9034_v34 = vadd.f32 %v3195_v54, %v3191_v37  ;;  %v3330_v54 = vld [vmem:[#allocation2 + $0x16] ss:$8 sm:$0x3] }
0x20b6   :  { %7392 = vtanh.f32 %v9034_v34 }
0x20b7   :  { %7394 = vpow2.f32 %v6937_v61 }
0x20ba   :  { %v7391_v56 = vpop.eup %7390 }
0x20bb   :  { %3113 = vrot.lane.b32.xlu1 %v7391_v56, %s7941_s3 }
0x20c0   :  { %v7393_v59 = vpop.eup %7392 }
0x20c1   :  { %3203 = vrot.lane.b32.xlu0 %v7393_v59, %s7941_s3  ;;  %v7395_v62 = vpop.eup %7394 }
0x20c2   :  { %v3094_v60 = vadd.f32 1.0, %v7395_v62 }
0x20c4   :  { %7396 = vrcp.f32 %v3094_v60 }
0x20ce   :  { %v7397_v50 = vpop.eup %7396 }
0x212d   :  { %v3114_v17 = vpop.permute.xlu1 %3113 }
0x212e   :  { %v3116_v55 = vmul.f32 %v7397_v50, %v3114_v17 }
0x2130   :  { %v3208_v11 = vpack.c.bf16 %v3116_v55, %v3116_v55 }
0x2132   :  { %6940 = vmatmul.mubr.msk.bf16.vlgmr.msra.gmra.mrb[80].mxu1 %vm272_vm2, %v3208_v11 }
0x2133   :  { %3332 = vmatpush1.bf16.msra.mxu1 %v8818_v51  ;;  %v3204_v20 = vpop.permute.xlu0 %3203  ;;  %3363 = vmatprep.mubr.bf16.mxu1 %v7939_v1 }
0x2134   :  { %v3206_v23 = vmul.f32 %v3204_v20, %v3200_v32  ;;  %3333 = vmatprep.subr.bf16.mxu1 %v8825_v6 }
0x2136   :  { %v3207_v52 = vpack.c.bf16 %v3206_v23, %v3206_v23 }
0x2137   :  { %3334 = vmatpush1.bf16.msra.mxu1 %v8831_v39 }
0x2138   :  { %6941 = vmatmul.mubr.msk.bf16.vlgmr.msra.gmra.mrb[88].mxu0 %vm272_vm2, %v3207_v52  ;;  %3335 = vmatprep.subr.bf16.mxu1 %v8837_v12 }
0x2139   :  { %3425 = vmatpush1.bf16.msra.mxu0 %v8902_v63  ;;  %3456 = vmatprep.mubr.bf16.mxu0 %v7939_v1 }
0x213a   :  { %3426 = vmatprep.subr.bf16.mxu0 %v8909_v41 }
0x213b   :  { %3336 = vmatpush1.bf16.msra.mxu1 %v8764_v9 }
0x213c   :  { %3337 = vmatprep.subr.bf16.mxu1 %v8770_v36 }
0x213d   :  { %3427 = vmatpush1.bf16.msra.mxu0 %v8917_v42 }
0x213e   :  { %3428 = vmatprep.subr.bf16.mxu0 %v8857_v58 }
0x213f   :  { %3338 = vmatpush1.bf16.msra.mxu1 %v8778_v14 }
0x2140   :  { %3468 = vmatprep.subr.bf16.mxu1 %v8922_v8 }
0x2141   :  { %3429 = vmatpush1.bf16.msra.mxu0 %v8928_v44 }
0x2142   :  { %6944 = vmatmul.mubr.msk.bf16.vlgmr.msra.gmra.mrb[84].mxu1 %vm272_vm2, %v3207_v52  ;;  %3430 = vmatprep.subr.bf16.mxu0 %v8935_v45 }
0x2143   :  { %3469 = vmatpush1.bf16.msra.mxu1 %v8938_v47  ;;  %3500 = vmatprep.mubr.bf16.mxu1 %v7939_v1 }
0x2144   :  { %3470 = vmatprep.subr.bf16.mxu1 %v8942_v4 }
0x2145   :  { %3431 = vmatpush1.bf16.msra.mxu0 %v8948_v25 }
0x2146   :  { %3543 = vmatprep.subr.bf16.mxu0 %v8870_v53 }
0x2147   :  { %3471 = vmatpush1.bf16.msra.mxu1 %v8952_v18 }
0x2148   :  { %3472 = vmatprep.subr.bf16.mxu1 %v8955_v35 }
0x214b   :  { %3473 = vmatpush1.bf16.msra.mxu1 %v8958_v15 }
0x214c   :  { %3474 = vmatprep.subr.bf16.mxu1 %v8961_v49 }
0x214f   :  { %3475 = vmatpush1.bf16.msra.mxu1 %v8964_v38 }
0x2150   :  { %3636 = vmatprep.subr.bf16.mxu1 %v8970_v48 }
0x2205   :  { %v3246_v21 = vpop.f32.mrb[80].mxu1 }
0x2206   :  { %v3248_v30 = vpop.f32.mrb[81].mxu1 }
0x2207   :  { %v3250_v16 = vpop.f32.mrb[82].mxu1 }
0x2208   :  { %v3251_v43 = vpop.f32.mrb[83].mxu1 }
0x220b   :  { %v3290_v40 = vpop.f32.mrb[88].mxu0 }
0x220c   :  { %v3291_v57 = vadd.f32 %v3290_v40, %v3246_v21  ;;  %v3292_v28 = vpop.f32.mrb[89].mxu0 }
0x220d   :  { %v3293_v7 = vadd.f32 %v3292_v28, %v3248_v30  ;;  %v3294_v29 = vpop.f32.mrb[90].mxu0 }
0x220e   :  { %v3295_v3 = vpop.f32.mrb[91].mxu0  ;;  %v3297_v59 = vadd.f32 %v3291_v57, %v8257_v24 }
0x220f   :  { %v3298_v22 = vadd.f32 %v3293_v7, %v8248_v19 }
0x2210   :  { %v6942_v61 = vmul.f32 -1.442695, %v3297_v59 }
0x2211   :  { %7398 = vtanh.f32 %v3298_v22 }
0x2212   :  { %7400 = vpow2.f32 %v6942_v61 }
0x2215   :  { %v3365_v26 = vpop.f32.mrb[84].mxu1 }
0x2216   :  { %v3367_v46 = vpop.f32.mrb[85].mxu1 }
0x2217   :  { %v3374_v5 = vcombine.low %v3365_v26, %v3367_v46  ;;  %v3369_v10 = vpop.f32.mrb[86].mxu1  ;;  %v6943_v46 = vmul.f32 -1.442695, %v3298_v22 }
0x2218   :  { %v3370_v2 = vpop.f32.mrb[87].mxu1 }
0x2219   :  { %v3381_v13 = vrot.slane %v3374_v5, %v8106_v27 }
0x221b   :  { %v7399_v33 = vpop.eup %7398  ;;  %v3388_v37 = vrot.slane %v3381_v13, %v8106_v27 }
0x221c   :  { %3314 = vrot.lane.b32.xlu1 %v7399_v33, %s7941_s3  ;;  %v7401_v62 = vpop.eup %7400 }
0x221d   :  { %v3390_v56 = vadd.f32 %v3388_v37, %v3330_v54  ;;  %v3305_v50 = vadd.f32 1.0, %v7401_v62 }
0x221f   :  { %3398 = vrot.lane.b32.xlu0 %v3390_v56, %s7941_s3  ;;  %v6945_v60 = vmul.f32 -1.442695, %v3390_v56 }
0x2221   :  { %7402 = vpow2.f32 %v6945_v60 }
0x2222   :  { %7404 = vrcp.f32 %v3305_v50 }
0x222b   :  { %v7403_v17 = vpop.eup %7402 }
0x222c   :  { %v7405_v55 = vpop.eup %7404  ;;  %v3394_v32 = vadd.f32 1.0, %v7403_v17 }
0x222d   :  { %v3312_v43 = vmul.f32 %v7405_v55, %v9030_v31 }
0x222e   :  { %7406 = vrcp.f32 %v3394_v32 }
0x2238   :  { %v7407_v21 = vpop.eup %7406 }
0x2239   :  { %v3403_v7 = vmul.f32 %v7407_v21, %v9034_v34  ;;  %v3412_v34 = vrot.slane %v7407_v21, 1 }
0x228e   :  { %v3315_v11 = vpop.permute.xlu1 %3314 }
0x228f   :  { %v3317_v20 = vmul.f32 %v7405_v55, %v3315_v11 }
0x2291   :  { %v3399_v23 = vpop.permute.xlu0 %3398  ;;  %3319 = vrot.lane.b32.xlu1 %v3317_v20, %s7941_s3 }
0x2292   :  { %v3400_v52 = vrot.slane %v3399_v23, 1 }
0x2294   :  { %7408 = vtanh.f32 %v3400_v52 }
0x229e   :  { %v7409_v30 = vpop.eup %7408 }
0x229f   :  { %v3404_v16 = vmul.f32 %v7409_v30, %v7407_v21 }
0x22a1   :  { %3406 = vrot.lane.b32.xlu0 %v3404_v16, %s7941_s3  ;;  %v3542_v16 = vld [vmem:[#allocation2 + $0x17] ss:$8 sm:$0x3] }
0x2303   :  { %v3320_v40 = vpop.permute.xlu1 %3319 }
0x2304   :  { %v9078_v57 = vadd.f32 %v3320_v40, %v3312_v43 }
0x2306   :  { %7410 = vtanh.f32 %v9078_v57 }
0x2310   :  { %v7411_v28 = vpop.eup %7410 }
0x2311   :  { %3325 = vrot.lane.b32.xlu1 %v7411_v28, %s7941_s3 }
0x2313   :  { %v3407_v29 = vpop.permute.xlu0 %3406 }
0x2314   :  { %v9083_v3 = vadd.f32 %v3407_v29, %v3403_v7 }
0x2316   :  { %7412 = vtanh.f32 %v9083_v3 }
0x2317   :  { %7414 = vpow2.f32 %v6943_v46 }
0x2320   :  { %v7413_v26 = vpop.eup %7412 }
0x2321   :  { %3415 = vrot.lane.b32.xlu0 %v7413_v26, %s7941_s3  ;;  %v7415_v31 = vpop.eup %7414 }
0x2322   :  { %v3306_v5 = vadd.f32 1.0, %v7415_v31 }
0x2324   :  { %7416 = vrcp.f32 %v3306_v5 }
0x232e   :  { %v7417_v10 = vpop.eup %7416 }
0x2383   :  { %v3326_v2 = vpop.permute.xlu1 %3325 }
0x2384   :  { %v3328_v13 = vmul.f32 %v7417_v10, %v3326_v2 }
0x2386   :  { %v3420_v33 = vpack.c.bf16 %v3328_v13, %v3328_v13 }
0x2388   :  { %6946 = vmatmul.mubr.msk.bf16.vlgmr.msra.gmra.mrb[92].mxu0 %vm272_vm2, %v3420_v33 }
0x2389   :  { %3544 = vmatpush1.bf16.msra.mxu0 %v8818_v51  ;;  %3575 = vmatprep.mubr.bf16.mxu0 %v7939_v1 }
0x238a   :  { %3545 = vmatprep.subr.bf16.mxu0 %v8825_v6 }
0x238d   :  { %3546 = vmatpush1.bf16.msra.mxu0 %v8831_v39 }
0x238e   :  { %3547 = vmatprep.subr.bf16.mxu0 %v8837_v12 }
0x2391   :  { %3548 = vmatpush1.bf16.msra.mxu0 %v8764_v9 }
0x2392   :  { %3549 = vmatprep.subr.bf16.mxu0 %v8770_v36 }
0x2393   :  { %v3416_v22 = vpop.permute.xlu0 %3415 }
0x2394   :  { %v3418_v37 = vmul.f32 %v3416_v22, %v3412_v34 }
0x2395   :  { %3550 = vmatpush1.bf16.msra.mxu0 %v8778_v14 }
0x2396   :  { %v3419_v54 = vpack.c.bf16 %v3418_v37, %v3418_v37  ;;  %3680 = vmatprep.subr.bf16.mxu0 %v8922_v8 }
0x2398   :  { %6947 = vmatmul.mubr.msk.bf16.vlgmr.msra.gmra.mrb[88].mxu1 %vm272_vm2, %v3419_v54  ;;  %6950 = vmatmul.mubr.msk.bf16.vlgmr.msra.gmra.mrb[96].mxu0 %vm272_vm2, %v3419_v54 }
0x2399   :  { %3637 = vmatpush1.bf16.msra.mxu1 %v8902_v63  ;;  %3681 = vmatpush1.bf16.msra.mxu0 %v8938_v47 }
0x239a   :  { %3638 = vmatprep.subr.bf16.mxu1 %v8909_v41  ;;  %3682 = vmatprep.subr.bf16.mxu0 %v8942_v4 }
0x239b   :  { %3668 = vmatprep.mubr.bf16.mxu1 %v7939_v1  ;;  %3712 = vmatprep.mubr.bf16.mxu0 %v7939_v1 }
0x239d   :  { %3639 = vmatpush1.bf16.msra.mxu1 %v8917_v42  ;;  %3683 = vmatpush1.bf16.msra.mxu0 %v8952_v18 }
0x239e   :  { %3640 = vmatprep.subr.bf16.mxu1 %v8857_v58  ;;  %3684 = vmatprep.subr.bf16.mxu0 %v8955_v35 }
0x23a1   :  { %3641 = vmatpush1.bf16.msra.mxu1 %v8928_v44  ;;  %3685 = vmatpush1.bf16.msra.mxu0 %v8958_v15 }
0x23a2   :  { %3642 = vmatprep.subr.bf16.mxu1 %v8935_v45  ;;  %3686 = vmatprep.subr.bf16.mxu0 %v8961_v49 }
0x23a5   :  { %3643 = vmatpush1.bf16.msra.mxu1 %v8948_v25  ;;  %3687 = vmatpush1.bf16.msra.mxu0 %v8964_v38 }
0x23a6   :  { %3755 = vmatprep.subr.bf16.mxu1 %v8870_v53  ;;  %3848 = vmatprep.subr.bf16.mxu0 %v8970_v48 }
0x245b   :  { %v3458_v9 = vpop.f32.mrb[92].mxu0 }
0x245c   :  { %v3460_v36 = vpop.f32.mrb[93].mxu0 }
0x245d   :  { %v3462_v14 = vpop.f32.mrb[94].mxu0 }
0x245e   :  { %v3463_v56 = vpop.f32.mrb[95].mxu0 }
0x246b   :  { %v3502_v59 = vpop.f32.mrb[88].mxu1  ;;  %v3577_v61 = vpop.f32.mrb[96].mxu0 }
0x246c   :  { %v3503_v62 = vadd.f32 %v3502_v59, %v3458_v9  ;;  %v3504_v60 = vpop.f32.mrb[89].mxu1  ;;  %v3579_v50 = vpop.f32.mrb[97].mxu0 }
0x246d   :  { %v3505_v17 = vadd.f32 %v3504_v60, %v3460_v36  ;;  %v3586_v55 = vcombine.low %v3577_v61, %v3579_v50  ;;  %v3506_v11 = vpop.f32.mrb[90].mxu1  ;;  %v3581_v32 = vpop.f32.mrb[98].mxu0 }
0x246e   :  { %v3507_v20 = vpop.f32.mrb[91].mxu1  ;;  %v3582_v23 = vpop.f32.mrb[99].mxu0  ;;  %v3509_v28 = vadd.f32 %v3503_v62, %v8257_v24 }
0x246f   :  { %v3510_v52 = vadd.f32 %v3505_v17, %v8248_v19  ;;  %v3593_v21 = vrot.slane %v3586_v55, %v8106_v27 }
0x2470   :  { %v6948_v7 = vmul.f32 -1.442695, %v3509_v28 }
0x2471   :  { %7418 = vtanh.f32 %v3510_v52  ;;  %v3600_v30 = vrot.slane %v3593_v21, %v8106_v27  ;;  %v6949_v50 = vmul.f32 -1.442695, %v3510_v52 }
0x2472   :  { %7420 = vpow2.f32 %v6948_v7 }
0x2473   :  { %v3602_v43 = vadd.f32 %v3600_v30, %v3542_v16 }
0x2475   :  { %3610 = vrot.lane.b32.xlu1 %v3602_v43, %s7941_s3  ;;  %v6951_v29 = vmul.f32 -1.442695, %v3602_v43 }
0x2477   :  { %7422 = vpow2.f32 %v6951_v29 }
0x247b   :  { %v7419_v40 = vpop.eup %7418 }
0x247c   :  { %3526 = vrot.lane.b32.xlu0 %v7419_v40, %s7941_s3  ;;  %v7421_v26 = vpop.eup %7420 }
0x247d   :  { %v3517_v46 = vadd.f32 1.0, %v7421_v26 }
0x247f   :  { %7424 = vrcp.f32 %v3517_v46 }
0x2481   :  { %v7423_v31 = vpop.eup %7422 }
0x2482   :  { %v3606_v5 = vadd.f32 1.0, %v7423_v31 }
0x2484   :  { %7426 = vrcp.f32 %v3606_v5 }
0x2489   :  { %v7425_v13 = vpop.eup %7424 }
0x248a   :  { %v3524_v9 = vmul.f32 %v7425_v13, %v9078_v57 }
0x248e   :  { %v7427_v22 = vpop.eup %7426 }
0x248f   :  { %v3615_v56 = vmul.f32 %v7427_v22, %v9083_v3  ;;  %v3624_v20 = vrot.slane %v7427_v22, 1 }
0x24e7   :  { %v3611_v10 = vpop.permute.xlu1 %3610 }
0x24e8   :  { %v3612_v2 = vrot.slane %v3611_v10, 1 }
0x24ea   :  { %7428 = vtanh.f32 %v3612_v2 }
0x24ee   :  { %v3527_v33 = vpop.permute.xlu0 %3526 }
0x24ef   :  { %v3529_v34 = vmul.f32 %v7425_v13, %v3527_v33 }
0x24f1   :  { %3531 = vrot.lane.b32.xlu1 %v3529_v34, %s7941_s3 }
0x24f4   :  { %v7429_v37 = vpop.eup %7428 }
0x24f5   :  { %v3616_v54 = vmul.f32 %v7429_v37, %v7427_v22  ;;  %v3754_v22 = vld [vmem:[#allocation2 + $0x20] ss:$8 sm:$0x3] }
0x24f7   :  { %3618 = vrot.lane.b32.xlu0 %v3616_v54, %s7941_s3 }
0x2563   :  { %v3532_v36 = vpop.permute.xlu1 %3531 }
0x2564   :  { %v9126_v14 = vadd.f32 %v3532_v36, %v3524_v9 }
0x2566   :  { %7430 = vtanh.f32 %v9126_v14 }
0x2569   :  { %v3619_v59 = vpop.permute.xlu0 %3618 }
0x256a   :  { %v9130_v61 = vadd.f32 %v3619_v59, %v3615_v56 }
0x256c   :  { %7432 = vtanh.f32 %v9130_v61 }
0x256d   :  { %7434 = vpow2.f32 %v6949_v50 }
0x2570   :  { %v7431_v62 = vpop.eup %7430 }
0x2571   :  { %3537 = vrot.lane.b32.xlu1 %v7431_v62, %s7941_s3 }
0x2576   :  { %v7433_v60 = vpop.eup %7432 }
0x2577   :  { %3627 = vrot.lane.b32.xlu0 %v7433_v60, %s7941_s3  ;;  %v7435_v57 = vpop.eup %7434 }
0x2578   :  { %v3518_v17 = vadd.f32 1.0, %v7435_v57 }
0x257a   :  { %7436 = vrcp.f32 %v3518_v17 }
0x2584   :  { %v7437_v55 = vpop.eup %7436 }
0x25e3   :  { %v3538_v11 = vpop.permute.xlu1 %3537 }
0x25e4   :  { %v3540_v32 = vmul.f32 %v7437_v55, %v3538_v11 }
0x25e6   :  { %v3632_v3 = vpack.c.bf16 %v3540_v32, %v3540_v32 }
0x25e8   :  { %6952 = vmatmul.mubr.msk.bf16.vlgmr.msra.gmra.mrb[92].mxu1 %vm272_vm2, %v3632_v3 }
0x25e9   :  { %3756 = vmatpush1.bf16.msra.mxu1 %v8818_v51  ;;  %v3628_v23 = vpop.permute.xlu0 %3627  ;;  %3787 = vmatprep.mubr.bf16.mxu1 %v7939_v1  ;;  %v9148_v51 = vld [vmem:[%s10079_s2 + $0x20] ss:$8 sps:$4 sm:$0xff]  }
0x25ea   :  { %v3630_v21 = vmul.f32 %v3628_v23, %v3624_v20  ;;  %3757 = vmatprep.subr.bf16.mxu1 %v8825_v6  ;;  %v9154_v6 = vld [vmem:[%s10079_s2 + $0x34] ss:$8 sps:$4 sm:$0xff]  }
0x25ec   :  { %v3631_v52 = vpack.c.bf16 %v3630_v21, %v3630_v21 }
0x25ed   :  { %3758 = vmatpush1.bf16.msra.mxu1 %v8831_v39  ;;  %v9162_v39 = vld [vmem:[%s10079_s2 + $0x30] ss:$8 sps:$4 sm:$0xff]  }
0x25ee   :  { %6953 = vmatmul.mubr.msk.bf16.vlgmr.msra.gmra.mrb[100].mxu0 %vm272_vm2, %v3631_v52  ;;  %3759 = vmatprep.subr.bf16.mxu1 %v8837_v12 }
0x25ef   :  { %3849 = vmatpush1.bf16.msra.mxu0 %v8902_v63  ;;  %3880 = vmatprep.mubr.bf16.mxu0 %v7939_v1 }
0x25f0   :  { %3850 = vmatprep.subr.bf16.mxu0 %v8909_v41 }
0x25f1   :  { %3760 = vmatpush1.bf16.msra.mxu1 %v9148_v51 }
0x25f2   :  { %3761 = vmatprep.subr.bf16.mxu1 %v9154_v6 }
0x25f3   :  { %3851 = vmatpush1.bf16.msra.mxu0 %v8917_v42 }
0x25f4   :  { %3852 = vmatprep.subr.bf16.mxu0 %v8857_v58 }
0x25f5   :  { %3762 = vmatpush1.bf16.msra.mxu1 %v9162_v39 }
0x25f6   :  { %3892 = vmatprep.subr.bf16.mxu1 %v8922_v8 }
0x25f7   :  { %3853 = vmatpush1.bf16.msra.mxu0 %v8928_v44 }
0x25f8   :  { %6956 = vmatmul.mubr.msk.bf16.vlgmr.msra.gmra.mrb[96].mxu1 %vm272_vm2, %v3631_v52  ;;  %3854 = vmatprep.subr.bf16.mxu0 %v8935_v45 }
0x25f9   :  { %3893 = vmatpush1.bf16.msra.mxu1 %v8938_v47  ;;  %3924 = vmatprep.mubr.bf16.mxu1 %v7939_v1 }
0x25fa   :  { %3894 = vmatprep.subr.bf16.mxu1 %v8942_v4 }
0x25fb   :  { %3855 = vmatpush1.bf16.msra.mxu0 %v8948_v25 }
0x25fc   :  { %3967 = vmatprep.subr.bf16.mxu0 %v8870_v53 }
0x25fd   :  { %3895 = vmatpush1.bf16.msra.mxu1 %v8952_v18 }
0x25fe   :  { %3896 = vmatprep.subr.bf16.mxu1 %v8955_v35 }
0x2601   :  { %3897 = vmatpush1.bf16.msra.mxu1 %v8958_v15 }
0x2602   :  { %3898 = vmatprep.subr.bf16.mxu1 %v8961_v49 }
0x2605   :  { %3899 = vmatpush1.bf16.msra.mxu1 %v8964_v38 }
0x2606   :  { %4060 = vmatprep.subr.bf16.mxu1 %v8970_v48 }
0x26bb   :  { %v3670_v12 = vpop.f32.mrb[92].mxu1 }
0x26bc   :  { %v3672_v58 = vpop.f32.mrb[93].mxu1 }
0x26bd   :  { %v3674_v30 = vpop.f32.mrb[94].mxu1 }
0x26be   :  { %v3675_v16 = vpop.f32.mrb[95].mxu1 }
0x26c1   :  { %v3714_v43 = vpop.f32.mrb[100].mxu0 }
0x26c2   :  { %v3715_v40 = vadd.f32 %v3714_v43, %v3670_v12  ;;  %v3716_v28 = vpop.f32.mrb[101].mxu0 }
0x26c3   :  { %v3717_v53 = vadd.f32 %v3716_v28, %v3672_v58  ;;  %v3718_v7 = vpop.f32.mrb[102].mxu0 }
0x26c4   :  { %v3719_v29 = vpop.f32.mrb[103].mxu0  ;;  %v3721_v54 = vadd.f32 %v3715_v40, %v8257_v24 }
0x26c5   :  { %v3722_v26 = vadd.f32 %v3717_v53, %v8248_v19 }
0x26c6   :  { %v6954_v9 = vmul.f32 -1.442695, %v3721_v54 }
0x26c7   :  { %7438 = vtanh.f32 %v3722_v26  ;;  %v6955_v40 = vmul.f32 -1.442695, %v3722_v26  ;;  %v9209_v26 = vld [vmem:[%s10079_s2 + $0x14] ss:$8 sps:$4 sm:$0xff]  }
0x26c8   :  { %7440 = vpow2.f32 %v6954_v9 }
0x26cb   :  { %v3789_v46 = vpop.f32.mrb[96].mxu1 }
0x26cc   :  { %v3791_v31 = vpop.f32.mrb[97].mxu1 }
0x26cd   :  { %v3798_v5 = vcombine.low %v3789_v46, %v3791_v31  ;;  %v3793_v10 = vpop.f32.mrb[98].mxu1  ;;  %v9215_v31 = vld [vmem:[%s10079_s2 + $0x10] ss:$8 sps:$4 sm:$0xff]  }
0x26ce   :  { %v3794_v2 = vpop.f32.mrb[99].mxu1 }
0x26cf   :  { %v3805_v13 = vrot.slane %v3798_v5, %v8106_v27  ;;  %v9221_v5 = vld [vmem:[%s10079_s2 + $0x24] ss:$8 sps:$4 sm:$0xff]  }
0x26d1   :  { %v7439_v33 = vpop.eup %7438  ;;  %v3812_v34 = vrot.slane %v3805_v13, %v8106_v27 }
0x26d2   :  { %3738 = vrot.lane.b32.xlu1 %v7439_v33, %s7941_s3  ;;  %v7441_v36 = vpop.eup %7440 }
0x26d3   :  { %v3814_v37 = vadd.f32 %v3812_v34, %v3754_v22  ;;  %v3729_v59 = vadd.f32 1.0, %v7441_v36  ;;  %v3966_v36 = vld [vmem:[#allocation2 + $0x21] ss:$8 sm:$0x3] }
0x26d5   :  { %3822 = vrot.lane.b32.xlu0 %v3814_v37, %s7941_s3  ;;  %v6957_v56 = vmul.f32 -1.442695, %v3814_v37 }
0x26d7   :  { %7442 = vpow2.f32 %v6957_v56 }
0x26d8   :  { %7444 = vrcp.f32 %v3729_v59 }
0x26e1   :  { %v7443_v62 = vpop.eup %7442 }
0x26e2   :  { %v7445_v60 = vpop.eup %7444  ;;  %v3818_v57 = vadd.f32 1.0, %v7443_v62 }
0x26e3   :  { %v3736_v23 = vmul.f32 %v7445_v60, %v9126_v14 }
0x26e4   :  { %7446 = vrcp.f32 %v3818_v57 }
0x26ee   :  { %v7447_v32 = vpop.eup %7446 }
0x26ef   :  { %v3827_v58 = vmul.f32 %v7447_v32, %v9130_v61  ;;  %v9202_v61 = vld [vmem:[%s10079_s2] ss:$8 sps:$4 sm:$0xff]   ;;  %v3836_v10 = vrot.slane %v7447_v32, 1 }
0x2744   :  { %v3739_v50 = vpop.permute.xlu1 %3738 }
0x2745   :  { %v3741_v17 = vmul.f32 %v7445_v60, %v3739_v50 }
0x2747   :  { %v3823_v55 = vpop.permute.xlu0 %3822  ;;  %3743 = vrot.lane.b32.xlu1 %v3741_v17, %s7941_s3 }
0x2748   :  { %v3824_v11 = vrot.slane %v3823_v55, 1 }
0x274a   :  { %7448 = vtanh.f32 %v3824_v11 }
0x2754   :  { %v7449_v3 = vpop.eup %7448 }
0x2755   :  { %v3828_v20 = vmul.f32 %v7449_v3, %v7447_v32 }
0x2757   :  { %3830 = vrot.lane.b32.xlu0 %v3828_v20, %s7941_s3 }
0x27b9   :  { %v3744_v21 = vpop.permute.xlu1 %3743 }
0x27ba   :  { %v9189_v52 = vadd.f32 %v3744_v21, %v3736_v23 }
0x27bc   :  { %7450 = vtanh.f32 %v9189_v52 }
0x27c6   :  { %v7451_v12 = vpop.eup %7450 }
0x27c7   :  { %3749 = vrot.lane.b32.xlu1 %v7451_v12, %s7941_s3 }
0x27c9   :  { %v3831_v30 = vpop.permute.xlu0 %3830 }
0x27ca   :  { %v9194_v16 = vadd.f32 %v3831_v30, %v3827_v58 }
0x27cc   :  { %7452 = vtanh.f32 %v9194_v16 }
0x27cd   :  { %7454 = vpow2.f32 %v6955_v40 }
0x27d6   :  { %v7453_v43 = vpop.eup %7452 }
0x27d7   :  { %3839 = vrot.lane.b32.xlu0 %v7453_v43, %s7941_s3  ;;  %v7455_v14 = vpop.eup %7454 }
0x27d8   :  { %v3730_v28 = vadd.f32 1.0, %v7455_v14 }
0x27da   :  { %7456 = vrcp.f32 %v3730_v28 }
0x27e4   :  { %v7457_v53 = vpop.eup %7456 }
0x2839   :  { %v3750_v7 = vpop.permute.xlu1 %3749 }
0x283a   :  { %v3752_v29 = vmul.f32 %v7457_v53, %v3750_v7 }
0x283c   :  { %v3844_v46 = vpack.c.bf16 %v3752_v29, %v3752_v29 }
0x283e   :  { %6958 = vmatmul.mubr.msk.bf16.vlgmr.msra.gmra.mrb[104].mxu0 %vm272_vm2, %v3844_v46 }
0x283f   :  { %3968 = vmatpush1.bf16.msra.mxu0 %v9202_v61  ;;  %3999 = vmatprep.mubr.bf16.mxu0 %v7939_v1 }
0x2840   :  { %3969 = vmatprep.subr.bf16.mxu0 %v9209_v26 }
0x2843   :  { %3970 = vmatpush1.bf16.msra.mxu0 %v9215_v31 }
0x2844   :  { %3971 = vmatprep.subr.bf16.mxu0 %v9221_v5 }
0x2847   :  { %3972 = vmatpush1.bf16.msra.mxu0 %v9148_v51 }
0x2848   :  { %3973 = vmatprep.subr.bf16.mxu0 %v9154_v6 }
0x2849   :  { %v3840_v2 = vpop.permute.xlu0 %3839 }
0x284a   :  { %v3842_v13 = vmul.f32 %v3840_v2, %v3836_v10 }
0x284b   :  { %3974 = vmatpush1.bf16.msra.mxu0 %v9162_v39 }
0x284c   :  { %v3843_v33 = vpack.c.bf16 %v3842_v13, %v3842_v13  ;;  %4104 = vmatprep.subr.bf16.mxu0 %v8922_v8  ;;  %v9241_v8 = vld [vmem:[%s10082_s5 + $0x24] ss:$8 sps:$4 sm:$0xff]  }
0x284e   :  { %6959 = vmatmul.mubr.msk.bf16.vlgmr.msra.gmra.mrb[100].mxu1 %vm272_vm2, %v3843_v33  ;;  %6962 = vmatmul.mubr.msk.bf16.vlgmr.msra.gmra.mrb[108].mxu0 %vm272_vm2, %v3843_v33 }
0x284f   :  { %4061 = vmatpush1.bf16.msra.mxu1 %v8902_v63  ;;  %4105 = vmatpush1.bf16.msra.mxu0 %v8938_v47  ;;  %v9254_v63 = vld [vmem:[%s10079_s2 + $0x4] ss:$8 sps:$4 sm:$0xff]  }
0x2850   :  { %4062 = vmatprep.subr.bf16.mxu1 %v8909_v41  ;;  %4106 = vmatprep.subr.bf16.mxu0 %v8942_v4 }
0x2851   :  { %4092 = vmatprep.mubr.bf16.mxu1 %v7939_v1  ;;  %4136 = vmatprep.mubr.bf16.mxu0 %v7939_v1 }
0x2853   :  { %4063 = vmatpush1.bf16.msra.mxu1 %v8917_v42  ;;  %4107 = vmatpush1.bf16.msra.mxu0 %v8952_v18 }
0x2854   :  { %4064 = vmatprep.subr.bf16.mxu1 %v9241_v8  ;;  %4108 = vmatprep.subr.bf16.mxu0 %v8955_v35 }
0x2857   :  { %4065 = vmatpush1.bf16.msra.mxu1 %v8928_v44  ;;  %4109 = vmatpush1.bf16.msra.mxu0 %v8958_v15 }
0x2858   :  { %4066 = vmatprep.subr.bf16.mxu1 %v8935_v45  ;;  %4110 = vmatprep.subr.bf16.mxu0 %v8961_v49 }
0x285b   :  { %4067 = vmatpush1.bf16.msra.mxu1 %v8948_v25  ;;  %4111 = vmatpush1.bf16.msra.mxu0 %v8964_v38 }
0x285c   :  { %4179 = vmatprep.subr.bf16.mxu1 %v9254_v63  ;;  %4272 = vmatprep.subr.bf16.mxu0 %v8970_v48 }
0x2911   :  { %v3882_v41 = vpop.f32.mrb[104].mxu0 }
0x2912   :  { %v3884_v42 = vpop.f32.mrb[105].mxu0 }
0x2913   :  { %v3886_v44 = vpop.f32.mrb[106].mxu0 }
0x2914   :  { %v3887_v47 = vpop.f32.mrb[107].mxu0 }
0x2921   :  { %v3926_v45 = vpop.f32.mrb[100].mxu1  ;;  %v4001_v4 = vpop.f32.mrb[108].mxu0 }
0x2922   :  { %v3927_v18 = vadd.f32 %v3926_v45, %v3882_v41  ;;  %v3928_v35 = vpop.f32.mrb[101].mxu1  ;;  %v4003_v25 = vpop.f32.mrb[109].mxu0 }
0x2923   :  { %v3929_v15 = vadd.f32 %v3928_v35, %v3884_v42  ;;  %v4010_v49 = vcombine.low %v4001_v4, %v4003_v25  ;;  %v3930_v38 = vpop.f32.mrb[102].mxu1  ;;  %v4005_v34 = vpop.f32.mrb[110].mxu0  ;;  %v9286_v4 = vld [vmem:[%s10082_s5] ss:$8 sps:$4 sm:$0xff]   ;;  %v9301_v35 = vld [vmem:[%s10082_s5 + $0x10] ss:$8 sps:$4 sm:$0xff]  }
0x2924   :  { %v3931_v22 = vpop.f32.mrb[103].mxu1  ;;  %v4006_v37 = vpop.f32.mrb[111].mxu0  ;;  %v3933_v62 = vadd.f32 %v3927_v18, %v8257_v24  ;;  %v9293_v18 = vld [vmem:[%s10082_s5 + $0x14] ss:$8 sps:$4 sm:$0xff]   ;;  %v9322_v38 = vld [vmem:[#allocation7] ss:$8 sps:$4 sm:$0xff]  }
0x2925   :  { %v3934_v54 = vadd.f32 %v3929_v15, %v8248_v19  ;;  %v4017_v9 = vrot.slane %v4010_v49, %v8106_v27  ;;  %v9306_v25 = vld [vmem:[#allocation7 + $0x4] ss:$8 sps:$4 sm:$0xff]   ;;  %v9312_v15 = vld [vmem:[%s10082_s5 + $0x20] ss:$8 sps:$4 sm:$0xff]   ;;  %v9326_v34 = vld [vmem:[#allocation7 + $0x14] ss:$8 sps:$4 sm:$0xff]  }
0x2926   :  { %v6960_v60 = vmul.f32 -1.442695, %v3933_v62  ;;  %v9319_v49 = vld [vmem:[%s10082_s5 + $0x34] ss:$8 sps:$4 sm:$0xff]   ;;  %v9332_v22 = vld [vmem:[%s10082_s5 + $0x30] ss:$8 sps:$4 sm:$0xff]  }
0x2927   :  { %7458 = vtanh.f32 %v3934_v54  ;;  %v4024_v48 = vrot.slane %v4017_v9, %v8106_v27  ;;  %v6961_v10 = vmul.f32 -1.442695, %v3934_v54  ;;  %v9336_v37 = vld [vmem:[#allocation7 + $0x10] ss:$8 sps:$4 sm:$0xff]   ;;  %v9339_v54 = vld [vmem:[#allocation7 + $0x24] ss:$8 sps:$4 sm:$0xff]  }
0x2928   :  { %7460 = vpow2.f32 %v6960_v60  ;;  %v9342_v9 = vld [vmem:[#allocation7 + $0x20] ss:$8 sps:$4 sm:$0xff]  }
0x2929   :  { %v4026_v56 = vadd.f32 %v4024_v48, %v3966_v36  ;;  %v9345_v48 = vld [vmem:[#allocation7 + $0x34] ss:$8 sps:$4 sm:$0xff]   ;;  %v9348_v36 = vld [vmem:[#allocation7 + $0x30] ss:$8 sps:$4 sm:$0xff]  }
0x292b   :  { %4034 = vrot.lane.b32.xlu1 %v4026_v56, %s7941_s3  ;;  %v6963_v50 = vmul.f32 -1.442695, %v4026_v56  ;;  %v9354_v56 = vld [vmem:[%s10082_s5 + $0x4] ss:$8 sps:$4 sm:$0xff]  }
0x292d   :  { %7462 = vpow2.f32 %v6963_v50 }
0x2931   :  { %v7459_v59 = vpop.eup %7458 }
0x2932   :  { %3950 = vrot.lane.b32.xlu0 %v7459_v59, %s7941_s3  ;;  %v7461_v57 = vpop.eup %7460 }
0x2933   :  { %v3941_v17 = vadd.f32 1.0, %v7461_v57 }
0x2935   :  { %7464 = vrcp.f32 %v3941_v17 }
0x2937   :  { %v7463_v55 = vpop.eup %7462 }
0x2938   :  { %v4030_v11 = vadd.f32 1.0, %v7463_v55 }
0x293a   :  { %7466 = vrcp.f32 %v4030_v11 }
0x293f   :  { %v7465_v20 = vpop.eup %7464 }
0x2940   :  { %v3948_v43 = vmul.f32 %v7465_v20, %v9189_v52 }
0x2944   :  { %v7467_v12 = vpop.eup %7466 }
0x2945   :  { %v4039_v28 = vmul.f32 %v7467_v12, %v9194_v16  ;;  %v4048_v42 = vrot.slane %v7467_v12, 1 }
0x299d   :  { %v4035_v32 = vpop.permute.xlu1 %4034 }
0x299e   :  { %v4036_v3 = vrot.slane %v4035_v32, 1 }
0x29a0   :  { %7468 = vtanh.f32 %v4036_v3 }
0x29a4   :  { %v3951_v23 = vpop.permute.xlu0 %3950 }
0x29a5   :  { %v3953_v21 = vmul.f32 %v7465_v20, %v3951_v23 }
0x29a7   :  { %3955 = vrot.lane.b32.xlu1 %v3953_v21, %s7941_s3 }
0x29aa   :  { %v7469_v58 = vpop.eup %7468 }
0x29ab   :  { %v4040_v30 = vmul.f32 %v7469_v58, %v7467_v12 }
0x29ad   :  { %4042 = vrot.lane.b32.xlu0 %v4040_v30, %s7941_s3 }
0x2a19   :  { %v3956_v40 = vpop.permute.xlu1 %3955 }
0x2a1a   :  { %v9267_v14 = vadd.f32 %v3956_v40, %v3948_v43 }
0x2a1c   :  { %7470 = vtanh.f32 %v9267_v14 }
0x2a1f   :  { %v4043_v53 = vpop.permute.xlu0 %4042 }
0x2a20   :  { %v9271_v7 = vadd.f32 %v4043_v53, %v4039_v28  ;;  %v4178_v53 = vld [vmem:[#allocation2 + $0x22] ss:$8 sm:$0x3] }
0x2a22   :  { %7472 = vtanh.f32 %v9271_v7 }
0x2a23   :  { %7474 = vpow2.f32 %v6961_v10 }
0x2a26   :  { %v7471_v29 = vpop.eup %7470 }
0x2a27   :  { %3961 = vrot.lane.b32.xlu1 %v7471_v29, %s7941_s3 }
0x2a2c   :  { %v7473_v46 = vpop.eup %7472 }
0x2a2d   :  { %4051 = vrot.lane.b32.xlu0 %v7473_v46, %s7941_s3  ;;  %v7475_v52 = vpop.eup %7474 }
0x2a2e   :  { %v3942_v2 = vadd.f32 1.0, %v7475_v52 }
0x2a30   :  { %7476 = vrcp.f32 %v3942_v2 }
0x2a3a   :  { %v7477_v13 = vpop.eup %7476 }
0x2a99   :  { %v3962_v33 = vpop.permute.xlu1 %3961 }
0x2a9a   :  { %v3964_v41 = vmul.f32 %v7477_v13, %v3962_v33 }
0x2a9c   :  { %v4056_v16 = vpack.c.bf16 %v3964_v41, %v3964_v41 }
0x2a9e   :  { %6964 = vmatmul.mubr.msk.bf16.vlgmr.msra.gmra.mrb[104].mxu1 %vm272_vm2, %v4056_v16 }
0x2a9f   :  { %4180 = vmatpush1.bf16.msra.mxu1 %v9202_v61  ;;  %v4052_v44 = vpop.permute.xlu0 %4051  ;;  %4211 = vmatprep.mubr.bf16.mxu1 %v7939_v1 }
0x2aa0   :  { %v4054_v47 = vmul.f32 %v4052_v44, %v4048_v42  ;;  %4181 = vmatprep.subr.bf16.mxu1 %v9209_v26 }
0x2aa2   :  { %v4055_v45 = vpack.c.bf16 %v4054_v47, %v4054_v47 }
0x2aa3   :  { %4182 = vmatpush1.bf16.msra.mxu1 %v9215_v31 }
0x2aa4   :  { %6965 = vmatmul.mubr.msk.bf16.vlgmr.msra.gmra.mrb[112].mxu0 %vm272_vm2, %v4055_v45  ;;  %4183 = vmatprep.subr.bf16.mxu1 %v9221_v5 }
0x2aa5   :  { %4273 = vmatpush1.bf16.msra.mxu0 %v9286_v4  ;;  %4304 = vmatprep.mubr.bf16.mxu0 %v7939_v1 }
0x2aa6   :  { %4274 = vmatprep.subr.bf16.mxu0 %v9293_v18 }
0x2aa7   :  { %4184 = vmatpush1.bf16.msra.mxu1 %v9148_v51 }
0x2aa8   :  { %4185 = vmatprep.subr.bf16.mxu1 %v9154_v6 }
0x2aa9   :  { %4275 = vmatpush1.bf16.msra.mxu0 %v9301_v35 }
0x2aaa   :  { %4276 = vmatprep.subr.bf16.mxu0 %v9241_v8 }
0x2aab   :  { %4186 = vmatpush1.bf16.msra.mxu1 %v9162_v39 }
0x2aac   :  { %4316 = vmatprep.subr.bf16.mxu1 %v9306_v25 }
0x2aad   :  { %4277 = vmatpush1.bf16.msra.mxu0 %v9312_v15 }
0x2aae   :  { %6968 = vmatmul.mubr.msk.bf16.vlgmr.msra.gmra.mrb[108].mxu1 %vm272_vm2, %v4055_v45  ;;  %4278 = vmatprep.subr.bf16.mxu0 %v9319_v49 }
0x2aaf   :  { %4317 = vmatpush1.bf16.msra.mxu1 %v9322_v38  ;;  %4348 = vmatprep.mubr.bf16.mxu1 %v7939_v1 }
0x2ab0   :  { %4318 = vmatprep.subr.bf16.mxu1 %v9326_v34 }
0x2ab1   :  { %4279 = vmatpush1.bf16.msra.mxu0 %v9332_v22 }
0x2ab2   :  { %4391 = vmatprep.subr.bf16.mxu0 %v9254_v63 }
0x2ab3   :  { %4319 = vmatpush1.bf16.msra.mxu1 %v9336_v37 }
0x2ab4   :  { %4320 = vmatprep.subr.bf16.mxu1 %v9339_v54 }
0x2ab7   :  { %4321 = vmatpush1.bf16.msra.mxu1 %v9342_v9 }
0x2ab8   :  { %4322 = vmatprep.subr.bf16.mxu1 %v9345_v48 }
0x2abb   :  { %4323 = vmatpush1.bf16.msra.mxu1 %v9348_v36 }
0x2abc   :  { %4484 = vmatprep.subr.bf16.mxu1 %v9354_v56 }
0x2b71   :  { %v4094_v59 = vpop.f32.mrb[104].mxu1 }
0x2b72   :  { %v4096_v62 = vpop.f32.mrb[105].mxu1 }
0x2b73   :  { %v4098_v60 = vpop.f32.mrb[106].mxu1 }
0x2b74   :  { %v4099_v50 = vpop.f32.mrb[107].mxu1 }
0x2b77   :  { %v4138_v57 = vpop.f32.mrb[112].mxu0 }
0x2b78   :  { %v4139_v17 = vadd.f32 %v4138_v57, %v4094_v59  ;;  %v4140_v55 = vpop.f32.mrb[113].mxu0 }
0x2b79   :  { %v4141_v11 = vadd.f32 %v4140_v55, %v4096_v62  ;;  %v4142_v32 = vpop.f32.mrb[114].mxu0 }
0x2b7a   :  { %v4143_v3 = vpop.f32.mrb[115].mxu0  ;;  %v4145_v46 = vadd.f32 %v4139_v17, %v8257_v24 }
0x2b7b   :  { %v4146_v20 = vadd.f32 %v4141_v11, %v8248_v19 }
0x2b7c   :  { %v6966_v10 = vmul.f32 -1.442695, %v4145_v46 }
0x2b7d   :  { %7478 = vtanh.f32 %v4146_v20 }
0x2b7e   :  { %7480 = vpow2.f32 %v6966_v10 }
0x2b81   :  { %v4213_v23 = vpop.f32.mrb[108].mxu1 }
0x2b82   :  { %v4215_v21 = vpop.f32.mrb[109].mxu1 }
0x2b83   :  { %v4222_v12 = vcombine.low %v4213_v23, %v4215_v21  ;;  %v4217_v58 = vpop.f32.mrb[110].mxu1  ;;  %v6967_v21 = vmul.f32 -1.442695, %v4146_v20 }
0x2b84   :  { %v4218_v30 = vpop.f32.mrb[111].mxu1 }
0x2b85   :  { %v4229_v43 = vrot.slane %v4222_v12, %v8106_v27 }
0x2b87   :  { %v7479_v40 = vpop.eup %7478  ;;  %v4236_v28 = vrot.slane %v4229_v43, %v8106_v27 }
0x2b88   :  { %4162 = vrot.lane.b32.xlu1 %v7479_v40, %s7941_s3  ;;  %v7481_v52 = vpop.eup %7480 }
0x2b89   :  { %v4238_v29 = vadd.f32 %v4236_v28, %v4178_v53  ;;  %v4153_v13 = vadd.f32 1.0, %v7481_v52 }
0x2b8b   :  { %4246 = vrot.lane.b32.xlu0 %v4238_v29, %s7941_s3  ;;  %v6969_v2 = vmul.f32 -1.442695, %v4238_v29 }
0x2b8d   :  { %7482 = vpow2.f32 %v6969_v2 }
0x2b8e   :  { %7484 = vrcp.f32 %v4153_v13 }
0x2b97   :  { %v7483_v33 = vpop.eup %7482 }
0x2b98   :  { %v7485_v41 = vpop.eup %7484  ;;  %v4242_v42 = vadd.f32 1.0, %v7483_v33 }
0x2b99   :  { %v4160_v50 = vmul.f32 %v7485_v41, %v9267_v14 }
0x2b9a   :  { %7486 = vrcp.f32 %v4242_v42 }
0x2ba4   :  { %v7487_v59 = vpop.eup %7486 }
0x2ba5   :  { %v4251_v11 = vmul.f32 %v7487_v59, %v9271_v7  ;;  %v4260_v7 = vrot.slane %v7487_v59, 1 }
0x2bfa   :  { %v4163_v16 = vpop.permute.xlu1 %4162 }
0x2bfb   :  { %v4165_v44 = vmul.f32 %v7485_v41, %v4163_v16 }
0x2bfd   :  { %v4247_v47 = vpop.permute.xlu0 %4246  ;;  %4167 = vrot.lane.b32.xlu1 %v4165_v44, %s7941_s3 }
0x2bfe   :  { %v4248_v45 = vrot.slane %v4247_v47, 1 }
0x2c00   :  { %7488 = vtanh.f32 %v4248_v45 }
0x2c0a   :  { %v7489_v62 = vpop.eup %7488 }
0x2c0b   :  { %v4252_v60 = vmul.f32 %v7489_v62, %v7487_v59 }
0x2c0d   :  { %4254 = vrot.lane.b32.xlu0 %v4252_v60, %s7941_s3 }
0x2c6f   :  { %v4168_v57 = vpop.permute.xlu1 %4167 }
0x2c70   :  { %v9366_v17 = vadd.f32 %v4168_v57, %v4160_v50 }
0x2c72   :  { %7490 = vtanh.f32 %v9366_v17 }
0x2c7c   :  { %v7491_v55 = vpop.eup %7490 }
0x2c7d   :  { %4173 = vrot.lane.b32.xlu1 %v7491_v55, %s7941_s3  ;;  %v4390_v55 = vld [vmem:[#allocation2 + $0x23] ss:$8 sm:$0x3] }
0x2c7f   :  { %v4255_v32 = vpop.permute.xlu0 %4254 }
0x2c80   :  { %v9371_v3 = vadd.f32 %v4255_v32, %v4251_v11 }
0x2c82   :  { %7492 = vtanh.f32 %v9371_v3 }
0x2c83   :  { %7494 = vpow2.f32 %v6967_v21 }
0x2c8c   :  { %v7493_v23 = vpop.eup %7492 }
0x2c8d   :  { %4263 = vrot.lane.b32.xlu0 %v7493_v23, %s7941_s3  ;;  %v7495_v14 = vpop.eup %7494 }
0x2c8e   :  { %v4154_v12 = vadd.f32 1.0, %v7495_v14 }
0x2c90   :  { %7496 = vrcp.f32 %v4154_v12 }
0x2c9a   :  { %v7497_v58 = vpop.eup %7496 }
0x2cef   :  { %v4174_v30 = vpop.permute.xlu1 %4173 }
0x2cf0   :  { %v4176_v43 = vmul.f32 %v7497_v58, %v4174_v30 }
0x2cf2   :  { %v4268_v40 = vpack.c.bf16 %v4176_v43, %v4176_v43 }
0x2cf4   :  { %6970 = vmatmul.mubr.msk.bf16.vlgmr.msra.gmra.mrb[116].mxu0 %vm272_vm2, %v4268_v40 }
0x2cf5   :  { %4392 = vmatpush1.bf16.msra.mxu0 %v9202_v61  ;;  %4423 = vmatprep.mubr.bf16.mxu0 %v7939_v1 }
0x2cf6   :  { %4393 = vmatprep.subr.bf16.mxu0 %v9209_v26 }
0x2cf9   :  { %4394 = vmatpush1.bf16.msra.mxu0 %v9215_v31 }
0x2cfa   :  { %4395 = vmatprep.subr.bf16.mxu0 %v9221_v5 }
0x2cfd   :  { %4396 = vmatpush1.bf16.msra.mxu0 %v9148_v51 }
0x2cfe   :  { %4397 = vmatprep.subr.bf16.mxu0 %v9154_v6 }
0x2cff   :  { %v4264_v20 = vpop.permute.xlu0 %4263 }
0x2d00   :  { %v4266_v28 = vmul.f32 %v4264_v20, %v4260_v7 }
0x2d01   :  { %4398 = vmatpush1.bf16.msra.mxu0 %v9162_v39 }
0x2d02   :  { %v4267_v53 = vpack.c.bf16 %v4266_v28, %v4266_v28  ;;  %4528 = vmatprep.subr.bf16.mxu0 %v9306_v25 }
0x2d04   :  { %6971 = vmatmul.mubr.msk.bf16.vlgmr.msra.gmra.mrb[112].mxu1 %vm272_vm2, %v4267_v53  ;;  %6974 = vmatmul.mubr.msk.bf16.vlgmr.msra.gmra.mrb[120].mxu0 %vm272_vm2, %v4267_v53 }
0x2d05   :  { %4485 = vmatpush1.bf16.msra.mxu1 %v9286_v4  ;;  %4529 = vmatpush1.bf16.msra.mxu0 %v9322_v38 }
0x2d06   :  { %4486 = vmatprep.subr.bf16.mxu1 %v9293_v18  ;;  %4530 = vmatprep.subr.bf16.mxu0 %v9326_v34 }
0x2d07   :  { %4516 = vmatprep.mubr.bf16.mxu1 %v7939_v1  ;;  %4560 = vmatprep.mubr.bf16.mxu0 %v7939_v1 }
0x2d09   :  { %4487 = vmatpush1.bf16.msra.mxu1 %v9301_v35  ;;  %4531 = vmatpush1.bf16.msra.mxu0 %v9336_v37 }
0x2d0a   :  { %4488 = vmatprep.subr.bf16.mxu1 %v9241_v8  ;;  %4532 = vmatprep.subr.bf16.mxu0 %v9339_v54 }
0x2d0d   :  { %4489 = vmatpush1.bf16.msra.mxu1 %v9312_v15  ;;  %4533 = vmatpush1.bf16.msra.mxu0 %v9342_v9 }
0x2d0e   :  { %4490 = vmatprep.subr.bf16.mxu1 %v9319_v49  ;;  %4534 = vmatprep.subr.bf16.mxu0 %v9345_v48 }
0x2d11   :  { %4491 = vmatpush1.bf16.msra.mxu1 %v9332_v22  ;;  %4535 = vmatpush1.bf16.msra.mxu0 %v9348_v36 }
0x2d12   :  { %4603 = vmatprep.subr.bf16.mxu1 %v9254_v63  ;;  %4696 = vmatprep.subr.bf16.mxu0 %v9354_v56 }
0x2dc7   :  { %v4306_v29 = vpop.f32.mrb[116].mxu0 }
0x2dc8   :  { %v4308_v46 = vpop.f32.mrb[117].mxu0 }
0x2dc9   :  { %v4310_v10 = vpop.f32.mrb[118].mxu0 }
0x2dca   :  { %v4311_v52 = vpop.f32.mrb[119].mxu0 }
0x2dd7   :  { %v4350_v2 = vpop.f32.mrb[112].mxu1  ;;  %v4425_v13 = vpop.f32.mrb[120].mxu0 }
0x2dd8   :  { %v4351_v33 = vadd.f32 %v4350_v2, %v4306_v29  ;;  %v4352_v41 = vpop.f32.mrb[113].mxu1  ;;  %v4427_v16 = vpop.f32.mrb[121].mxu0 }
0x2dd9   :  { %v4353_v42 = vadd.f32 %v4352_v41, %v4308_v46  ;;  %v4434_v44 = vcombine.low %v4425_v13, %v4427_v16  ;;  %v4354_v47 = vpop.f32.mrb[114].mxu1  ;;  %v4429_v45 = vpop.f32.mrb[122].mxu0 }
0x2dda   :  { %v4355_v59 = vpop.f32.mrb[115].mxu1  ;;  %v4430_v62 = vpop.f32.mrb[123].mxu0  ;;  %v4357_v23 = vadd.f32 %v4351_v33, %v8257_v24 }
0x2ddb   :  { %v4358_v60 = vadd.f32 %v4353_v42, %v8248_v19  ;;  %v4441_v50 = vrot.slane %v4434_v44, %v8106_v27 }
0x2ddc   :  { %v6972_v21 = vmul.f32 -1.442695, %v4357_v23 }
0x2ddd   :  { %7498 = vtanh.f32 %v4358_v60  ;;  %v4448_v57 = vrot.slane %v4441_v50, %v8106_v27  ;;  %v6973_v47 = vmul.f32 -1.442695, %v4358_v60 }
0x2dde   :  { %7500 = vpow2.f32 %v6972_v21 }
0x2ddf   :  { %v4450_v11 = vadd.f32 %v4448_v57, %v4390_v55 }
0x2de1   :  { %4458 = vrot.lane.b32.xlu1 %v4450_v11, %s7941_s3  ;;  %v6975_v14 = vmul.f32 -1.442695, %v4450_v11 }
0x2de3   :  { %7502 = vpow2.f32 %v6975_v14 }
0x2de7   :  { %v7499_v32 = vpop.eup %7498 }
0x2de8   :  { %4374 = vrot.lane.b32.xlu0 %v7499_v32, %s7941_s3  ;;  %v7501_v12 = vpop.eup %7500 }
0x2de9   :  { %v4365_v58 = vadd.f32 1.0, %v7501_v12 }
0x2deb   :  { %7504 = vrcp.f32 %v4365_v58 }
0x2ded   :  { %v7503_v30 = vpop.eup %7502 }
0x2dee   :  { %v4454_v43 = vadd.f32 1.0, %v7503_v30 }
0x2df0   :  { %7506 = vrcp.f32 %v4454_v43 }
0x2df5   :  { %v7505_v20 = vpop.eup %7504 }
0x2df6   :  { %v4372_v52 = vmul.f32 %v7505_v20, %v9366_v17 }
0x2dfa   :  { %v7507_v29 = vpop.eup %7506 }
0x2dfb   :  { %v4463_v33 = vmul.f32 %v7507_v29, %v9371_v3  ;;  %v4472_v57 = vrot.slane %v7507_v29, 1 }
0x2e53   :  { %v4459_v40 = vpop.permute.xlu1 %4458 }
0x2e54   :  { %v4460_v7 = vrot.slane %v4459_v40, 1 }
0x2e56   :  { %7508 = vtanh.f32 %v4460_v7 }
0x2e5a   :  { %v4375_v28 = vpop.permute.xlu0 %4374 }
0x2e5b   :  { %v4377_v53 = vmul.f32 %v7505_v20, %v4375_v28 }
0x2e5d   :  { %4379 = vrot.lane.b32.xlu1 %v4377_v53, %s7941_s3 }
0x2e60   :  { %v7509_v46 = vpop.eup %7508 }
0x2e61   :  { %v4464_v10 = vmul.f32 %v7509_v46, %v7507_v29 }
0x2e63   :  { %4466 = vrot.lane.b32.xlu0 %v4464_v10, %s7941_s3 }
0x2ecf   :  { %v4380_v2 = vpop.permute.xlu1 %4379 }
0x2ed0   :  { %v9414_v13 = vadd.f32 %v4380_v2, %v4372_v52 }
0x2ed2   :  { %7510 = vtanh.f32 %v9414_v13 }
0x2ed5   :  { %v4467_v41 = vpop.permute.xlu0 %4466 }
0x2ed6   :  { %v9418_v16 = vadd.f32 %v4467_v41, %v4463_v33  ;;  %v4602_v41 = vld [vmem:[#allocation2 + $0x24] ss:$8 sm:$0x3] }
0x2ed8   :  { %7512 = vtanh.f32 %v9418_v16 }
0x2ed9   :  { %7514 = vpow2.f32 %v6973_v47 }
0x2edc   :  { %v7511_v42 = vpop.eup %7510 }
0x2edd   :  { %4385 = vrot.lane.b32.xlu1 %v7511_v42, %s7941_s3 }
0x2ee2   :  { %v7513_v44 = vpop.eup %7512 }
0x2ee3   :  { %4475 = vrot.lane.b32.xlu0 %v7513_v44, %s7941_s3  ;;  %v7515_v17 = vpop.eup %7514 }
0x2ee4   :  { %v4366_v45 = vadd.f32 1.0, %v7515_v17 }
0x2ee6   :  { %7516 = vrcp.f32 %v4366_v45 }
0x2ef0   :  { %v7517_v59 = vpop.eup %7516 }
0x2f4f   :  { %v4386_v62 = vpop.permute.xlu1 %4385 }
0x2f50   :  { %v4388_v50 = vmul.f32 %v7517_v59, %v4386_v62 }
0x2f52   :  { %v4480_v3 = vpack.c.bf16 %v4388_v50, %v4388_v50 }
0x2f54   :  { %6976 = vmatmul.mubr.msk.bf16.vlgmr.msra.gmra.mrb[116].mxu1 %vm272_vm2, %v4480_v3 }
0x2f55   :  { %4604 = vmatpush1.bf16.msra.mxu1 %v9202_v61  ;;  %v4476_v55 = vpop.permute.xlu0 %4475  ;;  %4635 = vmatprep.mubr.bf16.mxu1 %v7939_v1 }
0x2f56   :  { %v4478_v11 = vmul.f32 %v4476_v55, %v4472_v57  ;;  %4605 = vmatprep.subr.bf16.mxu1 %v9209_v26 }
0x2f58   :  { %v4479_v60 = vpack.c.bf16 %v4478_v11, %v4478_v11 }
0x2f59   :  { %4606 = vmatpush1.bf16.msra.mxu1 %v9215_v31 }
0x2f5a   :  { %6977 = vmatmul.mubr.msk.bf16.vlgmr.msra.gmra.mrb[124].mxu0 %vm272_vm2, %v4479_v60  ;;  %4607 = vmatprep.subr.bf16.mxu1 %v9221_v5 }
0x2f5b   :  { %4697 = vmatpush1.bf16.msra.mxu0 %v9286_v4  ;;  %4728 = vmatprep.mubr.bf16.mxu0 %v7939_v1 }
0x2f5c   :  { %4698 = vmatprep.subr.bf16.mxu0 %v9293_v18 }
0x2f5d   :  { %4608 = vmatpush1.bf16.msra.mxu1 %v9148_v51 }
0x2f5e   :  { %4609 = vmatprep.subr.bf16.mxu1 %v9154_v6 }
0x2f5f   :  { %4699 = vmatpush1.bf16.msra.mxu0 %v9301_v35 }
0x2f60   :  { %4700 = vmatprep.subr.bf16.mxu0 %v9241_v8 }
0x2f61   :  { %4610 = vmatpush1.bf16.msra.mxu1 %v9162_v39 }
0x2f62   :  { %4740 = vmatprep.subr.bf16.mxu1 %v9306_v25 }
0x2f63   :  { %4701 = vmatpush1.bf16.msra.mxu0 %v9312_v15 }
0x2f64   :  { %6980 = vmatmul.mubr.msk.bf16.vlgmr.msra.gmra.mrb[120].mxu1 %vm272_vm2, %v4479_v60  ;;  %4702 = vmatprep.subr.bf16.mxu0 %v9319_v49 }
0x2f65   :  { %4741 = vmatpush1.bf16.msra.mxu1 %v9322_v38  ;;  %4772 = vmatprep.mubr.bf16.mxu1 %v7939_v1 }
0x2f66   :  { %4742 = vmatprep.subr.bf16.mxu1 %v9326_v34 }
0x2f67   :  { %4703 = vmatpush1.bf16.msra.mxu0 %v9332_v22 }
0x2f68   :  { %4815 = vmatprep.subr.bf16.mxu0 %v9254_v63 }
0x2f69   :  { %4743 = vmatpush1.bf16.msra.mxu1 %v9336_v37 }
0x2f6a   :  { %4744 = vmatprep.subr.bf16.mxu1 %v9339_v54 }
0x2f6d   :  { %4745 = vmatpush1.bf16.msra.mxu1 %v9342_v9 }
0x2f6e   :  { %4746 = vmatprep.subr.bf16.mxu1 %v9345_v48 }
0x2f71   :  { %4747 = vmatpush1.bf16.msra.mxu1 %v9348_v36 }
0x2f72   :  { %4908 = vmatprep.subr.bf16.mxu1 %v9354_v56 }
0x3027   :  { %v4518_v32 = vpop.f32.mrb[116].mxu1 }
0x3028   :  { %v4520_v23 = vpop.f32.mrb[117].mxu1 }
0x3029   :  { %v4522_v21 = vpop.f32.mrb[118].mxu1 }
0x302a   :  { %v4523_v14 = vpop.f32.mrb[119].mxu1 }
0x302d   :  { %v4562_v12 = vpop.f32.mrb[124].mxu0 }
0x302e   :  { %v4563_v58 = vadd.f32 %v4562_v12, %v4518_v32  ;;  %v4564_v30 = vpop.f32.mrb[125].mxu0 }
0x302f   :  { %v4565_v43 = vadd.f32 %v4564_v30, %v4520_v23  ;;  %v4566_v40 = vpop.f32.mrb[126].mxu0 }
0x3030   :  { %v4567_v7 = vpop.f32.mrb[127].mxu0  ;;  %v4569_v44 = vadd.f32 %v4563_v58, %v8257_v24 }
0x3031   :  { %v4570_v20 = vadd.f32 %v4565_v43, %v8248_v19 }
0x3032   :  { %v6978_v47 = vmul.f32 -1.442695, %v4569_v44 }
0x3033   :  { %7518 = vtanh.f32 %v4570_v20 }
0x3034   :  { %7520 = vpow2.f32 %v6978_v47 }
0x3037   :  { %v4637_v28 = vpop.f32.mrb[120].mxu1 }
0x3038   :  { %v4639_v53 = vpop.f32.mrb[121].mxu1 }
0x3039   :  { %v4646_v29 = vcombine.low %v4637_v28, %v4639_v53  ;;  %v4641_v46 = vpop.f32.mrb[122].mxu1  ;;  %v6979_v53 = vmul.f32 -1.442695, %v4570_v20 }
0x303a   :  { %v4642_v10 = vpop.f32.mrb[123].mxu1 }
0x303b   :  { %v4653_v52 = vrot.slane %v4646_v29, %v8106_v27 }
0x303d   :  { %v7519_v2 = vpop.eup %7518  ;;  %v4660_v33 = vrot.slane %v4653_v52, %v8106_v27 }
0x303e   :  { %4586 = vrot.lane.b32.xlu1 %v7519_v2, %s7941_s3  ;;  %v7521_v17 = vpop.eup %7520 }
0x303f   :  { %v4662_v42 = vadd.f32 %v4660_v33, %v4602_v41  ;;  %v4577_v59 = vadd.f32 1.0, %v7521_v17 }
0x3041   :  { %4670 = vrot.lane.b32.xlu0 %v4662_v42, %s7941_s3  ;;  %v6981_v45 = vmul.f32 -1.442695, %v4662_v42 }
0x3043   :  { %7522 = vpow2.f32 %v6981_v45 }
0x3044   :  { %7524 = vrcp.f32 %v4577_v59 }
0x304d   :  { %v7523_v62 = vpop.eup %7522 }
0x304e   :  { %v7525_v50 = vpop.eup %7524  ;;  %v4666_v57 = vadd.f32 1.0, %v7523_v62 }
0x304f   :  { %v4584_v14 = vmul.f32 %v7525_v50, %v9414_v13 }
0x3050   :  { %7526 = vrcp.f32 %v4666_v57 }
0x305a   :  { %v7527_v32 = vpop.eup %7526 }
0x305b   :  { %v4675_v43 = vmul.f32 %v7527_v32, %v9418_v16  ;;  %v4684_v16 = vrot.slane %v7527_v32, 1 }
0x30b0   :  { %v4587_v3 = vpop.permute.xlu1 %4586 }
0x30b1   :  { %v4589_v55 = vmul.f32 %v7525_v50, %v4587_v3 }
0x30b3   :  { %v4671_v11 = vpop.permute.xlu0 %4670  ;;  %4591 = vrot.lane.b32.xlu1 %v4589_v55, %s7941_s3 }
0x30b4   :  { %v4672_v60 = vrot.slane %v4671_v11, 1 }
0x30b6   :  { %7528 = vtanh.f32 %v4672_v60 }
0x30c0   :  { %v7529_v23 = vpop.eup %7528 }
0x30c1   :  { %v4676_v21 = vmul.f32 %v7529_v23, %v7527_v32 }
0x30c3   :  { %4678 = vrot.lane.b32.xlu0 %v4676_v21, %s7941_s3  ;;  %v4814_v21 = vld [vmem:[#allocation2 + $0x25] ss:$8 sm:$0x3] }
0x3125   :  { %v4592_v12 = vpop.permute.xlu1 %4591 }
0x3126   :  { %v9462_v58 = vadd.f32 %v4592_v12, %v4584_v14 }
0x3128   :  { %7530 = vtanh.f32 %v9462_v58 }
0x3132   :  { %v7531_v30 = vpop.eup %7530 }
0x3133   :  { %4597 = vrot.lane.b32.xlu1 %v7531_v30, %s7941_s3 }
0x3135   :  { %v4679_v40 = vpop.permute.xlu0 %4678 }
0x3136   :  { %v9467_v7 = vadd.f32 %v4679_v40, %v4675_v43 }
0x3138   :  { %7532 = vtanh.f32 %v9467_v7 }
0x3139   :  { %7534 = vpow2.f32 %v6979_v53 }
0x3142   :  { %v7533_v28 = vpop.eup %7532 }
0x3143   :  { %4687 = vrot.lane.b32.xlu0 %v7533_v28, %s7941_s3  ;;  %v7535_v13 = vpop.eup %7534 }
0x3144   :  { %v4578_v29 = vadd.f32 1.0, %v7535_v13 }
0x3146   :  { %7536 = vrcp.f32 %v4578_v29 }
0x3150   :  { %v7537_v46 = vpop.eup %7536 }
0x31a5   :  { %v4598_v10 = vpop.permute.xlu1 %4597 }
0x31a6   :  { %v4600_v52 = vmul.f32 %v7537_v46, %v4598_v10 }
0x31a8   :  { %v4692_v2 = vpack.c.bf16 %v4600_v52, %v4600_v52 }
0x31aa   :  { %6982 = vmatmul.mubr.msk.bf16.vlgmr.msra.gmra.mrb[128].mxu0 %vm272_vm2, %v4692_v2 }
0x31ab   :  { %4816 = vmatpush1.bf16.msra.mxu0 %v9202_v61  ;;  %4847 = vmatprep.mubr.bf16.mxu0 %v7939_v1 }
0x31ac   :  { %4817 = vmatprep.subr.bf16.mxu0 %v9209_v26 }
0x31af   :  { %4818 = vmatpush1.bf16.msra.mxu0 %v9215_v31 }
0x31b0   :  { %4819 = vmatprep.subr.bf16.mxu0 %v9221_v5 }
0x31b3   :  { %4820 = vmatpush1.bf16.msra.mxu0 %v9148_v51 }
0x31b4   :  { %4821 = vmatprep.subr.bf16.mxu0 %v9154_v6 }
0x31b5   :  { %v4688_v20 = vpop.permute.xlu0 %4687 }
0x31b6   :  { %v4690_v33 = vmul.f32 %v4688_v20, %v4684_v16 }
0x31b7   :  { %4822 = vmatpush1.bf16.msra.mxu0 %v9162_v39 }
0x31b8   :  { %v4691_v41 = vpack.c.bf16 %v4690_v33, %v4690_v33  ;;  %4952 = vmatprep.subr.bf16.mxu0 %v9306_v25 }
0x31ba   :  { %6983 = vmatmul.mubr.msk.bf16.vlgmr.msra.gmra.mrb[124].mxu1 %vm272_vm2, %v4691_v41  ;;  %6986 = vmatmul.mubr.msk.bf16.vlgmr.msra.gmra.mrb[132].mxu0 %vm272_vm2, %v4691_v41 }
0x31bb   :  { %4909 = vmatpush1.bf16.msra.mxu1 %v9286_v4  ;;  %4953 = vmatpush1.bf16.msra.mxu0 %v9322_v38 }
0x31bc   :  { %4910 = vmatprep.subr.bf16.mxu1 %v9293_v18  ;;  %4954 = vmatprep.subr.bf16.mxu0 %v9326_v34 }
0x31bd   :  { %4940 = vmatprep.mubr.bf16.mxu1 %v7939_v1  ;;  %4984 = vmatprep.mubr.bf16.mxu0 %v7939_v1 }
0x31bf   :  { %4911 = vmatpush1.bf16.msra.mxu1 %v9301_v35  ;;  %4955 = vmatpush1.bf16.msra.mxu0 %v9336_v37 }
0x31c0   :  { %4912 = vmatprep.subr.bf16.mxu1 %v9241_v8  ;;  %4956 = vmatprep.subr.bf16.mxu0 %v9339_v54 }
0x31c3   :  { %4913 = vmatpush1.bf16.msra.mxu1 %v9312_v15  ;;  %4957 = vmatpush1.bf16.msra.mxu0 %v9342_v9 }
0x31c4   :  { %4914 = vmatprep.subr.bf16.mxu1 %v9319_v49  ;;  %4958 = vmatprep.subr.bf16.mxu0 %v9345_v48 }
0x31c7   :  { %4915 = vmatpush1.bf16.msra.mxu1 %v9332_v22  ;;  %4959 = vmatpush1.bf16.msra.mxu0 %v9348_v36 }
0x31c8   :  { %5027 = vmatprep.subr.bf16.mxu1 %v9254_v63  ;;  %5120 = vmatprep.subr.bf16.mxu0 %v9354_v56 }
0x327d   :  { %v4730_v51 = vpop.f32.mrb[128].mxu0 }
0x327e   :  { %v4732_v6 = vpop.f32.mrb[129].mxu0 }
0x327f   :  { %v4734_v39 = vpop.f32.mrb[130].mxu0 }
0x3280   :  { %v4735_v42 = vpop.f32.mrb[131].mxu0 }
0x328d   :  { %v4774_v44 = vpop.f32.mrb[124].mxu1  ;;  %v4849_v47 = vpop.f32.mrb[132].mxu0 }
0x328e   :  { %v4775_v17 = vadd.f32 %v4774_v44, %v4730_v51  ;;  %v4776_v45 = vpop.f32.mrb[125].mxu1  ;;  %v4851_v59 = vpop.f32.mrb[133].mxu0 }
0x328f   :  { %v4777_v62 = vadd.f32 %v4776_v45, %v4732_v6  ;;  %v4858_v50 = vcombine.low %v4849_v47, %v4851_v59  ;;  %v4778_v3 = vpop.f32.mrb[126].mxu1  ;;  %v4853_v57 = vpop.f32.mrb[134].mxu0 }
0x3290   :  { %v4779_v55 = vpop.f32.mrb[127].mxu1  ;;  %v4854_v11 = vpop.f32.mrb[135].mxu0  ;;  %v4781_v30 = vadd.f32 %v4775_v17, %v8257_v24 }
0x3291   :  { %v4782_v60 = vadd.f32 %v4777_v62, %v8248_v19  ;;  %v4865_v32 = vrot.slane %v4858_v50, %v8106_v27 }
0x3292   :  { %v6984_v43 = vmul.f32 -1.442695, %v4781_v30 }
0x3293   :  { %7538 = vtanh.f32 %v4782_v60  ;;  %v4872_v23 = vrot.slane %v4865_v32, %v8106_v27  ;;  %v6985_v59 = vmul.f32 -1.442695, %v4782_v60 }
0x3294   :  { %7540 = vpow2.f32 %v6984_v43 }
0x3295   :  { %v4874_v14 = vadd.f32 %v4872_v23, %v4814_v21 }
0x3297   :  { %4882 = vrot.lane.b32.xlu1 %v4874_v14, %s7941_s3  ;;  %v6987_v40 = vmul.f32 -1.442695, %v4874_v14 }
0x3299   :  { %7542 = vpow2.f32 %v6987_v40 }
0x329d   :  { %v7539_v12 = vpop.eup %7538 }
0x329e   :  { %4798 = vrot.lane.b32.xlu0 %v7539_v12, %s7941_s3  ;;  %v7541_v28 = vpop.eup %7540 }
0x329f   :  { %v4789_v53 = vadd.f32 1.0, %v7541_v28 }
0x32a1   :  { %7544 = vrcp.f32 %v4789_v53 }
0x32a3   :  { %v7543_v13 = vpop.eup %7542 }
0x32a4   :  { %v4878_v29 = vadd.f32 1.0, %v7543_v13 }
0x32a6   :  { %7546 = vrcp.f32 %v4878_v29 }
0x32ab   :  { %v7545_v52 = vpop.eup %7544 }
0x32ac   :  { %v4796_v51 = vmul.f32 %v7545_v52, %v9462_v58 }
0x32b0   :  { %v7547_v20 = vpop.eup %7546 }
0x32b1   :  { %v4887_v42 = vmul.f32 %v7547_v20, %v9467_v7  ;;  %v4896_v55 = vrot.slane %v7547_v20, 1 }
0x3309   :  { %v4883_v46 = vpop.permute.xlu1 %4882 }
0x330a   :  { %v4884_v10 = vrot.slane %v4883_v46, 1 }
0x330c   :  { %7548 = vtanh.f32 %v4884_v10 }
0x3310   :  { %v4799_v2 = vpop.permute.xlu0 %4798 }
0x3311   :  { %v4801_v16 = vmul.f32 %v7545_v52, %v4799_v2 }
0x3313   :  { %4803 = vrot.lane.b32.xlu1 %v4801_v16, %s7941_s3 }
0x3316   :  { %v7549_v33 = vpop.eup %7548 }
0x3317   :  { %v4888_v41 = vmul.f32 %v7549_v33, %v7547_v20  ;;  %v5026_v20 = vld [vmem:[#allocation2 + $0x26] ss:$8 sm:$0x3] }
0x3319   :  { %4890 = vrot.lane.b32.xlu0 %v4888_v41, %s7941_s3 }
0x3385   :  { %v4804_v6 = vpop.permute.xlu1 %4803 }
0x3386   :  { %v9510_v39 = vadd.f32 %v4804_v6, %v4796_v51 }
0x3388   :  { %7550 = vtanh.f32 %v9510_v39 }
0x338b   :  { %v4891_v44 = vpop.permute.xlu0 %4890 }
0x338c   :  { %v9514_v47 = vadd.f32 %v4891_v44, %v4887_v42 }
0x338e   :  { %7552 = vtanh.f32 %v9514_v47 }
0x338f   :  { %7554 = vpow2.f32 %v6985_v59 }
0x3392   :  { %v7551_v17 = vpop.eup %7550 }
0x3393   :  { %4809 = vrot.lane.b32.xlu1 %v7551_v17, %s7941_s3 }
0x3398   :  { %v7553_v45 = vpop.eup %7552 }
0x3399   :  { %4899 = vrot.lane.b32.xlu0 %v7553_v45, %s7941_s3  ;;  %v7555_v58 = vpop.eup %7554 }
0x339a   :  { %v4790_v62 = vadd.f32 1.0, %v7555_v58 }
0x339c   :  { %7556 = vrcp.f32 %v4790_v62 }
0x33a6   :  { %v7557_v50 = vpop.eup %7556 }
0x3405   :  { %v4810_v3 = vpop.permute.xlu1 %4809 }
0x3406   :  { %v4812_v57 = vmul.f32 %v7557_v50, %v4810_v3 }
0x3408   :  { %v4904_v7 = vpack.c.bf16 %v4812_v57, %v4812_v57 }
0x340a   :  { %6988 = vmatmul.mubr.msk.bf16.vlgmr.msra.gmra.mrb[128].mxu1 %vm272_vm2, %v4904_v7 }
0x340b   :  { %5028 = vmatpush1.bf16.msra.mxu1 %v9202_v61  ;;  %v4900_v11 = vpop.permute.xlu0 %4899  ;;  %5059 = vmatprep.mubr.bf16.mxu1 %v7939_v1  ;;  %v9532_v61 = vld [vmem:[%s10079_s2 + $0x20] ss:$8 sps:$4 sm:$0xff]  }
0x340c   :  { %v4902_v32 = vmul.f32 %v4900_v11, %v4896_v55  ;;  %5029 = vmatprep.subr.bf16.mxu1 %v9209_v26  ;;  %v9538_v26 = vld [vmem:[%s10079_s2 + $0x34] ss:$8 sps:$4 sm:$0xff]  }
0x340e   :  { %v4903_v60 = vpack.c.bf16 %v4902_v32, %v4902_v32 }
0x340f   :  { %5030 = vmatpush1.bf16.msra.mxu1 %v9215_v31  ;;  %v9546_v31 = vld [vmem:[%s10079_s2 + $0x30] ss:$8 sps:$4 sm:$0xff]  }
0x3410   :  { %6989 = vmatmul.mubr.msk.bf16.vlgmr.msra.gmra.mrb[136].mxu0 %vm272_vm2, %v4903_v60  ;;  %5031 = vmatprep.subr.bf16.mxu1 %v9221_v5 }
0x3411   :  { %5121 = vmatpush1.bf16.msra.mxu0 %v9286_v4  ;;  %5152 = vmatprep.mubr.bf16.mxu0 %v7939_v1 }
0x3412   :  { %5122 = vmatprep.subr.bf16.mxu0 %v9293_v18 }
0x3413   :  { %5032 = vmatpush1.bf16.msra.mxu1 %v9532_v61 }
0x3414   :  { %5033 = vmatprep.subr.bf16.mxu1 %v9538_v26 }
0x3415   :  { %5123 = vmatpush1.bf16.msra.mxu0 %v9301_v35 }
0x3416   :  { %5124 = vmatprep.subr.bf16.mxu0 %v9241_v8 }
0x3417   :  { %5034 = vmatpush1.bf16.msra.mxu1 %v9546_v31 }
0x3418   :  { %5164 = vmatprep.subr.bf16.mxu1 %v9306_v25 }
0x3419   :  { %5125 = vmatpush1.bf16.msra.mxu0 %v9312_v15 }
0x341a   :  { %6992 = vmatmul.mubr.msk.bf16.vlgmr.msra.gmra.mrb[132].mxu1 %vm272_vm2, %v4903_v60  ;;  %5126 = vmatprep.subr.bf16.mxu0 %v9319_v49 }
0x341b   :  { %5165 = vmatpush1.bf16.msra.mxu1 %v9322_v38  ;;  %5196 = vmatprep.mubr.bf16.mxu1 %v7939_v1 }
0x341c   :  { %5166 = vmatprep.subr.bf16.mxu1 %v9326_v34 }
0x341d   :  { %5127 = vmatpush1.bf16.msra.mxu0 %v9332_v22 }
0x341e   :  { %5239 = vmatprep.subr.bf16.mxu0 %v9254_v63 }
0x341f   :  { %5167 = vmatpush1.bf16.msra.mxu1 %v9336_v37 }
0x3420   :  { %5168 = vmatprep.subr.bf16.mxu1 %v9339_v54 }
0x3423   :  { %5169 = vmatpush1.bf16.msra.mxu1 %v9342_v9 }
0x3424   :  { %5170 = vmatprep.subr.bf16.mxu1 %v9345_v48 }
0x3427   :  { %5171 = vmatpush1.bf16.msra.mxu1 %v9348_v36 }
0x3428   :  { %5332 = vmatprep.subr.bf16.mxu1 %v9354_v56 }
0x34dd   :  { %v4942_v5 = vpop.f32.mrb[128].mxu1 }
0x34de   :  { %v4944_v8 = vpop.f32.mrb[129].mxu1 }
0x34df   :  { %v4946_v23 = vpop.f32.mrb[130].mxu1 }
0x34e0   :  { %v4947_v21 = vpop.f32.mrb[131].mxu1 }
0x34e3   :  { %v4986_v14 = vpop.f32.mrb[136].mxu0 }
0x34e4   :  { %v4987_v12 = vadd.f32 %v4986_v14, %v4942_v5  ;;  %v4988_v30 = vpop.f32.mrb[137].mxu0 }
0x34e5   :  { %v4989_v63 = vadd.f32 %v4988_v30, %v4944_v8  ;;  %v4990_v43 = vpop.f32.mrb[138].mxu0 }
0x34e6   :  { %v4991_v40 = vpop.f32.mrb[139].mxu0  ;;  %v4993_v41 = vadd.f32 %v4987_v12, %v8257_v24 }
0x34e7   :  { %v4994_v28 = vadd.f32 %v4989_v63, %v8248_v19 }
0x34e8   :  { %v6990_v51 = vmul.f32 -1.442695, %v4993_v41 }
0x34e9   :  { %7558 = vtanh.f32 %v4994_v28  ;;  %v6991_v12 = vmul.f32 -1.442695, %v4994_v28  ;;  %v9593_v28 = vld [vmem:[%s10079_s2 + $0x14] ss:$8 sps:$4 sm:$0xff]  }
0x34ea   :  { %7560 = vpow2.f32 %v6990_v51 }
0x34ed   :  { %v5061_v53 = vpop.f32.mrb[132].mxu1 }
0x34ee   :  { %v5063_v13 = vpop.f32.mrb[133].mxu1 }
0x34ef   :  { %v5070_v29 = vcombine.low %v5061_v53, %v5063_v13  ;;  %v5065_v46 = vpop.f32.mrb[134].mxu1  ;;  %v9599_v13 = vld [vmem:[%s10079_s2 + $0x10] ss:$8 sps:$4 sm:$0xff]  }
0x34f0   :  { %v5066_v10 = vpop.f32.mrb[135].mxu1 }
0x34f1   :  { %v5077_v52 = vrot.slane %v5070_v29, %v8106_v27  ;;  %v9605_v29 = vld [vmem:[%s10079_s2 + $0x24] ss:$8 sps:$4 sm:$0xff]  }
0x34f3   :  { %v7559_v2 = vpop.eup %7558  ;;  %v5084_v16 = vrot.slane %v5077_v52, %v8106_v27 }
0x34f4   :  { %5010 = vrot.lane.b32.xlu1 %v7559_v2, %s7941_s3  ;;  %v7561_v6 = vpop.eup %7560 }
0x34f5   :  { %v5086_v33 = vadd.f32 %v5084_v16, %v5026_v20  ;;  %v5001_v44 = vadd.f32 1.0, %v7561_v6  ;;  %v5238_v6 = vld [vmem:[#allocation2 + $0x27] ss:$8 sm:$0x3] }
0x34f7   :  { %5094 = vrot.lane.b32.xlu0 %v5086_v33, %s7941_s3  ;;  %v6993_v42 = vmul.f32 -1.442695, %v5086_v33 }
0x34f9   :  { %7562 = vpow2.f32 %v6993_v42 }
0x34fa   :  { %7564 = vrcp.f32 %v5001_v44 }
0x3503   :  { %v7563_v17 = vpop.eup %7562 }
0x3504   :  { %v7565_v45 = vpop.eup %7564  ;;  %v5090_v58 = vadd.f32 1.0, %v7563_v17 }
0x3505   :  { %v5008_v11 = vmul.f32 %v7565_v45, %v9510_v39 }
0x3506   :  { %7566 = vrcp.f32 %v5090_v58 }
0x3510   :  { %v7567_v57 = vpop.eup %7566 }
0x3511   :  { %v5099_v8 = vmul.f32 %v7567_v57, %v9514_v47  ;;  %v9586_v47 = vld [vmem:[%s10079_s2] ss:$8 sps:$4 sm:$0xff]   ;;  %v5108_v46 = vrot.slane %v7567_v57, 1 }
0x3566   :  { %v5011_v59 = vpop.permute.xlu1 %5010 }
0x3567   :  { %v5013_v62 = vmul.f32 %v7565_v45, %v5011_v59 }
0x3569   :  { %v5095_v50 = vpop.permute.xlu0 %5094  ;;  %5015 = vrot.lane.b32.xlu1 %v5013_v62, %s7941_s3 }
0x356a   :  { %v5096_v3 = vrot.slane %v5095_v50, 1 }
0x356c   :  { %7568 = vtanh.f32 %v5096_v3 }
0x3576   :  { %v7569_v7 = vpop.eup %7568 }
0x3577   :  { %v5100_v55 = vmul.f32 %v7569_v7, %v7567_v57 }
0x3579   :  { %5102 = vrot.lane.b32.xlu0 %v5100_v55, %s7941_s3 }
0x35db   :  { %v5016_v32 = vpop.permute.xlu1 %5015 }
0x35dc   :  { %v9573_v60 = vadd.f32 %v5016_v32, %v5008_v11 }
0x35de   :  { %7570 = vtanh.f32 %v9573_v60 }
0x35e8   :  { %v7571_v5 = vpop.eup %7570 }
0x35e9   :  { %5021 = vrot.lane.b32.xlu1 %v7571_v5, %s7941_s3 }
0x35eb   :  { %v5103_v23 = vpop.permute.xlu0 %5102 }
0x35ec   :  { %v9578_v21 = vadd.f32 %v5103_v23, %v5099_v8 }
0x35ee   :  { %7572 = vtanh.f32 %v9578_v21 }
0x35ef   :  { %7574 = vpow2.f32 %v6991_v12 }
0x35f8   :  { %v7573_v14 = vpop.eup %7572 }
0x35f9   :  { %5111 = vrot.lane.b32.xlu0 %v7573_v14, %s7941_s3  ;;  %v7575_v39 = vpop.eup %7574 }
0x35fa   :  { %v5002_v30 = vadd.f32 1.0, %v7575_v39 }
0x35fc   :  { %7576 = vrcp.f32 %v5002_v30 }
0x3606   :  { %v7577_v63 = vpop.eup %7576 }
0x365b   :  { %v5022_v43 = vpop.permute.xlu1 %5021 }
0x365c   :  { %v5024_v40 = vmul.f32 %v7577_v63, %v5022_v43 }
0x365e   :  { %v5116_v53 = vpack.c.bf16 %v5024_v40, %v5024_v40 }
0x3660   :  { %6994 = vmatmul.mubr.msk.bf16.vlgmr.msra.gmra.mrb[140].mxu0 %vm272_vm2, %v5116_v53 }
0x3661   :  { %5240 = vmatpush1.bf16.msra.mxu0 %v9586_v47  ;;  %5271 = vmatprep.mubr.bf16.mxu0 %v7939_v1 }
0x3662   :  { %5241 = vmatprep.subr.bf16.mxu0 %v9593_v28 }
0x3665   :  { %5242 = vmatpush1.bf16.msra.mxu0 %v9599_v13 }
0x3666   :  { %5243 = vmatprep.subr.bf16.mxu0 %v9605_v29 }
0x3669   :  { %5244 = vmatpush1.bf16.msra.mxu0 %v9532_v61 }
0x366a   :  { %5245 = vmatprep.subr.bf16.mxu0 %v9538_v26 }
0x366b   :  { %v5112_v10 = vpop.permute.xlu0 %5111 }
0x366c   :  { %v5114_v52 = vmul.f32 %v5112_v10, %v5108_v46 }
0x366d   :  { %5246 = vmatpush1.bf16.msra.mxu0 %v9546_v31 }
0x366e   :  { %v5115_v2 = vpack.c.bf16 %v5114_v52, %v5114_v52  ;;  %5376 = vmatprep.subr.bf16.mxu0 %v9306_v25  ;;  %v9625_v25 = vld [vmem:[%s10082_s5 + $0x24] ss:$8 sps:$4 sm:$0xff]  }
0x3670   :  { %6995 = vmatmul.mubr.msk.bf16.vlgmr.msra.gmra.mrb[136].mxu1 %vm272_vm2, %v5115_v2  ;;  %6998 = vmatmul.mubr.msk.bf16.vlgmr.msra.gmra.mrb[144].mxu0 %vm272_vm2, %v5115_v2 }
0x3671   :  { %5333 = vmatpush1.bf16.msra.mxu1 %v9286_v4  ;;  %5377 = vmatpush1.bf16.msra.mxu0 %v9322_v38  ;;  %v9638_v4 = vld [vmem:[%s10079_s2 + $0x4] ss:$8 sps:$4 sm:$0xff]  }
0x3672   :  { %5334 = vmatprep.subr.bf16.mxu1 %v9293_v18  ;;  %5378 = vmatprep.subr.bf16.mxu0 %v9326_v34 }
0x3673   :  { %5364 = vmatprep.mubr.bf16.mxu1 %v7939_v1  ;;  %5408 = vmatprep.mubr.bf16.mxu0 %v7939_v1 }
0x3675   :  { %5335 = vmatpush1.bf16.msra.mxu1 %v9301_v35  ;;  %5379 = vmatpush1.bf16.msra.mxu0 %v9336_v37 }
0x3676   :  { %5336 = vmatprep.subr.bf16.mxu1 %v9625_v25  ;;  %5380 = vmatprep.subr.bf16.mxu0 %v9339_v54 }
0x3679   :  { %5337 = vmatpush1.bf16.msra.mxu1 %v9312_v15  ;;  %5381 = vmatpush1.bf16.msra.mxu0 %v9342_v9 }
0x367a   :  { %5338 = vmatprep.subr.bf16.mxu1 %v9319_v49  ;;  %5382 = vmatprep.subr.bf16.mxu0 %v9345_v48 }
0x367d   :  { %5339 = vmatpush1.bf16.msra.mxu1 %v9332_v22  ;;  %5383 = vmatpush1.bf16.msra.mxu0 %v9348_v36 }
0x367e   :  { %5451 = vmatprep.subr.bf16.mxu1 %v9638_v4  ;;  %5544 = vmatprep.subr.bf16.mxu0 %v9354_v56 }
0x3733   :  { %v5154_v18 = vpop.f32.mrb[140].mxu0 }
0x3734   :  { %v5156_v35 = vpop.f32.mrb[141].mxu0 }
0x3735   :  { %v5158_v15 = vpop.f32.mrb[142].mxu0 }
0x3736   :  { %v5159_v38 = vpop.f32.mrb[143].mxu0 }
0x3743   :  { %v5198_v49 = vpop.f32.mrb[136].mxu1  ;;  %v5273_v34 = vpop.f32.mrb[144].mxu0 }
0x3744   :  { %v5199_v37 = vadd.f32 %v5198_v49, %v5154_v18  ;;  %v5200_v54 = vpop.f32.mrb[137].mxu1  ;;  %v5275_v22 = vpop.f32.mrb[145].mxu0 }
0x3745   :  { %v5201_v9 = vadd.f32 %v5200_v54, %v5156_v35  ;;  %v5282_v48 = vcombine.low %v5273_v34, %v5275_v22  ;;  %v5202_v36 = vpop.f32.mrb[138].mxu1  ;;  %v5277_v16 = vpop.f32.mrb[146].mxu0  ;;  %v9670_v34 = vld [vmem:[%s10082_s5] ss:$8 sps:$4 sm:$0xff]   ;;  %v9685_v54 = vld [vmem:[%s10082_s5 + $0x10] ss:$8 sps:$4 sm:$0xff]  }
0x3746   :  { %v5203_v20 = vpop.f32.mrb[139].mxu1  ;;  %v5278_v33 = vpop.f32.mrb[147].mxu0  ;;  %v5205_v17 = vadd.f32 %v5199_v37, %v8257_v24  ;;  %v9677_v37 = vld [vmem:[%s10082_s5 + $0x14] ss:$8 sps:$4 sm:$0xff]   ;;  %v9706_v36 = vld [vmem:[#allocation7] ss:$8 sps:$4 sm:$0xff]  }
0x3747   :  { %v5206_v41 = vadd.f32 %v5201_v9, %v8248_v19  ;;  %v5289_v51 = vrot.slane %v5282_v48, %v8106_v27  ;;  %v9690_v22 = vld [vmem:[#allocation7 + $0x4] ss:$8 sps:$4 sm:$0xff]   ;;  %v9696_v9 = vld [vmem:[%s10082_s5 + $0x20] ss:$8 sps:$4 sm:$0xff]   ;;  %v9710_v16 = vld [vmem:[#allocation7 + $0x14] ss:$8 sps:$4 sm:$0xff]  }
0x3748   :  { %v6996_v45 = vmul.f32 -1.442695, %v5205_v17  ;;  %v9703_v48 = vld [vmem:[%s10082_s5 + $0x34] ss:$8 sps:$4 sm:$0xff]   ;;  %v9716_v20 = vld [vmem:[%s10082_s5 + $0x30] ss:$8 sps:$4 sm:$0xff]  }
0x3749   :  { %7578 = vtanh.f32 %v5206_v41  ;;  %v5296_v56 = vrot.slane %v5289_v51, %v8106_v27  ;;  %v6997_v46 = vmul.f32 -1.442695, %v5206_v41  ;;  %v9720_v33 = vld [vmem:[#allocation7 + $0x10] ss:$8 sps:$4 sm:$0xff]   ;;  %v9723_v41 = vld [vmem:[#allocation7 + $0x24] ss:$8 sps:$4 sm:$0xff]  }
0x374a   :  { %7580 = vpow2.f32 %v6996_v45  ;;  %v9726_v51 = vld [vmem:[#allocation7 + $0x20] ss:$8 sps:$4 sm:$0xff]  }
0x374b   :  { %v5298_v42 = vadd.f32 %v5296_v56, %v5238_v6  ;;  %v9729_v56 = vld [vmem:[#allocation7 + $0x34] ss:$8 sps:$4 sm:$0xff]   ;;  %v9732_v6 = vld [vmem:[#allocation7 + $0x30] ss:$8 sps:$4 sm:$0xff]  }
0x374d   :  { %5306 = vrot.lane.b32.xlu1 %v5298_v42, %s7941_s3  ;;  %v6999_v59 = vmul.f32 -1.442695, %v5298_v42  ;;  %v9738_v42 = vld [vmem:[%s10082_s5 + $0x4] ss:$8 sps:$4 sm:$0xff]  }
0x374f   :  { %7582 = vpow2.f32 %v6999_v59 }
0x3753   :  { %v7579_v44 = vpop.eup %7578 }
0x3754   :  { %5222 = vrot.lane.b32.xlu0 %v7579_v44, %s7941_s3  ;;  %v7581_v58 = vpop.eup %7580 }
0x3755   :  { %v5213_v62 = vadd.f32 1.0, %v7581_v58 }
0x3757   :  { %7584 = vrcp.f32 %v5213_v62 }
0x3759   :  { %v7583_v50 = vpop.eup %7582 }
0x375a   :  { %v5302_v3 = vadd.f32 1.0, %v7583_v50 }
0x375c   :  { %7586 = vrcp.f32 %v5302_v3 }
0x3761   :  { %v7585_v55 = vpop.eup %7584 }
0x3762   :  { %v5220_v14 = vmul.f32 %v7585_v55, %v9573_v60 }
0x3766   :  { %v7587_v5 = vpop.eup %7586 }
0x3767   :  { %v5311_v30 = vmul.f32 %v7587_v5, %v9578_v21  ;;  %v5320_v35 = vrot.slane %v7587_v5, 1 }
0x37bf   :  { %v5307_v57 = vpop.permute.xlu1 %5306 }
0x37c0   :  { %v5308_v7 = vrot.slane %v5307_v57, 1 }
0x37c2   :  { %7588 = vtanh.f32 %v5308_v7 }
0x37c6   :  { %v5223_v11 = vpop.permute.xlu0 %5222 }
0x37c7   :  { %v5225_v32 = vmul.f32 %v7585_v55, %v5223_v11 }
0x37c9   :  { %5227 = vrot.lane.b32.xlu1 %v5225_v32, %s7941_s3 }
0x37cc   :  { %v7589_v8 = vpop.eup %7588 }
0x37cd   :  { %v5312_v23 = vmul.f32 %v7589_v8, %v7587_v5 }
0x37cf   :  { %5314 = vrot.lane.b32.xlu0 %v5312_v23, %s7941_s3 }
0x383b   :  { %v5228_v12 = vpop.permute.xlu1 %5227 }
0x383c   :  { %v9651_v39 = vadd.f32 %v5228_v12, %v5220_v14 }
0x383e   :  { %7590 = vtanh.f32 %v9651_v39 }
0x3841   :  { %v5315_v63 = vpop.permute.xlu0 %5314 }
0x3842   :  { %v9655_v43 = vadd.f32 %v5315_v63, %v5311_v30  ;;  %v5450_v63 = vld [vmem:[#allocation2 + $0x30] ss:$8 sm:$0x3] }
0x3844   :  { %7592 = vtanh.f32 %v9655_v43 }
0x3845   :  { %7594 = vpow2.f32 %v6997_v46 }
0x3848   :  { %v7591_v40 = vpop.eup %7590 }
0x3849   :  { %5233 = vrot.lane.b32.xlu1 %v7591_v40, %s7941_s3 }
0x384e   :  { %v7593_v53 = vpop.eup %7592 }
0x384f   :  { %5323 = vrot.lane.b32.xlu0 %v7593_v53, %s7941_s3  ;;  %v7595_v60 = vpop.eup %7594 }
0x3850   :  { %v5214_v10 = vadd.f32 1.0, %v7595_v60 }
0x3852   :  { %7596 = vrcp.f32 %v5214_v10 }
0x385c   :  { %v7597_v52 = vpop.eup %7596 }
0x38bb   :  { %v5234_v2 = vpop.permute.xlu1 %5233 }
0x38bc   :  { %v5236_v18 = vmul.f32 %v7597_v52, %v5234_v2 }
0x38be   :  { %v5328_v21 = vpack.c.bf16 %v5236_v18, %v5236_v18 }
0x38c0   :  { %7000 = vmatmul.mubr.msk.bf16.vlgmr.msra.gmra.mrb[140].mxu1 %vm272_vm2, %v5328_v21 }
0x38c1   :  { %5452 = vmatpush1.bf16.msra.mxu1 %v9586_v47  ;;  %v5324_v15 = vpop.permute.xlu0 %5323  ;;  %5483 = vmatprep.mubr.bf16.mxu1 %v7939_v1 }
0x38c2   :  { %v5326_v38 = vmul.f32 %v5324_v15, %v5320_v35  ;;  %5453 = vmatprep.subr.bf16.mxu1 %v9593_v28 }
0x38c4   :  { %v5327_v49 = vpack.c.bf16 %v5326_v38, %v5326_v38 }
0x38c5   :  { %5454 = vmatpush1.bf16.msra.mxu1 %v9599_v13 }
0x38c6   :  { %7001 = vmatmul.mubr.msk.bf16.vlgmr.msra.gmra.mrb[148].mxu0 %vm272_vm2, %v5327_v49  ;;  %5455 = vmatprep.subr.bf16.mxu1 %v9605_v29 }
0x38c7   :  { %5545 = vmatpush1.bf16.msra.mxu0 %v9670_v34  ;;  %5576 = vmatprep.mubr.bf16.mxu0 %v7939_v1 }
0x38c8   :  { %5546 = vmatprep.subr.bf16.mxu0 %v9677_v37 }
0x38c9   :  { %5456 = vmatpush1.bf16.msra.mxu1 %v9532_v61 }
0x38ca   :  { %5457 = vmatprep.subr.bf16.mxu1 %v9538_v26 }
0x38cb   :  { %5547 = vmatpush1.bf16.msra.mxu0 %v9685_v54 }
0x38cc   :  { %5548 = vmatprep.subr.bf16.mxu0 %v9625_v25 }
0x38cd   :  { %5458 = vmatpush1.bf16.msra.mxu1 %v9546_v31 }
0x38ce   :  { %5588 = vmatprep.subr.bf16.mxu1 %v9690_v22 }
0x38cf   :  { %5549 = vmatpush1.bf16.msra.mxu0 %v9696_v9 }
0x38d0   :  { %7004 = vmatmul.mubr.msk.bf16.vlgmr.msra.gmra.mrb[144].mxu1 %vm272_vm2, %v5327_v49  ;;  %5550 = vmatprep.subr.bf16.mxu0 %v9703_v48 }
0x38d1   :  { %5589 = vmatpush1.bf16.msra.mxu1 %v9706_v36  ;;  %5620 = vmatprep.mubr.bf16.mxu1 %v7939_v1 }
0x38d2   :  { %5590 = vmatprep.subr.bf16.mxu1 %v9710_v16 }
0x38d3   :  { %5551 = vmatpush1.bf16.msra.mxu0 %v9716_v20 }
0x38d4   :  { %5663 = vmatprep.subr.bf16.mxu0 %v9638_v4 }
0x38d5   :  { %5591 = vmatpush1.bf16.msra.mxu1 %v9720_v33 }
0x38d6   :  { %5592 = vmatprep.subr.bf16.mxu1 %v9723_v41 }
0x38d9   :  { %5593 = vmatpush1.bf16.msra.mxu1 %v9726_v51 }
0x38da   :  { %5594 = vmatprep.subr.bf16.mxu1 %v9729_v56 }
0x38dd   :  { %5595 = vmatpush1.bf16.msra.mxu1 %v9732_v6 }
0x38de   :  { %5756 = vmatprep.subr.bf16.mxu1 %v9738_v42 }
0x3993   :  { %v5366_v44 = vpop.f32.mrb[140].mxu1 }
0x3994   :  { %v5368_v17 = vpop.f32.mrb[141].mxu1 }
0x3995   :  { %v5370_v45 = vpop.f32.mrb[142].mxu1 }
0x3996   :  { %v5371_v59 = vpop.f32.mrb[143].mxu1 }
0x3999   :  { %v5410_v58 = vpop.f32.mrb[148].mxu0 }
0x399a   :  { %v5411_v62 = vadd.f32 %v5410_v58, %v5366_v44  ;;  %v5412_v50 = vpop.f32.mrb[149].mxu0 }
0x399b   :  { %v5413_v3 = vadd.f32 %v5412_v50, %v5368_v17  ;;  %v5414_v57 = vpop.f32.mrb[150].mxu0 }
0x399c   :  { %v5415_v7 = vpop.f32.mrb[151].mxu0  ;;  %v5417_v53 = vadd.f32 %v5411_v62, %v8257_v24 }
0x399d   :  { %v5418_v55 = vadd.f32 %v5413_v3, %v8248_v19 }
0x399e   :  { %v7002_v46 = vmul.f32 -1.442695, %v5417_v53 }
0x399f   :  { %7598 = vtanh.f32 %v5418_v55 }
0x39a0   :  { %7600 = vpow2.f32 %v7002_v46 }
0x39a3   :  { %v5485_v11 = vpop.f32.mrb[144].mxu1 }
0x39a4   :  { %v5487_v32 = vpop.f32.mrb[145].mxu1 }
0x39a5   :  { %v5494_v5 = vcombine.low %v5485_v11, %v5487_v32  ;;  %v5489_v8 = vpop.f32.mrb[146].mxu1  ;;  %v7003_v32 = vmul.f32 -1.442695, %v5418_v55 }
0x39a6   :  { %v5490_v23 = vpop.f32.mrb[147].mxu1 }
0x39a7   :  { %v5501_v14 = vrot.slane %v5494_v5, %v8106_v27 }
0x39a9   :  { %v7599_v12 = vpop.eup %7598  ;;  %v5508_v30 = vrot.slane %v5501_v14, %v8106_v27 }
0x39aa   :  { %5434 = vrot.lane.b32.xlu1 %v7599_v12, %s7941_s3  ;;  %v7601_v60 = vpop.eup %7600 }
0x39ab   :  { %v5510_v40 = vadd.f32 %v5508_v30, %v5450_v63  ;;  %v5425_v52 = vadd.f32 1.0, %v7601_v60 }
0x39ad   :  { %5518 = vrot.lane.b32.xlu0 %v5510_v40, %s7941_s3  ;;  %v7005_v10 = vmul.f32 -1.442695, %v5510_v40 }
0x39af   :  { %7602 = vpow2.f32 %v7005_v10 }
0x39b0   :  { %7604 = vrcp.f32 %v5425_v52 }
0x39b9   :  { %v7603_v2 = vpop.eup %7602 }
0x39ba   :  { %v7605_v18 = vpop.eup %7604  ;;  %v5514_v35 = vadd.f32 1.0, %v7603_v2 }
0x39bb   :  { %v5432_v59 = vmul.f32 %v7605_v18, %v9651_v39 }
0x39bc   :  { %7606 = vrcp.f32 %v5514_v35 }
0x39c6   :  { %v7607_v44 = vpop.eup %7606 }
0x39c7   :  { %v5523_v3 = vmul.f32 %v7607_v44, %v9655_v43  ;;  %v5532_v43 = vrot.slane %v7607_v44, 1 }
0x3a1c   :  { %v5435_v21 = vpop.permute.xlu1 %5434 }
0x3a1d   :  { %v5437_v15 = vmul.f32 %v7605_v18, %v5435_v21 }
0x3a1f   :  { %v5519_v38 = vpop.permute.xlu0 %5518  ;;  %5439 = vrot.lane.b32.xlu1 %v5437_v15, %s7941_s3 }
0x3a20   :  { %v5520_v49 = vrot.slane %v5519_v38, 1 }
0x3a22   :  { %7608 = vtanh.f32 %v5520_v49 }
0x3a2c   :  { %v7609_v17 = vpop.eup %7608 }
0x3a2d   :  { %v5524_v45 = vmul.f32 %v7609_v17, %v7607_v44 }
0x3a2f   :  { %5526 = vrot.lane.b32.xlu0 %v5524_v45, %s7941_s3 }
0x3a91   :  { %v5440_v58 = vpop.permute.xlu1 %5439 }
0x3a92   :  { %v9750_v62 = vadd.f32 %v5440_v58, %v5432_v59 }
0x3a94   :  { %7610 = vtanh.f32 %v9750_v62 }
0x3a9e   :  { %v7611_v50 = vpop.eup %7610 }
0x3a9f   :  { %5445 = vrot.lane.b32.xlu1 %v7611_v50, %s7941_s3  ;;  %v5662_v50 = vld [vmem:[#allocation2 + $0x31] ss:$8 sm:$0x3] }
0x3aa1   :  { %v5527_v57 = vpop.permute.xlu0 %5526 }
0x3aa2   :  { %v9755_v7 = vadd.f32 %v5527_v57, %v5523_v3 }
0x3aa4   :  { %7612 = vtanh.f32 %v9755_v7 }
0x3aa5   :  { %7614 = vpow2.f32 %v7003_v32 }
0x3aae   :  { %v7613_v11 = vpop.eup %7612 }
0x3aaf   :  { %5535 = vrot.lane.b32.xlu0 %v7613_v11, %s7941_s3  ;;  %v7615_v39 = vpop.eup %7614 }
0x3ab0   :  { %v5426_v5 = vadd.f32 1.0, %v7615_v39 }
0x3ab2   :  { %7616 = vrcp.f32 %v5426_v5 }
0x3abc   :  { %v7617_v8 = vpop.eup %7616 }
0x3b11   :  { %v5446_v23 = vpop.permute.xlu1 %5445 }
0x3b12   :  { %v5448_v14 = vmul.f32 %v7617_v8, %v5446_v23 }
0x3b14   :  { %v5540_v12 = vpack.c.bf16 %v5448_v14, %v5448_v14 }
0x3b16   :  { %7006 = vmatmul.mubr.msk.bf16.vlgmr.msra.gmra.mrb[152].mxu0 %vm272_vm2, %v5540_v12 }
0x3b17   :  { %5664 = vmatpush1.bf16.msra.mxu0 %v9586_v47  ;;  %5695 = vmatprep.mubr.bf16.mxu0 %v7939_v1 }
0x3b18   :  { %5665 = vmatprep.subr.bf16.mxu0 %v9593_v28 }
0x3b1b   :  { %5666 = vmatpush1.bf16.msra.mxu0 %v9599_v13 }
0x3b1c   :  { %5667 = vmatprep.subr.bf16.mxu0 %v9605_v29 }
0x3b1f   :  { %5668 = vmatpush1.bf16.msra.mxu0 %v9532_v61 }
0x3b20   :  { %5669 = vmatprep.subr.bf16.mxu0 %v9538_v26 }
0x3b21   :  { %v5536_v55 = vpop.permute.xlu0 %5535 }
0x3b22   :  { %v5538_v30 = vmul.f32 %v5536_v55, %v5532_v43 }
0x3b23   :  { %5670 = vmatpush1.bf16.msra.mxu0 %v9546_v31 }
0x3b24   :  { %v5539_v63 = vpack.c.bf16 %v5538_v30, %v5538_v30  ;;  %5800 = vmatprep.subr.bf16.mxu0 %v9690_v22 }
0x3b26   :  { %7007 = vmatmul.mubr.msk.bf16.vlgmr.msra.gmra.mrb[148].mxu1 %vm272_vm2, %v5539_v63  ;;  %7010 = vmatmul.mubr.msk.bf16.vlgmr.msra.gmra.mrb[156].mxu0 %vm272_vm2, %v5539_v63 }
0x3b27   :  { %5757 = vmatpush1.bf16.msra.mxu1 %v9670_v34  ;;  %5801 = vmatpush1.bf16.msra.mxu0 %v9706_v36 }
0x3b28   :  { %5758 = vmatprep.subr.bf16.mxu1 %v9677_v37  ;;  %5802 = vmatprep.subr.bf16.mxu0 %v9710_v16 }
0x3b29   :  { %5788 = vmatprep.mubr.bf16.mxu1 %v7939_v1  ;;  %5832 = vmatprep.mubr.bf16.mxu0 %v7939_v1 }
0x3b2b   :  { %5759 = vmatpush1.bf16.msra.mxu1 %v9685_v54  ;;  %5803 = vmatpush1.bf16.msra.mxu0 %v9720_v33 }
0x3b2c   :  { %5760 = vmatprep.subr.bf16.mxu1 %v9625_v25  ;;  %5804 = vmatprep.subr.bf16.mxu0 %v9723_v41 }
0x3b2f   :  { %5761 = vmatpush1.bf16.msra.mxu1 %v9696_v9  ;;  %5805 = vmatpush1.bf16.msra.mxu0 %v9726_v51 }
0x3b30   :  { %5762 = vmatprep.subr.bf16.mxu1 %v9703_v48  ;;  %5806 = vmatprep.subr.bf16.mxu0 %v9729_v56 }
0x3b33   :  { %5763 = vmatpush1.bf16.msra.mxu1 %v9716_v20  ;;  %5807 = vmatpush1.bf16.msra.mxu0 %v9732_v6 }
0x3b34   :  { %5875 = vmatprep.subr.bf16.mxu1 %v9638_v4  ;;  %5968 = vmatprep.subr.bf16.mxu0 %v9738_v42 }
0x3be9   :  { %v5578_v40 = vpop.f32.mrb[152].mxu0 }
0x3bea   :  { %v5580_v53 = vpop.f32.mrb[153].mxu0 }
0x3beb   :  { %v5582_v46 = vpop.f32.mrb[154].mxu0 }
0x3bec   :  { %v5583_v60 = vpop.f32.mrb[155].mxu0 }
0x3bf9   :  { %v5622_v10 = vpop.f32.mrb[148].mxu1  ;;  %v5697_v52 = vpop.f32.mrb[156].mxu0 }
0x3bfa   :  { %v5623_v2 = vadd.f32 %v5622_v10, %v5578_v40  ;;  %v5624_v18 = vpop.f32.mrb[149].mxu1  ;;  %v5699_v21 = vpop.f32.mrb[157].mxu0 }
0x3bfb   :  { %v5625_v35 = vadd.f32 %v5624_v18, %v5580_v53  ;;  %v5706_v15 = vcombine.low %v5697_v52, %v5699_v21  ;;  %v5626_v38 = vpop.f32.mrb[150].mxu1  ;;  %v5701_v49 = vpop.f32.mrb[158].mxu0 }
0x3bfc   :  { %v5627_v44 = vpop.f32.mrb[151].mxu1  ;;  %v5702_v17 = vpop.f32.mrb[159].mxu0  ;;  %v5629_v11 = vadd.f32 %v5623_v2, %v8257_v24 }
0x3bfd   :  { %v5630_v45 = vadd.f32 %v5625_v35, %v8248_v19  ;;  %v5713_v59 = vrot.slane %v5706_v15, %v8106_v27 }
0x3bfe   :  { %v7008_v32 = vmul.f32 -1.442695, %v5629_v11 }
0x3bff   :  { %7618 = vtanh.f32 %v5630_v45  ;;  %v5720_v58 = vrot.slane %v5713_v59, %v8106_v27  ;;  %v7009_v38 = vmul.f32 -1.442695, %v5630_v45 }
0x3c00   :  { %7620 = vpow2.f32 %v7008_v32 }
0x3c01   :  { %v5722_v3 = vadd.f32 %v5720_v58, %v5662_v50 }
0x3c03   :  { %5730 = vrot.lane.b32.xlu1 %v5722_v3, %s7941_s3  ;;  %v7011_v39 = vmul.f32 -1.442695, %v5722_v3 }
0x3c05   :  { %7622 = vpow2.f32 %v7011_v39 }
0x3c09   :  { %v7619_v57 = vpop.eup %7618 }
0x3c0a   :  { %5646 = vrot.lane.b32.xlu0 %v7619_v57, %s7941_s3  ;;  %v7621_v5 = vpop.eup %7620 }
0x3c0b   :  { %v5637_v8 = vadd.f32 1.0, %v7621_v5 }
0x3c0d   :  { %7624 = vrcp.f32 %v5637_v8 }
0x3c0f   :  { %v7623_v23 = vpop.eup %7622 }
0x3c10   :  { %v5726_v14 = vadd.f32 1.0, %v7623_v23 }
0x3c12   :  { %7626 = vrcp.f32 %v5726_v14 }
0x3c17   :  { %v7625_v55 = vpop.eup %7624 }
0x3c18   :  { %v5644_v60 = vmul.f32 %v7625_v55, %v9750_v62 }
0x3c1c   :  { %v7627_v40 = vpop.eup %7626 }
0x3c1d   :  { %v5735_v2 = vmul.f32 %v7627_v40, %v9755_v7  ;;  %v5744_v58 = vrot.slane %v7627_v40, 1 }
0x3c75   :  { %v5731_v12 = vpop.permute.xlu1 %5730 }
0x3c76   :  { %v5732_v43 = vrot.slane %v5731_v12, 1 }
0x3c78   :  { %7628 = vtanh.f32 %v5732_v43 }
0x3c7c   :  { %v5647_v30 = vpop.permute.xlu0 %5646 }
0x3c7d   :  { %v5649_v63 = vmul.f32 %v7625_v55, %v5647_v30 }
0x3c7f   :  { %5651 = vrot.lane.b32.xlu1 %v5649_v63, %s7941_s3 }
0x3c82   :  { %v7629_v53 = vpop.eup %7628 }
0x3c83   :  { %v5736_v46 = vmul.f32 %v7629_v53, %v7627_v40 }
0x3c85   :  { %5738 = vrot.lane.b32.xlu0 %v5736_v46, %s7941_s3 }
0x3cf1   :  { %v5652_v10 = vpop.permute.xlu1 %5651 }
0x3cf2   :  { %v9798_v52 = vadd.f32 %v5652_v10, %v5644_v60 }
0x3cf4   :  { %7630 = vtanh.f32 %v9798_v52 }
0x3cf7   :  { %v5739_v18 = vpop.permute.xlu0 %5738 }
0x3cf8   :  { %v9802_v21 = vadd.f32 %v5739_v18, %v5735_v2  ;;  %v5874_v18 = vld [vmem:[#allocation2 + $0x32] ss:$8 sm:$0x3] }
0x3cfa   :  { %7632 = vtanh.f32 %v9802_v21 }
0x3cfb   :  { %7634 = vpow2.f32 %v7009_v38 }
0x3cfe   :  { %v7631_v35 = vpop.eup %7630 }
0x3cff   :  { %5657 = vrot.lane.b32.xlu1 %v7631_v35, %s7941_s3 }
0x3d04   :  { %v7633_v15 = vpop.eup %7632 }
0x3d05   :  { %5747 = vrot.lane.b32.xlu0 %v7633_v15, %s7941_s3  ;;  %v7635_v62 = vpop.eup %7634 }
0x3d06   :  { %v5638_v49 = vadd.f32 1.0, %v7635_v62 }
0x3d08   :  { %7636 = vrcp.f32 %v5638_v49 }
0x3d12   :  { %v7637_v44 = vpop.eup %7636 }
0x3d71   :  { %v5658_v17 = vpop.permute.xlu1 %5657 }
0x3d72   :  { %v5660_v59 = vmul.f32 %v7637_v44, %v5658_v17 }
0x3d74   :  { %v5752_v7 = vpack.c.bf16 %v5660_v59, %v5660_v59 }
0x3d76   :  { %7012 = vmatmul.mubr.msk.bf16.vlgmr.msra.gmra.mrb[152].mxu1 %vm272_vm2, %v5752_v7 }
0x3d77   :  { %5876 = vmatpush1.bf16.msra.mxu1 %v9586_v47  ;;  %v5748_v50 = vpop.permute.xlu0 %5747  ;;  %5907 = vmatprep.mubr.bf16.mxu1 %v7939_v1 }
0x3d78   :  { %v5750_v3 = vmul.f32 %v5748_v50, %v5744_v58  ;;  %5877 = vmatprep.subr.bf16.mxu1 %v9593_v28 }
0x3d7a   :  { %v5751_v45 = vpack.c.bf16 %v5750_v3, %v5750_v3 }
0x3d7b   :  { %5878 = vmatpush1.bf16.msra.mxu1 %v9599_v13 }
0x3d7c   :  { %7013 = vmatmul.mubr.msk.bf16.vlgmr.msra.gmra.mrb[160].mxu0 %vm272_vm2, %v5751_v45  ;;  %5879 = vmatprep.subr.bf16.mxu1 %v9605_v29 }
0x3d7d   :  { %5969 = vmatpush1.bf16.msra.mxu0 %v9670_v34  ;;  %6000 = vmatprep.mubr.bf16.mxu0 %v7939_v1 }
0x3d7e   :  { %5970 = vmatprep.subr.bf16.mxu0 %v9677_v37 }
0x3d7f   :  { %5880 = vmatpush1.bf16.msra.mxu1 %v9532_v61 }
0x3d80   :  { %5881 = vmatprep.subr.bf16.mxu1 %v9538_v26 }
0x3d81   :  { %5971 = vmatpush1.bf16.msra.mxu0 %v9685_v54 }
0x3d82   :  { %5972 = vmatprep.subr.bf16.mxu0 %v9625_v25 }
0x3d83   :  { %5882 = vmatpush1.bf16.msra.mxu1 %v9546_v31 }
0x3d84   :  { %6012 = vmatprep.subr.bf16.mxu1 %v9690_v22 }
0x3d85   :  { %5973 = vmatpush1.bf16.msra.mxu0 %v9696_v9 }
0x3d86   :  { %7016 = vmatmul.mubr.msk.bf16.vlgmr.msra.gmra.mrb[156].mxu1 %vm272_vm2, %v5751_v45  ;;  %5974 = vmatprep.subr.bf16.mxu0 %v9703_v48 }
0x3d87   :  { %6013 = vmatpush1.bf16.msra.mxu1 %v9706_v36  ;;  %6044 = vmatprep.mubr.bf16.mxu1 %v7939_v1 }
0x3d88   :  { %6014 = vmatprep.subr.bf16.mxu1 %v9710_v16 }
0x3d89   :  { %5975 = vmatpush1.bf16.msra.mxu0 %v9716_v20 }
0x3d8a   :  { %6087 = vmatprep.subr.bf16.mxu0 %v9638_v4 }
0x3d8b   :  { %6015 = vmatpush1.bf16.msra.mxu1 %v9720_v33 }
0x3d8c   :  { %6016 = vmatprep.subr.bf16.mxu1 %v9723_v41 }
0x3d8f   :  { %6017 = vmatpush1.bf16.msra.mxu1 %v9726_v51 }
0x3d90   :  { %6018 = vmatprep.subr.bf16.mxu1 %v9729_v56 }
0x3d93   :  { %6019 = vmatpush1.bf16.msra.mxu1 %v9732_v6 }
0x3d94   :  { %6180 = vmatprep.subr.bf16.mxu1 %v9738_v42 }
0x3e49   :  { %v5790_v57 = vpop.f32.mrb[152].mxu1 }
0x3e4a   :  { %v5792_v11 = vpop.f32.mrb[153].mxu1 }
0x3e4b   :  { %v5794_v32 = vpop.f32.mrb[154].mxu1 }
0x3e4c   :  { %v5795_v39 = vpop.f32.mrb[155].mxu1 }
0x3e4f   :  { %v5834_v5 = vpop.f32.mrb[160].mxu0 }
0x3e50   :  { %v5835_v8 = vadd.f32 %v5834_v5, %v5790_v57  ;;  %v5836_v23 = vpop.f32.mrb[161].mxu0 }
0x3e51   :  { %v5837_v14 = vadd.f32 %v5836_v23, %v5792_v11  ;;  %v5838_v12 = vpop.f32.mrb[162].mxu0 }
0x3e52   :  { %v5839_v43 = vpop.f32.mrb[163].mxu0  ;;  %v5841_v15 = vadd.f32 %v5835_v8, %v8257_v24 }
0x3e53   :  { %v5842_v55 = vadd.f32 %v5837_v14, %v8248_v19 }
0x3e54   :  { %v7014_v38 = vmul.f32 -1.442695, %v5841_v15 }
0x3e55   :  { %7638 = vtanh.f32 %v5842_v55 }
0x3e56   :  { %7640 = vpow2.f32 %v7014_v38 }
0x3e59   :  { %v5909_v30 = vpop.f32.mrb[156].mxu1 }
0x3e5a   :  { %v5911_v63 = vpop.f32.mrb[157].mxu1 }
0x3e5b   :  { %v5918_v40 = vcombine.low %v5909_v30, %v5911_v63  ;;  %v5913_v53 = vpop.f32.mrb[158].mxu1  ;;  %v7015_v63 = vmul.f32 -1.442695, %v5842_v55 }
0x3e5c   :  { %v5914_v46 = vpop.f32.mrb[159].mxu1 }
0x3e5d   :  { %v5925_v60 = vrot.slane %v5918_v40, %v8106_v27 }
0x3e5f   :  { %v7639_v10 = vpop.eup %7638  ;;  %v5932_v2 = vrot.slane %v5925_v60, %v8106_v27 }
0x3e60   :  { %5858 = vrot.lane.b32.xlu1 %v7639_v10, %s7941_s3  ;;  %v7641_v62 = vpop.eup %7640 }
0x3e61   :  { %v5934_v35 = vadd.f32 %v5932_v2, %v5874_v18  ;;  %v5849_v44 = vadd.f32 1.0, %v7641_v62 }
0x3e63   :  { %5942 = vrot.lane.b32.xlu0 %v5934_v35, %s7941_s3  ;;  %v7017_v49 = vmul.f32 -1.442695, %v5934_v35 }
0x3e65   :  { %7642 = vpow2.f32 %v7017_v49 }
0x3e66   :  { %7644 = vrcp.f32 %v5849_v44 }
0x3e6f   :  { %v7643_v17 = vpop.eup %7642 }
0x3e70   :  { %v7645_v59 = vpop.eup %7644  ;;  %v5938_v58 = vadd.f32 1.0, %v7643_v17 }
0x3e71   :  { %v5856_v39 = vmul.f32 %v7645_v59, %v9798_v52 }
0x3e72   :  { %7646 = vrcp.f32 %v5938_v58 }
0x3e7c   :  { %v7647_v57 = vpop.eup %7646 }
0x3e7d   :  { %v5947_v14 = vmul.f32 %v7647_v57, %v9802_v21  ;;  %v5956_v21 = vrot.slane %v7647_v57, 1 }
0x3ed2   :  { %v5859_v7 = vpop.permute.xlu1 %5858 }
0x3ed3   :  { %v5861_v50 = vmul.f32 %v7645_v59, %v5859_v7 }
0x3ed5   :  { %v5943_v3 = vpop.permute.xlu0 %5942  ;;  %5863 = vrot.lane.b32.xlu1 %v5861_v50, %s7941_s3 }
0x3ed6   :  { %v5944_v45 = vrot.slane %v5943_v3, 1 }
0x3ed8   :  { %7648 = vtanh.f32 %v5944_v45 }
0x3ee2   :  { %v7649_v11 = vpop.eup %7648 }
0x3ee3   :  { %v5948_v32 = vmul.f32 %v7649_v11, %v7647_v57 }
0x3ee5   :  { %5950 = vrot.lane.b32.xlu0 %v5948_v32, %s7941_s3  ;;  %v6086_v32 = vld [vmem:[#allocation2 + $0x33] ss:$8 sm:$0x3] }
0x3f47   :  { %v5864_v5 = vpop.permute.xlu1 %5863 }
0x3f48   :  { %v9846_v8 = vadd.f32 %v5864_v5, %v5856_v39 }
0x3f4a   :  { %7650 = vtanh.f32 %v9846_v8 }
0x3f54   :  { %v7651_v23 = vpop.eup %7650 }
0x3f55   :  { %5869 = vrot.lane.b32.xlu1 %v7651_v23, %s7941_s3 }
0x3f57   :  { %v5951_v12 = vpop.permute.xlu0 %5950 }
0x3f58   :  { %v9851_v43 = vadd.f32 %v5951_v12, %v5947_v14 }
0x3f5a   :  { %7652 = vtanh.f32 %v9851_v43 }
0x3f5b   :  { %7654 = vpow2.f32 %v7015_v63 }
0x3f64   :  { %v7653_v30 = vpop.eup %7652 }
0x3f65   :  { %5959 = vrot.lane.b32.xlu0 %v7653_v30, %s7941_s3  ;;  %v7655_v52 = vpop.eup %7654 }
0x3f66   :  { %v5850_v40 = vadd.f32 1.0, %v7655_v52 }
0x3f68   :  { %7656 = vrcp.f32 %v5850_v40 }
0x3f72   :  { %v7657_v53 = vpop.eup %7656 }
0x3fc7   :  { %v5870_v46 = vpop.permute.xlu1 %5869 }
0x3fc8   :  { %v5872_v60 = vmul.f32 %v7657_v53, %v5870_v46 }
0x3fca   :  { %v5964_v10 = vpack.c.bf16 %v5872_v60, %v5872_v60 }
0x3fcc   :  { %7018 = vmatmul.mubr.msk.bf16.vlgmr.msra.gmra.mrb[164].mxu0 %vm272_vm2, %v5964_v10 }
0x3fcd   :  { %6088 = vmatpush1.bf16.msra.mxu0 %v9586_v47  ;;  %6119 = vmatprep.mubr.bf16.mxu0 %v7939_v1 }
0x3fce   :  { %6089 = vmatprep.subr.bf16.mxu0 %v9593_v28 }
0x3fd1   :  { %6090 = vmatpush1.bf16.msra.mxu0 %v9599_v13 }
0x3fd2   :  { %6091 = vmatprep.subr.bf16.mxu0 %v9605_v29 }
0x3fd5   :  { %6092 = vmatpush1.bf16.msra.mxu0 %v9532_v61 }
0x3fd6   :  { %6093 = vmatprep.subr.bf16.mxu0 %v9538_v26 }
0x3fd7   :  { %v5960_v55 = vpop.permute.xlu0 %5959 }
0x3fd8   :  { %v5962_v2 = vmul.f32 %v5960_v55, %v5956_v21 }
0x3fd9   :  { %6094 = vmatpush1.bf16.msra.mxu0 %v9546_v31 }
0x3fda   :  { %v5963_v18 = vpack.c.bf16 %v5962_v2, %v5962_v2  ;;  %6224 = vmatprep.subr.bf16.mxu0 %v9690_v22 }
0x3fdc   :  { %7019 = vmatmul.mubr.msk.bf16.vlgmr.msra.gmra.mrb[160].mxu1 %vm272_vm2, %v5963_v18  ;;  %7022 = vmatmul.mubr.msk.bf16.vlgmr.msra.gmra.mrb[168].mxu0 %vm272_vm2, %v5963_v18 }
0x3fdd   :  { %6181 = vmatpush1.bf16.msra.mxu1 %v9670_v34  ;;  %6225 = vmatpush1.bf16.msra.mxu0 %v9706_v36 }
0x3fde   :  { %6182 = vmatprep.subr.bf16.mxu1 %v9677_v37  ;;  %6226 = vmatprep.subr.bf16.mxu0 %v9710_v16 }
0x3fdf   :  { %6212 = vmatprep.mubr.bf16.mxu1 %v7939_v1  ;;  %6256 = vmatprep.mubr.bf16.mxu0 %v7939_v1 }
0x3fe1   :  { %6183 = vmatpush1.bf16.msra.mxu1 %v9685_v54  ;;  %6227 = vmatpush1.bf16.msra.mxu0 %v9720_v33 }
0x3fe2   :  { %6184 = vmatprep.subr.bf16.mxu1 %v9625_v25  ;;  %6228 = vmatprep.subr.bf16.mxu0 %v9723_v41 }
0x3fe5   :  { %6185 = vmatpush1.bf16.msra.mxu1 %v9696_v9  ;;  %6229 = vmatpush1.bf16.msra.mxu0 %v9726_v51 }
0x3fe6   :  { %6186 = vmatprep.subr.bf16.mxu1 %v9703_v48  ;;  %6230 = vmatprep.subr.bf16.mxu0 %v9729_v56 }
0x3fe9   :  { %6187 = vmatpush1.bf16.msra.mxu1 %v9716_v20  ;;  %6231 = vmatpush1.bf16.msra.mxu0 %v9732_v6 }
0x3fea   :  { %6301 = vmatprep.subr.bf16.mxu1 %v9638_v4  ;;  %6394 = vmatprep.subr.bf16.mxu0 %v9738_v42 }
0x409f   :  { %v6002_v61 = vpop.f32.mrb[164].mxu0 }
0x40a0   :  { %v6004_v26 = vpop.f32.mrb[165].mxu0 }
0x40a1   :  { %v6006_v31 = vpop.f32.mrb[166].mxu0 }
0x40a2   :  { %v6007_v35 = vpop.f32.mrb[167].mxu0 }
0x40af   :  { %v6046_v15 = vpop.f32.mrb[160].mxu1  ;;  %v6121_v38 = vpop.f32.mrb[168].mxu0 }
0x40b0   :  { %v6047_v62 = vadd.f32 %v6046_v15, %v6002_v61  ;;  %v6048_v49 = vpop.f32.mrb[161].mxu1  ;;  %v6123_v44 = vpop.f32.mrb[169].mxu0 }
0x40b1   :  { %v6049_v17 = vadd.f32 %v6048_v49, %v6004_v26  ;;  %v6130_v59 = vcombine.low %v6121_v38, %v6123_v44  ;;  %v6050_v7 = vpop.f32.mrb[162].mxu1  ;;  %v6125_v58 = vpop.f32.mrb[170].mxu0 }
0x40b2   :  { %v6051_v50 = vpop.f32.mrb[163].mxu1  ;;  %v6126_v3 = vpop.f32.mrb[171].mxu0  ;;  %v6053_v23 = vadd.f32 %v6047_v62, %v8257_v24 }
0x40b3   :  { %v6054_v45 = vadd.f32 %v6049_v17, %v8248_v19  ;;  %v6137_v57 = vrot.slane %v6130_v59, %v8106_v27 }
0x40b4   :  { %v7020_v14 = vmul.f32 -1.442695, %v6053_v23 }
0x40b5   :  { %7658 = vtanh.f32 %v6054_v45  ;;  %v6144_v11 = vrot.slane %v6137_v57, %v8106_v27  ;;  %v7021_v44 = vmul.f32 -1.442695, %v6054_v45 }
0x40b6   :  { %7660 = vpow2.f32 %v7020_v14 }
0x40b7   :  { %v6146_v39 = vadd.f32 %v6144_v11, %v6086_v32 }
0x40b9   :  { %6154 = vrot.lane.b32.xlu1 %v6146_v39, %s7941_s3  ;;  %v7023_v12 = vmul.f32 -1.442695, %v6146_v39 }
0x40bb   :  { %7662 = vpow2.f32 %v7023_v12 }
0x40bf   :  { %v7659_v5 = vpop.eup %7658 }
0x40c0   :  { %6070 = vrot.lane.b32.xlu0 %v7659_v5, %s7941_s3  ;;  %v7661_v30 = vpop.eup %7660 }
0x40c1   :  { %v6061_v63 = vadd.f32 1.0, %v7661_v30 }
0x40c3   :  { %7664 = vrcp.f32 %v6061_v63 }
0x40c5   :  { %v7663_v52 = vpop.eup %7662 }
0x40c6   :  { %v6150_v40 = vadd.f32 1.0, %v7663_v52 }
0x40c8   :  { %7666 = vrcp.f32 %v6150_v40  ;;  %v6300_v40 = vld [vmem:[#allocation2 + $0x34] ss:$8 sm:$0x3] }
0x40cd   :  { %v7665_v60 = vpop.eup %7664 }
0x40ce   :  { %v6068_v61 = vmul.f32 %v7665_v60, %v9846_v8 }
0x40d2   :  { %v7667_v55 = vpop.eup %7666 }
0x40d3   :  { %v6159_v35 = vmul.f32 %v7667_v55, %v9851_v43  ;;  %v6168_v50 = vrot.slane %v7667_v55, 1 }
0x412b   :  { %v6155_v53 = vpop.permute.xlu1 %6154 }
0x412c   :  { %v6156_v46 = vrot.slane %v6155_v53, 1 }
0x412e   :  { %7668 = vtanh.f32 %v6156_v46 }
0x4132   :  { %v6071_v10 = vpop.permute.xlu0 %6070 }
0x4133   :  { %v6073_v21 = vmul.f32 %v7665_v60, %v6071_v10 }
0x4135   :  { %6075 = vrot.lane.b32.xlu1 %v6073_v21, %s7941_s3 }
0x4138   :  { %v7669_v2 = vpop.eup %7668 }
0x4139   :  { %v6160_v18 = vmul.f32 %v7669_v2, %v7667_v55 }
0x413b   :  { %6162 = vrot.lane.b32.xlu0 %v6160_v18, %s7941_s3 }
0x41a7   :  { %v6076_v26 = vpop.permute.xlu1 %6075 }
0x41a8   :  { %v9894_v31 = vadd.f32 %v6076_v26, %v6068_v61 }
0x41aa   :  { %7670 = vtanh.f32 %v9894_v31 }
0x41ad   :  { %v6163_v15 = vpop.permute.xlu0 %6162 }
0x41ae   :  { %v9898_v38 = vadd.f32 %v6163_v15, %v6159_v35 }
0x41b0   :  { %7672 = vtanh.f32 %v9898_v38 }
0x41b1   :  { %7674 = vpow2.f32 %v7021_v44 }
0x41b4   :  { %v7671_v62 = vpop.eup %7670 }
0x41b5   :  { %6081 = vrot.lane.b32.xlu1 %v7671_v62, %s7941_s3 }
0x41ba   :  { %v7673_v49 = vpop.eup %7672 }
0x41bb   :  { %6171 = vrot.lane.b32.xlu0 %v7673_v49, %s7941_s3  ;;  %v7675_v8 = vpop.eup %7674 }
0x41bc   :  { %v6062_v17 = vadd.f32 1.0, %v7675_v8 }
0x41be   :  { %7676 = vrcp.f32 %v6062_v17 }
0x41c8   :  { %v7677_v59 = vpop.eup %7676 }
0x4227   :  { %v6082_v7 = vpop.permute.xlu1 %6081 }
0x4228   :  { %v6084_v58 = vmul.f32 %v7677_v59, %v6082_v7 }
0x422a   :  { %v6176_v43 = vpack.c.bf16 %v6084_v58, %v6084_v58 }
0x422c   :  { %7024 = vmatmul.mubr.msk.bf16.vlgmr.msra.gmra.mrb[164].mxu1 %vm272_vm2, %v6176_v43 }
0x422d   :  { %6302 = vmatpush1.bf16.msra.mxu1 %v9586_v47  ;;  %v6172_v3 = vpop.permute.xlu0 %6171  ;;  %6333 = vmatprep.mubr.bf16.mxu1 %v7939_v1  ;;  %v9916_v47 = vld [vmem:[%s10079_s2 + $0x20] ss:$8 sps:$4 sm:$0xff]  }
0x422e   :  { %v6174_v57 = vmul.f32 %v6172_v3, %v6168_v50  ;;  %6303 = vmatprep.subr.bf16.mxu1 %v9593_v28  ;;  %v9922_v28 = vld [vmem:[%s10079_s2 + $0x34] ss:$8 sps:$4 sm:$0xff]  }
0x4230   :  { %v6175_v45 = vpack.c.bf16 %v6174_v57, %v6174_v57 }
0x4231   :  { %6304 = vmatpush1.bf16.msra.mxu1 %v9599_v13  ;;  %v9930_v13 = vld [vmem:[%s10079_s2 + $0x30] ss:$8 sps:$4 sm:$0xff]  }
0x4232   :  { %7025 = vmatmul.mubr.msk.bf16.vlgmr.msra.gmra.mrb[172].mxu0 %vm272_vm2, %v6175_v45  ;;  %6305 = vmatprep.subr.bf16.mxu1 %v9605_v29 }
0x4233   :  { %6395 = vmatpush1.bf16.msra.mxu0 %v9670_v34  ;;  %6426 = vmatprep.mubr.bf16.mxu0 %v7939_v1 }
0x4234   :  { %6396 = vmatprep.subr.bf16.mxu0 %v9677_v37 }
0x4235   :  { %6306 = vmatpush1.bf16.msra.mxu1 %v9916_v47 }
0x4236   :  { %6307 = vmatprep.subr.bf16.mxu1 %v9922_v28 }
0x4237   :  { %6397 = vmatpush1.bf16.msra.mxu0 %v9685_v54 }
0x4238   :  { %6398 = vmatprep.subr.bf16.mxu0 %v9625_v25 }
0x4239   :  { %6308 = vmatpush1.bf16.msra.mxu1 %v9930_v13 }
0x423a   :  { %6438 = vmatprep.subr.bf16.mxu1 %v9690_v22 }
0x423b   :  { %6399 = vmatpush1.bf16.msra.mxu0 %v9696_v9 }
0x423c   :  { %7028 = vmatmul.mubr.msk.bf16.vlgmr.msra.gmra.mrb[168].mxu1 %vm272_vm2, %v6175_v45  ;;  %6400 = vmatprep.subr.bf16.mxu0 %v9703_v48 }
0x423d   :  { %6439 = vmatpush1.bf16.msra.mxu1 %v9706_v36  ;;  %6470 = vmatprep.mubr.bf16.mxu1 %v7939_v1 }
0x423e   :  { %6440 = vmatprep.subr.bf16.mxu1 %v9710_v16 }
0x423f   :  { %6401 = vmatpush1.bf16.msra.mxu0 %v9716_v20 }
0x4240   :  { %6514 = vmatprep.subr.bf16.mxu0 %v9638_v4 }
0x4241   :  { %6441 = vmatpush1.bf16.msra.mxu1 %v9720_v33 }
0x4242   :  { %6442 = vmatprep.subr.bf16.mxu1 %v9723_v41 }
0x4245   :  { %6443 = vmatpush1.bf16.msra.mxu1 %v9726_v51 }
0x4246   :  { %6444 = vmatprep.subr.bf16.mxu1 %v9729_v56 }
0x4249   :  { %6445 = vmatpush1.bf16.msra.mxu1 %v9732_v6 }
0x424a   :  { %6607 = vmatprep.subr.bf16.mxu1 %v9738_v42 }
0x42ff   :  { %v6214_v29 = vpop.f32.mrb[164].mxu1 }
0x4300   :  { %v6216_v25 = vpop.f32.mrb[165].mxu1 }
0x4301   :  { %v6218_v34 = vpop.f32.mrb[166].mxu1 }
0x4302   :  { %v6219_v37 = vpop.f32.mrb[167].mxu1 }
0x4305   :  { %v6258_v54 = vpop.f32.mrb[172].mxu0 }
0x4306   :  { %v6259_v9 = vadd.f32 %v6258_v54, %v6214_v29  ;;  %v6260_v48 = vpop.f32.mrb[173].mxu0  ;;  %v7829_v54 = vld [vmem:[%s10079_s2] ss:$8 sps:$4 sm:$0xff]  }
0x4307   :  { %v6261_v4 = vadd.f32 %v6260_v48, %v6216_v25  ;;  %v6262_v11 = vpop.f32.mrb[174].mxu0  ;;  %v7831_v48 = vld [vmem:[%s10079_s2 + $0x10] ss:$8 sps:$4 sm:$0xff]  }
0x4308   :  { %v6263_v32 = vpop.f32.mrb[175].mxu0  ;;  %v6265_v46 = vadd.f32 %v6259_v9, %v8257_v24  ;;  %v7830_v9 = vld [vmem:[%s10079_s2 + $0x14] ss:$8 sps:$4 sm:$0xff]  }
0x4309   :  { %v6266_v39 = vadd.f32 %v6261_v4, %v8248_v19  ;;  %v7832_v4 = vld [vmem:[%s10079_s2 + $0x24] ss:$8 sps:$4 sm:$0xff]   ;;  %s7944_s2 = smov [#allocation10]  }
0x430a   :  { %v7026_v60 = vmul.f32 -1.442695, %v6265_v46  ;;  %s6822_s10 = sshll.u32 %s7944_s2, 4  ;;  %s6823_s10 = int_to_ptr.vmem [resolvable:$true] %s6822_s10 }
0x430b   :  { %7678 = vtanh.f32 %v6266_v39  ;;  %v7027_v45 = vmul.f32 -1.442695, %v6266_v39  ;;  %p7910_p11 = scmp.lt.s32.totalorder %s6823_s10, %s6823_s10 }
0x430c   :  { %7680 = vpow2.f32 %v7026_v60 }
0x430f   :  { %v6335_v5 = vpop.f32.mrb[168].mxu1 }
0x4310   :  { %v6337_v23 = vpop.f32.mrb[169].mxu1 }
0x4311   :  { %v6344_v14 = vcombine.low %v6335_v5, %v6337_v23  ;;  %v6339_v12 = vpop.f32.mrb[170].mxu1  ;;  %v7833_v23 = vld [vmem:[%s10082_s5] ss:$8 sps:$4 sm:$0xff]  }
0x4312   :  { %v6340_v30 = vpop.f32.mrb[171].mxu1 }
0x4313   :  { %v6351_v42 = vrot.slane %v6344_v14, %v8106_v27 }
0x4315   :  { %v7679_v63 = vpop.eup %7678  ;;  %v6358_v52 = vrot.slane %v6351_v42, %v8106_v27 }
0x4316   :  { %6282 = vrot.lane.b32.xlu1 %v7679_v63, %s7941_s3  ;;  %v7681_v10 = vpop.eup %7680 }
0x4317   :  { %v6360_v53 = vadd.f32 %v6358_v52, %v6300_v40  ;;  %v6273_v55 = vadd.f32 1.0, %v7681_v10  ;;  %v6513_v10 = vld [vmem:[#allocation2 + $0x35] ss:$8 sm:$0x3] }
0x4319   :  { %6368 = vrot.lane.b32.xlu0 %v6360_v53, %s7941_s3  ;;  %v7029_v21 = vmul.f32 -1.442695, %v6360_v53 }
0x431b   :  { %7682 = vpow2.f32 %v7029_v21 }
0x431c   :  { %7684 = vrcp.f32 %v6273_v55 }
0x4325   :  { %v7683_v2 = vpop.eup %7682 }
0x4326   :  { %v7685_v18 = vpop.eup %7684  ;;  %v6364_v26 = vadd.f32 1.0, %v7683_v2 }
0x4327   :  { %v6280_v17 = vmul.f32 %v7685_v18, %v9894_v31 }
0x4328   :  { %7686 = vrcp.f32 %v6364_v26 }
0x4332   :  { %v7687_v49 = vpop.eup %7686 }
0x4333   :  { %v6373_v43 = vmul.f32 %v7687_v49, %v9898_v38  ;;  %v6382_v11 = vrot.slane %v7687_v49, 1 }
0x4388   :  { %v6283_v61 = vpop.permute.xlu1 %6282 }
0x4389   :  { %v6285_v35 = vmul.f32 %v7685_v18, %v6283_v61 }
0x438b   :  { %v6369_v15 = vpop.permute.xlu0 %6368  ;;  %6287 = vrot.lane.b32.xlu1 %v6285_v35, %s7941_s3 }
0x438c   :  { %v6370_v62 = vrot.slane %v6369_v15, 1 }
0x438e   :  { %7688 = vtanh.f32 %v6370_v62 }
0x4398   :  { %v7689_v44 = vpop.eup %7688 }
0x4399   :  { %v6374_v8 = vmul.f32 %v7689_v44, %v7687_v49 }
0x439b   :  { %6376 = vrot.lane.b32.xlu0 %v6374_v8, %s7941_s3 }
0x43fd   :  { %v6288_v59 = vpop.permute.xlu1 %6287 }
0x43fe   :  { %v9957_v7 = vadd.f32 %v6288_v59, %v6280_v17 }
0x4400   :  { %7690 = vtanh.f32 %v9957_v7 }
0x440a   :  { %v7691_v58 = vpop.eup %7690 }
0x440b   :  { %6293 = vrot.lane.b32.xlu1 %v7691_v58, %s7941_s3 }
0x440d   :  { %v6377_v50 = vpop.permute.xlu0 %6376 }
0x440e   :  { %v9962_v3 = vadd.f32 %v6377_v50, %v6373_v43 }
0x4410   :  { %7692 = vtanh.f32 %v9962_v3 }
0x4411   :  { %7694 = vpow2.f32 %v7027_v45 }
0x441a   :  { %v7693_v57 = vpop.eup %7692 }
0x441b   :  { %6385 = vrot.lane.b32.xlu0 %v7693_v57, %s7941_s3  ;;  %v7695_v31 = vpop.eup %7694 }
0x441c   :  { %v6274_v29 = vadd.f32 1.0, %v7695_v31 }
0x441e   :  { %7696 = vrcp.f32 %v6274_v29 }
0x4428   :  { %v7697_v25 = vpop.eup %7696 }
0x447d   :  { %v6294_v34 = vpop.permute.xlu1 %6293 }
0x447e   :  { %v6296_v37 = vmul.f32 %v7697_v25, %v6294_v34 }
0x4480   :  { %6298 = vst.msk [vmem:[#allocation3] sm:$0x1] %vm6297_vm3, %v6296_v37  ;;  %v6390_v38 = vpack.c.bf16 %v6296_v37, %v6296_v37 }
0x4482   :  { %7030 = vmatmul.mubr.msk.bf16.vlgmr.msra.gmra.mrb[176].mxu0 %vm272_vm2, %v6390_v38 }
0x4483   :  { %6515 = vmatpush1.bf16.msra.mxu0 %v7829_v54  ;;  %6546 = vmatprep.mubr.bf16.mxu0 %v7939_v1 }
0x4484   :  { %6516 = vmatprep.subr.bf16.mxu0 %v7830_v9 }
0x4487   :  { %6517 = vmatpush1.bf16.msra.mxu0 %v7831_v48 }
0x4488   :  { %6518 = vmatprep.subr.bf16.mxu0 %v7832_v4 }
0x448b   :  { %6519 = vmatpush1.bf16.msra.mxu0 %v9916_v47  ;;  %v7834_v47 = vld [vmem:[%s10082_s5 + $0x14] ss:$8 sps:$4 sm:$0xff]  }
0x448c   :  { %6520 = vmatprep.subr.bf16.mxu0 %v9922_v28 }
0x448d   :  { %v6386_v32 = vpop.permute.xlu0 %6385 }
0x448e   :  { %v6388_v39 = vmul.f32 %v6386_v32, %v6382_v11 }
0x448f   :  { %6521 = vmatpush1.bf16.msra.mxu0 %v9930_v13 }
0x4490   :  { %v6389_v5 = vpack.c.bf16 %v6388_v39, %v6388_v39  ;;  %6651 = vmatprep.subr.bf16.mxu0 %v9690_v22  ;;  %v7835_v22 = vld [vmem:[%s10082_s5 + $0x10] ss:$8 sps:$4 sm:$0xff]  }
0x4492   :  { %7031 = vmatmul.mubr.msk.bf16.vlgmr.msra.gmra.mrb[172].mxu1 %vm272_vm2, %v6389_v5  ;;  %7034 = vmatmul.mubr.msk.bf16.vlgmr.msra.gmra.mrb[180].mxu0 %vm272_vm2, %v6389_v5 }
0x4493   :  { %6608 = vmatpush1.bf16.msra.mxu1 %v7833_v23  ;;  %6652 = vmatpush1.bf16.msra.mxu0 %v9706_v36  ;;  %v7836_v36 = vld [vmem:[%s10082_s5 + $0x24] ss:$8 sps:$4 sm:$0xff]  }
0x4494   :  { %6609 = vmatprep.subr.bf16.mxu1 %v7834_v47  ;;  %6653 = vmatprep.subr.bf16.mxu0 %v9710_v16  ;;  %v7837_v16 = vld [vmem:[%s10082_s5 + $0x20] ss:$8 sps:$4 sm:$0xff]  }
0x4495   :  { %6639 = vmatprep.mubr.bf16.mxu1 %v7939_v1  ;;  %6683 = vmatprep.mubr.bf16.mxu0 %v7939_v1  ;;  %v7838_v1 = vld [vmem:[%s10082_s5 + $0x34] ss:$8 sps:$4 sm:$0xff]  }
0x4497   :  { %6610 = vmatpush1.bf16.msra.mxu1 %v7835_v22  ;;  %6654 = vmatpush1.bf16.msra.mxu0 %v9720_v33 }
0x4498   :  { %6611 = vmatprep.subr.bf16.mxu1 %v7836_v36  ;;  %6655 = vmatprep.subr.bf16.mxu0 %v9723_v41 }
0x449b   :  { %6612 = vmatpush1.bf16.msra.mxu1 %v7837_v16  ;;  %6656 = vmatpush1.bf16.msra.mxu0 %v9726_v51 }
0x449c   :  { %6613 = vmatprep.subr.bf16.mxu1 %v7838_v1  ;;  %6657 = vmatprep.subr.bf16.mxu0 %v9729_v56 }
0x449f   :  { %6614 = vmatpush1.bf16.msra.mxu1 %v9716_v20  ;;  %6658 = vmatpush1.bf16.msra.mxu0 %v9732_v6 }
0x4555   :  { %v6428_v33 = vpop.f32.mrb[176].mxu0 }
0x4556   :  { %v6430_v41 = vpop.f32.mrb[177].mxu0 }
0x4557   :  { %v6432_v28 = vpop.f32.mrb[178].mxu0 }
0x4558   :  { %v6433_v13 = vpop.f32.mrb[179].mxu0 }
0x4565   :  { %v6472_v14 = vpop.f32.mrb[172].mxu1  ;;  %v6548_v12 = vpop.f32.mrb[180].mxu0 }
0x4566   :  { %v6473_v30 = vadd.f32 %v6472_v14, %v6428_v33  ;;  %v6474_v42 = vpop.f32.mrb[173].mxu1  ;;  %v6550_v51 = vpop.f32.mrb[181].mxu0 }
0x4567   :  { %v6475_v63 = vadd.f32 %v6474_v42, %v6430_v41  ;;  %v6557_v52 = vcombine.low %v6548_v12, %v6550_v51  ;;  %v6476_v40 = vpop.f32.mrb[174].mxu1  ;;  %v6552_v53 = vpop.f32.mrb[182].mxu0 }
0x4568   :  { %v6477_v46 = vpop.f32.mrb[175].mxu1  ;;  %v6553_v60 = vpop.f32.mrb[183].mxu0  ;;  %v6479_v2 = vadd.f32 %v6473_v30, %v8257_v24 }
0x4569   :  { %v6480_v56 = vadd.f32 %v6475_v63, %v8248_v19  ;;  %v6564_v20 = vrot.slane %v6557_v52, %v8106_v27  ;;  %v6727_v46 = vld [vmem:[%s10084_s7 + $0x8] sm:$0xff]  ;;  %v7942_v60 = vmov 0.0|0.0  }
0x456a   :  { %v7032_v18 = vmul.f32 -1.442695, %v6479_v2  ;;  %7070 = vmatprep.subr.bf16.mxu1 %v7942_v60  ;;  %v6730_v2 = vld [vmem:[%s10084_s7 + $0x20] sm:$0xff] }
0x456b   :  { %7698 = vtanh.f32 %v6480_v56  ;;  %v6571_v6 = vrot.slane %v6564_v20, %v8106_v27  ;;  %v7033_v38 = vmul.f32 -1.442695, %v6480_v56  ;;  %v6729_v20 = vld [vmem:[%s10084_s7 + $0x18] sm:$0xff] }
0x456c   :  { %7700 = vpow2.f32 %v7032_v18  ;;  %v6731_v18 = vld [vmem:[%s10084_s7 + $0x28] sm:$0xff] }
0x456d   :  { %v6573_v21 = vadd.f32 %v6571_v6, %v6513_v10 }
0x456f   :  { %6581 = vrot.lane.b32.xlu1 %v6573_v21, %s7941_s3  ;;  %v7035_v61 = vmul.f32 -1.442695, %v6573_v21 }
0x4571   :  { %7702 = vpow2.f32 %v7035_v61  ;;  %v7077_v61 = vpack.c.bf16 %v6731_v18, %v6730_v2 }
0x4575   :  { %v7699_v55 = vpop.eup %7698 }
0x4576   :  { %6496 = vrot.lane.b32.xlu0 %v7699_v55, %s7941_s3  ;;  %v7701_v26 = vpop.eup %7700 }
0x4577   :  { %v6487_v35 = vadd.f32 1.0, %v7701_v26  ;;  %v6732_v26 = vld [vmem:[%s10084_s7 + $0x30] sm:$0xff] }
0x4579   :  { %7704 = vrcp.f32 %v6487_v35  ;;  %v6733_v35 = vld [vmem:[%s10084_s7 + $0x38] sm:$0xff] }
0x457b   :  { %v7703_v15 = vpop.eup %7702 }
0x457c   :  { %v6577_v62 = vadd.f32 1.0, %v7703_v15  ;;  %v7080_v15 = vpack.c.bf16 %v6733_v35, %v6732_v26 }
0x457e   :  { %7706 = vrcp.f32 %v6577_v62 }
0x4583   :  { %v7705_v44 = vpop.eup %7704 }
0x4584   :  { %v6494_v50 = vmul.f32 %v7705_v44, %v9957_v7 }
0x4588   :  { %v7707_v59 = vpop.eup %7706 }
0x4589   :  { %v6586_v31 = vmul.f32 %v7707_v59, %v9962_v3  ;;  %v6595_v11 = vrot.slane %v7707_v59, 1 }
0x45e1   :  { %v6582_v49 = vpop.permute.xlu1 %6581 }
0x45e2   :  { %v6583_v27 = vrot.slane %v6582_v49, 1 }
0x45e4   :  { %7708 = vtanh.f32 %v6583_v27 }
0x45e8   :  { %v6497_v8 = vpop.permute.xlu0 %6496 }
0x45e9   :  { %v6499_v17 = vmul.f32 %v7705_v44, %v6497_v8 }
0x45eb   :  { %6501 = vrot.lane.b32.xlu1 %v6499_v17, %s7941_s3 }
0x45ee   :  { %v7709_v58 = vpop.eup %7708 }
0x45ef   :  { %v6587_v43 = vmul.f32 %v7709_v58, %v7707_v59 }
0x45f1   :  { %6589 = vrot.lane.b32.xlu0 %v6587_v43, %s7941_s3 }
0x465d   :  { %v6502_v57 = vpop.permute.xlu1 %6501 }
0x465e   :  { %v6504_v45 = vadd.f32 %v6502_v57, %v6494_v50 }
0x4660   :  { %7710 = vtanh.f32 %v6504_v45 }
0x4663   :  { %v6590_v29 = vpop.permute.xlu0 %6589 }
0x4664   :  { %v6592_v25 = vadd.f32 %v6590_v29, %v6586_v31 }
0x4666   :  { %7712 = vtanh.f32 %v6592_v25 }
0x4667   :  { %7714 = vpow2.f32 %v7033_v38 }
0x466a   :  { %v7711_v34 = vpop.eup %7710 }
0x466b   :  { %6507 = vrot.lane.b32.xlu1 %v7711_v34, %s7941_s3 }
0x4670   :  { %v7713_v37 = vpop.eup %7712 }
0x4671   :  { %6598 = vrot.lane.b32.xlu0 %v7713_v37, %s7941_s3  ;;  %v7715_v54 = vpop.eup %7714 }
0x4672   :  { %v6488_v9 = vadd.f32 1.0, %v7715_v54 }
0x4674   :  { %7716 = vrcp.f32 %v6488_v9 }
0x467e   :  { %v7717_v7 = vpop.eup %7716 }
0x46dd   :  { %v6508_v48 = vpop.permute.xlu1 %6507 }
0x46de   :  { %v6510_v4 = vmul.f32 %v7717_v7, %v6508_v48 }
0x46e0   :  { %6511 = vst.msk [vmem:[#allocation3 + $0x1] sm:$0x1] %vm6297_vm3, %v6510_v4  ;;  %v6603_v3 = vpack.c.bf16 %v6510_v4, %v6510_v4 }
0x46e2   :  { %7036 = vmatmul.mubr.msk.bf16.vlgmr.msra.gmra.mrb[176].mxu1 %vm272_vm2, %v6603_v3 }
0x46e3   :  { %v6599_v32 = vpop.permute.xlu0 %6598  ;;  %7067 = vmatprep.mubr.msk.f32.mxu1 %vm7943_vm4, %v7938_v0  ;;  %v7040_v0 = vld [vmem:[%s10085_s8] ss:$0 sm:$0xff] }
0x46e4   :  { %v6601_v39 = vmul.f32 %v6599_v32, %v6595_v11 }
0x46e6   :  { %v6602_v5 = vpack.c.bf16 %v6601_v39, %v6601_v39 }
0x46e8   :  { %7037 = vmatmul.mubr.msk.bf16.vlgmr.msra.gmra.mrb[184].mxu0 %vm272_vm2, %v6602_v5 }
0x47b5   :  { %v6641_v23 = vpop.f32.mrb[176].mxu1 }
0x47b6   :  { %v6643_v47 = vpop.f32.mrb[177].mxu1 }
0x47b7   :  { %v6645_v22 = vpop.f32.mrb[178].mxu1 }
0x47b8   :  { %v6646_v36 = vpop.f32.mrb[179].mxu1 }
0x47bb   :  { %v6685_v16 = vpop.f32.mrb[184].mxu0 }
0x47bc   :  { %v6686_v1 = vadd.f32 %v6685_v16, %v6641_v23  ;;  %v6687_v33 = vpop.f32.mrb[185].mxu0 }
0x47bd   :  { %v6688_v41 = vadd.f32 %v6687_v33, %v6643_v47  ;;  %v6689_v28 = vpop.f32.mrb[186].mxu0 }
0x47be   :  { %v6690_v13 = vpop.f32.mrb[187].mxu0  ;;  %v6692_v30 = vadd.f32 %v6686_v1, %v8257_v24  ;;  %v6728_v24 = vld [vmem:[%s10084_s7 + $0x10] sm:$0xff] }
0x47bf   :  { %v6693_v14 = vadd.f32 %v6688_v41, %v8248_v19  ;;  %v6726_v19 = vld [vmem:[%s10084_s7] sm:$0xff]  ;;  %v7074_v6 = vpack.c.bf16 %v6729_v20, %v6728_v24 }
0x47c0   :  { %v7038_v42 = vmul.f32 -1.442695, %v6692_v30  ;;  %v7071_v56 = vpack.c.bf16 %v6727_v46, %v6726_v19 }
0x47c1   :  { %7718 = vtanh.f32 %v6693_v14  ;;  %v7039_v49 = vmul.f32 -1.442695, %v6693_v14 }
0x47c2   :  { %7720 = vpow2.f32 %v7038_v42  ;;  %7072 = vmatpush3.bf16.msra.mxu1 %v7071_v56 }
0x47c3   :  { %7073 = vmatprep.subr.bf16.mxu1 %v7942_v60 }
0x47c6   :  { %7075 = vmatpush3.bf16.msra.mxu1 %v7074_v6 }
0x47c7   :  { %7076 = vmatprep.subr.bf16.mxu1 %v7942_v60 }
0x47ca   :  { %7078 = vmatpush3.bf16.msra.mxu1 %v7077_v61 }
0x47cb   :  { %v7719_v12 = vpop.eup %7718  ;;  %7079 = vmatprep.subr.bf16.mxu1 %v7942_v60 }
0x47cc   :  { %6709 = vrot.lane.b32.xlu1 %v7719_v12, %s7941_s3  ;;  %v7721_v51 = vpop.eup %7720 }
0x47cd   :  { %v6700_v63 = vadd.f32 1.0, %v7721_v51 }
0x47ce   :  { %7081 = vmatpush3.bf16.msra.mxu1 %v7080_v15 }
0x47cf   :  { %7722 = vrcp.f32 %v6700_v63 }
0x47d9   :  { %v7723_v52 = vpop.eup %7722 }
0x47da   :  { %v6707_v10 = vmul.f32 %v7723_v52, %v6504_v45 }
0x483e   :  { %v6710_v40 = vpop.permute.xlu1 %6709 }
0x483f   :  { %v6712_v53 = vmul.f32 %v7723_v52, %v6710_v40 }
0x4841   :  { %6714 = vrot.lane.b32.xlu0 %v6712_v53, %s7941_s3 }
0x48b3   :  { %v6715_v21 = vpop.permute.xlu0 %6714 }
0x48b4   :  { %v6717_v55 = vadd.f32 %v6715_v21, %v6707_v10 }
0x48b6   :  { %7724 = vtanh.f32 %v6717_v55 }
0x48b7   :  { %7726 = vpow2.f32 %v7039_v49 }
0x48c0   :  { %v7725_v62 = vpop.eup %7724 }
0x48c1   :  { %6720 = vrot.lane.b32.xlu1 %v7725_v62, %s7941_s3  ;;  %v7727_v27 = vpop.eup %7726  ;;  %s7905_s3 = scalar_lea.vmem %s6823_s10, 64 }
0x48c2   :  { %v6701_v44 = vadd.f32 1.0, %v7727_v27  ;;  %p7906_p10 = scmp.ne.s32.totalorder %s6823_s10, %s7905_s3  ;;  %p7911_p12 = scmp.lt.s32.totalorder %s7905_s3, %s7905_s3 }
0x48c4   :  { %7728 = vrcp.f32 %v6701_v44  ;;  %p7912_p13 = por %p7911_p12, %p7910_p11 }
0x48c6   :  { %p7913_p0 = pnand %p7912_p13, %p7906_p10 }
0x48ce   :  { %v7729_v8 = vpop.eup %7728 }
0x4933   :  { %v6721_v17 = vpop.permute.xlu1 %6720 }
0x4934   :  { %v6723_v59 = vmul.f32 %v7729_v8, %v6721_v17 }
0x4936   :  { %6724 = vst.msk [vmem:[#allocation3 + $0x2] sm:$0x1] %vm6297_vm3, %v6723_v59 }
0x493d   :  { %v6725_v58 = vld [vmem:[#allocation3] sm:$0x7] }
0x493e   :  { %7068 = vmatmul.mubr.msk.f32.vlgmr.msra.gmra.mrb[180].mxu1 %vm272_vm2, %v6725_v58 }
0x4a11   :  { %v6810_v43 = vpop.f32.mrb[180].mxu1 }
0x4a12   :  { %v6811_v50 = vadd.f32 %v7040_v0, %v6810_v43  ;;  %v7069_v57 = vpop.f32.mrb[181].mxu1 }
0x4a14   :  { %6815 = vst.msk [vmem:[#allocation10] sm:$0x7] %vm6814_vm5, %v6811_v50 }
0x4a15   :  { %7916 = shalt.err (!%p7913_p0)
}
0x4a16   :  { %s7917_s16 = scalar_lea.hbm %s10086_s9, 64 }
0x4a17   :  { %p7918_p1 = scmp.ne.s32.totalorder %s10086_s9, %s7917_s16  ;;  %p7921_p2 = scmp.lt.u32.totalorder %s7917_s16, %s10086_s9 }
0x4a19   :  { %p7923_p3 = pnand %p7921_p2, %p7918_p1 }
0x4a1b   :  { %7926 = shalt.err (!%p7923_p3)
}
0x4a1c   :  { %6825 = dma.vmem_to_hbm [thread:$0]  %s6823_s10, 64, %s10086_s9, [#allocation6]  }
0x4a1d   :  { %7931 = dma.done.wait [#allocation6], 64  }
0x4a1e   :  { %7932 = vsyncadd [#allocation6], 4294967232 }
0x4a1f   :  { %6829 = vsyncpa [#allocation5], 1 }
0x4a20   :  { %6830 = vsyncpa [#allocation8], 1 }
0x4a21   :  { %6831 = vsyncpa [#allocation6], 1 }

</bundles_post_ra>
